<compile_context>
chip_gen: v5e
topology: v5e:2x2
jax: 0.10.0
libtpu: 0.0.40
codegen_flags: <defaults>
</compile_context>

<pallas_src>
import jax
import jax.numpy as jnp
import numpy as np
from jax import lax
from jax.experimental import pallas as pl
from jax.experimental.pallas import tpu as pltpu

BN_EPS = 1e-5
PREC = jax.lax.Precision.HIGHEST  # reference only


def imu_kernel(p1_ref, w1_ref, b1_ref, w2_ref, b2_ref,
               wf1_ref, bf1_ref, wf2_ref, bf2_ref, wf3_ref, bf3_ref,
               o_ref):
    g_dim, tb, feat = p1_ref.shape          # (10, TB, 180), all static

    # conv1 (block-diagonal over the 3 conv2 taps, BN1 folded) + ReLU.
    # Leading-dim collapse reshape only (minor dim unchanged, TB % 8 == 0).
    p1 = p1_ref[...].reshape(g_dim * tb, feat)               # bf16
    h1 = jnp.dot(p1, w1_ref[...], preferred_element_type=jnp.float32) + b1_ref[...]
    h1 = jnp.maximum(h1, 0.0).astype(jnp.bfloat16)           # (10*TB, 384)

    # conv2 (BN2 folded) + ReLU : one fused K=384 matmul.
    h2 = jnp.dot(h1, w2_ref[...], preferred_element_type=jnp.float32) + b2_ref[...]
    h2 = jnp.maximum(h2, 0.0).astype(jnp.bfloat16)           # (10*TB, 256)

    # fc1 + ReLU : accumulate over the 10 flatten groups (K=256 each).
    # h2 row-block g holds flatten features [g*256, (g+1)*256) for every sample
    # (rows are 8-aligned, full width -> slices are free views, no tile crossing).
    acc = jnp.dot(h2[0:tb, :], wf1_ref[0], preferred_element_type=jnp.float32)
    for g in range(1, g_dim):
        acc = acc + jnp.dot(h2[g * tb:(g + 1) * tb, :], wf1_ref[g],
                            preferred_element_type=jnp.float32)
    f1 = jnp.maximum(acc + bf1_ref[...], 0.0).astype(jnp.bfloat16)   # (TB, 512)

    # fc2 + ReLU
    f2 = jnp.dot(f1, wf2_ref[...], preferred_element_type=jnp.float32) + bf2_ref[...]
    f2 = jnp.maximum(f2, 0.0).astype(jnp.bfloat16)           # (TB, 128)

    # fc3 (padded to 128 output lanes -> unmasked, lane-dense stores)
    o_ref[...] = jnp.dot(f2, wf3_ref[...],
                         preferred_element_type=jnp.float32) + bf3_ref[...]


def fold_params(p):
    """Fold conv bias + eval-mode BatchNorm into matmul weights; cast to bf16."""
    f32, bf16 = jnp.float32, jnp.bfloat16
    # conv1 + bn1
    s1 = p['bn1_gamma'] / jnp.sqrt(p['bn1_var'] + BN_EPS)                 # (128,)
    w1 = p['conv1_w'].reshape(128, 60).T * s1[None, :]                    # (60,128)
    b1 = (p['conv1_b'] - p['bn1_mean']) * s1 + p['bn1_beta']              # (128,)
    # Block-diagonal over the 3 conv2 taps: output column index = kw*128 + c.
    w1b = jnp.zeros((180, 384), f32)
    for kw in range(3):
        w1b = w1b.at[kw * 60:(kw + 1) * 60, kw * 128:(kw + 1) * 128].set(w1)
    b1t = jnp.tile(b1[None, :], (1, 3))                                   # (1,384)
    # conv2 + bn2 : fused (384,256) with K index = kw*128 + c_in
    s2 = p['bn2_gamma'] / jnp.sqrt(p['bn2_var'] + BN_EPS)                 # (256,)
    w2 = (jnp.transpose(p['conv2_w'][:, :, 0, :], (2, 1, 0))
          * s2[None, None, :]).reshape(384, 256)                          # (384,256)
    b2 = ((p['conv2_b'] - p['bn2_mean']) * s2 + p['bn2_beta'])[None, :]   # (1,256)
    # fc1: PyTorch flatten of (N,256,1,10) is feature c*10+g; kernel uses group-
    # major blocks, so expose wf1 as (g, c_in, out) for per-group accumulation.
    wf1 = jnp.transpose(p['fc1_w'].reshape(512, 256, 10), (2, 1, 0))      # (10,256,512)
    bf1 = p['fc1_b'][None, :]
    wf2 = p['fc2_w'].T                                                    # (512,128)
    bf2 = p['fc2_b'][None, :]
    # fc3 padded to 128 output lanes (lane-dense); wrapper slices [:, :27].
    wf3 = jnp.zeros((128, 128), f32).at[:, :27].set(p['fc3_w'].T)
    bf3 = jnp.zeros((1, 128), f32).at[:, :27].set(p['fc3_b'][None, :])
    return (w1b.astype(bf16), b1t.astype(f32),
            w2.astype(bf16), b2.astype(f32),
            wf1.astype(bf16), bf1.astype(f32),
            wf2.astype(bf16), bf2.astype(f32),
            wf3.astype(bf16), bf3.astype(f32))


def _choose_tb(n):
    """Batch tile: multiple of 8, capped at 512, and ~half the padded batch so
    the grid has >= 2 steps whenever the batch allows it (v7x megacore)."""
    n8 = max(8, ((n + 7) // 8) * 8)
    return min(512, max(8, ((n8 + 15) // 16) * 8))   # ~ceil(n8/2) rounded to 8


def imu_forward_pallas(x, params):
    N = x.shape[0]
    TB = _choose_tb(N)
    N_pad = ((N + TB - 1) // TB) * TB
    grid = (N_pad // TB,)

    # im2col, g-major, emitted directly in bf16 (halves the p1 HBM write, the
    # per-step input DMA and the double-buffered p1 VMEM footprint):
    #   p1[g, n, kw*60 + (c*30 + kh*10 + t)] = x[n, c, kh, (3g+kw)*10 + t]
    xr = x.astype(jnp.bfloat16).reshape(N, 2, 3, 30, 10)
    patches = xr.transpose(3, 0, 1, 2, 4).reshape(30, N, 60)      # [p, n, 60]
    p1 = patches.reshape(10, 3, N, 60).transpose(0, 2, 1, 3).reshape(10, N, 180)
    if N_pad != N:
        p1 = jnp.pad(p1, ((0, 0), (0, N_pad - N), (0, 0)))
    # TODO(synk): im2col is still a wrapper-side XLA transpose (one extra HBM
    # pass over x); fuse it upstream / into the input DMA if N gets very large.

    args = fold_params(params)

    def const_spec(a):
        zeros = (0,) * a.ndim
        # Constant index_map -> DMA'd once, kept VMEM-resident across steps.
        # TODO(synk): pipeline_mode=pl.Buffered(1) would reclaim the unused
        # second pipeline buffer (~3 MiB); only relevant on v7x at TB=512.
        return pl.BlockSpec(a.shape, lambda i, z=zeros: z)

    in_specs = ([pl.BlockSpec((10, TB, 180), lambda i: (0, i, 0))]
                + [const_spec(a) for a in args])

    out = pl.pallas_call(
        imu_kernel,
        out_shape=jax.ShapeDtypeStruct((N_pad, 128), jnp.float32),
        grid=grid,
        in_specs=in_specs,
        out_specs=pl.BlockSpec((TB, 128), lambda i: (i, 0)),
        compiler_params=pltpu.CompilerParams(
            dimension_semantics=("parallel",),
            # TB=512 budget: 2x bf16 p1 (3.7 MiB) + 2x bf16 weights (~6 MiB)
            # + 2x f32 out (0.5 MiB) + f32/bf16 temporaries (~13 MiB) ~= 24 MiB.
            # 48 MiB leaves headroom and stays under v7x's 64 MiB physical VMEM
            # (v5e/v6e have 128 MiB, so this is safe everywhere).
            vmem_limit_bytes=48 << 20),
    )(p1, *args)
    return out[:N, :27]


def imu_forward_ref(x, p):
    """Pure-JAX f32 reference (lax convs, eval-mode BN) mirroring the PyTorch forward."""
    dn = ('NCHW', 'OIHW', 'NCHW')

    def bn(y, g, b, m, v):
        return (y - m[None, :, None, None]) / jnp.sqrt(v + BN_EPS)[None, :, None, None] \
               * g[None, :, None, None] + b[None, :, None, None]

    y = lax.conv_general_dilated(x, p['conv1_w'], (10, 10), 'VALID',
                                 dimension_numbers=dn, precision=PREC)
    y = y + p['conv1_b'][None, :, None, None]
    y = jnp.maximum(bn(y, p['bn1_gamma'], p['bn1_beta'], p['bn1_mean'], p['bn1_var']), 0.0)
    y = lax.conv_general_dilated(y, p['conv2_w'], (3, 3), 'VALID',
                                 dimension_numbers=dn, precision=PREC)
    y = y + p['conv2_b'][None, :, None, None]
    y = jnp.maximum(bn(y, p['bn2_gamma'], p['bn2_beta'], p['bn2_mean'], p['bn2_var']), 0.0)
    flat = y.reshape(y.shape[0], -1)
    f1 = jnp.maximum(jnp.dot(flat, p['fc1_w'].T, precision=PREC) + p['fc1_b'], 0.0)
    f2 = jnp.maximum(jnp.dot(f1, p['fc2_w'].T, precision=PREC) + p['fc2_b'], 0.0)
    return jnp.dot(f2, p['fc3_w'].T, precision=PREC) + p['fc3_b']


def init_params(key):
    ks = jax.random.split(key, 22)
    nrm = lambda k, shape, s=0.1: (s * jax.random.normal(k, shape)).astype(jnp.float32)
    uni = lambda k, shape: jax.random.uniform(k, shape, minval=0.5, maxval=1.5,
                                              dtype=jnp.float32)
    # TODO(synk): BatchNorm2d is realized in eval mode (running stats); training-mode
    # batch statistics are not reproduced.
    return dict(
        conv1_w=nrm(ks[0], (128, 2, 3, 10)),   conv1_b=nrm(ks[1], (128,)),
        bn1_gamma=uni(ks[2], (128,)),          bn1_beta=nrm(ks[3], (128,)),
        bn1_mean=nrm(ks[4], (128,)),           bn1_var=uni(ks[5], (128,)),
        conv2_w=nrm(ks[6], (256, 128, 1, 3), 0.05), conv2_b=nrm(ks[7], (256,)),
        bn2_gamma=uni(ks[8], (256,)),          bn2_beta=nrm(ks[9], (256,)),
        bn2_mean=nrm(ks[10], (256,)),          bn2_var=uni(ks[11], (256,)),
        fc1_w=nrm(ks[12], (512, 2560), 0.02),  fc1_b=nrm(ks[13], (512,)),
        fc2_w=nrm(ks[14], (128, 512), 0.05),   fc2_b=nrm(ks[15], (128,)),
        fc3_w=nrm(ks[16], (27, 128), 0.1),     fc3_b=nrm(ks[17], (27,)),
    )


if __name__ == "__main__":
    key = jax.random.PRNGKey(0)
    kx, kx2, kp = jax.random.split(key, 3)
    params = init_params(kp)
    fwd = jax.jit(imu_forward_pallas)

    # IMU input: 2 channels, 3 axes, 300 time samples -> flatten gives 2560 as fc1 expects.
    # Small batch (single grid step).
    x = jax.random.normal(kx, (2, 2, 3, 300), dtype=jnp.float32)
    out = jax.block_until_ready(fwd(x, params))
    assert out.shape == (2, 27) and out.dtype == jnp.float32
    ref = imu_forward_ref(x, params)
    # bf16 matmul inputs (incl. bf16 im2col) with f32 accumulation vs an f32
    # HIGHEST reference: agreement is ~1e-2 relative after 5 layers.
    np.testing.assert_allclose(np.asarray(out), np.asarray(ref), rtol=5e-2, atol=5e-2)

    # Larger batch exercising a multi-step grid + batch padding.
    x2 = jax.random.normal(kx2, (20, 2, 3, 300), dtype=jnp.float32)
    out2 = jax.block_until_ready(fwd(x2, params))
    assert out2.shape == (20, 27) and out2.dtype == jnp.float32
    ref2 = imu_forward_ref(x2, params)
    np.testing.assert_allclose(np.asarray(out2), np.asarray(ref2), rtol=5e-2, atol=5e-2)

    print("KERNEL_OK")
</pallas_src>

<mosaic_0001>
module attributes {stable_mosaic.version = 11 : i64} {
  func.func @imu_kernel(%arg0: i32, %arg1: memref<10x8x180xbf16, #tpu.memory_space<vmem>>, %arg2: memref<180x384xbf16, #tpu.memory_space<vmem>>, %arg3: memref<1x384xf32, #tpu.memory_space<vmem>>, %arg4: memref<384x256xbf16, #tpu.memory_space<vmem>>, %arg5: memref<1x256xf32, #tpu.memory_space<vmem>>, %arg6: memref<10x256x512xbf16, #tpu.memory_space<vmem>>, %arg7: memref<1x512xf32, #tpu.memory_space<vmem>>, %arg8: memref<512x128xbf16, #tpu.memory_space<vmem>>, %arg9: memref<1x128xf32, #tpu.memory_space<vmem>>, %arg10: memref<128x128xbf16, #tpu.memory_space<vmem>>, %arg11: memref<1x128xf32, #tpu.memory_space<vmem>>, %arg12: memref<8x128xf32, #tpu.memory_space<vmem>>) attributes {dimension_semantics = [#tpu.dimension_semantics<parallel>], iteration_bounds = array<i64: 1>, scalar_prefetch = 0 : i64, scratch_operands = 0 : i64, tpu.core_type = #tpu.core_type<tc>, window_params = [{transform_indices = @transform_0, window_bounds = array<i64: 10, 8, 180>}, {pipeline_mode = #tpu.pipeline_mode<synchronous>, transform_indices = @transform_1, window_bounds = array<i64: 180, 384>}, {pipeline_mode = #tpu.pipeline_mode<synchronous>, transform_indices = @transform_2, window_bounds = array<i64: 1, 384>}, {pipeline_mode = #tpu.pipeline_mode<synchronous>, transform_indices = @transform_3, window_bounds = array<i64: 384, 256>}, {pipeline_mode = #tpu.pipeline_mode<synchronous>, transform_indices = @transform_4, window_bounds = array<i64: 1, 256>}, {pipeline_mode = #tpu.pipeline_mode<synchronous>, transform_indices = @transform_5, window_bounds = array<i64: 10, 256, 512>}, {pipeline_mode = #tpu.pipeline_mode<synchronous>, transform_indices = @transform_6, window_bounds = array<i64: 1, 512>}, {pipeline_mode = #tpu.pipeline_mode<synchronous>, transform_indices = @transform_7, window_bounds = array<i64: 512, 128>}, {pipeline_mode = #tpu.pipeline_mode<synchronous>, transform_indices = @transform_8, window_bounds = array<i64: 1, 128>}, {pipeline_mode = #tpu.pipeline_mode<synchronous>, transform_indices = @transform_9, window_bounds = array<i64: 128, 128>}, {pipeline_mode = #tpu.pipeline_mode<synchronous>, transform_indices = @transform_10, window_bounds = array<i64: 1, 128>}, {transform_indices = @transform_11, window_bounds = array<i64: 8, 128>}]} {
    %c0 = arith.constant 0 : index
    %c0_0 = arith.constant 0 : index
    %c0_1 = arith.constant 0 : index
    %0 = vector.load %arg1[%c0, %c0_0, %c0_1] : memref<10x8x180xbf16, #tpu.memory_space<vmem>>, vector<10x8x180xbf16>
    %1 = vector.shape_cast %0 : vector<10x8x180xbf16> to vector<80x180xbf16>
    %c0_2 = arith.constant 0 : index
    %c0_3 = arith.constant 0 : index
    %2 = vector.load %arg2[%c0_2, %c0_3] : memref<180x384xbf16, #tpu.memory_space<vmem>>, vector<180x384xbf16>
    %cst = arith.constant dense<0.000000e+00> : vector<80x384xf32>
    %3 = tpu.matmul %1, %2, %cst {dimension_numbers = #tpu.dot_dimension_numbers<[1], [0], [0], [1], [0, 0, 1, 1], [], []>} : vector<80x180xbf16>, vector<180x384xbf16>, vector<80x384xf32> -> vector<80x384xf32>
    %c0_4 = arith.constant 0 : index
    %c0_5 = arith.constant 0 : index
    %4 = vector.load %arg3[%c0_4, %c0_5] : memref<1x384xf32, #tpu.memory_space<vmem>>, vector<1x384xf32>
    %5 = vector.broadcast %4 : vector<1x384xf32> to vector<80x384xf32>
    %6 = arith.addf %3, %5 : vector<80x384xf32>
    %cst_6 = arith.constant 0.000000e+00 : f32
    %7 = vector.broadcast %cst_6 : f32 to vector<80x384xf32>
    %8 = arith.maximumf %6, %7 : vector<80x384xf32>
    %9 = arith.truncf %8 : vector<80x384xf32> to vector<80x384xbf16>
    %c0_7 = arith.constant 0 : index
    %c0_8 = arith.constant 0 : index
    %10 = vector.load %arg4[%c0_7, %c0_8] : memref<384x256xbf16, #tpu.memory_space<vmem>>, vector<384x256xbf16>
    %cst_9 = arith.constant dense<0.000000e+00> : vector<80x256xf32>
    %11 = tpu.matmul %9, %10, %cst_9 {dimension_numbers = #tpu.dot_dimension_numbers<[1], [0], [0], [1], [0, 0, 1, 1], [], []>} : vector<80x384xbf16>, vector<384x256xbf16>, vector<80x256xf32> -> vector<80x256xf32>
    %c0_10 = arith.constant 0 : index
    %c0_11 = arith.constant 0 : index
    %12 = vector.load %arg5[%c0_10, %c0_11] : memref<1x256xf32, #tpu.memory_space<vmem>>, vector<1x256xf32>
    %13 = vector.broadcast %12 : vector<1x256xf32> to vector<80x256xf32>
    %14 = arith.addf %11, %13 : vector<80x256xf32>
    %cst_12 = arith.constant 0.000000e+00 : f32
    %15 = vector.broadcast %cst_12 : f32 to vector<80x256xf32>
    %16 = arith.maximumf %14, %15 : vector<80x256xf32>
    %17 = arith.truncf %16 : vector<80x256xf32> to vector<80x256xbf16>
    %18 = vector.extract_strided_slice %17 {offsets = [0, 0], sizes = [8, 256], strides = [1, 1]} : vector<80x256xbf16> to vector<8x256xbf16>
    %c0_13 = arith.constant 0 : index
    %c0_14 = arith.constant 0 : index
    %c0_15 = arith.constant 0 : index
    %19 = vector.load %arg6[%c0_13, %c0_14, %c0_15] : memref<10x256x512xbf16, #tpu.memory_space<vmem>>, vector<1x256x512xbf16>
    %20 = vector.shape_cast %19 : vector<1x256x512xbf16> to vector<256x512xbf16>
    %cst_16 = arith.constant dense<0.000000e+00> : vector<8x512xf32>
    %21 = tpu.matmul %18, %20, %cst_16 {dimension_numbers = #tpu.dot_dimension_numbers<[1], [0], [0], [1], [0, 0, 1, 1], [], []>} : vector<8x256xbf16>, vector<256x512xbf16>, vector<8x512xf32> -> vector<8x512xf32>
    %22 = vector.extract_strided_slice %17 {offsets = [8, 0], sizes = [8, 256], strides = [1, 1]} : vector<80x256xbf16> to vector<8x256xbf16>
    %c1 = arith.constant 1 : index
    %c0_17 = arith.constant 0 : index
    %c0_18 = arith.constant 0 : index
    %23 = vector.load %arg6[%c1, %c0_17, %c0_18] : memref<10x256x512xbf16, #tpu.memory_space<vmem>>, vector<1x256x512xbf16>
    %24 = vector.shape_cast %23 : vector<1x256x512xbf16> to vector<256x512xbf16>
    %cst_19 = arith.constant dense<0.000000e+00> : vector<8x512xf32>
    %25 = tpu.matmul %22, %24, %cst_19 {dimension_numbers = #tpu.dot_dimension_numbers<[1], [0], [0], [1], [0, 0, 1, 1], [], []>} : vector<8x256xbf16>, vector<256x512xbf16>, vector<8x512xf32> -> vector<8x512xf32>
    %26 = arith.addf %21, %25 : vector<8x512xf32>
    %27 = vector.extract_strided_slice %17 {offsets = [16, 0], sizes = [8, 256], strides = [1, 1]} : vector<80x256xbf16> to vector<8x256xbf16>
    %c2 = arith.constant 2 : index
    %c0_20 = arith.constant 0 : index
    %c0_21 = arith.constant 0 : index
    %28 = vector.load %arg6[%c2, %c0_20, %c0_21] : memref<10x256x512xbf16, #tpu.memory_space<vmem>>, vector<1x256x512xbf16>
    %29 = vector.shape_cast %28 : vector<1x256x512xbf16> to vector<256x512xbf16>
    %cst_22 = arith.constant dense<0.000000e+00> : vector<8x512xf32>
    %30 = tpu.matmul %27, %29, %cst_22 {dimension_numbers = #tpu.dot_dimension_numbers<[1], [0], [0], [1], [0, 0, 1, 1], [], []>} : vector<8x256xbf16>, vector<256x512xbf16>, vector<8x512xf32> -> vector<8x512xf32>
    %31 = arith.addf %26, %30 : vector<8x512xf32>
    %32 = vector.extract_strided_slice %17 {offsets = [24, 0], sizes = [8, 256], strides = [1, 1]} : vector<80x256xbf16> to vector<8x256xbf16>
    %c3 = arith.constant 3 : index
    %c0_23 = arith.constant 0 : index
    %c0_24 = arith.constant 0 : index
    %33 = vector.load %arg6[%c3, %c0_23, %c0_24] : memref<10x256x512xbf16, #tpu.memory_space<vmem>>, vector<1x256x512xbf16>
    %34 = vector.shape_cast %33 : vector<1x256x512xbf16> to vector<256x512xbf16>
    %cst_25 = arith.constant dense<0.000000e+00> : vector<8x512xf32>
    %35 = tpu.matmul %32, %34, %cst_25 {dimension_numbers = #tpu.dot_dimension_numbers<[1], [0], [0], [1], [0, 0, 1, 1], [], []>} : vector<8x256xbf16>, vector<256x512xbf16>, vector<8x512xf32> -> vector<8x512xf32>
    %36 = arith.addf %31, %35 : vector<8x512xf32>
    %37 = vector.extract_strided_slice %17 {offsets = [32, 0], sizes = [8, 256], strides = [1, 1]} : vector<80x256xbf16> to vector<8x256xbf16>
    %c4 = arith.constant 4 : index
    %c0_26 = arith.constant 0 : index
    %c0_27 = arith.constant 0 : index
    %38 = vector.load %arg6[%c4, %c0_26, %c0_27] : memref<10x256x512xbf16, #tpu.memory_space<vmem>>, vector<1x256x512xbf16>
    %39 = vector.shape_cast %38 : vector<1x256x512xbf16> to vector<256x512xbf16>
    %cst_28 = arith.constant dense<0.000000e+00> : vector<8x512xf32>
    %40 = tpu.matmul %37, %39, %cst_28 {dimension_numbers = #tpu.dot_dimension_numbers<[1], [0], [0], [1], [0, 0, 1, 1], [], []>} : vector<8x256xbf16>, vector<256x512xbf16>, vector<8x512xf32> -> vector<8x512xf32>
    %41 = arith.addf %36, %40 : vector<8x512xf32>
    %42 = vector.extract_strided_slice %17 {offsets = [40, 0], sizes = [8, 256], strides = [1, 1]} : vector<80x256xbf16> to vector<8x256xbf16>
    %c5 = arith.constant 5 : index
    %c0_29 = arith.constant 0 : index
    %c0_30 = arith.constant 0 : index
    %43 = vector.load %arg6[%c5, %c0_29, %c0_30] : memref<10x256x512xbf16, #tpu.memory_space<vmem>>, vector<1x256x512xbf16>
    %44 = vector.shape_cast %43 : vector<1x256x512xbf16> to vector<256x512xbf16>
    %cst_31 = arith.constant dense<0.000000e+00> : vector<8x512xf32>
    %45 = tpu.matmul %42, %44, %cst_31 {dimension_numbers = #tpu.dot_dimension_numbers<[1], [0], [0], [1], [0, 0, 1, 1], [], []>} : vector<8x256xbf16>, vector<256x512xbf16>, vector<8x512xf32> -> vector<8x512xf32>
    %46 = arith.addf %41, %45 : vector<8x512xf32>
    %47 = vector.extract_strided_slice %17 {offsets = [48, 0], sizes = [8, 256], strides = [1, 1]} : vector<80x256xbf16> to vector<8x256xbf16>
    %c6 = arith.constant 6 : index
    %c0_32 = arith.constant 0 : index
    %c0_33 = arith.constant 0 : index
    %48 = vector.load %arg6[%c6, %c0_32, %c0_33] : memref<10x256x512xbf16, #tpu.memory_space<vmem>>, vector<1x256x512xbf16>
    %49 = vector.shape_cast %48 : vector<1x256x512xbf16> to vector<256x512xbf16>
    %cst_34 = arith.constant dense<0.000000e+00> : vector<8x512xf32>
    %50 = tpu.matmul %47, %49, %cst_34 {dimension_numbers = #tpu.dot_dimension_numbers<[1], [0], [0], [1], [0, 0, 1, 1], [], []>} : vector<8x256xbf16>, vector<256x512xbf16>, vector<8x512xf32> -> vector<8x512xf32>
    %51 = arith.addf %46, %50 : vector<8x512xf32>
    %52 = vector.extract_strided_slice %17 {offsets = [56, 0], sizes = [8, 256], strides = [1, 1]} : vector<80x256xbf16> to vector<8x256xbf16>
    %c7 = arith.constant 7 : index
    %c0_35 = arith.constant 0 : index
    %c0_36 = arith.constant 0 : index
    %53 = vector.load %arg6[%c7, %c0_35, %c0_36] : memref<10x256x512xbf16, #tpu.memory_space<vmem>>, vector<1x256x512xbf16>
    %54 = vector.shape_cast %53 : vector<1x256x512xbf16> to vector<256x512xbf16>
    %cst_37 = arith.constant dense<0.000000e+00> : vector<8x512xf32>
    %55 = tpu.matmul %52, %54, %cst_37 {dimension_numbers = #tpu.dot_dimension_numbers<[1], [0], [0], [1], [0, 0, 1, 1], [], []>} : vector<8x256xbf16>, vector<256x512xbf16>, vector<8x512xf32> -> vector<8x512xf32>
    %56 = arith.addf %51, %55 : vector<8x512xf32>
    %57 = vector.extract_strided_slice %17 {offsets = [64, 0], sizes = [8, 256], strides = [1, 1]} : vector<80x256xbf16> to vector<8x256xbf16>
    %c8 = arith.constant 8 : index
    %c0_38 = arith.constant 0 : index
    %c0_39 = arith.constant 0 : index
    %58 = vector.load %arg6[%c8, %c0_38, %c0_39] : memref<10x256x512xbf16, #tpu.memory_space<vmem>>, vector<1x256x512xbf16>
    %59 = vector.shape_cast %58 : vector<1x256x512xbf16> to vector<256x512xbf16>
    %cst_40 = arith.constant dense<0.000000e+00> : vector<8x512xf32>
    %60 = tpu.matmul %57, %59, %cst_40 {dimension_numbers = #tpu.dot_dimension_numbers<[1], [0], [0], [1], [0, 0, 1, 1], [], []>} : vector<8x256xbf16>, vector<256x512xbf16>, vector<8x512xf32> -> vector<8x512xf32>
    %61 = arith.addf %56, %60 : vector<8x512xf32>
    %62 = vector.extract_strided_slice %17 {offsets = [72, 0], sizes = [8, 256], strides = [1, 1]} : vector<80x256xbf16> to vector<8x256xbf16>
    %c9 = arith.constant 9 : index
    %c0_41 = arith.constant 0 : index
    %c0_42 = arith.constant 0 : index
    %63 = vector.load %arg6[%c9, %c0_41, %c0_42] : memref<10x256x512xbf16, #tpu.memory_space<vmem>>, vector<1x256x512xbf16>
    %64 = vector.shape_cast %63 : vector<1x256x512xbf16> to vector<256x512xbf16>
    %cst_43 = arith.constant dense<0.000000e+00> : vector<8x512xf32>
    %65 = tpu.matmul %62, %64, %cst_43 {dimension_numbers = #tpu.dot_dimension_numbers<[1], [0], [0], [1], [0, 0, 1, 1], [], []>} : vector<8x256xbf16>, vector<256x512xbf16>, vector<8x512xf32> -> vector<8x512xf32>
    %66 = arith.addf %61, %65 : vector<8x512xf32>
    %c0_44 = arith.constant 0 : index
    %c0_45 = arith.constant 0 : index
    %67 = vector.load %arg7[%c0_44, %c0_45] : memref<1x512xf32, #tpu.memory_space<vmem>>, vector<1x512xf32>
    %68 = vector.broadcast %67 : vector<1x512xf32> to vector<8x512xf32>
    %69 = arith.addf %66, %68 : vector<8x512xf32>
    %cst_46 = arith.constant 0.000000e+00 : f32
    %70 = vector.broadcast %cst_46 : f32 to vector<8x512xf32>
    %71 = arith.maximumf %69, %70 : vector<8x512xf32>
    %72 = arith.truncf %71 : vector<8x512xf32> to vector<8x512xbf16>
    %c0_47 = arith.constant 0 : index
    %c0_48 = arith.constant 0 : index
    %73 = vector.load %arg8[%c0_47, %c0_48] : memref<512x128xbf16, #tpu.memory_space<vmem>>, vector<512x128xbf16>
    %cst_49 = arith.constant dense<0.000000e+00> : vector<8x128xf32>
    %74 = tpu.matmul %72, %73, %cst_49 {dimension_numbers = #tpu.dot_dimension_numbers<[1], [0], [0], [1], [0, 0, 1, 1], [], []>} : vector<8x512xbf16>, vector<512x128xbf16>, vector<8x128xf32> -> vector<8x128xf32>
    %c0_50 = arith.constant 0 : index
    %c0_51 = arith.constant 0 : index
    %75 = vector.load %arg9[%c0_50, %c0_51] : memref<1x128xf32, #tpu.memory_space<vmem>>, vector<1x128xf32>
    %76 = vector.broadcast %75 : vector<1x128xf32> to vector<8x128xf32>
    %77 = arith.addf %74, %76 : vector<8x128xf32>
    %cst_52 = arith.constant 0.000000e+00 : f32
    %78 = vector.broadcast %cst_52 : f32 to vector<8x128xf32>
    %79 = arith.maximumf %77, %78 : vector<8x128xf32>
    %80 = arith.truncf %79 : vector<8x128xf32> to vector<8x128xbf16>
    %c0_53 = arith.constant 0 : index
    %c0_54 = arith.constant 0 : index
    %81 = vector.load %arg10[%c0_53, %c0_54] : memref<128x128xbf16, #tpu.memory_space<vmem>>, vector<128x128xbf16>
    %cst_55 = arith.constant dense<0.000000e+00> : vector<8x128xf32>
    %82 = tpu.matmul %80, %81, %cst_55 {dimension_numbers = #tpu.dot_dimension_numbers<[1], [0], [0], [1], [0, 0, 1, 1], [], []>} : vector<8x128xbf16>, vector<128x128xbf16>, vector<8x128xf32> -> vector<8x128xf32>
    %c0_56 = arith.constant 0 : index
    %c0_57 = arith.constant 0 : index
    %83 = vector.load %arg11[%c0_56, %c0_57] : memref<1x128xf32, #tpu.memory_space<vmem>>, vector<1x128xf32>
    %84 = vector.broadcast %83 : vector<1x128xf32> to vector<8x128xf32>
    %85 = arith.addf %82, %84 : vector<8x128xf32>
    %c0_58 = arith.constant 0 : index
    %c0_59 = arith.constant 0 : index
    %86 = vector.load %arg12[%c0_58, %c0_59] : memref<8x128xf32, #tpu.memory_space<vmem>>, vector<8x128xf32>
    tpu.vector_store %arg12[%c0_58, %c0_59], %85 {strides = array<i32>} : memref<8x128xf32, #tpu.memory_space<vmem>>, vector<8x128xf32>,
    return
  }
  func.func @transform_0(%arg0: i32) -> (i32, i32, i32) {
    %c0_i32 = arith.constant 0 : i32
    %c0_i32_0 = arith.constant 0 : i32
    %c0_i32_1 = arith.constant 0 : i32
    return %c0_i32, %arg0, %c0_i32_0 : i32, i32, i32
  }
  func.func @transform_1(%arg0: i32) -> (i32, i32) {
    %c0_i32 = arith.constant 0 : i32
    %c0_i32_0 = arith.constant 0 : i32
    %c0_i32_1 = arith.constant 0 : i32
    return %c0_i32, %c0_i32_0 : i32, i32
  }
  func.func @transform_2(%arg0: i32) -> (i32, i32) {
    %c0_i32 = arith.constant 0 : i32
    %c0_i32_0 = arith.constant 0 : i32
    %c0_i32_1 = arith.constant 0 : i32
    return %c0_i32, %c0_i32_0 : i32, i32
  }
  func.func @transform_3(%arg0: i32) -> (i32, i32) {
    %c0_i32 = arith.constant 0 : i32
    %c0_i32_0 = arith.constant 0 : i32
    %c0_i32_1 = arith.constant 0 : i32
    return %c0_i32, %c0_i32_0 : i32, i32
  }
  func.func @transform_4(%arg0: i32) -> (i32, i32) {
    %c0_i32 = arith.constant 0 : i32
    %c0_i32_0 = arith.constant 0 : i32
    %c0_i32_1 = arith.constant 0 : i32
    return %c0_i32, %c0_i32_0 : i32, i32
  }
  func.func @transform_5(%arg0: i32) -> (i32, i32, i32) {
    %c0_i32 = arith.constant 0 : i32
    %c0_i32_0 = arith.constant 0 : i32
    %c0_i32_1 = arith.constant 0 : i32
    %c0_i32_2 = arith.constant 0 : i32
    return %c0_i32, %c0_i32_0, %c0_i32_1 : i32, i32, i32
  }
  func.func @transform_6(%arg0: i32) -> (i32, i32) {
    %c0_i32 = arith.constant 0 : i32
    %c0_i32_0 = arith.constant 0 : i32
    %c0_i32_1 = arith.constant 0 : i32
    return %c0_i32, %c0_i32_0 : i32, i32
  }
  func.func @transform_7(%arg0: i32) -> (i32, i32) {
    %c0_i32 = arith.constant 0 : i32
    %c0_i32_0 = arith.constant 0 : i32
    %c0_i32_1 = arith.constant 0 : i32
    return %c0_i32, %c0_i32_0 : i32, i32
  }
  func.func @transform_8(%arg0: i32) -> (i32, i32) {
    %c0_i32 = arith.constant 0 : i32
    %c0_i32_0 = arith.constant 0 : i32
    %c0_i32_1 = arith.constant 0 : i32
    return %c0_i32, %c0_i32_0 : i32, i32
  }
  func.func @transform_9(%arg0: i32) -> (i32, i32) {
    %c0_i32 = arith.constant 0 : i32
    %c0_i32_0 = arith.constant 0 : i32
    %c0_i32_1 = arith.constant 0 : i32
    return %c0_i32, %c0_i32_0 : i32, i32
  }
  func.func @transform_10(%arg0: i32) -> (i32, i32) {
    %c0_i32 = arith.constant 0 : i32
    %c0_i32_0 = arith.constant 0 : i32
    %c0_i32_1 = arith.constant 0 : i32
    return %c0_i32, %c0_i32_0 : i32, i32
  }
  func.func @transform_11(%arg0: i32) -> (i32, i32) {
    %c0_i32 = arith.constant 0 : i32
    %c0_i32_0 = arith.constant 0 : i32
    return %arg0, %c0_i32 : i32, i32
  }
}

</mosaic_0001>

<bundles_post_ra>
// kernel: imu_forward_pallas.1
= control target key start
LH: loop header
LB: loop body
LE: loop exit
PB: predicated region body
PF: predicated region fallthrough
CT: control target
= control target key end

     0   :  { %vm348_vm0 = vcmask 1041408   ;;  %vm332_vm1 = vcmask 424960   ;;  %s16139_s1 = inlined_call_operand.vmem [shape: bf16[180,384], index: 1, kind: input, shape index: {}]   ;;  %s16140_s0 = inlined_call_operand.vmem [shape: bf16[10,8,180], index: 0, kind: input, shape index: {}]   ;;  %s16141_s3 = inlined_call_operand.vmem [shape: bf16[384,256], index: 3, kind: input, shape index: {}]   ;;  %s16142_s2 = inlined_call_operand.vmem [shape: f32[1,384], index: 2, kind: input, shape index: {}]   ;;  %s16143_s4 = inlined_call_operand.vmem [shape: f32[1,256], index: 4, kind: input, shape index: {}]   ;;  %s16144_s5 = inlined_call_operand.vmem [shape: bf16[10,256,512], index: 5, kind: input, shape index: {}]   ;;  %s16145_s8 = inlined_call_operand.vmem [shape: f32[1,128], index: 8, kind: input, shape index: {}]   ;;  %s16146_s7 = inlined_call_operand.vmem [shape: bf16[512,128], index: 7, kind: input, shape index: {}]   ;;  %s16147_s6 = inlined_call_operand.vmem [shape: f32[1,512], index: 6, kind: input, shape index: {}]   ;;  %s16148_s10 = inlined_call_operand.vmem [shape: f32[1,128], index: 10, kind: input, shape index: {}]   ;;  %s16149_s9 = inlined_call_operand.vmem [shape: bf16[128,128], index: 9, kind: input, shape index: {}]   ;;  %s16150_s11 = inlined_call_operand.vmem [shape: f32[8,128], index: 11, kind: output, shape index: {}]  }
   0x1   :  { %v6674_v0 = vld [vmem:[%s16139_s1 + $0xa8] sm:$0xf]  ;;  %v10255_v1 = vld [vmem:[%s16139_s1 + $0xb0] sm:$0xf0]  ;;  %v10254_v2 = vld [vmem:[%s16139_s1 + $0xac] sm:$0xf] }
   0x2   :  { %v6675_v3 = vor.u32 %v10255_v1, %v6674_v0  ;;  %v6676_v4 = vld [vmem:[%s16139_s1 + $0xb4] sm:$0xf0]  ;;  %v93_v5 = vld [vmem:[%s16139_s1 + $0x108] sm:$0x33]  ;;  %v6662_v6 = vld [vmem:[%s16139_s1 + $0x90] sm:$0xf] }
   0x3   :  { %v6679_v7 = vor.u32 %v10254_v2, %v6676_v4  ;;  %v260_v8 = vunpack.c.l.b16 %v93_v5  ;;  %v10252_v9 = vld [vmem:[%s16139_s1 + $0x98] sm:$0xf0]  ;;  %v10251_v10 = vld [vmem:[%s16139_s1 + $0x94] sm:$0xf]  ;;  %v6664_v11 = vld [vmem:[%s16139_s1 + $0x9c] sm:$0xf0]  ;;  %v261_v25 = vunpack.c.h.b16 %v93_v5 }
   0x4   :  { %358 = vmatpush.bf16.msra.mxu0 %v6675_v3  ;;  %v6663_v12 = vor.u32 %v10252_v9, %v6662_v6  ;;  %v6710_v13 = vld [vmem:[%s16139_s1 + $0xf0] sm:$0xf]  ;;  %v6667_v15 = vor.u32 %v10251_v10, %v6664_v11  ;;  %v10264_v16 = vld [vmem:[%s16139_s1 + $0xf8] sm:$0xf0]  ;;  %v6650_v17 = vld [vmem:[%s16139_s1 + $0x78] sm:$0xf] }
   0x5   :  { %426 = vmatpush.bf16.msra.mxu2 %v6679_v7  ;;  %v296_v14 = vpack.c.b16 %v260_v8, %v260_v8  ;;  %v10249_v18 = vld [vmem:[%s16139_s1 + $0x80] sm:$0xf0]  ;;  %v10248_v19 = vld [vmem:[%s16139_s1 + $0x7c] sm:$0xf]  ;;  %v6652_v20 = vld [vmem:[%s16139_s1 + $0x84] sm:$0xf0]  ;;  %v6711_v22 = vor.u32 %v10264_v16, %v6710_v13  ;;  %v297_v35 = vpack.c.b16 %v261_v25, %v261_v25 }
   0x6   :  { %v6651_v23 = vor.u32 %v10249_v18, %v6650_v17  ;;  %v6698_v24 = vld [vmem:[%s16139_s1 + $0xd8] sm:$0xf]  ;;  %v6655_v26 = vor.u32 %v10248_v19, %v6652_v20  ;;  %v10261_v27 = vld [vmem:[%s16139_s1 + $0xe0] sm:$0xf0]  ;;  %v6638_v28 = vld [vmem:[%s16139_s1 + $0x60] sm:$0xf] }
   0x7   :  { %v350_v21 = vsel %vm348_vm0, %v296_v14, 0  ;;  %v10246_v29 = vld [vmem:[%s16139_s1 + $0x68] sm:$0xf0]  ;;  %v10245_v30 = vld [vmem:[%s16139_s1 + $0x64] sm:$0xf]  ;;  %v6699_v32 = vor.u32 %v10261_v27, %v6698_v24  ;;  %v353_v46 = vsel %vm348_vm0, %v297_v35, 0 }
   0x8   :  { %10994 = vmatpush.bf16.msra.mxu3 %v350_v21  ;;  %359 = vmatpush.bf16.msra.mxu0 %v6663_v12  ;;  %v6640_v31 = vld [vmem:[%s16139_s1 + $0x6c] sm:$0xf0]  ;;  %v6639_v33 = vor.u32 %v10246_v29, %v6638_v28  ;;  %v6686_v34 = vld [vmem:[%s16139_s1 + $0xc0] sm:$0xf]  ;;  %v10258_v37 = vld [vmem:[%s16139_s1 + $0xc8] sm:$0xf0] }
   0x9   :  { %427 = vmatpush.bf16.msra.mxu2 %v6667_v15  ;;  %396 = vmatpush.bf16.msra.mxu1 %v350_v21  ;;  %v6643_v36 = vor.u32 %v10245_v30, %v6640_v31  ;;  %v6626_v38 = vld [vmem:[%s16139_s1 + $0x48] sm:$0xf]  ;;  %v10243_v39 = vld [vmem:[%s16139_s1 + $0x50] sm:$0xf0]  ;;  %v10242_v40 = vld [vmem:[%s16139_s1 + $0x4c] sm:$0xf]  ;;  %v6687_v42 = vor.u32 %v10258_v37, %v6686_v34 }
   0xa   :  { %v6628_v41 = vld [vmem:[%s16139_s1 + $0x54] sm:$0xf0]  ;;  %v6627_v43 = vor.u32 %v10243_v39, %v6626_v38  ;;  %v10231_v44 = vld [vmem:[%s16140_s0 + $0x44] sm:$0xf]  ;;  %v6584_v45 = vld [vmem:[%s16140_s0 + $0x48] sm:$0xf0] }
   0xb   :  { %v6631_v47 = vor.u32 %v10242_v40, %v6628_v41  ;;  %v6614_v48 = vld [vmem:[%s16139_s1 + $0x30] sm:$0xf]  ;;  %v10240_v49 = vld [vmem:[%s16139_s1 + $0x38] sm:$0xf0]  ;;  %v10239_v50 = vld [vmem:[%s16139_s1 + $0x34] sm:$0xf]  ;;  %v11167_v54 = vor.u32 %v10231_v44, %v6584_v45 }
   0xc   :  { %10995 = vmatpush.bf16.msra.mxu3 %v6711_v22  ;;  %360 = vmatpush.bf16.msra.mxu0 %v6651_v23  ;;  %v6616_v51 = vld [vmem:[%s16139_s1 + $0x3c] sm:$0xf0]  ;;  %v10263_v52 = vld [vmem:[%s16139_s1 + $0xf4] sm:$0xf]  ;;  %v10223_v55 = vld [vmem:[%s16140_s0 + $0x4] sm:$0xf]  ;;  %v6615_v57 = vor.u32 %v10240_v49, %v6614_v48 }
   0xd   :  { %428 = vmatpush.bf16.msra.mxu2 %v6655_v26  ;;  %397 = vmatpush.bf16.msra.mxu1 %v6711_v22  ;;  %v6712_v53 = vld [vmem:[%s16139_s1 + $0xfc] sm:$0xf0]  ;;  %v6552_v56 = vld [vmem:[%s16140_s0 + $0x8] sm:$0xf0]  ;;  %v6619_v58 = vor.u32 %v10239_v50, %v6616_v51  ;;  %v6602_v60 = vld [vmem:[%s16139_s1 + $0x18] sm:$0xf] }
   0xe   :  { %v6715_v59 = vor.u32 %v10263_v52, %v6712_v53  ;;  %v10237_v61 = vld [vmem:[%s16139_s1 + $0x20] sm:$0xf0]  ;;  %v10236_v62 = vld [vmem:[%s16139_s1 + $0x1c] sm:$0xf]  ;;  %v6604_v63 = vld [vmem:[%s16139_s1 + $0x24] sm:$0xf0]  ;;  %v11193_v2 = vor.u32 %v10223_v55, %v6552_v56 }
   0xf   :  { %v10260_v0 = vld [vmem:[%s16139_s1 + $0xdc] sm:$0xf]  ;;  %v6700_v1 = vld [vmem:[%s16139_s1 + $0xe4] sm:$0xf0]  ;;  %v6603_v3 = vor.u32 %v10237_v61, %v6602_v60  ;;  %v6607_v4 = vor.u32 %v10236_v62, %v6604_v63  ;;  %v6590_v6 = vld [vmem:[%s16139_s1] sm:$0xf] }
  0x10   :  { %10996 = vmatpush.bf16.msra.mxu3 %v6699_v32  ;;  %361 = vmatpush.bf16.msra.mxu0 %v6639_v33  ;;  %v6703_v5 = vor.u32 %v10260_v0, %v6700_v1  ;;  %v10234_v7 = vld [vmem:[%s16139_s1 + $0x8] sm:$0xf0]  ;;  %v10233_v8 = vld [vmem:[%s16139_s1 + $0x4] sm:$0xf]  ;;  %v6592_v9 = vld [vmem:[%s16139_s1 + $0xc] sm:$0xf0] }
  0x11   :  { %429 = vmatpush.bf16.msra.mxu2 %v6643_v36  ;;  %398 = vmatpush.bf16.msra.mxu1 %v6699_v32  ;;  %v10257_v10 = vld [vmem:[%s16139_s1 + $0xc4] sm:$0xf]  ;;  %v6688_v11 = vld [vmem:[%s16139_s1 + $0xcc] sm:$0xf0]  ;;  %v6591_v12 = vor.u32 %v10234_v7, %v6590_v6  ;;  %v6550_v13 = vld [vmem:[%s16140_s0] sm:$0xf]  ;;  %v6595_v15 = vor.u32 %v10233_v8, %v6592_v9 }
  0x12   :  { %v10224_v14 = vld [vmem:[%s16140_s0 + $0x4] sm:$0xf0]  ;;  %v6691_v16 = vor.u32 %v10257_v10, %v6688_v11  ;;  %v10225_v18 = vld [vmem:[%s16140_s0 + $0x14] sm:$0xf]  ;;  %v6560_v19 = vld [vmem:[%s16140_s0 + $0x18] sm:$0xf0] }
  0x13   :  { %v11223_v17 = vor.u32 %v10224_v14, %v6550_v13  ;;  %v11233_v20 = vor.u32 %v10225_v18, %v6560_v19  ;;  %v6558_v21 = vld [vmem:[%s16140_s0 + $0x10] sm:$0xf]  ;;  %v10226_v22 = vld [vmem:[%s16140_s0 + $0x14] sm:$0xf0]  ;;  %v10256_v25 = vld [vmem:[%s16139_s1 + $0xb8] sm:$0xf0] }
  0x14   :  { %10997 = vmatpush.bf16.msra.mxu3 %v6687_v42  ;;  %362 = vmatpush.bf16.msra.mxu0 %v6627_v43  ;;  %v11245_v23 = vor.u32 %v10226_v22, %v6558_v21  ;;  %v6682_v24 = vld [vmem:[%s16139_s1 + $0xb0] sm:$0xf]  ;;  %v10227_v27 = vld [vmem:[%s16140_s0 + $0x24] sm:$0xf]  ;;  %v6568_v28 = vld [vmem:[%s16140_s0 + $0x28] sm:$0xf0] }
  0x15   :  { %430 = vmatpush.bf16.msra.mxu2 %v6631_v47  ;;  %399 = vmatpush.bf16.msra.mxu1 %v6687_v42  ;;  %v6683_v26 = vor.u32 %v10256_v25, %v6682_v24  ;;  %v6670_v29 = vld [vmem:[%s16139_s1 + $0x98] sm:$0xf]  ;;  %v10253_v30 = vld [vmem:[%s16139_s1 + $0xa0] sm:$0xf0]  ;;  %v11267_v31 = vor.u32 %v10227_v27, %v6568_v28  ;;  %v6658_v33 = vld [vmem:[%s16139_s1 + $0x80] sm:$0xf] }
  0x16   :  { %v6671_v32 = vor.u32 %v10253_v30, %v6670_v29  ;;  %v10250_v34 = vld [vmem:[%s16139_s1 + $0x88] sm:$0xf0]  ;;  %v6646_v36 = vld [vmem:[%s16139_s1 + $0x68] sm:$0xf]  ;;  %v10247_v37 = vld [vmem:[%s16139_s1 + $0x70] sm:$0xf0] }
  0x17   :  { %6724 = vmatmul.msk.bf16.vlgmr.msra.gmra.mxu3 %vm332_vm1, %v11167_v54  ;;  %v6659_v35 = vor.u32 %v10250_v34, %v6658_v33  ;;  %v6566_v38 = vld [vmem:[%s16140_s0 + $0x20] sm:$0xf]  ;;  %v10228_v39 = vld [vmem:[%s16140_s0 + $0x24] sm:$0xf0]  ;;  %v6647_v40 = vor.u32 %v10247_v37, %v6646_v36  ;;  %v6634_v42 = vld [vmem:[%s16139_s1 + $0x50] sm:$0xf] }
  0x18   :  { %464 = vmatpush.bf16.msrb.mxu3 %v353_v46  ;;  %363 = vmatpush.bf16.msra.mxu0 %v6615_v57  ;;  %v11291_v41 = vor.u32 %v10228_v39, %v6566_v38  ;;  %v10244_v43 = vld [vmem:[%s16139_s1 + $0x58] sm:$0xf0]  ;;  %v94_v45 = vld [vmem:[%s16139_s1 + $0x110] sm:$0x3]  ;;  %v10229_v46 = vld [vmem:[%s16140_s0 + $0x34] sm:$0xf] }
  0x19   :  { %431 = vmatpush.bf16.msra.mxu2 %v6619_v58  ;;  %6720 = vmatmul.msk.bf16.vlgmr.msra.gmra.mxu1 %vm332_vm1, %v11193_v2  ;;  %v6635_v44 = vor.u32 %v10244_v43, %v6634_v42  ;;  %v6576_v47 = vld [vmem:[%s16140_s0 + $0x38] sm:$0xf0]  ;;  %v262_v48 = vunpack.c.l.b16 %v94_v45  ;;  %v6622_v49 = vld [vmem:[%s16139_s1 + $0x38] sm:$0xf]  ;;  %v10241_v50 = vld [vmem:[%s16139_s1 + $0x40] sm:$0xf0] }
  0x1a   :  { %494 = vmatpush.bf16.msrb.mxu1 %v6683_v26  ;;  %v11316_v52 = vor.u32 %v10229_v46, %v6576_v47  ;;  %v6623_v53 = vor.u32 %v10241_v50, %v6622_v49  ;;  %v6610_v56 = vld [vmem:[%s16139_s1 + $0x20] sm:$0xf]  ;;  %v10238_v57 = vld [vmem:[%s16139_s1 + $0x28] sm:$0xf0]  ;;  %v10265_v60 = vld [vmem:[%s16139_s1 + $0x100] sm:$0xf0] }
  0x1b   :  { %v298_v51 = vpack.c.b16 %v262_v48, %v262_v48  ;;  %v6611_v58 = vor.u32 %v10238_v57, %v6610_v56  ;;  %v6598_v61 = vld [vmem:[%s16139_s1 + $0x8] sm:$0xf]  ;;  %v10235_v63 = vld [vmem:[%s16139_s1 + $0x10] sm:$0xf0]  ;;  %v6706_v0 = vld [vmem:[%s16139_s1 + $0xe0] sm:$0xf] }
  0x1c   :  { %465 = vmatpush.bf16.msrb.mxu3 %v6715_v59  ;;  %364 = vmatpush.bf16.msra.mxu0 %v6603_v3  ;;  %v6718_v59 = vld [vmem:[%s16139_s1 + $0xf8] sm:$0xf]  ;;  %v10262_v1 = vld [vmem:[%s16139_s1 + $0xe8] sm:$0xf0]  ;;  %v6574_v3 = vld [vmem:[%s16140_s0 + $0x30] sm:$0xf] }
  0x1d   :  { %432 = vmatpush.bf16.msra.mxu2 %v6607_v4  ;;  %v356_v55 = vsel %vm348_vm0, %v298_v51, 0  ;;  %v6719_v62 = vor.u32 %v10265_v60, %v6718_v59  ;;  %v10230_v4 = vld [vmem:[%s16140_s0 + $0x34] sm:$0xf0]  ;;  %v6707_v6 = vor.u32 %v10262_v1, %v6706_v0  ;;  %v6694_v7 = vld [vmem:[%s16139_s1 + $0xc8] sm:$0xf] }
  0x1e   :  { %495 = vmatpush.bf16.msrb.mxu1 %v6671_v32  ;;  %v10259_v8 = vld [vmem:[%s16139_s1 + $0xd0] sm:$0xf0]  ;;  %v11359_v9 = vor.u32 %v10230_v4, %v6574_v3  ;;  %v6582_v11 = vld [vmem:[%s16140_s0 + $0x40] sm:$0xf]  ;;  %v6793_v14 = vld [vmem:[%s16141_s3 + $0x70] sm:$0xf] }
  0x1f   :  { %v6695_v10 = vor.u32 %v10259_v8, %v6694_v7  ;;  %v10279_v18 = vld [vmem:[%s16141_s3 + $0x64] sm:$0xf0]  ;;  %v6857_v21 = vld [vmem:[%s16141_s3 + $0xf0] sm:$0xf]  ;;  %v10297_v22 = vld [vmem:[%s16141_s3 + $0xf4] sm:$0xf0] }
  0x20   :  { %466 = vmatpush.bf16.msrb.mxu3 %v6703_v5  ;;  %365 = vmatpush.bf16.msra.mxu0 %v6591_v12  ;;  %v6599_v5 = vor.u32 %v10235_v63, %v6598_v61  ;;  %v10232_v12 = vld [vmem:[%s16140_s0 + $0x44] sm:$0xf0]  ;;  %v6777_v24 = vld [vmem:[%s16141_s3 + $0x50] sm:$0xf]  ;;  %v10277_v25 = vld [vmem:[%s16141_s3 + $0x54] sm:$0xf0] }
  0x21   :  { %433 = vmatpush.bf16.msra.mxu2 %v6595_v15  ;;  %v11372_v13 = vor.u32 %v10232_v12, %v6582_v11  ;;  %v10281_v15 = vld [vmem:[%s16141_s3 + $0x74] sm:$0xf0]  ;;  %v6778_v26 = vor.u32 %v10277_v25, %v6777_v24  ;;  %v10295_v27 = vld [vmem:[%s16141_s3 + $0xe4] sm:$0xf0]  ;;  %v6769_v28 = vld [vmem:[%s16141_s3 + $0x40] sm:$0xf] }
  0x22   :  { %496 = vmatpush.bf16.msrb.mxu1 %v6659_v35  ;;  %v10275_v30 = vld [vmem:[%s16141_s3 + $0x44] sm:$0xf0]  ;;  %v6841_v33 = vld [vmem:[%s16141_s3 + $0xd0] sm:$0xf]  ;;  %v10293_v34 = vld [vmem:[%s16141_s3 + $0xd4] sm:$0xf0] }
  0x23   :  { %366 = vmatmul.bf16.vlgmr.msra.gmra.mxu0 %v11223_v17  ;;  %v6770_v32 = vor.u32 %v10275_v30, %v6769_v28  ;;  %v6842_v35 = vor.u32 %v10293_v34, %v6841_v33  ;;  %v6761_v36 = vld [vmem:[%s16141_s3 + $0x30] sm:$0xf]  ;;  %v10273_v37 = vld [vmem:[%s16141_s3 + $0x34] sm:$0xf0]  ;;  %v6833_v39 = vld [vmem:[%s16141_s3 + $0xc0] sm:$0xf] }
  0x24   :  { %467 = vmatpush.bf16.msrb.mxu3 %v6691_v16  ;;  %434 = vmatmul.bf16.vlgmr.msra.gmra.mxu2 %v11223_v17  ;;  %v6794_v16 = vor.u32 %v10281_v15, %v6793_v14  ;;  %v6762_v38 = vor.u32 %v10273_v37, %v6761_v36  ;;  %v6753_v42 = vld [vmem:[%s16141_s3 + $0x20] sm:$0xf]  ;;  %v10271_v43 = vld [vmem:[%s16141_s3 + $0x24] sm:$0xf0]  ;;  %v10280_v45 = vld [vmem:[%s16141_s3 + $0x74] sm:$0xf] }
  0x25   :  { %v6795_v46 = vld [vmem:[%s16141_s3 + $0x78] sm:$0xf0]  ;;  %v6825_v48 = vld [vmem:[%s16141_s3 + $0xb0] sm:$0xf]  ;;  %v10289_v49 = vld [vmem:[%s16141_s3 + $0xb4] sm:$0xf0] }
  0x26   :  { %497 = vmatpush.bf16.msrb.mxu1 %v6647_v40  ;;  %901 = vmatpush.bf16.msrb.mxu0 %v6794_v16  ;;  %v10291_v40 = vld [vmem:[%s16141_s3 + $0xc4] sm:$0xf0]  ;;  %v6798_v47 = vor.u32 %v10280_v45, %v6795_v46  ;;  %v6826_v50 = vor.u32 %v10289_v49, %v6825_v48  ;;  %v6745_v51 = vld [vmem:[%s16141_s3 + $0x10] sm:$0xf]  ;;  %v6787_v56 = vld [vmem:[%s16141_s3 + $0x68] sm:$0xf0] }
  0x27   :  { %6725 = vmatmul.msk.bf16.vlgmr.msrb.gmra.mxu3 %vm332_vm1, %v11193_v2  ;;  %v10287_v59 = vld [vmem:[%s16141_s3 + $0xa4] sm:$0xf0]  ;;  %v6737_v61 = vld [vmem:[%s16141_s3] sm:$0xf]  ;;  %v10276_v0 = vld [vmem:[%s16141_s3 + $0x54] sm:$0xf] }
  0x28   :  { %532 = vmatpush.bf16.msra.mxu3 %v356_v55  ;;  %v10278_v55 = vld [vmem:[%s16141_s3 + $0x64] sm:$0xf]  ;;  %v6779_v1 = vld [vmem:[%s16141_s3 + $0x58] sm:$0xf0]  ;;  %v6809_v4 = vld [vmem:[%s16141_s3 + $0x90] sm:$0xf] }
  0x29   :  { %6721 = vmatmul.msk.bf16.gmra.mxu1 %vm332_vm1, %v11233_v20  ;;  %v6790_v57 = vor.u32 %v10278_v55, %v6787_v56  ;;  %v6782_v3 = vor.u32 %v10276_v0, %v6779_v1  ;;  %v10274_v7 = vld [vmem:[%s16141_s3 + $0x44] sm:$0xf]  ;;  %v6771_v8 = vld [vmem:[%s16141_s3 + $0x48] sm:$0xf0]  ;;  %v10283_v11 = vld [vmem:[%s16141_s3 + $0x84] sm:$0xf0] }
  0x2a   :  { %498 = vmatpush.bf16.msrb.mxu1 %v6635_v44  ;;  %v6754_v44 = vor.u32 %v10271_v43, %v6753_v42  ;;  %v10272_v14 = vld [vmem:[%s16141_s3 + $0x34] sm:$0xf]  ;;  %v6763_v15 = vld [vmem:[%s16141_s3 + $0x38] sm:$0xf0]  ;;  %v6739_v28 = vld [vmem:[%s16141_s3 + $0x8] sm:$0xf0] }
  0x2b   :  { %v6766_v16 = vor.u32 %v10272_v14, %v6763_v15  ;;  %v6747_v24 = vld [vmem:[%s16141_s3 + $0x18] sm:$0xf0]  ;;  %v10294_v15 = vld [vmem:[%s16141_s3 + $0xe4] sm:$0xf] }
  0x2c   :  { %533 = vmatpush.bf16.msra.mxu3 %v6719_v62  ;;  %v10267_v62 = vld [vmem:[%s16141_s3 + $0x4] sm:$0xf0] }
  0x2d   :  { %v6738_v63 = vor.u32 %v10267_v62, %v6737_v61 }
  0x2e   :  { %499 = vmatpush.bf16.msrb.mxu1 %v6623_v53  ;;  %v10269_v53 = vld [vmem:[%s16141_s3 + $0x14] sm:$0xf0] }
  0x30   :  { %534 = vmatpush.bf16.msra.mxu3 %v6707_v6 }
  0x32   :  { %500 = vmatpush.bf16.msrb.mxu1 %v6611_v58  ;;  %v6817_v58 = vld [vmem:[%s16141_s3 + $0xa0] sm:$0xf] }
  0x33   :  { %371 = vmatmul.bf16.gmra.mxu0 %v11245_v23  ;;  %v6818_v60 = vor.u32 %v10287_v59, %v6817_v58 }
  0x34   :  { %439 = vmatmul.bf16.gmra.mxu2 %v11245_v23  ;;  %535 = vmatpush.bf16.msra.mxu3 %v6695_v10  ;;  %v6801_v10 = vld [vmem:[%s16141_s3 + $0x80] sm:$0xf] }
  0x35   :  { %v6802_v12 = vor.u32 %v10283_v11, %v6801_v10 }
  0x36   :  { %501 = vmatpush.bf16.msrb.mxu1 %v6599_v5  ;;  %v10285_v5 = vld [vmem:[%s16141_s3 + $0x94] sm:$0xf0] }
  0x37   :  { %6726 = vmatmul.msk.bf16.gmra.mxu3 %vm332_vm1, %v11233_v20  ;;  %v6810_v6 = vor.u32 %v10285_v5, %v6809_v4 }
  0x38   :  { %1003 = vmatpush.bf16.msrb.mxu3 %v6798_v47 }
  0x39   :  { %6722 = vmatmul.msk.bf16.gmra.mxu1 %vm332_vm1, %v11267_v31 }
  0x3c   :  { %1004 = vmatpush.bf16.msrb.mxu3 %v6790_v57 }
  0x40   :  { %1005 = vmatpush.bf16.msrb.mxu3 %v6782_v3 }
  0x43   :  { %376 = vmatmul.bf16.gmra.mxu0 %v11291_v41 }
  0x44   :  { %444 = vmatmul.bf16.gmra.mxu2 %v11291_v41 }
  0x47   :  { %6727 = vmatmul.msk.bf16.gmra.mxu3 %vm332_vm1, %v11267_v31 }
  0x49   :  { %6723 = vmatmul.msk.bf16.gmra.mxu1 %vm332_vm1, %v11316_v52 }
  0x53   :  { %381 = vmatmul.bf16.gmra.mxu0 %v11359_v9 }
  0x54   :  { %449 = vmatmul.bf16.gmra.mxu2 %v11359_v9 }
  0x57   :  { %6728 = vmatmul.msk.bf16.gmra.mxu3 %vm332_vm1, %v11316_v52 }
  0x59   :  { %502 = vmatmul.bf16.vlgmr.msrb.gmra.mxu1 %v11223_v17  ;;  %v6785_v17 = vld [vmem:[%s16141_s3 + $0x60] sm:$0xf] }
  0x5a   :  { %v6786_v19 = vor.u32 %v10279_v18, %v6785_v17  ;;  %v10270_v18 = vld [vmem:[%s16141_s3 + $0x24] sm:$0xf] }
  0x5c   :  { %902 = vmatpush.bf16.msrb.mxu0 %v6786_v19  ;;  %v6755_v19 = vld [vmem:[%s16141_s3 + $0x28] sm:$0xf0] }
  0x60   :  { %903 = vmatpush.bf16.msrb.mxu0 %v6778_v26 }
  0x63   :  { %386 = vmatmul.bf16.gmra.mxu0 %v11372_v13 }
  0x64   :  { %454 = vmatmul.bf16.gmra.mxu2 %v11372_v13  ;;  %904 = vmatpush.bf16.msrb.mxu0 %v6770_v32 }
  0x67   :  { %6729 = vmatmul.msk.bf16.gmra.mxu3 %vm332_vm1, %v11167_v54 }
  0x68   :  { %905 = vmatpush.bf16.msrb.mxu0 %v6762_v38 }
  0x69   :  { %507 = vmatmul.bf16.gmra.mxu1 %v11245_v23  ;;  %v6858_v23 = vor.u32 %v10297_v22, %v6857_v21  ;;  %v6758_v22 = vor.u32 %v10270_v18, %v6755_v19 }
  0x6b   :  { %935 = vmatpush.bf16.msrb.mxu2 %v6858_v23  ;;  %v11525_v23 = vld [vmem:[%s16142_s2] sm:$0x7] }
  0x6c   :  { %906 = vmatpush.bf16.msrb.mxu0 %v6754_v44  ;;  %v11534_v26 = vperm.slane %v11525_v23, 0  ;;  %v11548_v37 = vperm.slane %v11525_v23, 1 }
  0x77   :  { %6730 = vmatmul.msk.bf16.vlgmr.msra.gmra.mxu3 %vm332_vm1, %v11193_v2  ;;  %v6849_v2 = vld [vmem:[%s16141_s3 + $0xe0] sm:$0xf] }
  0x78   :  { %v6850_v29 = vor.u32 %v10295_v27, %v6849_v2  ;;  %v10266_v27 = vld [vmem:[%s16141_s3 + $0x4] sm:$0xf] }
  0x79   :  { %512 = vmatmul.bf16.gmra.mxu1 %v11291_v41  ;;  %v6834_v41 = vor.u32 %v10291_v40, %v6833_v39  ;;  %v6742_v30 = vor.u32 %v10266_v27, %v6739_v28 }
  0x7a   :  { %936 = vmatpush.bf16.msrb.mxu2 %v6850_v29 }
  0x7e   :  { %937 = vmatpush.bf16.msrb.mxu2 %v6842_v35 }
  0x82   :  { %938 = vmatpush.bf16.msrb.mxu2 %v6834_v41 }
  0x86   :  { %939 = vmatpush.bf16.msrb.mxu2 %v6826_v50 }
  0x87   :  { %6731 = vmatmul.msk.bf16.gmra.mxu3 %vm332_vm1, %v11233_v20  ;;  %v6746_v20 = vor.u32 %v10269_v53, %v6745_v51 }
  0x89   :  { %517 = vmatmul.bf16.gmra.mxu1 %v11359_v9  ;;  %907 = vmatpush.bf16.msrb.mxu0 %v6746_v20  ;;  %v6774_v9 = vor.u32 %v10274_v7, %v6771_v8  ;;  %v6859_v7 = vld [vmem:[%s16141_s3 + $0xf8] sm:$0xf0] }
  0x8a   :  { %940 = vmatpush.bf16.msrb.mxu2 %v6818_v60 }
  0x8b   :  { %1006 = vmatpush.bf16.msrb.mxu3 %v6774_v9 }
  0x8d   :  { %908 = vmatpush.bf16.msrb.mxu0 %v6738_v63 }
  0x8e   :  { %941 = vmatpush.bf16.msrb.mxu2 %v6810_v6  ;;  %v10296_v6 = vld [vmem:[%s16141_s3 + $0xf4] sm:$0xf] }
  0x8f   :  { %1007 = vmatpush.bf16.msrb.mxu3 %v6766_v16  ;;  %v6862_v9 = vor.u32 %v10296_v6, %v6859_v7  ;;  %v6851_v16 = vld [vmem:[%s16141_s3 + $0xe8] sm:$0xf0] }
  0x90   :  { %v6854_v19 = vor.u32 %v10294_v15, %v6851_v16  ;;  %v6819_v15 = vld [vmem:[%s16141_s3 + $0xa8] sm:$0xf0] }
  0x91   :  { %1037 = vmatpush.bf16.msra.mxu0 %v6862_v9  ;;  %v10307_v9 = vld [vmem:[%s16141_s3 + $0x144] sm:$0xf0] }
  0x92   :  { %942 = vmatpush.bf16.msrb.mxu2 %v6802_v12 }
  0x93   :  { %1008 = vmatpush.bf16.msrb.mxu3 %v6758_v22 }
  0x95   :  { %1038 = vmatpush.bf16.msra.mxu0 %v6854_v19 }
  0x96   :  { %v401_v17 = vpop.f32.mrf.mxu1 }
  0x97   :  { %6732 = vmatmul.msk.bf16.gmra.mxu3 %vm332_vm1, %v11267_v31  ;;  %v10268_v31 = vld [vmem:[%s16141_s3 + $0x14] sm:$0xf] }
  0x98   :  { %v6750_v25 = vor.u32 %v10268_v31, %v6747_v24 }
  0x99   :  { %522 = vmatmul.bf16.gmra.mxu1 %v11372_v13 }
  0x9a   :  { %v11519_v21 = vpop.f32.mrf.mxu3  ;;  %1009 = vmatpush.bf16.msrb.mxu3 %v6750_v25  ;;  %v6921_v25 = vld [vmem:[%s16141_s3 + $0x170] sm:$0xf] }
  0x9e   :  { %v403_v13 = vpop.f32.mrf.mxu1  ;;  %1010 = vmatpush.bf16.msrb.mxu3 %v6742_v30  ;;  %v6923_v30 = vld [vmem:[%s16141_s3 + $0x178] sm:$0xf0] }
  0xa0   :  { %v367_v2 = vpop.f32.mrf.mxu0 }
  0xa1   :  { %v368_v32 = vadd.f32 %v367_v2, %v11534_v26  ;;  %v10312_v2 = vld [vmem:[%s16141_s3 + $0x174] sm:$0xf] }
  0xa2   :  { %v11542_v29 = vpop.f32.mrf.mxu3 }
  0xa3   :  { %v402_v33 = vadd.f32 %v401_v17, %v368_v32  ;;  %v10292_v32 = vld [vmem:[%s16141_s3 + $0xd4] sm:$0xf] }
  0xa5   :  { %v562_v40 = vmax.f32 %v402_v33, 0.0  ;;  %v6843_v33 = vld [vmem:[%s16141_s3 + $0xd8] sm:$0xf0] }
  0xa6   :  { %v406_v35 = vpop.f32.mrf.mxu1 }
  0xa7   :  { %v435_v34 = vpop.f32.mrf.mxu2  ;;  %6733 = vmatmul.msk.bf16.gmra.mxu3 %vm332_vm1, %v11316_v52 }
  0xa8   :  { %v369_v36 = vpop.f32.mrf.mxu0  ;;  %v436_v42 = vadd.f32 %v435_v34, %v11548_v37 }
  0xa9   :  { %v370_v38 = vadd.f32 %v369_v36, %v11534_v26  ;;  %v6846_v36 = vor.u32 %v10292_v32, %v6843_v33  ;;  %v10284_v33 = vld [vmem:[%s16141_s3 + $0x94] sm:$0xf] }
  0xaa   :  { %v469_v39 = vpop.f32.mrf.mxu3 }
  0xab   :  { %v404_v41 = vadd.f32 %v403_v13, %v370_v38  ;;  %v470_v52 = vadd.f32 %v469_v39, %v436_v42  ;;  %v10313_v13 = vld [vmem:[%s16141_s3 + $0x174] sm:$0xf0]  ;;  %1039 = vmatpush.bf16.msra.mxu0 %v6846_v36  ;;  %v10311_v42 = vld [vmem:[%s16141_s3 + $0x164] sm:$0xf0] }
  0xac   :  { %v6922_v28 = vor.u32 %v10313_v13, %v6921_v25  ;;  %v6889_v13 = vld [vmem:[%s16141_s3 + $0x130] sm:$0xf] }
  0xad   :  { %v565_v43 = vmax.f32 %v404_v41, 0.0  ;;  %v563_v53 = vmax.f32 %v470_v52, 0.0  ;;  %v6913_v41 = vld [vmem:[%s16141_s3 + $0x160] sm:$0xf] }
  0xae   :  { %v408_v48 = vpop.f32.mrf.mxu1  ;;  %969 = vmatpush.bf16.msra.mxu1 %v6922_v28 }
  0xaf   :  { %v437_v44 = vpop.f32.mrf.mxu2  ;;  %v592_v45 = vpack.c.bf16 %v565_v43, %v562_v40  ;;  %v10310_v43 = vld [vmem:[%s16141_s3 + $0x164] sm:$0xf] }
  0xb0   :  { %v438_v46 = vadd.f32 %v437_v44, %v11548_v37  ;;  %v372_v47 = vpop.f32.mrf.mxu0  ;;  %v6914_v44 = vor.u32 %v10311_v42, %v6913_v41  ;;  %v6881_v42 = vld [vmem:[%s16141_s3 + $0x120] sm:$0xf] }
  0xb1   :  { %909 = vmatmul.bf16.vlgmr.msrb.gmra.mxu0 %v592_v45  ;;  %v373_v50 = vadd.f32 %v372_v47, %v11534_v26  ;;  %v6835_v47 = vld [vmem:[%s16141_s3 + $0xc8] sm:$0xf0] }
  0xb2   :  { %v471_v49 = vpop.f32.mrf.mxu3  ;;  %970 = vmatpush.bf16.msra.mxu1 %v6914_v44  ;;  %v10302_v44 = vld [vmem:[%s16141_s3 + $0x124] sm:$0xf] }
  0xb3   :  { %v472_v51 = vadd.f32 %v471_v49, %v438_v46  ;;  %v407_v55 = vadd.f32 %v406_v35, %v373_v50  ;;  %v6926_v35 = vor.u32 %v10312_v2, %v6923_v30  ;;  %v10290_v46 = vld [vmem:[%s16141_s3 + $0xc4] sm:$0xf]  ;;  %v10305_v2 = vld [vmem:[%s16141_s3 + $0x134] sm:$0xf0] }
  0xb4   :  { %v6838_v50 = vor.u32 %v10290_v46, %v6835_v47  ;;  %v6890_v32 = vor.u32 %v10305_v2, %v6889_v13  ;;  %v6883_v46 = vld [vmem:[%s16141_s3 + $0x128] sm:$0xf0]  ;;  %v10282_v47 = vld [vmem:[%s16141_s3 + $0x84] sm:$0xf] }
  0xb5   :  { %v566_v20 = vmax.f32 %v472_v51, 0.0  ;;  %v568_v62 = vmax.f32 %v407_v55, 0.0  ;;  %1071 = vmatpush.bf16.msra.mxu2 %v6926_v35  ;;  %v6905_v55 = vld [vmem:[%s16141_s3 + $0x150] sm:$0xf] }
  0xb6   :  { %v411_v61 = vpop.f32.mrf.mxu1  ;;  %1040 = vmatpush.bf16.msra.mxu0 %v6838_v50  ;;  %v6886_v50 = vor.u32 %v10302_v44, %v6883_v46 }
  0xb7   :  { %v440_v56 = vpop.f32.mrf.mxu2  ;;  %6734 = vmatmul.msk.bf16.gmra.mxu3 %vm332_vm1, %v11167_v54  ;;  %v11556_v57 = vpack.c.bf16 %v566_v20, %v563_v53 }
  0xb8   :  { %v374_v58 = vpop.f32.mrf.mxu0  ;;  %v441_v0 = vadd.f32 %v440_v56, %v11548_v37  ;;  %v10309_v56 = vld [vmem:[%s16141_s3 + $0x154] sm:$0xf0] }
  0xb9   :  { %v375_v59 = vadd.f32 %v374_v58, %v11534_v26  ;;  %943 = vmatmul.bf16.vlgmr.msrb.gmra.mxu2 %v11556_v57  ;;  %v10308_v58 = vld [vmem:[%s16141_s3 + $0x154] sm:$0xf] }
  0xba   :  { %v474_v60 = vpop.f32.mrf.mxu3 }
  0xbb   :  { %v409_v63 = vadd.f32 %v408_v48, %v375_v59  ;;  %v475_v8 = vadd.f32 %v474_v60, %v441_v0 }
  0xbd   :  { %v571_v1 = vmax.f32 %v409_v63, 0.0  ;;  %v569_v17 = vmax.f32 %v475_v8, 0.0  ;;  %v10288_v63 = vld [vmem:[%s16141_s3 + $0xb4] sm:$0xf]  ;;  %v6897_v8 = vld [vmem:[%s16141_s3 + $0x140] sm:$0xf] }
  0xbe   :  { %v413_v14 = vpop.f32.mrf.mxu1 }
  0xbf   :  { %v442_v3 = vpop.f32.mrf.mxu2  ;;  %v11561_v4 = vpack.c.bf16 %v571_v1, %v568_v62  ;;  %v6907_v62 = vld [vmem:[%s16141_s3 + $0x158] sm:$0xf0] }
  0xc0   :  { %v443_v5 = vadd.f32 %v442_v3, %v11548_v37  ;;  %v377_v54 = vpop.f32.mrf.mxu0  ;;  %v6910_v1 = vor.u32 %v10308_v58, %v6907_v62  ;;  %v6827_v3 = vld [vmem:[%s16141_s3 + $0xb8] sm:$0xf0]  ;;  %v10301_v58 = vld [vmem:[%s16141_s3 + $0x114] sm:$0xf0] }
  0xc1   :  { %914 = vmatmul.bf16.gmra.mxu0 %v11561_v4  ;;  %v378_v10 = vadd.f32 %v377_v54, %v11534_v26  ;;  %v6830_v6 = vor.u32 %v10288_v63, %v6827_v3  ;;  %v6875_v63 = vld [vmem:[%s16141_s3 + $0x118] sm:$0xf0] }
  0xc2   :  { %v476_v11 = vpop.f32.mrf.mxu3 }
  0xc3   :  { %v477_v12 = vadd.f32 %v476_v11, %v443_v5  ;;  %v412_v22 = vadd.f32 %v411_v61, %v378_v10  ;;  %v6906_v61 = vor.u32 %v10309_v56, %v6905_v55  ;;  %v10306_v10 = vld [vmem:[%s16141_s3 + $0x144] sm:$0xf]  ;;  %1041 = vmatpush.bf16.msra.mxu0 %v6830_v6  ;;  %v6898_v11 = vor.u32 %v10307_v9, %v6897_v8  ;;  %v6873_v56 = vld [vmem:[%s16141_s3 + $0x110] sm:$0xf]  ;;  %v10299_v6 = vld [vmem:[%s16141_s3 + $0x104] sm:$0xf0] }
  0xc4   :  { %v6874_v62 = vor.u32 %v10301_v58, %v6873_v56 }
  0xc5   :  { %v572_v18 = vmax.f32 %v477_v12, 0.0  ;;  %v574_v38 = vmax.f32 %v412_v22, 0.0  ;;  %971 = vmatpush.bf16.msra.mxu1 %v6906_v61  ;;  %v6899_v12 = vld [vmem:[%s16141_s3 + $0x148] sm:$0xf0] }
  0xc6   :  { %v416_v51 = vpop.f32.mrf.mxu1 }
  0xc7   :  { %v445_v31 = vpop.f32.mrf.mxu2  ;;  %1011 = vmatmul.bf16.vlgmr.msrb.gmra.mxu3 %v592_v45  ;;  %v11578_v24 = vpack.c.bf16 %v572_v18, %v569_v17  ;;  %v6915_v45 = vld [vmem:[%s16141_s3 + $0x168] sm:$0xf0]  ;;  %v6902_v18 = vor.u32 %v10306_v10, %v6899_v12 }
  0xc8   :  { %v379_v27 = vpop.f32.mrf.mxu0  ;;  %v446_v48 = vadd.f32 %v445_v31, %v11548_v37  ;;  %v6918_v49 = vor.u32 %v10310_v43, %v6915_v45  ;;  %v10303_v43 = vld [vmem:[%s16141_s3 + $0x124] sm:$0xf0]  ;;  %v6867_v10 = vld [vmem:[%s16141_s3 + $0x108] sm:$0xf0] }
  0xc9   :  { %v380_v34 = vadd.f32 %v379_v27, %v11534_v26  ;;  %948 = vmatmul.bf16.gmra.mxu2 %v11578_v24  ;;  %972 = vmatpush.bf16.msra.mxu1 %v6898_v11  ;;  %v10304_v27 = vld [vmem:[%s16141_s3 + $0x134] sm:$0xf]  ;;  %v6882_v45 = vor.u32 %v10303_v43, %v6881_v42 }
  0xca   :  { %v479_v39 = vpop.f32.mrf.mxu3  ;;  %1072 = vmatpush.bf16.msra.mxu2 %v6918_v49 }
  0xcb   :  { %v414_v40 = vadd.f32 %v413_v14, %v380_v34  ;;  %v480_v0 = vadd.f32 %v479_v39, %v446_v48  ;;  %v10286_v14 = vld [vmem:[%s16141_s3 + $0xa4] sm:$0xf]  ;;  %v6811_v34 = vld [vmem:[%s16141_s3 + $0x98] sm:$0xf0]  ;;  %v6803_v48 = vld [vmem:[%s16141_s3 + $0x88] sm:$0xf0] }
  0xcc   :  { %v6822_v19 = vor.u32 %v10286_v14, %v6819_v15 }
  0xcd   :  { %v577_v52 = vmax.f32 %v414_v40, 0.0  ;;  %v575_v16 = vmax.f32 %v480_v0, 0.0  ;;  %973 = vmatpush.bf16.msra.mxu1 %v6890_v32 }
  0xce   :  { %1073 = vmatpush.bf16.msra.mxu2 %v6910_v1  ;;  %v418_v30 = vpop.f32.mrf.mxu1  ;;  %1042 = vmatpush.bf16.msra.mxu0 %v6822_v19 }
  0xcf   :  { %v447_v53 = vpop.f32.mrf.mxu2  ;;  %v11619_v20 = vpack.c.bf16 %v577_v52, %v574_v38  ;;  %v6814_v38 = vor.u32 %v10284_v33, %v6811_v34 }
  0xd0   :  { %v448_v59 = vadd.f32 %v447_v53, %v11548_v37  ;;  %v382_v60 = vpop.f32.mrf.mxu0 }
  0xd1   :  { %919 = vmatmul.bf16.gmra.mxu0 %v11619_v20  ;;  %v383_v5 = vadd.f32 %v382_v60, %v11534_v26  ;;  %974 = vmatpush.bf16.msra.mxu1 %v6882_v45 }
  0xd2   :  { %v481_v54 = vpop.f32.mrf.mxu3  ;;  %1074 = vmatpush.bf16.msra.mxu2 %v6902_v18  ;;  %1043 = vmatpush.bf16.msra.mxu0 %v6814_v38 }
  0xd3   :  { %v482_v7 = vadd.f32 %v481_v54, %v448_v59  ;;  %v417_v22 = vadd.f32 %v416_v51, %v383_v5  ;;  %v6806_v51 = vor.u32 %v10282_v47, %v6803_v48  ;;  %v10300_v59 = vld [vmem:[%s16141_s3 + $0x114] sm:$0xf]  ;;  %v6865_v54 = vld [vmem:[%s16141_s3 + $0x100] sm:$0xf] }
  0xd4   :  { %v6878_v1 = vor.u32 %v10300_v59, %v6875_v63  ;;  %v6866_v9 = vor.u32 %v10299_v6, %v6865_v54 }
  0xd5   :  { %v578_v17 = vmax.f32 %v482_v7, 0.0  ;;  %v580_v39 = vmax.f32 %v417_v22, 0.0  ;;  %975 = vmatpush.bf16.msra.mxu1 %v6874_v62  ;;  %v10298_v7 = vld [vmem:[%s16141_s3 + $0x104] sm:$0xf] }
  0xd6   :  { %1044 = vmatpush.bf16.msra.mxu0 %v6806_v51  ;;  %v503_v8 = vpop.f32.mrf.mxu1  ;;  %v6870_v15 = vor.u32 %v10298_v7, %v6867_v10 }
  0xd7   :  { %v450_v31 = vpop.f32.mrf.mxu2  ;;  %1016 = vmatmul.bf16.gmra.mxu3 %v11561_v4  ;;  %v11661_v25 = vpack.c.bf16 %v578_v17, %v575_v16  ;;  %v6891_v4 = vld [vmem:[%s16141_s3 + $0x138] sm:$0xf0] }
  0xd8   :  { %v384_v28 = vpop.f32.mrf.mxu0  ;;  %v6894_v36 = vor.u32 %v10304_v27, %v6891_v4  ;;  %v451_v52 = vadd.f32 %v450_v31, %v11548_v37 }
  0xd9   :  { %v385_v35 = vadd.f32 %v384_v28, %v11534_v26  ;;  %953 = vmatmul.bf16.gmra.mxu2 %v11661_v25  ;;  %976 = vmatpush.bf16.msra.mxu1 %v6866_v9 }
  0xda   :  { %v484_v40 = vpop.f32.mrf.mxu3  ;;  %1075 = vmatpush.bf16.msra.mxu2 %v6894_v36 }
  0xdb   :  { %v419_v41 = vadd.f32 %v418_v30, %v385_v35  ;;  %v485_v0 = vadd.f32 %v484_v40, %v451_v52 }
  0xdd   :  { %v583_v49 = vmax.f32 %v419_v41, 0.0  ;;  %v581_v11 = vmax.f32 %v485_v0, 0.0 }
  0xde   :  { %1076 = vmatpush.bf16.msra.mxu2 %v6886_v50  ;;  %v505_v30 = vpop.f32.mrf.mxu1 }
  0xdf   :  { %v452_v53 = vpop.f32.mrf.mxu2  ;;  %v601_v55 = vpack.c.bf16 %v583_v49, %v580_v39 }
  0xe0   :  { %v453_v60 = vadd.f32 %v452_v53, %v11548_v37  ;;  %v387_v61 = vpop.f32.mrf.mxu0 }
  0xe1   :  { %924 = vmatmul.bf16.gmra.mxu0 %v601_v55  ;;  %v388_v12 = vadd.f32 %v387_v61, %v11534_v26 }
  0xe2   :  { %v486_v3 = vpop.f32.mrf.mxu3  ;;  %1077 = vmatpush.bf16.msra.mxu2 %v6878_v1 }
  0xe3   :  { %v487_v5 = vadd.f32 %v486_v3, %v453_v60  ;;  %v422_v19 = vadd.f32 %v11519_v21, %v388_v12 }
  0xe5   :  { %v584_v14 = vmax.f32 %v487_v5, 0.0  ;;  %v586_v2 = vmax.f32 %v422_v19, 0.0 }
  0xe6   :  { %1078 = vmatpush.bf16.msra.mxu2 %v6870_v15  ;;  %v508_v36 = vpop.f32.mrf.mxu1  ;;  %v11758_v15 = vld [vmem:[%s16143_s4] sm:$0x3] }
  0xe7   :  { %v455_v16 = vpop.f32.mrf.mxu2  ;;  %1021 = vmatmul.bf16.gmra.mxu3 %v11619_v20  ;;  %v11729_v17 = vpack.c.bf16 %v584_v14, %v581_v11  ;;  %v11763_v19 = vperm.slane %v11758_v15, 0 }
  0xe8   :  { %v389_v18 = vpop.f32.mrf.mxu0  ;;  %v456_v27 = vadd.f32 %v455_v16, %v11548_v37 }
  0xe9   :  { %v390_v22 = vadd.f32 %v389_v18, %v11534_v26  ;;  %958 = vmatmul.bf16.gmra.mxu2 %v11729_v17 }
  0xea   :  { %v489_v31 = vpop.f32.mrf.mxu3 }
  0xeb   :  { %v424_v13 = vadd.f32 %v11542_v29, %v390_v22  ;;  %v490_v33 = vadd.f32 %v489_v31, %v456_v27  ;;  %v11740_v29 = vperm.slane %v11525_v23, 2 }
  0xed   :  { %v589_v28 = vmax.f32 %v424_v13, 0.0  ;;  %v587_v35 = vmax.f32 %v490_v33, 0.0  ;;  %v504_v40 = vadd.f32 %v503_v8, %v11740_v29  ;;  %v509_v52 = vadd.f32 %v508_v36, %v11740_v29 }
  0xee   :  { %v510_v41 = vpop.f32.mrf.mxu1 }
  0xef   :  { %v457_v32 = vpop.f32.mrf.mxu2  ;;  %v604_v20 = vpack.c.bf16 %v589_v28, %v586_v2  ;;  %v511_v50 = vadd.f32 %v510_v41, %v11740_v29 }
  0xf0   :  { %v458_v4 = vadd.f32 %v457_v32, %v11548_v37  ;;  %v506_v37 = vadd.f32 %v505_v30, %v11740_v29 }
  0xf1   :  { %929 = vmatmul.bf16.gmra.mxu0 %v604_v20 }
  0xf2   :  { %v491_v34 = vpop.f32.mrf.mxu3 }
  0xf3   :  { %v492_v21 = vadd.f32 %v491_v34, %v458_v4  ;;  %v7105_v34 = vld [vmem:[%s16144_s5 + $0x2e0] sm:$0xf] }
  0xf5   :  { %v590_v26 = vmax.f32 %v492_v21, 0.0  ;;  %v10408_v21 = vld [vmem:[%s16144_s5 + $0x2ec] sm:$0xf0] }
  0xf6   :  { %v513_v48 = vpop.f32.mrf.mxu1  ;;  %v7106_v36 = vor.u32 %v10408_v21, %v7105_v34  ;;  %v10424_v21 = vld [vmem:[%s16144_s5 + $0x36c] sm:$0xf0] }
  0xf7   :  { %1026 = vmatmul.bf16.gmra.mxu3 %v601_v55  ;;  %v11737_v38 = vpack.c.bf16 %v590_v26, %v587_v35  ;;  %v514_v60 = vadd.f32 %v513_v48, %v11740_v29  ;;  %v7233_v35 = vld [vmem:[%s16144_s5 + $0x3e0] sm:$0xf] }
  0xf8   :  { %1591 = vmatpush.bf16.msrb.mxu1 %v7106_v36  ;;  %v7217_v48 = vld [vmem:[%s16144_s5 + $0x3c0] sm:$0xf] }
  0xf9   :  { %963 = vmatmul.bf16.gmra.mxu2 %v11737_v38 }
  0xfa   :  { %v537_v39 = vpop.f32.mrf.mxu3 }
  0xfb   :  { %v538_v42 = vadd.f32 %v537_v39, %v504_v40  ;;  %v7107_v39 = vld [vmem:[%s16144_s5 + $0x2f0] sm:$0xf0] }
  0xfd   :  { %v564_v45 = vmax.f32 %v538_v42, 0.0  ;;  %v10438_v42 = vld [vmem:[%s16144_s5 + $0x3e4] sm:$0xf] }
  0xfe   :  { %v515_v55 = vpop.f32.mrf.mxu1 }
  0xff   :  { %v516_v63 = vadd.f32 %v515_v55, %v11740_v29 }
 0x101   :  { %1045 = vmatmul.bf16.vlgmr.msra.gmra.mxu0 %v11556_v57 }
 0x102   :  { %v539_v43 = vpop.f32.mrf.mxu3 }
 0x103   :  { %v540_v44 = vadd.f32 %v539_v43, %v506_v37  ;;  %v7235_v43 = vld [vmem:[%s16144_s5 + $0x3f0] sm:$0xf0] }
 0x105   :  { %v567_v46 = vmax.f32 %v540_v44, 0.0 }
 0x106   :  { %v518_v61 = vpop.f32.mrf.mxu1 }
 0x107   :  { %v594_v47 = vpack.c.bf16 %v567_v46, %v564_v45  ;;  %1031 = vmatmul.bf16.gmra.mxu3 %v604_v20  ;;  %v519_v7 = vadd.f32 %v518_v61, %v11740_v29  ;;  %v7238_v45 = vor.u32 %v10438_v42, %v7235_v43  ;;  %v10400_v61 = vld [vmem:[%s16144_s5 + $0x2ac] sm:$0xf0]  ;;  %v7025_v43 = vld [vmem:[%s16144_s5 + $0x240] sm:$0xf] }
 0x109   :  { %977 = vmatmul.bf16.vlgmr.msra.gmra.mxu1 %v594_v47  ;;  %1079 = vmatmul.bf16.vlgmr.msra.gmra.mxu2 %v594_v47  ;;  %v7089_v47 = vld [vmem:[%s16144_s5 + $0x2c0] sm:$0xf] }
 0x10a   :  { %v542_v23 = vpop.f32.mrf.mxu3  ;;  %1630 = vmatpush.bf16.msrb.mxu2 %v7238_v45  ;;  %v7153_v45 = vld [vmem:[%s16144_s5 + $0x340] sm:$0xf] }
 0x10b   :  { %v543_v49 = vadd.f32 %v542_v23, %v509_v52  ;;  %v10404_v23 = vld [vmem:[%s16144_s5 + $0x2cc] sm:$0xf0] }
 0x10d   :  { %v570_v53 = vmax.f32 %v543_v49, 0.0  ;;  %v7090_v49 = vor.u32 %v10404_v23, %v7089_v47  ;;  %v10420_v23 = vld [vmem:[%s16144_s5 + $0x34c] sm:$0xf0] }
 0x10e   :  { %v520_v54 = vpop.f32.mrf.mxu1 }
 0x10f   :  { %v521_v10 = vadd.f32 %v520_v54, %v11740_v29  ;;  %1592 = vmatpush.bf16.msrb.mxu1 %v7090_v49  ;;  %v7154_v49 = vor.u32 %v10420_v23, %v7153_v45  ;;  %v10437_v45 = vld [vmem:[%s16144_s5 + $0x3d4] sm:$0xf0] }
 0x111   :  { %1050 = vmatmul.bf16.gmra.mxu0 %v11578_v24 }
 0x112   :  { %v544_v51 = vpop.f32.mrf.mxu3 }
 0x113   :  { %v545_v57 = vadd.f32 %v544_v51, %v511_v50  ;;  %v10436_v50 = vld [vmem:[%s16144_s5 + $0x3cc] sm:$0xf0]  ;;  %v10402_v51 = vld [vmem:[%s16144_s5 + $0x2c4] sm:$0xf] }
 0x115   :  { %v573_v56 = vmax.f32 %v545_v57, 0.0  ;;  %v7218_v57 = vor.u32 %v10436_v50, %v7217_v48  ;;  %v10386_v48 = vld [vmem:[%s16144_s5 + $0x244] sm:$0xf] }
 0x116   :  { %v523_v12 = vpop.f32.mrf.mxu1 }
 0x117   :  { %v597_v58 = vpack.c.bf16 %v573_v56, %v570_v53  ;;  %v524_v31 = vadd.f32 %v523_v12, %v11740_v29  ;;  %v7091_v53 = vld [vmem:[%s16144_s5 + $0x2d0] sm:$0xf0]  ;;  %v10434_v56 = vld [vmem:[%s16144_s5 + $0x3c4] sm:$0xf]  ;;  %v7057_v12 = vld [vmem:[%s16144_s5 + $0x280] sm:$0xf] }
 0x118   :  { %v7094_v55 = vor.u32 %v10402_v51, %v7091_v53  ;;  %v10418_v51 = vld [vmem:[%s16144_s5 + $0x344] sm:$0xf]  ;;  %v7155_v53 = vld [vmem:[%s16144_s5 + $0x350] sm:$0xf0] }
 0x119   :  { %982 = vmatmul.bf16.gmra.mxu1 %v597_v58  ;;  %1084 = vmatmul.bf16.gmra.mxu2 %v597_v58  ;;  %v7219_v58 = vld [vmem:[%s16144_s5 + $0x3d0] sm:$0xf0] }
 0x11a   :  { %v547_v59 = vpop.f32.mrf.mxu3 }
 0x11b   :  { %v548_v62 = vadd.f32 %v547_v59, %v514_v60  ;;  %v7222_v59 = vor.u32 %v10434_v56, %v7219_v58  ;;  %v7073_v60 = vld [vmem:[%s16144_s5 + $0x2a0] sm:$0xf]  ;;  %v10384_v56 = vld [vmem:[%s16144_s5 + $0x22c] sm:$0xf0] }
 0x11c   :  { %v7137_v58 = vld [vmem:[%s16144_s5 + $0x320] sm:$0xf] }
 0x11d   :  { %v576_v1 = vmax.f32 %v548_v62, 0.0  ;;  %v7201_v62 = vld [vmem:[%s16144_s5 + $0x3a0] sm:$0xf]  ;;  %1631 = vmatpush.bf16.msrb.mxu2 %v7222_v59 }
 0x11e   :  { %v525_v27 = vpop.f32.mrf.mxu1 }
 0x11f   :  { %v526_v20 = vadd.f32 %v525_v27, %v11740_v29  ;;  %v10440_v29 = vld [vmem:[%s16144_s5 + $0x3ec] sm:$0xf0]  ;;  %v10426_v27 = vld [vmem:[%s16144_s5 + $0x384] sm:$0xf] }
 0x120   :  { %v7234_v41 = vor.u32 %v10440_v29, %v7233_v35  ;;  %v10390_v35 = vld [vmem:[%s16144_s5 + $0x264] sm:$0xf] }
 0x121   :  { %1055 = vmatmul.bf16.gmra.mxu0 %v11661_v25 }
 0x122   :  { %v549_v0 = vpop.f32.mrf.mxu3  ;;  %1604 = vmatpush.bf16.msra.mxu3 %v7234_v41  ;;  %v7171_v41 = vld [vmem:[%s16144_s5 + $0x370] sm:$0xf0] }
 0x123   :  { %v550_v24 = vadd.f32 %v549_v0, %v516_v63  ;;  %v7074_v0 = vor.u32 %v10400_v61, %v7073_v60  ;;  %v10416_v61 = vld [vmem:[%s16144_s5 + $0x32c] sm:$0xf0] }
 0x125   :  { %v579_v3 = vmax.f32 %v550_v24, 0.0  ;;  %v10398_v24 = vld [vmem:[%s16144_s5 + $0x2a4] sm:$0xf]  ;;  %1593 = vmatpush.bf16.msrb.mxu1 %v7074_v0 }
 0x126   :  { %1605 = vmatpush.bf16.msra.mxu3 %v7218_v57  ;;  %v7158_v57 = vor.u32 %v10418_v51, %v7155_v53 }
 0x127   :  { %v600_v5 = vpack.c.bf16 %v579_v3, %v576_v1  ;;  %v10432_v1 = vld [vmem:[%s16144_s5 + $0x3ac] sm:$0xf0]  ;;  %v7075_v3 = vld [vmem:[%s16144_s5 + $0x2b0] sm:$0xf0] }
 0x128   :  { %v7202_v54 = vor.u32 %v10432_v1, %v7201_v62  ;;  %v10382_v62 = vld [vmem:[%s16144_s5 + $0x224] sm:$0xf]  ;;  %v7138_v1 = vor.u32 %v10416_v61, %v7137_v58  ;;  %v7083_v61 = vld [vmem:[%s16144_s5 + $0x2b8] sm:$0xf0] }
 0x129   :  { %987 = vmatmul.bf16.gmra.mxu1 %v600_v5  ;;  %1089 = vmatmul.bf16.gmra.mxu2 %v600_v5 }
 0x12a   :  { %v552_v6 = vpop.f32.mrf.mxu3  ;;  %1606 = vmatpush.bf16.msra.mxu3 %v7202_v54 }
 0x12b   :  { %v553_v9 = vadd.f32 %v552_v6, %v519_v7  ;;  %v7078_v6 = vor.u32 %v10398_v24, %v7075_v3  ;;  %v10430_v7 = vld [vmem:[%s16144_s5 + $0x3a4] sm:$0xf] }
 0x12c   :  { %v10414_v3 = vld [vmem:[%s16144_s5 + $0x324] sm:$0xf] }
 0x12d   :  { %v582_v25 = vmax.f32 %v553_v9, 0.0 }
 0x12e   :  { %v910_v8 = vpop.f32.mrf.mxu0 }
 0x12f   :  { %v911_v13 = vadd.f32 %v910_v8, %v11763_v19  ;;  %v7203_v8 = vld [vmem:[%s16144_s5 + $0x3b0] sm:$0xf0] }
 0x131   :  { %1060 = vmatmul.bf16.gmra.mxu0 %v11729_v17 }
 0x132   :  { %v554_v11 = vpop.f32.mrf.mxu3 }
 0x133   :  { %v555_v14 = vadd.f32 %v554_v11, %v521_v10  ;;  %v7206_v10 = vor.u32 %v10430_v7, %v7203_v8  ;;  %v6993_v8 = vld [vmem:[%s16144_s5 + $0x200] sm:$0xf] }
 0x135   :  { %v585_v16 = vmax.f32 %v555_v14, 0.0  ;;  %v7185_v14 = vld [vmem:[%s16144_s5 + $0x380] sm:$0xf]  ;;  %1632 = vmatpush.bf16.msrb.mxu2 %v7206_v10  ;;  %v10380_v10 = vld [vmem:[%s16144_s5 + $0x20c] sm:$0xf0] }
 0x136   :  { %v11760_v18 = vpop.f32.mrf.mxu0 }
 0x137   :  { %v603_v22 = vpack.c.bf16 %v585_v16, %v582_v25  ;;  %v10396_v25 = vld [vmem:[%s16144_s5 + $0x28c] sm:$0xf0] }
 0x138   :  { %v7058_v16 = vor.u32 %v10396_v25, %v7057_v12  ;;  %v6994_v12 = vor.u32 %v10380_v10, %v6993_v8  ;;  %v10412_v25 = vld [vmem:[%s16144_s5 + $0x30c] sm:$0xf0]  ;;  %v10397_v8 = vld [vmem:[%s16144_s5 + $0x294] sm:$0xf0]  ;;  %v7193_v10 = vld [vmem:[%s16144_s5 + $0x388] sm:$0xf] }
 0x139   :  { %992 = vmatmul.bf16.gmra.mxu1 %v603_v22  ;;  %1094 = vmatmul.bf16.gmra.mxu2 %v603_v22  ;;  %v10428_v22 = vld [vmem:[%s16144_s5 + $0x38c] sm:$0xf0] }
 0x13a   :  { %v557_v17 = vpop.f32.mrf.mxu3  ;;  %1594 = vmatpush.bf16.msrb.mxu1 %v7058_v16  ;;  %v6995_v16 = vld [vmem:[%s16144_s5 + $0x210] sm:$0xf0] }
 0x13b   :  { %v558_v28 = vadd.f32 %v557_v17, %v524_v31  ;;  %v10394_v31 = vld [vmem:[%s16144_s5 + $0x284] sm:$0xf]  ;;  %v7059_v17 = vld [vmem:[%s16144_s5 + $0x290] sm:$0xf0] }
 0x13c   :  { %v944_v2 = vpop.f32.mrf.mxu2 }
 0x13d   :  { %v11767_v30 = vadd.f32 %v944_v2, %v911_v13  ;;  %v588_v4 = vmax.f32 %v558_v28, 0.0  ;;  %v7186_v13 = vor.u32 %v10428_v22, %v7185_v14  ;;  %v7062_v2 = vor.u32 %v10394_v31, %v7059_v17  ;;  %v7187_v28 = vld [vmem:[%s16144_s5 + $0x390] sm:$0xf0]  ;;  %v10378_v14 = vld [vmem:[%s16144_s5 + $0x204] sm:$0xf] }
 0x13e   :  { %v915_v32 = vpop.f32.mrf.mxu0  ;;  %v6998_v31 = vor.u32 %v10378_v14, %v6995_v16  ;;  %v10410_v17 = vld [vmem:[%s16144_s5 + $0x304] sm:$0xf]  ;;  %v7067_v14 = vld [vmem:[%s16144_s5 + $0x298] sm:$0xf0] }
 0x13f   :  { %v916_v63 = vadd.f32 %v915_v32, %v11763_v19  ;;  %v7190_v32 = vor.u32 %v10426_v27, %v7187_v28  ;;  %1607 = vmatpush.bf16.msra.mxu3 %v7186_v13  ;;  %v7123_v13 = vld [vmem:[%s16144_s5 + $0x310] sm:$0xf0]  ;;  %v10409_v28 = vld [vmem:[%s16144_s5 + $0x2f4] sm:$0xf0] }
 0x140   :  { %v7126_v27 = vor.u32 %v10410_v17, %v7123_v13  ;;  %v10427_v17 = vld [vmem:[%s16144_s5 + $0x38c] sm:$0xf]  ;;  %v7195_v13 = vld [vmem:[%s16144_s5 + $0x398] sm:$0xf0] }
 0x141   :  { %1065 = vmatmul.bf16.gmra.mxu0 %v11737_v38  ;;  %v10406_v38 = vld [vmem:[%s16144_s5 + $0x2e4] sm:$0xf]  ;;  %1633 = vmatpush.bf16.msrb.mxu2 %v7190_v32  ;;  %v7241_v32 = vld [vmem:[%s16144_s5 + $0x3e8] sm:$0xf] }
 0x142   :  { %v559_v33 = vpop.f32.mrf.mxu3  ;;  %v7110_v37 = vor.u32 %v10406_v38, %v7107_v39  ;;  %v10422_v39 = vld [vmem:[%s16144_s5 + $0x364] sm:$0xf] }
 0x143   :  { %v560_v26 = vadd.f32 %v559_v33, %v526_v20  ;;  %v7041_v20 = vld [vmem:[%s16144_s5 + $0x260] sm:$0xf] }
 0x144   :  { %v11789_v40 = vpop.f32.mrf.mxu2  ;;  %1617 = vmatpush.bf16.msrb.mxu0 %v7110_v37  ;;  %v7169_v33 = vld [vmem:[%s16144_s5 + $0x360] sm:$0xf]  ;;  %v7174_v37 = vor.u32 %v10422_v39, %v7171_v41  ;;  %v10405_v39 = vld [vmem:[%s16144_s5 + $0x2d4] sm:$0xf0] }
 0x145   :  { %v591_v44 = vmax.f32 %v560_v26, 0.0  ;;  %v7043_v26 = vld [vmem:[%s16144_s5 + $0x270] sm:$0xf0]  ;;  %v7170_v29 = vor.u32 %v10424_v21, %v7169_v33  ;;  %v7115_v21 = vld [vmem:[%s16144_s5 + $0x2f8] sm:$0xf0] }
 0x146   :  { %v11797_v46 = vpop.f32.mrf.mxu0  ;;  %v7046_v38 = vor.u32 %v10390_v35, %v7043_v26  ;;  %1634 = vmatpush.bf16.msrb.mxu2 %v7174_v37  ;;  %v10439_v35 = vld [vmem:[%s16144_s5 + $0x3ec] sm:$0xf] }
 0x147   :  { %v606_v52 = vpack.c.bf16 %v591_v44, %v588_v4  ;;  %v10392_v4 = vld [vmem:[%s16144_s5 + $0x26c] sm:$0xf0]  ;;  %1608 = vmatpush.bf16.msra.mxu3 %v7170_v29  ;;  %v7243_v29 = vld [vmem:[%s16144_s5 + $0x3f8] sm:$0xf0] }
 0x148   :  { %1618 = vmatpush.bf16.msrb.mxu0 %v7094_v55  ;;  %v7042_v34 = vor.u32 %v10392_v4, %v7041_v20  ;;  %v10388_v44 = vld [vmem:[%s16144_s5 + $0x24c] sm:$0xf0]  ;;  %v7009_v55 = vld [vmem:[%s16144_s5 + $0x220] sm:$0xf]  ;;  %v10441_v20 = vld [vmem:[%s16144_s5 + $0x3f4] sm:$0xf0]  ;;  %v7246_v37 = vor.u32 %v10439_v35, %v7243_v29 }
 0x149   :  { %997 = vmatmul.bf16.gmra.mxu1 %v606_v52  ;;  %1099 = vmatmul.bf16.gmra.mxu2 %v606_v52  ;;  %v7026_v47 = vor.u32 %v10388_v44, %v7025_v43  ;;  %v7027_v52 = vld [vmem:[%s16144_s5 + $0x250] sm:$0xf0]  ;;  %v7010_v60 = vor.u32 %v10384_v56, %v7009_v55  ;;  %v7242_v33 = vor.u32 %v10441_v20, %v7241_v32  ;;  %v7225_v44 = vld [vmem:[%s16144_s5 + $0x3c8] sm:$0xf]  ;;  %v10401_v55 = vld [vmem:[%s16144_s5 + $0x2b4] sm:$0xf0] }
 0x14a   :  { %1595 = vmatpush.bf16.msrb.mxu1 %v7042_v34  ;;  %v7030_v50 = vor.u32 %v10386_v48, %v7027_v52  ;;  %1635 = vmatpush.bf16.msrb.mxu2 %v7158_v57  ;;  %v10407_v34 = vld [vmem:[%s16144_s5 + $0x2ec] sm:$0xf]  ;;  %v7226_v23 = vor.u32 %v10437_v45, %v7225_v44  ;;  %v7099_v48 = vld [vmem:[%s16144_s5 + $0x2d8] sm:$0xf0]  ;;  %v7081_v57 = vld [vmem:[%s16144_s5 + $0x2a8] sm:$0xf] }
 0x14b   :  { %1609 = vmatpush.bf16.msra.mxu3 %v7154_v49  ;;  %v7118_v26 = vor.u32 %v10407_v34, %v7115_v21  ;;  %v10435_v52 = vld [vmem:[%s16144_s5 + $0x3cc] sm:$0xf]  ;;  %v7227_v49 = vld [vmem:[%s16144_s5 + $0x3d8] sm:$0xf0]  ;;  %v7209_v56 = vld [vmem:[%s16144_s5 + $0x3a8] sm:$0xf]  ;;  %v7082_v58 = vor.u32 %v10401_v55, %v7081_v57 }
 0x14c   :  { %v949_v5 = vpop.f32.mrf.mxu2  ;;  %1619 = vmatpush.bf16.msrb.mxu0 %v7078_v6  ;;  %v7230_v53 = vor.u32 %v10435_v52, %v7227_v49  ;;  %v10393_v32 = vld [vmem:[%s16144_s5 + $0x274] sm:$0xf0]  ;;  %v7177_v20 = vld [vmem:[%s16144_s5 + $0x368] sm:$0xf]  ;;  %v10391_v34 = vld [vmem:[%s16144_s5 + $0x26c] sm:$0xf] }
 0x14d   :  { %v11848_v9 = vadd.f32 %v949_v5, %v916_v63  ;;  %v7011_v63 = vld [vmem:[%s16144_s5 + $0x230] sm:$0xf0]  ;;  %v7051_v21 = vld [vmem:[%s16144_s5 + $0x278] sm:$0xf0]  ;;  %v10423_v29 = vld [vmem:[%s16144_s5 + $0x36c] sm:$0xf] }
 0x14e   :  { %v920_v11 = vpop.f32.mrf.mxu0  ;;  %1596 = vmatpush.bf16.msrb.mxu1 %v7026_v47  ;;  %v7014_v24 = vor.u32 %v10382_v62, %v7011_v63  ;;  %v7139_v5 = vld [vmem:[%s16144_s5 + $0x330] sm:$0xf0]  ;;  %v10403_v47 = vld [vmem:[%s16144_s5 + $0x2cc] sm:$0xf]  ;;  %v12049_v62 = vpop.f32.mrf.mxu3  ;;  %v10389_v44 = vld [vmem:[%s16144_s5 + $0x254] sm:$0xf0] }
 0x14f   :  { %v921_v59 = vadd.f32 %v920_v11, %v11763_v19  ;;  %v7142_v6 = vor.u32 %v10414_v3, %v7139_v5  ;;  %1610 = vmatpush.bf16.msra.mxu3 %v7138_v1  ;;  %v7121_v11 = vld [vmem:[%s16144_s5 + $0x300] sm:$0xf]  ;;  %v7102_v51 = vor.u32 %v10403_v47, %v7099_v48  ;;  %v10431_v1 = vld [vmem:[%s16144_s5 + $0x3ac] sm:$0xf]  ;;  %v7161_v45 = vld [vmem:[%s16144_s5 + $0x348] sm:$0xf] }
 0x150   :  { %1620 = vmatpush.bf16.msrb.mxu0 %v7062_v2  ;;  %v7122_v22 = vor.u32 %v10412_v25, %v7121_v11  ;;  %v7113_v2 = vld [vmem:[%s16144_s5 + $0x2e8] sm:$0xf]  ;;  %v10395_v25 = vld [vmem:[%s16144_s5 + $0x28c] sm:$0xf]  ;;  %v10421_v48 = vld [vmem:[%s16144_s5 + $0x354] sm:$0xf0] }
 0x151   :  { %1636 = vmatpush.bf16.msrb.mxu2 %v7142_v6  ;;  %v7114_v4 = vor.u32 %v10409_v28, %v7113_v2  ;;  %v7065_v6 = vld [vmem:[%s16144_s5 + $0x288] sm:$0xf]  ;;  %v10387_v52 = vld [vmem:[%s16144_s5 + $0x24c] sm:$0xf]  ;;  %v7035_v49 = vld [vmem:[%s16144_s5 + $0x258] sm:$0xf0] }
 0x152   :  { %1597 = vmatpush.bf16.msrb.mxu1 %v7010_v60  ;;  %v10399_v60 = vld [vmem:[%s16144_s5 + $0x2ac] sm:$0xf]  ;;  %v7049_v28 = vld [vmem:[%s16144_s5 + $0x268] sm:$0xf]  ;;  %v7163_v55 = vld [vmem:[%s16144_s5 + $0x358] sm:$0xf0] }
 0x153   :  { %1611 = vmatpush.bf16.msra.mxu3 %v7122_v22  ;;  %v10419_v57 = vld [vmem:[%s16144_s5 + $0x34c] sm:$0xf] }
 0x154   :  { %v11892_v36 = vpop.f32.mrf.mxu2  ;;  %1621 = vmatpush.bf16.msrb.mxu0 %v7046_v38  ;;  %v7097_v38 = vld [vmem:[%s16144_s5 + $0x2c8] sm:$0xf] }
 0x155   :  { %1637 = vmatpush.bf16.msrb.mxu2 %v7126_v27  ;;  %v7098_v43 = vor.u32 %v10405_v39, %v7097_v38  ;;  %v7198_v27 = vor.u32 %v10427_v17, %v7195_v13  ;;  %v7179_v38 = vld [vmem:[%s16144_s5 + $0x378] sm:$0xf0]  ;;  %v10379_v17 = vld [vmem:[%s16144_s5 + $0x20c] sm:$0xf] }
 0x156   :  { %v11900_v42 = vpop.f32.mrf.mxu0  ;;  %1598 = vmatpush.bf16.msrb.mxu1 %v6994_v12  ;;  %v7066_v12 = vor.u32 %v10397_v8, %v7065_v6  ;;  %v7182_v39 = vor.u32 %v10423_v29, %v7179_v38  ;;  %v10415_v6 = vld [vmem:[%s16144_s5 + $0x32c] sm:$0xf]  ;;  %v7147_v8 = vld [vmem:[%s16144_s5 + $0x338] sm:$0xf0] }
 0x157   :  { %1656 = vmatpush.bf16.msrb.mxu3 %v7242_v33  ;;  %v10425_v33 = vld [vmem:[%s16144_s5 + $0x374] sm:$0xf0]  ;;  %v7003_v13 = vld [vmem:[%s16144_s5 + $0x218] sm:$0xf0] }
 0x158   :  { %1622 = vmatpush.bf16.msrb.mxu0 %v7030_v50  ;;  %v7178_v35 = vor.u32 %v10425_v33, %v7177_v20  ;;  %v10411_v20 = vld [vmem:[%s16144_s5 + $0x30c] sm:$0xf] }
 0x159   :  { %1682 = vmatpush.bf16.msra.mxu2 %v7246_v37  ;;  %v12109_v37 = vpop.f32.mrf.mxu3 }
 0x15a   :  { %1643 = vmatpush.bf16.msra.mxu1 %v7114_v4  ;;  %v7050_v4 = vor.u32 %v10393_v32, %v7049_v28  ;;  %v7006_v32 = vor.u32 %v10379_v17, %v7003_v13 }
 0x15b   :  { %1657 = vmatpush.bf16.msrb.mxu3 %v7226_v23 }
 0x15c   :  { %v954_v0 = vpop.f32.mrf.mxu2  ;;  %1623 = vmatpush.bf16.msrb.mxu0 %v7014_v24  ;;  %v7211_v24 = vld [vmem:[%s16144_s5 + $0x3b8] sm:$0xf0] }
 0x15d   :  { %v11951_v54 = vadd.f32 %v954_v0, %v921_v59  ;;  %v10433_v59 = vld [vmem:[%s16144_s5 + $0x3b4] sm:$0xf0]  ;;  %v7086_v0 = vor.u32 %v10399_v60, %v7083_v61  ;;  %1683 = vmatpush.bf16.msra.mxu2 %v7230_v53  ;;  %v7214_v3 = vor.u32 %v10431_v1, %v7211_v24  ;;  %v7038_v53 = vor.u32 %v10387_v52, %v7035_v49  ;;  %v7145_v61 = vld [vmem:[%s16144_s5 + $0x328] sm:$0xf]  ;;  %v10383_v1 = vld [vmem:[%s16144_s5 + $0x22c] sm:$0xf] }
 0x15e   :  { %v11953_v7 = vpop.f32.mrf.mxu0  ;;  %1644 = vmatpush.bf16.msra.mxu1 %v7098_v43  ;;  %v7210_v63 = vor.u32 %v10433_v59, %v7209_v56  ;;  %v7033_v43 = vld [vmem:[%s16144_s5 + $0x248] sm:$0xf]  ;;  %v10385_v60 = vld [vmem:[%s16144_s5 + $0x234] sm:$0xf0]  ;;  %v7019_v24 = vld [vmem:[%s16144_s5 + $0x238] sm:$0xf0] }
 0x15f   :  { %v926_v5 = vadd.f32 %v11953_v7, %v11763_v19  ;;  %v10429_v7 = vld [vmem:[%s16144_s5 + $0x394] sm:$0xf0]  ;;  %v7034_v23 = vor.u32 %v10389_v44, %v7033_v43  ;;  %v7017_v59 = vld [vmem:[%s16144_s5 + $0x228] sm:$0xf]  ;;  %v913_v44 = vadd.f32 %v11760_v18, %v11763_v19 }
 0x160   :  { %1624 = vmatpush.bf16.msrb.mxu0 %v6998_v31  ;;  %1658 = vmatpush.bf16.msrb.mxu3 %v7210_v63  ;;  %v7194_v22 = vor.u32 %v10429_v7, %v7193_v10  ;;  %v7070_v31 = vor.u32 %v10395_v25, %v7067_v14  ;;  %v7018_v63 = vor.u32 %v10385_v60, %v7017_v59  ;;  %v10381_v7 = vld [vmem:[%s16144_s5 + $0x214] sm:$0xf0]  ;;  %v7129_v25 = vld [vmem:[%s16144_s5 + $0x308] sm:$0xf] }
 0x161   :  { %1684 = vmatpush.bf16.msra.mxu2 %v7214_v3  ;;  %v7150_v10 = vor.u32 %v10415_v6, %v7147_v8  ;;  %v7491_v6 = vld [vmem:[%s16144_s5 + $0x1f0] sm:$0xf0] }
 0x162   :  { %1645 = vmatpush.bf16.msra.mxu1 %v7082_v58  ;;  %v7166_v58 = vor.u32 %v10419_v57, %v7163_v55 }
 0x164   :  { %v12009_v41 = vpop.f32.mrf.mxu2  ;;  %1669 = vmatpush.bf16.msra.mxu0 %v7118_v26  ;;  %1659 = vmatpush.bf16.msrb.mxu3 %v7194_v22  ;;  %v7054_v26 = vor.u32 %v10391_v34, %v7051_v21 }
 0x165   :  { %1685 = vmatpush.bf16.msra.mxu2 %v7198_v27 }
 0x166   :  { %v12029_v50 = vpop.f32.mrf.mxu0  ;;  %1646 = vmatpush.bf16.msra.mxu1 %v7066_v12  ;;  %v7001_v12 = vld [vmem:[%s16144_s5 + $0x208] sm:$0xf] }
 0x167   :  { %v7002_v22 = vor.u32 %v10381_v7, %v7001_v12 }
 0x168   :  { %1670 = vmatpush.bf16.msra.mxu0 %v7102_v51  ;;  %1660 = vmatpush.bf16.msrb.mxu3 %v7178_v35  ;;  %v7162_v51 = vor.u32 %v10421_v48, %v7161_v45  ;;  %v12207_v45 = vperm.slane %v11758_v15, 1  ;;  %v7361_v15 = vld [vmem:[%s16144_s5 + $0xe0] sm:$0xf] }
 0x169   :  { %1686 = vmatpush.bf16.msra.mxu2 %v7182_v39 }
 0x16a   :  { %1647 = vmatpush.bf16.msra.mxu1 %v7050_v4  ;;  %v7131_v4 = vld [vmem:[%s16144_s5 + $0x318] sm:$0xf0]  ;;  %v1015_v48 = vadd.f32 %v12109_v37, %v12207_v45  ;;  %v7489_v37 = vld [vmem:[%s16144_s5 + $0x1e0] sm:$0xf] }
 0x16b   :  { %v7134_v34 = vor.u32 %v10411_v20, %v7131_v4  ;;  %v10372_v20 = vld [vmem:[%s16144_s5 + $0x1cc] sm:$0xf0]  ;;  %v10338_v4 = vld [vmem:[%s16144_s5 + $0xc4] sm:$0xf] }
 0x16c   :  { %v959_v11 = vpop.f32.mrf.mxu2  ;;  %1671 = vmatpush.bf16.msra.mxu0 %v7086_v0  ;;  %1661 = vmatpush.bf16.msrb.mxu3 %v7162_v51  ;;  %v10417_v0 = vld [vmem:[%s16144_s5 + $0x334] sm:$0xf0] }
 0x16d   :  { %v12077_v16 = vadd.f32 %v959_v11, %v926_v5  ;;  %v7146_v3 = vor.u32 %v10417_v0, %v7145_v61  ;;  %v7022_v5 = vor.u32 %v10383_v1, %v7019_v24  ;;  %1687 = vmatpush.bf16.msra.mxu2 %v7166_v58  ;;  %v10376_v61 = vld [vmem:[%s16144_s5 + $0x1ec] sm:$0xf0] }
 0x16e   :  { %v930_v2 = vpop.f32.mrf.mxu0  ;;  %1648 = vmatpush.bf16.msra.mxu1 %v7034_v23  ;;  %v947_v23 = vadd.f32 %v11789_v40, %v913_v44  ;;  %v10344_v40 = vld [vmem:[%s16144_s5 + $0xec] sm:$0xf0]  ;;  %v7475_v44 = vld [vmem:[%s16144_s5 + $0x1d0] sm:$0xf0] }
 0x16f   :  { %v931_v11 = vadd.f32 %v930_v2, %v11763_v19  ;;  %v12182_v2 = vpop.f32.mrf.mxu3  ;;  %v7362_v7 = vor.u32 %v10344_v40, %v7361_v15  ;;  %v10366_v15 = vld [vmem:[%s16144_s5 + $0x1a4] sm:$0xf]  ;;  %v7459_v40 = vld [vmem:[%s16144_s5 + $0x1b0] sm:$0xf0] }
 0x170   :  { %1672 = vmatpush.bf16.msra.mxu0 %v7070_v31  ;;  %1662 = vmatpush.bf16.msrb.mxu3 %v7146_v3  ;;  %v10413_v31 = vld [vmem:[%s16144_s5 + $0x314] sm:$0xf0]  ;;  %v7363_v3 = vld [vmem:[%s16144_s5 + $0xf0] sm:$0xf0] }
 0x171   :  { %v7130_v28 = vor.u32 %v10413_v31, %v7129_v25  ;;  %1688 = vmatpush.bf16.msra.mxu2 %v7150_v10  ;;  %v7490_v25 = vor.u32 %v10376_v61, %v7489_v37 }
 0x172   :  { %1649 = vmatpush.bf16.msra.mxu1 %v7018_v63  ;;  %v10342_v63 = vld [vmem:[%s16144_s5 + $0xe4] sm:$0xf] }
 0x173   :  { %v7366_v13 = vor.u32 %v10342_v63, %v7363_v3  ;;  %v10332_v3 = vld [vmem:[%s16144_s5 + $0x8c] sm:$0xf0] }
 0x174   :  { %v12120_v47 = vpop.f32.mrf.mxu2  ;;  %1673 = vmatpush.bf16.msra.mxu0 %v7054_v26  ;;  %1663 = vmatpush.bf16.msrb.mxu3 %v7130_v28 }
 0x175   :  { %1689 = vmatpush.bf16.msra.mxu2 %v7134_v34 }
 0x176   :  { %v12137_v56 = vpop.f32.mrf.mxu0  ;;  %1650 = vmatpush.bf16.msra.mxu1 %v7002_v22  ;;  %v10340_v22 = vld [vmem:[%s16144_s5 + $0xcc] sm:$0xf0] }
 0x177   :  { %v12198_v29 = vpop.f32.mrf.mxu3 }
 0x178   :  { %1674 = vmatpush.bf16.msra.mxu0 %v7038_v53 }
 0x17c   :  { %v964_v14 = vpop.f32.mrf.mxu2  ;;  %1675 = vmatpush.bf16.msra.mxu0 %v7022_v5  ;;  %v10374_v5 = vld [vmem:[%s16144_s5 + $0x1e4] sm:$0xf] }
 0x17d   :  { %v12184_v27 = vadd.f32 %v964_v14, %v931_v11  ;;  %v7345_v14 = vld [vmem:[%s16144_s5 + $0xc0] sm:$0xf]  ;;  %v7494_v28 = vor.u32 %v10374_v5, %v7491_v6 }
 0x17e   :  { %v12192_v33 = vpop.f32.mrf.mxu0 }
 0x17f   :  { %v1022_v52 = vpop.f32.mrf.mxu3 }
 0x180   :  { %1676 = vmatpush.bf16.msra.mxu0 %v7006_v32  ;;  %v1023_v8 = vadd.f32 %v1022_v52, %v12207_v45  ;;  %v7473_v32 = vld [vmem:[%s16144_s5 + $0x1c0] sm:$0xf] }
 0x181   :  { %v7329_v52 = vld [vmem:[%s16144_s5 + $0xa0] sm:$0xf] }
 0x184   :  { %v12194_v21 = vpop.f32.mrf.mxu2 }
 0x186   :  { %v12196_v35 = vpop.f32.mrf.mxu1  ;;  %v1048_v26 = vpop.f32.mrf.mxu0 }
 0x187   :  { %v1049_v49 = vadd.f32 %v1048_v26, %v1015_v48  ;;  %v12231_v0 = vpop.f32.mrf.mxu3  ;;  %v7347_v26 = vld [vmem:[%s16144_s5 + $0xd0] sm:$0xf0]  ;;  %v7474_v48 = vor.u32 %v10372_v20, %v7473_v32  ;;  %v1013_v20 = vadd.f32 %v12049_v62, %v12207_v45  ;;  %v7425_v62 = vld [vmem:[%s16144_s5 + $0x160] sm:$0xf] }
 0x188   :  { %v7443_v32 = vld [vmem:[%s16144_s5 + $0x190] sm:$0xf0] }
 0x18c   :  { %v12200_v38 = vpop.f32.mrf.mxu2 }
 0x18e   :  { %v980_v39 = vpop.f32.mrf.mxu1  ;;  %v12202_v43 = vpop.f32.mrf.mxu0 }
 0x18f   :  { %v981_v51 = vadd.f32 %v980_v39, %v947_v23  ;;  %v10370_v39 = vld [vmem:[%s16144_s5 + $0x1c4] sm:$0xf]  ;;  %v7346_v23 = vor.u32 %v10340_v22, %v7345_v14  ;;  %v1027_v61 = vpop.f32.mrf.mxu3  ;;  %v10364_v14 = vld [vmem:[%s16144_s5 + $0x18c] sm:$0xf0] }
 0x190   :  { %v10330_v22 = vld [vmem:[%s16144_s5 + $0x84] sm:$0xf] }
 0x191   :  { %v1107_v59 = vmax.f32 %v981_v51, 0.0  ;;  %v7350_v51 = vor.u32 %v10338_v4, %v7347_v26 }
 0x194   :  { %v1082_v53 = vpop.f32.mrf.mxu2 }
 0x195   :  { %v1083_v57 = vadd.f32 %v1082_v53, %v1049_v49  ;;  %v10336_v49 = vld [vmem:[%s16144_s5 + $0xac] sm:$0xf0]  ;;  %v7478_v53 = vor.u32 %v10370_v39, %v7475_v44  ;;  %v1047_v44 = vadd.f32 %v12192_v33, %v1013_v20  ;;  %v7299_v33 = vld [vmem:[%s16144_s5 + $0x70] sm:$0xf0] }
 0x196   :  { %v12212_v55 = vpop.f32.mrf.mxu1  ;;  %v12214_v58 = vpop.f32.mrf.mxu0  ;;  %v7330_v63 = vor.u32 %v10336_v49, %v7329_v52  ;;  %v10328_v39 = vld [vmem:[%s16144_s5 + $0x6c] sm:$0xf0]  ;;  %v10326_v49 = vld [vmem:[%s16144_s5 + $0x64] sm:$0xf] }
 0x197   :  { %v1108_v60 = vmax.f32 %v1083_v57, 0.0  ;;  %v7457_v57 = vld [vmem:[%s16144_s5 + $0x1a0] sm:$0xf]  ;;  %v10360_v52 = vld [vmem:[%s16144_s5 + $0x16c] sm:$0xf0] }
 0x199   :  { %v1126_v18 = vpack.c.bf16 %v1108_v60, %v1107_v59  ;;  %v10368_v59 = vld [vmem:[%s16144_s5 + $0x1ac] sm:$0xf0]  ;;  %v10334_v60 = vld [vmem:[%s16144_s5 + $0xa4] sm:$0xf] }
 0x19b   :  { %v1265_v1 = vunpack.c.l.b16 %v1126_v18  ;;  %v1266_v24 = vunpack.c.h.b16 %v1126_v18  ;;  %v7331_v18 = vld [vmem:[%s16144_s5 + $0xb0] sm:$0xf0] }
 0x19c   :  { %v12243_v10 = vpop.f32.mrf.mxu2 }
 0x19d   :  { %v12245_v11 = vpack.c.b16 %v1265_v1, %v1265_v1  ;;  %v12247_v12 = vpack.c.b16 %v1266_v24, %v1266_v24  ;;  %v7458_v1 = vor.u32 %v10368_v59, %v7457_v57  ;;  %v7313_v24 = vld [vmem:[%s16144_s5 + $0x80] sm:$0xf]  ;;  %v1028_v57 = vadd.f32 %v1027_v61, %v12207_v45 }
 0x19e   :  { %v12255_v31 = vpop.f32.mrf.mxu1  ;;  %v1056_v17 = vpop.f32.mrf.mxu0  ;;  %v7314_v4 = vor.u32 %v10332_v3, %v7313_v24  ;;  %v1081_v59 = vadd.f32 %v12200_v38, %v1047_v44  ;;  %v7409_v61 = vld [vmem:[%s16144_s5 + $0x140] sm:$0xf]  ;;  %v10320_v44 = vld [vmem:[%s16144_s5 + $0x2c] sm:$0xf0] }
 0x19f   :  { %v12266_v34 = vadd.f32 %v1056_v17, %v1023_v8  ;;  %1599 = vmatmul.bf16.vlgmr.msrb.gmra.mxu1 %v12245_v11  ;;  %1612 = vmatmul.bf16.vlgmr.msra.gmra.mxu3 %v12247_v12  ;;  %v7334_v8 = vor.u32 %v10334_v60, %v7331_v18 }
 0x1a0   :  { %1625 = vmatmul.bf16.vlgmr.msrb.gmra.mxu0 %v12245_v11  ;;  %1638 = vmatmul.bf16.vlgmr.msrb.gmra.mxu2 %v12247_v12  ;;  %v1106_v20 = vmax.f32 %v1081_v59, 0.0  ;;  %v10316_v59 = vld [vmem:[%s16144_s5 + $0xc] sm:$0xf0] }
 0x1a1   :  { %2022 = vmatpush.bf16.msrb.mxu1 %v7362_v7  ;;  %2035 = vmatpush.bf16.msra.mxu3 %v7490_v25  ;;  %v7462_v7 = vor.u32 %v10366_v15, %v7459_v40  ;;  %v7441_v25 = vld [vmem:[%s16144_s5 + $0x180] sm:$0xf]  ;;  %v7426_v40 = vor.u32 %v10360_v52, %v7425_v62  ;;  %v10350_v62 = vld [vmem:[%s16144_s5 + $0x124] sm:$0xf]  ;;  %v7395_v52 = vld [vmem:[%s16144_s5 + $0x130] sm:$0xf0] }
 0x1a2   :  { %2048 = vmatpush.bf16.msrb.mxu0 %v7366_v13  ;;  %2061 = vmatpush.bf16.msrb.mxu2 %v7494_v28  ;;  %v7315_v13 = vld [vmem:[%s16144_s5 + $0x90] sm:$0xf0]  ;;  %v10362_v28 = vld [vmem:[%s16144_s5 + $0x184] sm:$0xf]  ;;  %v7442_v26 = vor.u32 %v10364_v14, %v7441_v25 }
 0x1a4   :  { %v12305_v37 = vpop.f32.mrf.mxu2 }
 0x1a5   :  { %2023 = vmatpush.bf16.msrb.mxu1 %v7346_v23  ;;  %2036 = vmatpush.bf16.msra.mxu3 %v7474_v48  ;;  %v7318_v23 = vor.u32 %v10330_v22, %v7315_v13  ;;  %v7446_v48 = vor.u32 %v10362_v28, %v7443_v32  ;;  %v10354_v13 = vld [vmem:[%s16144_s5 + $0x144] sm:$0xf]  ;;  %v7411_v28 = vld [vmem:[%s16144_s5 + $0x150] sm:$0xf0]  ;;  %v12394_v32 = vpop.f32.mrf.mxu3 }
 0x1a6   :  { %2049 = vmatpush.bf16.msrb.mxu0 %v7350_v51  ;;  %2062 = vmatpush.bf16.msrb.mxu2 %v7478_v53  ;;  %v988_v5 = vpop.f32.mrf.mxu1  ;;  %v12313_v6 = vpop.f32.mrf.mxu0  ;;  %v10358_v51 = vld [vmem:[%s16144_s5 + $0x164] sm:$0xf]  ;;  %v7427_v53 = vld [vmem:[%s16144_s5 + $0x170] sm:$0xf0] }
 0x1a7   :  { %v989_v17 = vadd.f32 %v988_v5, %v11951_v54  ;;  %v7297_v54 = vld [vmem:[%s16144_s5 + $0x60] sm:$0xf]  ;;  %v7430_v3 = vor.u32 %v10358_v51, %v7427_v53  ;;  %v10356_v5 = vld [vmem:[%s16144_s5 + $0x14c] sm:$0xf0] }
 0x1a8   :  { %v7298_v15 = vor.u32 %v10328_v39, %v7297_v54  ;;  %v7410_v54 = vor.u32 %v10356_v5, %v7409_v61  ;;  %v7265_v39 = vld [vmem:[%s16144_s5 + $0x20] sm:$0xf]  ;;  %v7398_v61 = vor.u32 %v10350_v62, %v7395_v52  ;;  %v10341_v62 = vld [vmem:[%s16144_s5 + $0xd4] sm:$0xf0] }
 0x1a9   :  { %2024 = vmatpush.bf16.msrb.mxu1 %v7330_v63  ;;  %2037 = vmatpush.bf16.msra.mxu3 %v7458_v1  ;;  %v7281_v63 = vld [vmem:[%s16144_s5 + $0x40] sm:$0xf]  ;;  %v10324_v1 = vld [vmem:[%s16144_s5 + $0x4c] sm:$0xf0]  ;;  %v1113_v25 = vmax.f32 %v989_v17, 0.0  ;;  %v979_v17 = vadd.f32 %v12196_v35, %v11767_v30  ;;  %v7414_v35 = vor.u32 %v10354_v13, %v7411_v28  ;;  %v7266_v53 = vor.u32 %v10320_v44, %v7265_v39 }
 0x1aa   :  { %2050 = vmatpush.bf16.msrb.mxu0 %v7334_v8  ;;  %2063 = vmatpush.bf16.msrb.mxu2 %v7462_v7  ;;  %v10322_v8 = vld [vmem:[%s16144_s5 + $0x44] sm:$0xf]  ;;  %v7283_v7 = vld [vmem:[%s16144_s5 + $0x50] sm:$0xf0]  ;;  %v7249_v51 = vld [vmem:[%s16144_s5] sm:$0xf] }
 0x1ab   :  { %v7286_v30 = vor.u32 %v10322_v8, %v7283_v7  ;;  %v7379_v8 = vld [vmem:[%s16144_s5 + $0x110] sm:$0xf0]  ;;  %v7369_v7 = vld [vmem:[%s16144_s5 + $0xe8] sm:$0xf]  ;;  %v10343_v13 = vld [vmem:[%s16144_s5 + $0xec] sm:$0xf]  ;;  %v7250_v28 = vor.u32 %v10316_v59, %v7249_v51 }
 0x1ac   :  { %v1090_v60 = vpop.f32.mrf.mxu2  ;;  %v10339_v59 = vld [vmem:[%s16144_s5 + $0xcc] sm:$0xf] }
 0x1ad   :  { %2025 = vmatpush.bf16.msrb.mxu1 %v7314_v4  ;;  %2038 = vmatpush.bf16.msra.mxu3 %v7442_v26  ;;  %v1091_v18 = vadd.f32 %v1090_v60, %v12266_v34  ;;  %v7302_v34 = vor.u32 %v10326_v49, %v7299_v33  ;;  %v7282_v26 = vor.u32 %v10324_v1, %v7281_v63  ;;  %v1105_v49 = vmax.f32 %v979_v17, 0.0  ;;  %v7377_v60 = vld [vmem:[%s16144_s5 + $0x100] sm:$0xf]  ;;  %v1032_v39 = vpop.f32.mrf.mxu3 }
 0x1ae   :  { %2051 = vmatpush.bf16.msrb.mxu0 %v7318_v23  ;;  %2064 = vmatpush.bf16.msrb.mxu2 %v7446_v48  ;;  %v12373_v38 = vpop.f32.mrf.mxu1  ;;  %v1061_v24 = vpop.f32.mrf.mxu0  ;;  %v10318_v23 = vld [vmem:[%s16144_s5 + $0x24] sm:$0xf]  ;;  %v7267_v48 = vld [vmem:[%s16144_s5 + $0x30] sm:$0xf0] }
 0x1af   :  { %v1114_v14 = vmax.f32 %v1091_v18, 0.0  ;;  %v12384_v22 = vadd.f32 %v1061_v24, %v1028_v57  ;;  %1651 = vmatmul.bf16.vlgmr.msra.gmra.mxu1 %v12245_v11  ;;  %1664 = vmatmul.bf16.vlgmr.msrb.gmra.mxu3 %v12247_v12  ;;  %v10348_v18 = vld [vmem:[%s16144_s5 + $0x10c] sm:$0xf0]  ;;  %v7270_v1 = vor.u32 %v10318_v23, %v7267_v48  ;;  %v10314_v24 = vld [vmem:[%s16144_s5 + $0x4] sm:$0xf] }
 0x1b0   :  { %1677 = vmatmul.bf16.vlgmr.msra.gmra.mxu0 %v12245_v11  ;;  %1690 = vmatmul.bf16.vlgmr.msra.gmra.mxu2 %v12247_v12  ;;  %v7393_v11 = vld [vmem:[%s16144_s5 + $0x120] sm:$0xf]  ;;  %v10352_v12 = vld [vmem:[%s16144_s5 + $0x12c] sm:$0xf0]  ;;  %v7378_v17 = vor.u32 %v10348_v18, %v7377_v60  ;;  %v7353_v48 = vld [vmem:[%s16144_s5 + $0xc8] sm:$0xf]  ;;  %v1033_v60 = vadd.f32 %v1032_v39, %v12207_v45 }
 0x1b1   :  { %v12400_v4 = vpack.c.bf16 %v1114_v14, %v1113_v25  ;;  %2026 = vmatpush.bf16.msrb.mxu1 %v7298_v15  ;;  %2039 = vmatpush.bf16.msra.mxu3 %v7426_v40  ;;  %v7394_v57 = vor.u32 %v10352_v12, %v7393_v11  ;;  %v1125_v15 = vpack.c.bf16 %v1106_v20, %v1105_v49  ;;  %v10345_v25 = vld [vmem:[%s16144_s5 + $0xf4] sm:$0xf0]  ;;  %v7497_v14 = vld [vmem:[%s16144_s5 + $0x1e8] sm:$0xf]  ;;  %v7371_v20 = vld [vmem:[%s16144_s5 + $0xf8] sm:$0xf0] }
 0x1b2   :  { %2052 = vmatpush.bf16.msrb.mxu0 %v7302_v34  ;;  %2065 = vmatpush.bf16.msrb.mxu2 %v7430_v3  ;;  %v7251_v34 = vld [vmem:[%s16144_s5 + $0x10] sm:$0xf0]  ;;  %v10346_v3 = vld [vmem:[%s16144_s5 + $0x104] sm:$0xf]  ;;  %v7370_v12 = vor.u32 %v10345_v25, %v7369_v7  ;;  %v7374_v49 = vor.u32 %v10343_v13, %v7371_v20  ;;  %v10337_v13 = vld [vmem:[%s16144_s5 + $0xb4] sm:$0xf0] }
 0x1b3   :  { %v1696_v44 = vunpack.c.l.b16 %v1125_v15  ;;  %v7382_v11 = vor.u32 %v10346_v3, %v7379_v8  ;;  %v7354_v3 = vor.u32 %v10341_v62, %v7353_v48  ;;  %v10369_v20 = vld [vmem:[%s16144_s5 + $0x1b4] sm:$0xf0]  ;;  %v7339_v39 = vld [vmem:[%s16144_s5 + $0xb8] sm:$0xf0] }
 0x1b4   :  { %v12426_v33 = vpop.f32.mrf.mxu2 }
 0x1b5   :  { %2027 = vmatpush.bf16.msrb.mxu1 %v7282_v26  ;;  %2040 = vmatpush.bf16.msra.mxu3 %v7410_v54  ;;  %v10375_v26 = vld [vmem:[%s16144_s5 + $0x1ec] sm:$0xf]  ;;  %v7499_v54 = vld [vmem:[%s16144_s5 + $0x1f8] sm:$0xf0] }
 0x1b6   :  { %2053 = vmatpush.bf16.msrb.mxu0 %v7286_v30  ;;  %2066 = vmatpush.bf16.msrb.mxu2 %v7414_v35  ;;  %v993_v40 = vpop.f32.mrf.mxu1  ;;  %v12440_v63 = vpop.f32.mrf.mxu0  ;;  %v1697_v30 = vunpack.c.h.b16 %v1125_v15  ;;  %v7254_v35 = vor.u32 %v10314_v24, %v7251_v34  ;;  %v7502_v51 = vor.u32 %v10375_v26, %v7499_v54  ;;  %v7355_v15 = vld [vmem:[%s16144_s5 + $0xd8] sm:$0xf0]  ;;  %v10335_v26 = vld [vmem:[%s16144_s5 + $0xac] sm:$0xf] }
 0x1b7   :  { %v994_v5 = vadd.f32 %v993_v40, %v12077_v16  ;;  %v10377_v16 = vld [vmem:[%s16144_s5 + $0x1f4] sm:$0xf0]  ;;  %v10371_v40 = vld [vmem:[%s16144_s5 + $0x1cc] sm:$0xf]  ;;  %v7342_v62 = vor.u32 %v10335_v26, %v7339_v39  ;;  %v7289_v26 = vld [vmem:[%s16144_s5 + $0x48] sm:$0xf] }
 0x1b8   :  { %v7498_v23 = vor.u32 %v10377_v16, %v7497_v14  ;;  %v12507_v24 = vpack.c.b16 %v1697_v30, %v1697_v30  ;;  %v7337_v16 = vld [vmem:[%s16144_s5 + $0xa8] sm:$0xf]  ;;  %v7467_v30 = vld [vmem:[%s16144_s5 + $0x1b8] sm:$0xf0]  ;;  %v10325_v39 = vld [vmem:[%s16144_s5 + $0x54] sm:$0xf0] }
 0x1b9   :  { %2028 = vmatpush.bf16.msrb.mxu1 %v7266_v53  ;;  %2041 = vmatpush.bf16.msra.mxu3 %v7394_v57  ;;  %v7481_v53 = vld [vmem:[%s16144_s5 + $0x1c8] sm:$0xf]  ;;  %v10373_v57 = vld [vmem:[%s16144_s5 + $0x1d4] sm:$0xf0]  ;;  %v1117_v8 = vmax.f32 %v994_v5, 0.0 }
 0x1ba   :  { %2054 = vmatpush.bf16.msrb.mxu0 %v7270_v1  ;;  %2067 = vmatpush.bf16.msrb.mxu2 %v7398_v61  ;;  %v7483_v1 = vld [vmem:[%s16144_s5 + $0x1d8] sm:$0xf0]  ;;  %v12505_v61 = vpack.c.b16 %v1696_v44, %v1696_v44  ;;  %v7482_v14 = vor.u32 %v10373_v57, %v7481_v53  ;;  %v7465_v5 = vld [vmem:[%s16144_s5 + $0x1a8] sm:$0xf]  ;;  %v10367_v44 = vld [vmem:[%s16144_s5 + $0x1ac] sm:$0xf] }
 0x1bb   :  { %v10331_v53 = vld [vmem:[%s16144_s5 + $0x8c] sm:$0xf]  ;;  %v7323_v57 = vld [vmem:[%s16144_s5 + $0x98] sm:$0xf0] }
 0x1bc   :  { %v1095_v52 = vpop.f32.mrf.mxu2 }
 0x1bd   :  { %2029 = vmatpush.bf16.msrb.mxu1 %v7250_v28  ;;  %2042 = vmatpush.bf16.msra.mxu3 %v7378_v17  ;;  %v1096_v18 = vadd.f32 %v1095_v52, %v12384_v22  ;;  %v7358_v28 = vor.u32 %v10339_v59, %v7355_v15  ;;  %v7486_v17 = vor.u32 %v10371_v40, %v7483_v1  ;;  %v10363_v59 = vld [vmem:[%s16144_s5 + $0x18c] sm:$0xf] }
 0x1be   :  { %2055 = vmatpush.bf16.msrb.mxu0 %v7254_v35  ;;  %2068 = vmatpush.bf16.msrb.mxu2 %v7382_v11  ;;  %v12509_v34 = vpop.f32.mrf.mxu1  ;;  %v1066_v22 = vpop.f32.mrf.mxu0  ;;  %v7338_v35 = vor.u32 %v10337_v13, %v7337_v16  ;;  %v7466_v11 = vor.u32 %v10369_v20, %v7465_v5  ;;  %v7470_v52 = vor.u32 %v10367_v44, %v7467_v30  ;;  %v10327_v16 = vld [vmem:[%s16144_s5 + $0x6c] sm:$0xf]  ;;  %v7307_v13 = vld [vmem:[%s16144_s5 + $0x78] sm:$0xf0] }
 0x1bf   :  { %v1118_v7 = vmax.f32 %v1096_v18, 0.0  ;;  %v12511_v25 = vadd.f32 %v1066_v22, %v1033_v60  ;;  %v7451_v60 = vld [vmem:[%s16144_s5 + $0x198] sm:$0xf0]  ;;  %v7305_v22 = vld [vmem:[%s16144_s5 + $0x68] sm:$0xf]  ;;  %v7310_v30 = vor.u32 %v10327_v16, %v7307_v13 }
 0x1c0   :  { %2030 = vmatmul.bf16.vlgmr.msrb.gmra.mxu1 %v12505_v61  ;;  %2043 = vmatmul.bf16.vlgmr.msra.gmra.mxu3 %v12507_v24  ;;  %v7257_v16 = vld [vmem:[%s16144_s5 + $0x8] sm:$0xf] }
 0x1c1   :  { %2074 = vmatpush.bf16.msra.mxu1 %v7370_v12  ;;  %2087 = vmatpush.bf16.msrb.mxu3 %v7498_v23  ;;  %v12528_v54 = vpack.c.bf16 %v1118_v7, %v1117_v8  ;;  %v7321_v12 = vld [vmem:[%s16144_s5 + $0x88] sm:$0xf]  ;;  %v10333_v23 = vld [vmem:[%s16144_s5 + $0x94] sm:$0xf0]  ;;  %v7326_v8 = vor.u32 %v10331_v53, %v7323_v57  ;;  %v7454_v7 = vor.u32 %v10363_v59, %v7451_v60 }
 0x1c2   :  { %2100 = vmatpush.bf16.msra.mxu0 %v7374_v49  ;;  %2113 = vmatpush.bf16.msra.mxu2 %v7502_v51  ;;  %v7449_v49 = vld [vmem:[%s16144_s5 + $0x188] sm:$0xf]  ;;  %v10365_v51 = vld [vmem:[%s16144_s5 + $0x194] sm:$0xf0]  ;;  %v7322_v40 = vor.u32 %v10333_v23, %v7321_v12  ;;  %v10323_v23 = vld [vmem:[%s16144_s5 + $0x4c] sm:$0xf]  ;;  %v7290_v59 = vor.u32 %v10325_v39, %v7289_v26 }
 0x1c3   :  { %2056 = vmatmul.bf16.vlgmr.msrb.gmra.mxu0 %v12505_v61  ;;  %2069 = vmatmul.bf16.vlgmr.msrb.gmra.mxu2 %v12507_v24  ;;  %v7450_v1 = vor.u32 %v10365_v51, %v7449_v49  ;;  %v10357_v12 = vld [vmem:[%s16144_s5 + $0x154] sm:$0xf0]  ;;  %v10355_v49 = vld [vmem:[%s16144_s5 + $0x14c] sm:$0xf]  ;;  %v7419_v51 = vld [vmem:[%s16144_s5 + $0x158] sm:$0xf0] }
 0x1c4   :  { %v12549_v48 = vpop.f32.mrf.mxu2 }
 0x1c5   :  { %2075 = vmatpush.bf16.msra.mxu1 %v7354_v3  ;;  %2088 = vmatpush.bf16.msrb.mxu3 %v7482_v14  ;;  %v10329_v3 = vld [vmem:[%s16144_s5 + $0x74] sm:$0xf0]  ;;  %v7433_v14 = vld [vmem:[%s16144_s5 + $0x168] sm:$0xf] }
 0x1c6   :  { %2101 = vmatpush.bf16.msra.mxu0 %v7358_v28  ;;  %2114 = vmatpush.bf16.msra.mxu2 %v7486_v17  ;;  %v998_v18 = vpop.f32.mrf.mxu1  ;;  %v10359_v28 = vld [vmem:[%s16144_s5 + $0x16c] sm:$0xf]  ;;  %v7435_v17 = vld [vmem:[%s16144_s5 + $0x178] sm:$0xf0]  ;;  %v7306_v5 = vor.u32 %v10329_v3, %v7305_v22  ;;  %v10353_v22 = vld [vmem:[%s16144_s5 + $0x134] sm:$0xf0] }
 0x1c7   :  { %v999_v15 = vadd.f32 %v998_v18, %v12184_v27  ;;  %v10361_v27 = vld [vmem:[%s16144_s5 + $0x174] sm:$0xf0]  ;;  %v10319_v3 = vld [vmem:[%s16144_s5 + $0x2c] sm:$0xf] }
 0x1c8   :  { %v7434_v20 = vor.u32 %v10361_v27, %v7433_v14  ;;  %v10321_v18 = vld [vmem:[%s16144_s5 + $0x34] sm:$0xf0]  ;;  %v10351_v14 = vld [vmem:[%s16144_s5 + $0x12c] sm:$0xf]  ;;  %v7403_v27 = vld [vmem:[%s16144_s5 + $0x138] sm:$0xf0] }
 0x1c9   :  { %2076 = vmatpush.bf16.msra.mxu1 %v7338_v35  ;;  %2089 = vmatpush.bf16.msrb.mxu3 %v7466_v11  ;;  %v7438_v35 = vor.u32 %v10359_v28, %v7435_v17  ;;  %v7417_v11 = vld [vmem:[%s16144_s5 + $0x148] sm:$0xf]  ;;  %v1121_v53 = vmax.f32 %v999_v15, 0.0  ;;  %v10317_v17 = vld [vmem:[%s16144_s5 + $0x14] sm:$0xf0]  ;;  %v7406_v39 = vor.u32 %v10351_v14, %v7403_v27 }
 0x1ca   :  { %2102 = vmatpush.bf16.msra.mxu0 %v7342_v62  ;;  %2115 = vmatpush.bf16.msra.mxu2 %v7470_v52  ;;  %v7291_v52 = vld [vmem:[%s16144_s5 + $0x58] sm:$0xf0]  ;;  %v7418_v60 = vor.u32 %v10357_v12, %v7417_v11  ;;  %v7401_v15 = vld [vmem:[%s16144_s5 + $0x128] sm:$0xf]  ;;  %v7681_v12 = vld [vmem:[%s16144_s5 + $0x4e0] sm:$0xf] }
 0x1cb   :  { %v7402_v28 = vor.u32 %v10353_v22, %v7401_v15  ;;  %v7387_v11 = vld [vmem:[%s16144_s5 + $0x118] sm:$0xf0]  ;;  %v7665_v15 = vld [vmem:[%s16144_s5 + $0x4c0] sm:$0xf]  ;;  %v10468_v22 = vld [vmem:[%s16144_s5 + $0x4cc] sm:$0xf0] }
 0x1cc   :  { %v1100_v44 = vpop.f32.mrf.mxu2  ;;  %v7793_v14 = vld [vmem:[%s16144_s5 + $0x5c0] sm:$0xf]  ;;  %v10500_v27 = vld [vmem:[%s16144_s5 + $0x5cc] sm:$0xf0] }
 0x1cd   :  { %2077 = vmatpush.bf16.msra.mxu1 %v7322_v40  ;;  %2090 = vmatpush.bf16.msrb.mxu3 %v7450_v1  ;;  %v1101_v62 = vadd.f32 %v1100_v44, %v12511_v25  ;;  %v7273_v25 = vld [vmem:[%s16144_s5 + $0x28] sm:$0xf]  ;;  %v7294_v40 = vor.u32 %v10323_v23, %v7291_v52  ;;  %v7422_v1 = vor.u32 %v10355_v49, %v7419_v51  ;;  %v10315_v44 = vld [vmem:[%s16144_s5 + $0xc] sm:$0xf]  ;;  %v10472_v23 = vld [vmem:[%s16144_s5 + $0x4ec] sm:$0xf0] }
 0x1ce   :  { %2103 = vmatpush.bf16.msra.mxu0 %v7326_v8  ;;  %2116 = vmatpush.bf16.msra.mxu2 %v7454_v7  ;;  %v7275_v7 = vld [vmem:[%s16144_s5 + $0x38] sm:$0xf0]  ;;  %v7274_v13 = vor.u32 %v10321_v18, %v7273_v25  ;;  %v10504_v52 = vld [vmem:[%s16144_s5 + $0x5ec] sm:$0xf0]  ;;  %v10470_v49 = vld [vmem:[%s16144_s5 + $0x4e4] sm:$0xf]  ;;  %v7258_v51 = vor.u32 %v10317_v17, %v7257_v16 }
 0x1cf   :  { %v1122_v57 = vmax.f32 %v1101_v62, 0.0  ;;  %v7278_v26 = vor.u32 %v10319_v3, %v7275_v7  ;;  %v7809_v62 = vld [vmem:[%s16144_s5 + $0x5e0] sm:$0xf]  ;;  %v10466_v16 = vld [vmem:[%s16144_s5 + $0x4c4] sm:$0xf] }
 0x1d0   :  { %v7795_v17 = vld [vmem:[%s16144_s5 + $0x5d0] sm:$0xf0] }
 0x1d1   :  { %2078 = vmatpush.bf16.msra.mxu1 %v7306_v5  ;;  %2091 = vmatpush.bf16.msrb.mxu3 %v7434_v20  ;;  %v12634_v8 = vpack.c.bf16 %v1122_v57, %v1121_v53  ;;  %v7385_v5 = vld [vmem:[%s16144_s5 + $0x108] sm:$0xf]  ;;  %v10349_v20 = vld [vmem:[%s16144_s5 + $0x114] sm:$0xf0]  ;;  %v7683_v57 = vld [vmem:[%s16144_s5 + $0x4f0] sm:$0xf0] }
 0x1d2   :  { %2104 = vmatpush.bf16.msra.mxu0 %v7310_v30  ;;  %2117 = vmatpush.bf16.msra.mxu2 %v7438_v35  ;;  %v7259_v30 = vld [vmem:[%s16144_s5 + $0x18] sm:$0xf0]  ;;  %v10347_v35 = vld [vmem:[%s16144_s5 + $0x10c] sm:$0xf]  ;;  %v7386_v53 = vor.u32 %v10349_v20, %v7385_v5  ;;  %v7686_v3 = vor.u32 %v10470_v49, %v7683_v57  ;;  %v7666_v5 = vor.u32 %v10468_v22, %v7665_v15  ;;  %v10460_v57 = vld [vmem:[%s16144_s5 + $0x48c] sm:$0xf0] }
 0x1d3   :  { %v7262_v25 = vor.u32 %v10315_v44, %v7259_v30  ;;  %v7390_v18 = vor.u32 %v10347_v35, %v7387_v11  ;;  %v7794_v20 = vor.u32 %v10500_v27, %v7793_v14  ;;  %v7777_v35 = vld [vmem:[%s16144_s5 + $0x5a0] sm:$0xf]  ;;  %v10496_v11 = vld [vmem:[%s16144_s5 + $0x5ac] sm:$0xf0]  ;;  %v1018_v15 = vadd.f32 %v12182_v2, %v12207_v45 }
 0x1d4   :  { %v10456_v14 = vld [vmem:[%s16144_s5 + $0x46c] sm:$0xf0]  ;;  %v7745_v2 = vld [vmem:[%s16144_s5 + $0x560] sm:$0xf] }
 0x1d5   :  { %2079 = vmatpush.bf16.msra.mxu1 %v7290_v59  ;;  %2092 = vmatpush.bf16.msrb.mxu3 %v7418_v60  ;;  %v10502_v59 = vld [vmem:[%s16144_s5 + $0x5e4] sm:$0xf]  ;;  %v7811_v60 = vld [vmem:[%s16144_s5 + $0x5f0] sm:$0xf0] }
 0x1d6   :  { %2105 = vmatpush.bf16.msra.mxu0 %v7294_v40  ;;  %2118 = vmatpush.bf16.msra.mxu2 %v7422_v1  ;;  %v7682_v40 = vor.u32 %v10472_v23, %v7681_v12  ;;  %v7810_v1 = vor.u32 %v10504_v52, %v7809_v62  ;;  %v7814_v7 = vor.u32 %v10502_v59, %v7811_v60  ;;  %v10462_v12 = vld [vmem:[%s16144_s5 + $0x4a4] sm:$0xf]  ;;  %v7651_v23 = vld [vmem:[%s16144_s5 + $0x4b0] sm:$0xf0] }
 0x1d7   :  { %v10494_v62 = vld [vmem:[%s16144_s5 + $0x5a4] sm:$0xf]  ;;  %v7779_v52 = vld [vmem:[%s16144_s5 + $0x5b0] sm:$0xf0]  ;;  %v7654_v59 = vor.u32 %v10462_v12, %v7651_v23  ;;  %v10484_v23 = vld [vmem:[%s16144_s5 + $0x54c] sm:$0xf0] }
 0x1d8   :  { %v7782_v60 = vor.u32 %v10494_v62, %v7779_v52  ;;  %v10450_v62 = vld [vmem:[%s16144_s5 + $0x444] sm:$0xf]  ;;  %v7603_v52 = vld [vmem:[%s16144_s5 + $0x450] sm:$0xf0] }
 0x1d9   :  { %2080 = vmatpush.bf16.msra.mxu1 %v7274_v13  ;;  %2093 = vmatpush.bf16.msrb.mxu3 %v7402_v28  ;;  %v7667_v13 = vld [vmem:[%s16144_s5 + $0x4d0] sm:$0xf0]  ;;  %v10498_v28 = vld [vmem:[%s16144_s5 + $0x5c4] sm:$0xf] }
 0x1da   :  { %2106 = vmatpush.bf16.msra.mxu0 %v7278_v26  ;;  %2119 = vmatpush.bf16.msra.mxu2 %v7406_v39  ;;  %v7649_v26 = vld [vmem:[%s16144_s5 + $0x4a0] sm:$0xf]  ;;  %v10464_v39 = vld [vmem:[%s16144_s5 + $0x4ac] sm:$0xf0]  ;;  %v7670_v44 = vor.u32 %v10466_v16, %v7667_v13  ;;  %v7798_v30 = vor.u32 %v10498_v28, %v7795_v17  ;;  %v10454_v28 = vld [vmem:[%s16144_s5 + $0x464] sm:$0xf]  ;;  %v1052_v17 = vadd.f32 %v12202_v43, %v1018_v15 }
 0x1db   :  { %v7650_v49 = vor.u32 %v10464_v39, %v7649_v26  ;;  %v10488_v13 = vld [vmem:[%s16144_s5 + $0x56c] sm:$0xf0]  ;;  %v7747_v26 = vld [vmem:[%s16144_s5 + $0x570] sm:$0xf0]  ;;  %v7601_v43 = vld [vmem:[%s16144_s5 + $0x440] sm:$0xf] }
 0x1dc   :  { %v1086_v39 = vadd.f32 %v12243_v10, %v1052_v17  ;;  %v7729_v10 = vld [vmem:[%s16144_s5 + $0x540] sm:$0xf]  ;;  %v10478_v15 = vld [vmem:[%s16144_s5 + $0x524] sm:$0xf] }
 0x1dd   :  { %2081 = vmatpush.bf16.msra.mxu1 %v7258_v51  ;;  %2094 = vmatpush.bf16.msrb.mxu3 %v7386_v53  ;;  %v7778_v51 = vor.u32 %v10496_v11, %v7777_v35  ;;  %v7633_v53 = vld [vmem:[%s16144_s5 + $0x480] sm:$0xf]  ;;  %v10452_v35 = vld [vmem:[%s16144_s5 + $0x44c] sm:$0xf0] }
 0x1de   :  { %2107 = vmatpush.bf16.msra.mxu0 %v7262_v25  ;;  %2120 = vmatpush.bf16.msra.mxu2 %v7390_v18  ;;  %v10458_v25 = vld [vmem:[%s16144_s5 + $0x484] sm:$0xf]  ;;  %v7635_v18 = vld [vmem:[%s16144_s5 + $0x490] sm:$0xf0]  ;;  %v7634_v22 = vor.u32 %v10460_v57, %v7633_v53  ;;  %v984_v53 = vadd.f32 %v12212_v55, %v11848_v9  ;;  %v1110_v57 = vmax.f32 %v1086_v39, 0.0 }
 0x1df   :  { %v7638_v27 = vor.u32 %v10458_v25, %v7635_v18  ;;  %v7606_v25 = vor.u32 %v10450_v62, %v7603_v52  ;;  %v7713_v9 = vld [vmem:[%s16144_s5 + $0x520] sm:$0xf]  ;;  %v10480_v55 = vld [vmem:[%s16144_s5 + $0x52c] sm:$0xf0]  ;;  %v10474_v39 = vld [vmem:[%s16144_s5 + $0x504] sm:$0xf] }
 0x1e0   :  { %2082 = vmatmul.bf16.vlgmr.msra.gmra.mxu1 %v12505_v61  ;;  %2095 = vmatmul.bf16.vlgmr.msrb.gmra.mxu3 %v12507_v24  ;;  %v7691_v62 = vld [vmem:[%s16144_s5 + $0x4f8] sm:$0xf0]  ;;  %v10503_v52 = vld [vmem:[%s16144_s5 + $0x5ec] sm:$0xf] }
 0x1e1   :  { %2518 = vmatpush.bf16.msrb.mxu1 %v7682_v40  ;;  %2531 = vmatpush.bf16.msra.mxu3 %v7810_v1  ;;  %v10490_v40 = vld [vmem:[%s16144_s5 + $0x584] sm:$0xf]  ;;  %v7763_v1 = vld [vmem:[%s16144_s5 + $0x590] sm:$0xf0] }
 0x1e2   :  { %2544 = vmatpush.bf16.msrb.mxu0 %v7686_v3  ;;  %2557 = vmatpush.bf16.msrb.mxu2 %v7814_v7  ;;  %v7617_v7 = vld [vmem:[%s16144_s5 + $0x460] sm:$0xf]  ;;  %v7766_v16 = vor.u32 %v10490_v40, %v7763_v1  ;;  %v10446_v40 = vld [vmem:[%s16144_s5 + $0x424] sm:$0xf]  ;;  %v7587_v1 = vld [vmem:[%s16144_s5 + $0x430] sm:$0xf0] }
 0x1e3   :  { %2108 = vmatmul.bf16.vlgmr.msra.gmra.mxu0 %v12505_v61  ;;  %2121 = vmatmul.bf16.vlgmr.msra.gmra.mxu2 %v12507_v24  ;;  %v7761_v61 = vld [vmem:[%s16144_s5 + $0x580] sm:$0xf]  ;;  %v10492_v24 = vld [vmem:[%s16144_s5 + $0x58c] sm:$0xf0]  ;;  %v7590_v17 = vor.u32 %v10446_v40, %v7587_v1  ;;  %v10501_v40 = vld [vmem:[%s16144_s5 + $0x5d4] sm:$0xf0] }
 0x1e4   :  { %v7762_v3 = vor.u32 %v10492_v24, %v7761_v61  ;;  %v7585_v61 = vld [vmem:[%s16144_s5 + $0x420] sm:$0xf]  ;;  %v10448_v24 = vld [vmem:[%s16144_s5 + $0x42c] sm:$0xf0]  ;;  %v10467_v1 = vld [vmem:[%s16144_s5 + $0x4cc] sm:$0xf] }
 0x1e5   :  { %2519 = vmatpush.bf16.msrb.mxu1 %v7666_v5  ;;  %2532 = vmatpush.bf16.msra.mxu3 %v7794_v20  ;;  %v7619_v5 = vld [vmem:[%s16144_s5 + $0x470] sm:$0xf0]  ;;  %v10486_v20 = vld [vmem:[%s16144_s5 + $0x564] sm:$0xf] }
 0x1e6   :  { %2545 = vmatpush.bf16.msrb.mxu0 %v7670_v44  ;;  %2558 = vmatpush.bf16.msrb.mxu2 %v7798_v30  ;;  %v7618_v44 = vor.u32 %v10456_v14, %v7617_v7  ;;  %v7746_v30 = vor.u32 %v10488_v13, %v7745_v2  ;;  %v7622_v11 = vor.u32 %v10454_v28, %v7619_v5  ;;  %v7569_v7 = vld [vmem:[%s16144_s5 + $0x400] sm:$0xf]  ;;  %v10476_v13 = vld [vmem:[%s16144_s5 + $0x50c] sm:$0xf0] }
 0x1e7   :  { %v7750_v12 = vor.u32 %v10486_v20, %v7747_v26  ;;  %v7586_v14 = vor.u32 %v10448_v24, %v7585_v61  ;;  %v7697_v2 = vld [vmem:[%s16144_s5 + $0x500] sm:$0xf]  ;;  %v10442_v20 = vld [vmem:[%s16144_s5 + $0x404] sm:$0xf]  ;;  %v7571_v26 = vld [vmem:[%s16144_s5 + $0x410] sm:$0xf0] }
 0x1e8   :  { %v7673_v24 = vld [vmem:[%s16144_s5 + $0x4c8] sm:$0xf] }
 0x1e9   :  { %2520 = vmatpush.bf16.msrb.mxu1 %v7650_v49  ;;  %2533 = vmatpush.bf16.msra.mxu3 %v7778_v51  ;;  %v10482_v49 = vld [vmem:[%s16144_s5 + $0x544] sm:$0xf]  ;;  %v7731_v51 = vld [vmem:[%s16144_s5 + $0x550] sm:$0xf0] }
 0x1ea   :  { %2546 = vmatpush.bf16.msrb.mxu0 %v7654_v59  ;;  %2559 = vmatpush.bf16.msrb.mxu2 %v7782_v60  ;;  %v7602_v59 = vor.u32 %v10452_v35, %v7601_v43  ;;  %v7730_v60 = vor.u32 %v10484_v23, %v7729_v10  ;;  %v7734_v18 = vor.u32 %v10482_v49, %v7731_v51  ;;  %v10473_v43 = vld [vmem:[%s16144_s5 + $0x4f4] sm:$0xf0]  ;;  %v7817_v35 = vld [vmem:[%s16144_s5 + $0x5e8] sm:$0xf]  ;;  %v7819_v49 = vld [vmem:[%s16144_s5 + $0x5f8] sm:$0xf0] }
 0x1eb   :  { %v7698_v23 = vor.u32 %v10476_v13, %v7697_v2  ;;  %v7657_v2 = vld [vmem:[%s16144_s5 + $0x4a8] sm:$0xf]  ;;  %v10465_v13 = vld [vmem:[%s16144_s5 + $0x4b4] sm:$0xf0] }
 0x1ed   :  { %2521 = vmatpush.bf16.msrb.mxu1 %v7634_v22  ;;  %2534 = vmatpush.bf16.msra.mxu3 %v7762_v3  ;;  %v7715_v22 = vld [vmem:[%s16144_s5 + $0x530] sm:$0xf0]  ;;  %v1109_v3 = vmax.f32 %v984_v53, 0.0  ;;  %v7574_v53 = vor.u32 %v10442_v20, %v7571_v26  ;;  %v10497_v20 = vld [vmem:[%s16144_s5 + $0x5b4] sm:$0xf0] }
 0x1ee   :  { %2547 = vmatpush.bf16.msrb.mxu0 %v7638_v27  ;;  %2560 = vmatpush.bf16.msrb.mxu2 %v7766_v16  ;;  %v7714_v27 = vor.u32 %v10480_v55, %v7713_v9  ;;  %v10444_v16 = vld [vmem:[%s16144_s5 + $0x40c] sm:$0xf0]  ;;  %v7718_v5 = vor.u32 %v10478_v15, %v7715_v22  ;;  %v7822_v9 = vor.u32 %v10503_v52, %v7819_v49  ;;  %v7801_v55 = vld [vmem:[%s16144_s5 + $0x5c8] sm:$0xf]  ;;  %v7675_v15 = vld [vmem:[%s16144_s5 + $0x4d8] sm:$0xf0] }
 0x1ef   :  { %v1127_v28 = vpack.c.bf16 %v1110_v57, %v1109_v3  ;;  %v7570_v10 = vor.u32 %v10444_v16, %v7569_v7  ;;  %v10499_v22 = vld [vmem:[%s16144_s5 + $0x5cc] sm:$0xf]  ;;  %v7803_v3 = vld [vmem:[%s16144_s5 + $0x5d8] sm:$0xf0]  ;;  %v7802_v16 = vor.u32 %v10501_v40, %v7801_v55  ;;  %v10493_v52 = vld [vmem:[%s16144_s5 + $0x594] sm:$0xf0] }
 0x1f0   :  { %v10463_v26 = vld [vmem:[%s16144_s5 + $0x4ac] sm:$0xf]  ;;  %v10489_v55 = vld [vmem:[%s16144_s5 + $0x574] sm:$0xf0] }
 0x1f1   :  { %2522 = vmatpush.bf16.msrb.mxu1 %v7618_v44  ;;  %2535 = vmatpush.bf16.msra.mxu3 %v7746_v30  ;;  %v7699_v44 = vld [vmem:[%s16144_s5 + $0x510] sm:$0xf0]  ;;  %v7689_v30 = vld [vmem:[%s16144_s5 + $0x4e8] sm:$0xf]  ;;  %v2192_v51 = vunpack.c.l.b16 %v1127_v28  ;;  %v10459_v49 = vld [vmem:[%s16144_s5 + $0x48c] sm:$0xf] }
 0x1f2   :  { %2548 = vmatpush.bf16.msrb.mxu0 %v7622_v11  ;;  %2561 = vmatpush.bf16.msrb.mxu2 %v7750_v12  ;;  %v10505_v11 = vld [vmem:[%s16144_s5 + $0x5f4] sm:$0xf0]  ;;  %v10471_v12 = vld [vmem:[%s16144_s5 + $0x4ec] sm:$0xf]  ;;  %v7702_v57 = vor.u32 %v10474_v39, %v7699_v44  ;;  %v7659_v39 = vld [vmem:[%s16144_s5 + $0x4b8] sm:$0xf0] }
 0x1f3   :  { %v7818_v61 = vor.u32 %v10505_v11, %v7817_v35  ;;  %v12919_v7 = vpack.c.b16 %v2192_v51, %v2192_v51  ;;  %v10495_v44 = vld [vmem:[%s16144_s5 + $0x5ac] sm:$0xf]  ;;  %v7641_v11 = vld [vmem:[%s16144_s5 + $0x488] sm:$0xf]  ;;  %v7643_v51 = vld [vmem:[%s16144_s5 + $0x498] sm:$0xf0] }
 0x1f4   :  { %v10455_v40 = vld [vmem:[%s16144_s5 + $0x46c] sm:$0xf] }
 0x1f5   :  { %2523 = vmatpush.bf16.msrb.mxu1 %v7602_v59  ;;  %2536 = vmatpush.bf16.msra.mxu3 %v7730_v60  ;;  %v2193_v59 = vunpack.c.h.b16 %v1127_v28  ;;  %v7690_v60 = vor.u32 %v10473_v43, %v7689_v30  ;;  %v7678_v28 = vor.u32 %v10467_v1, %v7675_v15  ;;  %v7787_v30 = vld [vmem:[%s16144_s5 + $0x5b8] sm:$0xf0]  ;;  %v7658_v43 = vor.u32 %v10465_v13, %v7657_v2  ;;  %v10487_v15 = vld [vmem:[%s16144_s5 + $0x56c] sm:$0xf]  ;;  %v10453_v2 = vld [vmem:[%s16144_s5 + $0x454] sm:$0xf0] }
 0x1f6   :  { %2549 = vmatpush.bf16.msrb.mxu0 %v7606_v25  ;;  %2562 = vmatpush.bf16.msrb.mxu2 %v7734_v18  ;;  %v10469_v25 = vld [vmem:[%s16144_s5 + $0x4d4] sm:$0xf0]  ;;  %v7694_v18 = vor.u32 %v10471_v12, %v7691_v62  ;;  %v7769_v62 = vld [vmem:[%s16144_s5 + $0x588] sm:$0xf]  ;;  %v7627_v1 = vld [vmem:[%s16144_s5 + $0x478] sm:$0xf0] }
 0x1f7   :  { %v10461_v12 = vld [vmem:[%s16144_s5 + $0x494] sm:$0xf0]  ;;  %v7630_v13 = vor.u32 %v10455_v40, %v7627_v1  ;;  %v7579_v40 = vld [vmem:[%s16144_s5 + $0x418] sm:$0xf0]  ;;  %v10475_v1 = vld [vmem:[%s16144_s5 + $0x50c] sm:$0xf] }
 0x1f9   :  { %2524 = vmatpush.bf16.msrb.mxu1 %v7586_v14  ;;  %2537 = vmatpush.bf16.msra.mxu3 %v7714_v27  ;;  %v12921_v14 = vpack.c.b16 %v2193_v59, %v2193_v59  ;;  %v7674_v27 = vor.u32 %v10469_v25, %v7673_v24  ;;  %v7642_v59 = vor.u32 %v10461_v12, %v7641_v11  ;;  %v10457_v24 = vld [vmem:[%s16144_s5 + $0x474] sm:$0xf0] }
 0x1fa   :  { %2550 = vmatpush.bf16.msrb.mxu0 %v7590_v17  ;;  %2563 = vmatpush.bf16.msrb.mxu2 %v7718_v5  ;;  %v7806_v17 = vor.u32 %v10499_v22, %v7803_v3  ;;  %v7785_v5 = vld [vmem:[%s16144_s5 + $0x5a8] sm:$0xf]  ;;  %v7646_v25 = vor.u32 %v10459_v49, %v7643_v51  ;;  %v7755_v22 = vld [vmem:[%s16144_s5 + $0x578] sm:$0xf0]  ;;  %v10449_v11 = vld [vmem:[%s16144_s5 + $0x434] sm:$0xf0] }
 0x1fb   :  { %v7786_v35 = vor.u32 %v10497_v20, %v7785_v5  ;;  %v10485_v5 = vld [vmem:[%s16144_s5 + $0x554] sm:$0xf0]  ;;  %v10451_v20 = vld [vmem:[%s16144_s5 + $0x44c] sm:$0xf]  ;;  %v7595_v49 = vld [vmem:[%s16144_s5 + $0x438] sm:$0xf0] }
 0x1fc   :  { %v10479_v51 = vld [vmem:[%s16144_s5 + $0x52c] sm:$0xf] }
 0x1fd   :  { %2525 = vmatpush.bf16.msrb.mxu1 %v7570_v10  ;;  %2538 = vmatpush.bf16.msra.mxu3 %v7698_v23  ;;  %v7662_v10 = vor.u32 %v10463_v26, %v7659_v39  ;;  %v7790_v23 = vor.u32 %v10495_v44, %v7787_v30  ;;  %v7611_v26 = vld [vmem:[%s16144_s5 + $0x458] sm:$0xf0]  ;;  %v10483_v39 = vld [vmem:[%s16144_s5 + $0x54c] sm:$0xf] }
 0x1fe   :  { %2551 = vmatpush.bf16.msrb.mxu0 %v7574_v53  ;;  %2564 = vmatpush.bf16.msrb.mxu2 %v7702_v57  ;;  %v10491_v53 = vld [vmem:[%s16144_s5 + $0x58c] sm:$0xf]  ;;  %v7771_v57 = vld [vmem:[%s16144_s5 + $0x598] sm:$0xf0]  ;;  %v7614_v12 = vor.u32 %v10451_v20, %v7611_v26  ;;  %v8131_v20 = vld [vmem:[%s16144_s5 + $0x7f0] sm:$0xf0]  ;;  %v13095_v26 = vpop.f32.mrf.mxu1 }
 0x1ff   :  { %v7739_v44 = vld [vmem:[%s16144_s5 + $0x558] sm:$0xf0] }
 0x200   :  { %2526 = vmatmul.bf16.vlgmr.msrb.gmra.mxu1 %v12919_v7  ;;  %2539 = vmatmul.bf16.vlgmr.msra.gmra.mxu3 %v12921_v14 }
 0x201   :  { %2570 = vmatpush.bf16.msra.mxu1 %v7690_v60  ;;  %2583 = vmatpush.bf16.msrb.mxu3 %v7818_v61  ;;  %v7770_v60 = vor.u32 %v10493_v52, %v7769_v62  ;;  %v7625_v61 = vld [vmem:[%s16144_s5 + $0x468] sm:$0xf]  ;;  %v10481_v62 = vld [vmem:[%s16144_s5 + $0x534] sm:$0xf0]  ;;  %v10447_v52 = vld [vmem:[%s16144_s5 + $0x42c] sm:$0xf] }
 0x202   :  { %2596 = vmatpush.bf16.msra.mxu0 %v7694_v18  ;;  %2609 = vmatpush.bf16.msra.mxu2 %v7822_v9  ;;  %v7774_v18 = vor.u32 %v10491_v53, %v7771_v57  ;;  %v7753_v9 = vld [vmem:[%s16144_s5 + $0x568] sm:$0xf]  ;;  %v7626_v3 = vor.u32 %v10457_v24, %v7625_v61  ;;  %v7723_v53 = vld [vmem:[%s16144_s5 + $0x538] sm:$0xf0]  ;;  %v10445_v61 = vld [vmem:[%s16144_s5 + $0x414] sm:$0xf0] }
 0x203   :  { %2552 = vmatmul.bf16.vlgmr.msrb.gmra.mxu0 %v12919_v7  ;;  %2565 = vmatmul.bf16.vlgmr.msrb.gmra.mxu2 %v12921_v14  ;;  %v7577_v57 = vld [vmem:[%s16144_s5 + $0x408] sm:$0xf] }
 0x204   :  { %v7705_v24 = vld [vmem:[%s16144_s5 + $0x508] sm:$0xf] }
 0x205   :  { %2571 = vmatpush.bf16.msra.mxu1 %v7674_v27  ;;  %2584 = vmatpush.bf16.msrb.mxu3 %v7802_v16  ;;  %v7754_v27 = vor.u32 %v10489_v55, %v7753_v9  ;;  %v7609_v16 = vld [vmem:[%s16144_s5 + $0x448] sm:$0xf]  ;;  %v7726_v9 = vor.u32 %v10479_v51, %v7723_v53  ;;  %v10443_v55 = vld [vmem:[%s16144_s5 + $0x40c] sm:$0xf]  ;;  %v7987_v51 = vld [vmem:[%s16144_s5 + $0x6d0] sm:$0xf0] }
 0x206   :  { %2597 = vmatpush.bf16.msra.mxu0 %v7678_v28  ;;  %2610 = vmatpush.bf16.msra.mxu2 %v7806_v17  ;;  %v7758_v28 = vor.u32 %v10487_v15, %v7755_v22  ;;  %v7737_v17 = vld [vmem:[%s16144_s5 + $0x548] sm:$0xf]  ;;  %v7610_v30 = vor.u32 %v10453_v2, %v7609_v16  ;;  %v7707_v15 = vld [vmem:[%s16144_s5 + $0x518] sm:$0xf0]  ;;  %v8001_v22 = vld [vmem:[%s16144_s5 + $0x6e0] sm:$0xf] }
 0x207   :  { %v10568_v16 = vld [vmem:[%s16144_s5 + $0x7ec] sm:$0xf0]  ;;  %v10534_v2 = vld [vmem:[%s16144_s5 + $0x6e4] sm:$0xf] }
 0x208   :  { %v10562_v53 = vld [vmem:[%s16144_s5 + $0x7c4] sm:$0xf] }
 0x209   :  { %2572 = vmatpush.bf16.msra.mxu1 %v7658_v43  ;;  %2585 = vmatpush.bf16.msrb.mxu3 %v7786_v35  ;;  %v7738_v43 = vor.u32 %v10485_v5, %v7737_v17  ;;  %v7593_v35 = vld [vmem:[%s16144_s5 + $0x428] sm:$0xf]  ;;  %v8003_v17 = vld [vmem:[%s16144_s5 + $0x6f0] sm:$0xf0]  ;;  %v10566_v5 = vld [vmem:[%s16144_s5 + $0x7e4] sm:$0xf] }
 0x20a   :  { %2598 = vmatpush.bf16.msra.mxu0 %v7662_v10  ;;  %2611 = vmatpush.bf16.msra.mxu2 %v7790_v23  ;;  %v7742_v10 = vor.u32 %v10483_v39, %v7739_v44  ;;  %v7721_v23 = vld [vmem:[%s16144_s5 + $0x528] sm:$0xf]  ;;  %v7582_v39 = vor.u32 %v10443_v55, %v7579_v40  ;;  %v7710_v44 = vor.u32 %v10475_v1, %v7707_v15  ;;  %v8097_v55 = vld [vmem:[%s16144_s5 + $0x7a0] sm:$0xf]  ;;  %v10560_v40 = vld [vmem:[%s16144_s5 + $0x7ac] sm:$0xf0]  ;;  %v13140_v15 = vpop.f32.mrf.mxu2 }
 0x20b   :  { %v10526_v1 = vld [vmem:[%s16144_s5 + $0x6a4] sm:$0xf] }
 0x20d   :  { %2573 = vmatpush.bf16.msra.mxu1 %v7642_v59  ;;  %2586 = vmatpush.bf16.msrb.mxu3 %v7770_v60  ;;  %v7594_v59 = vor.u32 %v10449_v11, %v7593_v35  ;;  %v7722_v60 = vor.u32 %v10481_v62, %v7721_v23  ;;  %v7985_v11 = vld [vmem:[%s16144_s5 + $0x6c0] sm:$0xf]  ;;  %v8134_v23 = vor.u32 %v10566_v5, %v8131_v20  ;;  %v10524_v5 = vld [vmem:[%s16144_s5 + $0x68c] sm:$0xf0] }
 0x20e   :  { %2599 = vmatpush.bf16.msra.mxu0 %v7646_v25  ;;  %2612 = vmatpush.bf16.msra.mxu2 %v7774_v18  ;;  %v10477_v25 = vld [vmem:[%s16144_s5 + $0x514] sm:$0xf0]  ;;  %v7598_v18 = vor.u32 %v10447_v52, %v7595_v49  ;;  %v8113_v62 = vld [vmem:[%s16144_s5 + $0x7c0] sm:$0xf]  ;;  %v10564_v52 = vld [vmem:[%s16144_s5 + $0x7cc] sm:$0xf0] }
 0x20f   :  { %v10530_v49 = vld [vmem:[%s16144_s5 + $0x6c4] sm:$0xf] }
 0x211   :  { %2574 = vmatpush.bf16.msra.mxu1 %v7626_v3  ;;  %2587 = vmatpush.bf16.msrb.mxu3 %v7754_v27  ;;  %v10536_v3 = vld [vmem:[%s16144_s5 + $0x6ec] sm:$0xf0]  ;;  %v8129_v27 = vld [vmem:[%s16144_s5 + $0x7e0] sm:$0xf] }
 0x212   :  { %2600 = vmatpush.bf16.msra.mxu0 %v7630_v13  ;;  %2613 = vmatpush.bf16.msra.mxu2 %v7758_v28  ;;  %v7578_v13 = vor.u32 %v10445_v61, %v7577_v57  ;;  %v7706_v28 = vor.u32 %v10477_v25, %v7705_v24  ;;  %v8130_v35 = vor.u32 %v10568_v16, %v8129_v27  ;;  %v8115_v57 = vld [vmem:[%s16144_s5 + $0x7d0] sm:$0xf0]  ;;  %v7969_v61 = vld [vmem:[%s16144_s5 + $0x6a0] sm:$0xf]  ;;  %v10528_v24 = vld [vmem:[%s16144_s5 + $0x6ac] sm:$0xf0]  ;;  %v13129_v25 = vpop.f32.mrf.mxu3 }
 0x213   :  { %v8099_v27 = vld [vmem:[%s16144_s5 + $0x7b0] sm:$0xf0] }
 0x215   :  { %2575 = vmatpush.bf16.msra.mxu1 %v7610_v30  ;;  %2588 = vmatpush.bf16.msrb.mxu3 %v7738_v43  ;;  %v13097_v30 = vpop.f32.mrf.mxu0  ;;  %v8002_v43 = vor.u32 %v10536_v3, %v8001_v22  ;;  %v7971_v22 = vld [vmem:[%s16144_s5 + $0x6b0] sm:$0xf0]  ;;  %v10558_v3 = vld [vmem:[%s16144_s5 + $0x7a4] sm:$0xf] }
 0x216   :  { %2601 = vmatpush.bf16.msra.mxu0 %v7614_v12  ;;  %2614 = vmatpush.bf16.msra.mxu2 %v7742_v10  ;;  %v10532_v12 = vld [vmem:[%s16144_s5 + $0x6cc] sm:$0xf0]  ;;  %v8006_v10 = vor.u32 %v10534_v2, %v8003_v17  ;;  %v7970_v2 = vor.u32 %v10528_v24, %v7969_v61  ;;  %v7953_v17 = vld [vmem:[%s16144_s5 + $0x680] sm:$0xf]  ;;  %v7974_v20 = vor.u32 %v10526_v1, %v7971_v22 }
 0x219   :  { %2576 = vmatpush.bf16.msra.mxu1 %v7594_v59  ;;  %2589 = vmatpush.bf16.msrb.mxu3 %v7722_v60  ;;  %v7986_v59 = vor.u32 %v10532_v12, %v7985_v11  ;;  %v8114_v60 = vor.u32 %v10564_v52, %v8113_v62  ;;  %v8083_v11 = vld [vmem:[%s16144_s5 + $0x790] sm:$0xf0]  ;;  %v1020_v12 = vadd.f32 %v12198_v29, %v12207_v45  ;;  %v7937_v62 = vld [vmem:[%s16144_s5 + $0x660] sm:$0xf]  ;;  %v10520_v52 = vld [vmem:[%s16144_s5 + $0x66c] sm:$0xf0] }
 0x21a   :  { %2602 = vmatpush.bf16.msra.mxu0 %v7598_v18  ;;  %2615 = vmatpush.bf16.msra.mxu2 %v7726_v9  ;;  %v7990_v18 = vor.u32 %v10530_v49, %v7987_v51  ;;  %v8118_v9 = vor.u32 %v10562_v53, %v8115_v57  ;;  %v8065_v29 = vld [vmem:[%s16144_s5 + $0x760] sm:$0xf]  ;;  %v10552_v57 = vld [vmem:[%s16144_s5 + $0x76c] sm:$0xf0] }
 0x21c   :  { %v1600_v16 = vpop.f32.mrf.mxu1 }
 0x21d   :  { %2577 = vmatpush.bf16.msra.mxu1 %v7578_v13  ;;  %2590 = vmatpush.bf16.msrb.mxu3 %v7706_v28  ;;  %v8098_v13 = vor.u32 %v10560_v40, %v8097_v55  ;;  %v1626_v28 = vpop.f32.mrf.mxu0  ;;  %v8067_v55 = vld [vmem:[%s16144_s5 + $0x770] sm:$0xf0]  ;;  %v918_v40 = vadd.f32 %v11797_v46, %v11763_v19 }
 0x21e   :  { %2603 = vmatpush.bf16.msra.mxu0 %v7582_v39  ;;  %2616 = vmatpush.bf16.msra.mxu2 %v7710_v44  ;;  %v10556_v39 = vld [vmem:[%s16144_s5 + $0x78c] sm:$0xf0]  ;;  %v10522_v44 = vld [vmem:[%s16144_s5 + $0x684] sm:$0xf] }
 0x21f   :  { %v952_v46 = vadd.f32 %v11892_v36, %v918_v40  ;;  %v7923_v36 = vld [vmem:[%s16144_s5 + $0x650] sm:$0xf0]  ;;  %v10508_v40 = vld [vmem:[%s16144_s5 + $0x60c] sm:$0xf0] }
 0x220   :  { %2578 = vmatmul.bf16.vlgmr.msra.gmra.mxu1 %v12919_v7  ;;  %2591 = vmatmul.bf16.vlgmr.msrb.gmra.mxu3 %v12921_v14 }
 0x221   :  { %3018 = vmatpush.bf16.msrb.mxu1 %v8002_v43  ;;  %3031 = vmatpush.bf16.msra.mxu3 %v8130_v35  ;;  %v7955_v43 = vld [vmem:[%s16144_s5 + $0x690] sm:$0xf0]  ;;  %v10554_v35 = vld [vmem:[%s16144_s5 + $0x784] sm:$0xf] }
 0x222   :  { %3044 = vmatpush.bf16.msrb.mxu0 %v8006_v10  ;;  %3057 = vmatpush.bf16.msrb.mxu2 %v8134_v23  ;;  %v7954_v10 = vor.u32 %v10524_v5, %v7953_v17  ;;  %v7958_v49 = vor.u32 %v10522_v44, %v7955_v43  ;;  %v8086_v51 = vor.u32 %v10554_v35, %v8083_v11  ;;  %v1613_v53 = vpop.f32.mrf.mxu3  ;;  %v10548_v5 = vld [vmem:[%s16144_s5 + $0x74c] sm:$0xf0]  ;;  %v7905_v11 = vld [vmem:[%s16144_s5 + $0x620] sm:$0xf] }
 0x223   :  { %2604 = vmatmul.bf16.vlgmr.msra.gmra.mxu0 %v12919_v7  ;;  %2617 = vmatmul.bf16.vlgmr.msra.gmra.mxu2 %v12921_v14  ;;  %v8102_v7 = vor.u32 %v10558_v3, %v8099_v27  ;;  %v8081_v14 = vld [vmem:[%s16144_s5 + $0x780] sm:$0xf]  ;;  %v13197_v61 = vadd.f32 %v1613_v53, %v1600_v16  ;;  %v1639_v24 = vpop.f32.mrf.mxu2  ;;  %v7938_v3 = vor.u32 %v10520_v52, %v7937_v62  ;;  %v10544_v52 = vld [vmem:[%s16144_s5 + $0x72c] sm:$0xf0]  ;;  %v7907_v53 = vld [vmem:[%s16144_s5 + $0x630] sm:$0xf0] }
 0x224   :  { %v8082_v23 = vor.u32 %v10556_v39, %v8081_v14  ;;  %v13210_v1 = vadd.f32 %v1639_v24, %v1626_v28  ;;  %v8066_v27 = vor.u32 %v10552_v57, %v8065_v29  ;;  %v8051_v14 = vld [vmem:[%s16144_s5 + $0x750] sm:$0xf0]  ;;  %v986_v39 = vadd.f32 %v12255_v31, %v952_v46  ;;  %v8033_v31 = vld [vmem:[%s16144_s5 + $0x720] sm:$0xf]  ;;  %v10542_v29 = vld [vmem:[%s16144_s5 + $0x724] sm:$0xf] }
 0x225   :  { %3019 = vmatpush.bf16.msrb.mxu1 %v7986_v59  ;;  %3032 = vmatpush.bf16.msra.mxu3 %v8114_v60  ;;  %v10518_v59 = vld [vmem:[%s16144_s5 + $0x664] sm:$0xf]  ;;  %v1054_v60 = vadd.f32 %v12214_v58, %v1020_v12  ;;  %v1602_v58 = vpop.f32.mrf.mxu1  ;;  %v1628_v16 = vpop.f32.mrf.mxu0  ;;  %v10512_v12 = vld [vmem:[%s16144_s5 + $0x62c] sm:$0xf0]  ;;  %v8035_v57 = vld [vmem:[%s16144_s5 + $0x730] sm:$0xf0] }
 0x226   :  { %3045 = vmatpush.bf16.msrb.mxu0 %v7990_v18  ;;  %3058 = vmatpush.bf16.msrb.mxu2 %v8118_v9  ;;  %v7939_v18 = vld [vmem:[%s16144_s5 + $0x670] sm:$0xf0]  ;;  %v10550_v9 = vld [vmem:[%s16144_s5 + $0x764] sm:$0xf]  ;;  %v7889_v24 = vld [vmem:[%s16144_s5 + $0x600] sm:$0xf]  ;;  %v8038_v16 = vor.u32 %v10542_v29, %v8035_v57 }
 0x227   :  { %v1088_v22 = vadd.f32 %v12305_v37, %v1054_v60  ;;  %v7942_v28 = vor.u32 %v10518_v59, %v7939_v18  ;;  %v8070_v17 = vor.u32 %v10550_v9, %v8067_v55  ;;  %v8049_v37 = vld [vmem:[%s16144_s5 + $0x740] sm:$0xf]  ;;  %v1111_v59 = vmax.f32 %v986_v39, 0.0  ;;  %v10538_v46 = vld [vmem:[%s16144_s5 + $0x704] sm:$0xf] }
 0x228   :  { %v8050_v35 = vor.u32 %v10548_v5, %v8049_v37  ;;  %v7906_v18 = vor.u32 %v10512_v12, %v7905_v11  ;;  %v8034_v9 = vor.u32 %v10544_v52, %v8033_v31  ;;  %v8017_v58 = vld [vmem:[%s16144_s5 + $0x700] sm:$0xf]  ;;  %v10537_v37 = vld [vmem:[%s16144_s5 + $0x6f4] sm:$0xf0]  ;;  %v8137_v5 = vld [vmem:[%s16144_s5 + $0x7e8] sm:$0xf] }
 0x229   :  { %3020 = vmatpush.bf16.msrb.mxu1 %v7970_v2  ;;  %3033 = vmatpush.bf16.msra.mxu3 %v8098_v13  ;;  %v7921_v2 = vld [vmem:[%s16144_s5 + $0x640] sm:$0xf]  ;;  %v10516_v13 = vld [vmem:[%s16144_s5 + $0x64c] sm:$0xf0]  ;;  %v1112_v44 = vmax.f32 %v1088_v22, 0.0 }
 0x22a   :  { %3046 = vmatpush.bf16.msrb.mxu0 %v7974_v20  ;;  %3059 = vmatpush.bf16.msrb.mxu2 %v8102_v7  ;;  %v10514_v20 = vld [vmem:[%s16144_s5 + $0x644] sm:$0xf]  ;;  %v7922_v43 = vor.u32 %v10516_v13, %v7921_v2  ;;  %v1615_v62 = vpop.f32.mrf.mxu3  ;;  %v10540_v22 = vld [vmem:[%s16144_s5 + $0x70c] sm:$0xf0]  ;;  %v7891_v13 = vld [vmem:[%s16144_s5 + $0x610] sm:$0xf0] }
 0x22b   :  { %v10546_v7 = vld [vmem:[%s16144_s5 + $0x744] sm:$0xf]  ;;  %v8011_v39 = vld [vmem:[%s16144_s5 + $0x6f8] sm:$0xf0] }
 0x22c   :  { %v10506_v2 = vld [vmem:[%s16144_s5 + $0x604] sm:$0xf] }
 0x22d   :  { %3021 = vmatpush.bf16.msrb.mxu1 %v7954_v10  ;;  %3034 = vmatpush.bf16.msra.mxu3 %v8082_v23  ;;  %v7926_v10 = vor.u32 %v10514_v20, %v7923_v36  ;;  %v8054_v23 = vor.u32 %v10546_v7, %v8051_v14  ;;  %v1652_v60 = vpop.f32.mrf.mxu1  ;;  %v1678_v55 = vpop.f32.mrf.mxu0  ;;  %v10569_v20 = vld [vmem:[%s16144_s5 + $0x7f4] sm:$0xf0]  ;;  %v10535_v36 = vld [vmem:[%s16144_s5 + $0x6ec] sm:$0xf]  ;;  %v7890_v7 = vor.u32 %v10508_v40, %v7889_v24 }
 0x22e   :  { %3047 = vmatpush.bf16.msrb.mxu0 %v7958_v49  ;;  %3060 = vmatpush.bf16.msrb.mxu2 %v8086_v51  ;;  %v10510_v49 = vld [vmem:[%s16144_s5 + $0x624] sm:$0xf]  ;;  %v1641_v51 = vpop.f32.mrf.mxu2  ;;  %v8018_v14 = vor.u32 %v10540_v22, %v8017_v58  ;;  %v7894_v11 = vor.u32 %v10506_v2, %v7891_v13  ;;  %v8138_v31 = vor.u32 %v10569_v20, %v8137_v5  ;;  %v10563_v58 = vld [vmem:[%s16144_s5 + $0x7cc] sm:$0xf]  ;;  %v8123_v22 = vld [vmem:[%s16144_s5 + $0x7d8] sm:$0xf0] }
 0x22f   :  { %v7993_v51 = vld [vmem:[%s16144_s5 + $0x6c8] sm:$0xf]  ;;  %v8014_v29 = vor.u32 %v10535_v36, %v8011_v39  ;;  %v10561_v5 = vld [vmem:[%s16144_s5 + $0x7b4] sm:$0xf0]  ;;  %v10527_v20 = vld [vmem:[%s16144_s5 + $0x6ac] sm:$0xf] }
 0x230   :  { %v7977_v13 = vld [vmem:[%s16144_s5 + $0x6a8] sm:$0xf]  ;;  %v7979_v36 = vld [vmem:[%s16144_s5 + $0x6b8] sm:$0xf0] }
 0x231   :  { %3022 = vmatpush.bf16.msrb.mxu1 %v7938_v3  ;;  %3035 = vmatpush.bf16.msra.mxu3 %v8066_v27  ;;  %v1128_v3 = vpack.c.bf16 %v1112_v44, %v1111_v59  ;;  %v7910_v27 = vor.u32 %v10510_v49, %v7907_v53  ;;  %v10567_v44 = vld [vmem:[%s16144_s5 + $0x7ec] sm:$0xf]  ;;  %v10533_v53 = vld [vmem:[%s16144_s5 + $0x6d4] sm:$0xf0] }
 0x232   :  { %3048 = vmatpush.bf16.msrb.mxu0 %v7942_v28  ;;  %3061 = vmatpush.bf16.msrb.mxu2 %v8070_v17  ;;  %v8019_v28 = vld [vmem:[%s16144_s5 + $0x710] sm:$0xf0]  ;;  %v8009_v17 = vld [vmem:[%s16144_s5 + $0x6e8] sm:$0xf] }
 0x233   :  { %v8022_v12 = vor.u32 %v10538_v46, %v8019_v28  ;;  %v8010_v62 = vor.u32 %v10537_v37, %v8009_v17  ;;  %v10529_v46 = vld [vmem:[%s16144_s5 + $0x6b4] sm:$0xf0]  ;;  %v8126_v17 = vor.u32 %v10563_v58, %v8123_v22  ;;  %v8105_v37 = vld [vmem:[%s16144_s5 + $0x7a8] sm:$0xf] }
 0x235   :  { %3023 = vmatpush.bf16.msrb.mxu1 %v7922_v43  ;;  %3036 = vmatpush.bf16.msra.mxu3 %v8050_v35  ;;  %v8139_v43 = vld [vmem:[%s16144_s5 + $0x7f8] sm:$0xf0]  ;;  %v2692_v35 = vunpack.c.l.b16 %v1128_v3  ;;  %v1654_v24 = vpop.f32.mrf.mxu1  ;;  %v1680_v40 = vpop.f32.mrf.mxu0 }
 0x236   :  { %3049 = vmatpush.bf16.msrb.mxu0 %v7926_v10  ;;  %3062 = vmatpush.bf16.msrb.mxu2 %v8054_v23  ;;  %v1665_v10 = vpop.f32.mrf.mxu3  ;;  %v2693_v23 = vunpack.c.h.b16 %v1128_v3  ;;  %v1691_v49 = vpop.f32.mrf.mxu2  ;;  %v8142_v57 = vor.u32 %v10567_v44, %v8139_v43  ;;  %v7978_v44 = vor.u32 %v10529_v46, %v7977_v13  ;;  %v8106_v43 = vor.u32 %v10561_v5, %v8105_v37  ;;  %v7945_v40 = vld [vmem:[%s16144_s5 + $0x668] sm:$0xf]  ;;  %v10519_v13 = vld [vmem:[%s16144_s5 + $0x66c] sm:$0xf]  ;;  %v7947_v46 = vld [vmem:[%s16144_s5 + $0x678] sm:$0xf0] }
 0x237   :  { %v13311_v52 = vadd.f32 %v1665_v10, %v1652_v60  ;;  %v13319_v59 = vadd.f32 %v1691_v49, %v1678_v55  ;;  %v10565_v60 = vld [vmem:[%s16144_s5 + $0x7d4] sm:$0xf0]  ;;  %v7995_v55 = vld [vmem:[%s16144_s5 + $0x6d8] sm:$0xf0]  ;;  %v13339_v3 = vpack.c.b16 %v2692_v35, %v2692_v35  ;;  %v7982_v10 = vor.u32 %v10527_v20, %v7979_v36  ;;  %v10523_v49 = vld [vmem:[%s16144_s5 + $0x68c] sm:$0xf] }
 0x238   :  { %v7929_v5 = vld [vmem:[%s16144_s5 + $0x648] sm:$0xf]  ;;  %v10517_v20 = vld [vmem:[%s16144_s5 + $0x654] sm:$0xf0]  ;;  %v7950_v36 = vor.u32 %v10519_v13, %v7947_v46 }
 0x239   :  { %3024 = vmatpush.bf16.msrb.mxu1 %v7906_v18  ;;  %3037 = vmatpush.bf16.msra.mxu3 %v8034_v9  ;;  %v8121_v18 = vld [vmem:[%s16144_s5 + $0x7c8] sm:$0xf]  ;;  %v10531_v9 = vld [vmem:[%s16144_s5 + $0x6cc] sm:$0xf]  ;;  %v10509_v13 = vld [vmem:[%s16144_s5 + $0x614] sm:$0xf0] }
 0x23a   :  { %3050 = vmatpush.bf16.msrb.mxu0 %v7910_v27  ;;  %3063 = vmatpush.bf16.msrb.mxu2 %v8038_v16  ;;  %v13341_v27 = vpack.c.b16 %v2693_v23, %v2693_v23  ;;  %v7994_v16 = vor.u32 %v10533_v53, %v7993_v51  ;;  %v8122_v2 = vor.u32 %v10565_v60, %v8121_v18  ;;  %v7963_v51 = vld [vmem:[%s16144_s5 + $0x698] sm:$0xf0]  ;;  %v10555_v53 = vld [vmem:[%s16144_s5 + $0x78c] sm:$0xf]  ;;  %v8025_v46 = vld [vmem:[%s16144_s5 + $0x708] sm:$0xf] }
 0x23b   :  { %v7998_v28 = vor.u32 %v10531_v9, %v7995_v55  ;;  %v10521_v55 = vld [vmem:[%s16144_s5 + $0x674] sm:$0xf0]  ;;  %v7966_v22 = vor.u32 %v10523_v49, %v7963_v51  ;;  %v7930_v51 = vor.u32 %v10517_v20, %v7929_v5  ;;  %v10507_v5 = vld [vmem:[%s16144_s5 + $0x60c] sm:$0xf]  ;;  %v7899_v20 = vld [vmem:[%s16144_s5 + $0x618] sm:$0xf0] }
 0x23d   :  { %3025 = vmatpush.bf16.msrb.mxu1 %v7890_v7  ;;  %3038 = vmatpush.bf16.msra.mxu3 %v8018_v14  ;;  %v10559_v7 = vld [vmem:[%s16144_s5 + $0x7ac] sm:$0xf]  ;;  %v8107_v14 = vld [vmem:[%s16144_s5 + $0x7b8] sm:$0xf0] }
 0x23e   :  { %3051 = vmatpush.bf16.msrb.mxu0 %v7894_v11  ;;  %3064 = vmatpush.bf16.msrb.mxu2 %v8022_v12  ;;  %v1667_v39 = vpop.f32.mrf.mxu3  ;;  %v1693_v35 = vpop.f32.mrf.mxu2  ;;  %v7961_v11 = vld [vmem:[%s16144_s5 + $0x688] sm:$0xf]  ;;  %v10525_v12 = vld [vmem:[%s16144_s5 + $0x694] sm:$0xf0]  ;;  %v8110_v23 = vor.u32 %v10559_v7, %v8107_v14 }
 0x23f   :  { %v7962_v60 = vor.u32 %v10525_v12, %v7961_v11  ;;  %v8057_v39 = vld [vmem:[%s16144_s5 + $0x748] sm:$0xf]  ;;  %v7931_v12 = vld [vmem:[%s16144_s5 + $0x658] sm:$0xf0] }
 0x240   :  { %3026 = vmatmul.bf16.vlgmr.msrb.gmra.mxu1 %v13339_v3  ;;  %3039 = vmatmul.bf16.vlgmr.msra.gmra.mxu3 %v13341_v27  ;;  %v2057_v18 = vpop.f32.mrf.mxu0 }
 0x241   :  { %3070 = vmatpush.bf16.msra.mxu1 %v8010_v62  ;;  %3083 = vmatpush.bf16.msrb.mxu3 %v8138_v31  ;;  %v8089_v62 = vld [vmem:[%s16144_s5 + $0x788] sm:$0xf]  ;;  %v10557_v31 = vld [vmem:[%s16144_s5 + $0x794] sm:$0xf0]  ;;  %v2058_v58 = vadd.f32 %v2057_v18, %v13210_v1  ;;  %v10551_v1 = vld [vmem:[%s16144_s5 + $0x76c] sm:$0xf] }
 0x242   :  { %3096 = vmatpush.bf16.msra.mxu0 %v8014_v29  ;;  %3109 = vmatpush.bf16.msra.mxu2 %v8142_v57  ;;  %v8091_v29 = vld [vmem:[%s16144_s5 + $0x798] sm:$0xf0]  ;;  %v2031_v57 = vpop.f32.mrf.mxu1  ;;  %v8090_v9 = vor.u32 %v10557_v31, %v8089_v62 }
 0x243   :  { %3052 = vmatmul.bf16.vlgmr.msrb.gmra.mxu0 %v13339_v3  ;;  %3065 = vmatmul.bf16.vlgmr.msrb.gmra.mxu2 %v13341_v27  ;;  %v2032_v24 = vadd.f32 %v2031_v57, %v13197_v61  ;;  %v8073_v61 = vld [vmem:[%s16144_s5 + $0x768] sm:$0xf]  ;;  %v10513_v57 = vld [vmem:[%s16144_s5 + $0x634] sm:$0xf0] }
 0x245   :  { %3071 = vmatpush.bf16.msra.mxu1 %v7994_v16  ;;  %3084 = vmatpush.bf16.msrb.mxu3 %v8122_v2  ;;  %v8094_v16 = vor.u32 %v10555_v53, %v8091_v29  ;;  %v10553_v2 = vld [vmem:[%s16144_s5 + $0x774] sm:$0xf0]  ;;  %v7913_v29 = vld [vmem:[%s16144_s5 + $0x628] sm:$0xf] }
 0x246   :  { %3097 = vmatpush.bf16.msra.mxu0 %v7998_v28  ;;  %3110 = vmatpush.bf16.msra.mxu2 %v8126_v17  ;;  %v8075_v28 = vld [vmem:[%s16144_s5 + $0x778] sm:$0xf0]  ;;  %v7946_v17 = vor.u32 %v10521_v55, %v7945_v40  ;;  %v8074_v37 = vor.u32 %v10553_v2, %v8073_v61  ;;  %v2044_v14 = vpop.f32.mrf.mxu3  ;;  %v2070_v11 = vpop.f32.mrf.mxu2  ;;  %v10511_v40 = vld [vmem:[%s16144_s5 + $0x62c] sm:$0xf]  ;;  %v7914_v61 = vor.u32 %v10513_v57, %v7913_v29 }
 0x247   :  { %v8078_v7 = vor.u32 %v10551_v1, %v8075_v28  ;;  %v13436_v35 = vadd.f32 %v2044_v14, %v2032_v24  ;;  %v13447_v62 = vadd.f32 %v2070_v11, %v2058_v58  ;;  %v7915_v55 = vld [vmem:[%s16144_s5 + $0x638] sm:$0xf0]  ;;  %v10543_v58 = vld [vmem:[%s16144_s5 + $0x72c] sm:$0xf]  ;;  %v10541_v1 = vld [vmem:[%s16144_s5 + $0x714] sm:$0xf0] }
 0x248   :  { %v2059_v49 = vpop.f32.mrf.mxu0  ;;  %v7918_v28 = vor.u32 %v10511_v40, %v7915_v55  ;;  %v8027_v14 = vld [vmem:[%s16144_s5 + $0x718] sm:$0xf0]  ;;  %v10632_v11 = vld [vmem:[%s16144_s5 + $0x9ec] sm:$0xf0]  ;;  %v8433_v55 = vld [vmem:[%s16144_s5 + $0x9c0] sm:$0xf] }
 0x249   :  { %3072 = vmatpush.bf16.msra.mxu1 %v7978_v44  ;;  %3085 = vmatpush.bf16.msrb.mxu3 %v8106_v43  ;;  %v10549_v44 = vld [vmem:[%s16144_s5 + $0x754] sm:$0xf0]  ;;  %v10515_v43 = vld [vmem:[%s16144_s5 + $0x64c] sm:$0xf]  ;;  %v10630_v49 = vld [vmem:[%s16144_s5 + $0x9e4] sm:$0xf] }
 0x24a   :  { %3098 = vmatpush.bf16.msra.mxu0 %v7982_v10  ;;  %3111 = vmatpush.bf16.msra.mxu2 %v8110_v23  ;;  %v10547_v10 = vld [vmem:[%s16144_s5 + $0x74c] sm:$0xf]  ;;  %v8059_v23 = vld [vmem:[%s16144_s5 + $0x758] sm:$0xf0]  ;;  %v2033_v31 = vpop.f32.mrf.mxu1  ;;  %v8058_v53 = vor.u32 %v10549_v44, %v8057_v39  ;;  %v7934_v24 = vor.u32 %v10515_v43, %v7931_v12  ;;  %v8321_v39 = vld [vmem:[%s16144_s5 + $0x8e0] sm:$0xf] }
 0x24b   :  { %v8062_v18 = vor.u32 %v10547_v10, %v8059_v23  ;;  %v10600_v44 = vld [vmem:[%s16144_s5 + $0x8ec] sm:$0xf0]  ;;  %v8449_v43 = vld [vmem:[%s16144_s5 + $0x9e0] sm:$0xf]  ;;  %v10598_v12 = vld [vmem:[%s16144_s5 + $0x8e4] sm:$0xf]  ;;  %v8026_v23 = vor.u32 %v10541_v1, %v8025_v46 }
 0x24c   :  { %v8323_v31 = vld [vmem:[%s16144_s5 + $0x8f0] sm:$0xf0]  ;;  %v8322_v57 = vor.u32 %v10600_v44, %v8321_v39  ;;  %v8289_v1 = vld [vmem:[%s16144_s5 + $0x8a0] sm:$0xf] }
 0x24d   :  { %3073 = vmatpush.bf16.msra.mxu1 %v7962_v60  ;;  %3086 = vmatpush.bf16.msrb.mxu3 %v8090_v9  ;;  %v8041_v60 = vld [vmem:[%s16144_s5 + $0x728] sm:$0xf]  ;;  %v10545_v9 = vld [vmem:[%s16144_s5 + $0x734] sm:$0xf0]  ;;  %v8419_v39 = vld [vmem:[%s16144_s5 + $0x9b0] sm:$0xf0] }
 0x24e   :  { %3099 = vmatpush.bf16.msra.mxu0 %v7966_v22  ;;  %3112 = vmatpush.bf16.msra.mxu2 %v8094_v16  ;;  %v8043_v22 = vld [vmem:[%s16144_s5 + $0x738] sm:$0xf0]  ;;  %v7897_v16 = vld [vmem:[%s16144_s5 + $0x608] sm:$0xf]  ;;  %v8042_v2 = vor.u32 %v10545_v9, %v8041_v60  ;;  %v10596_v60 = vld [vmem:[%s16144_s5 + $0x8cc] sm:$0xf0]  ;;  %v8326_v9 = vor.u32 %v10598_v12, %v8323_v31 }
 0x24f   :  { %v7898_v10 = vor.u32 %v10509_v13, %v7897_v16  ;;  %v8307_v16 = vld [vmem:[%s16144_s5 + $0x8d0] sm:$0xf0]  ;;  %v10588_v12 = vld [vmem:[%s16144_s5 + $0x88c] sm:$0xf0]  ;;  %v10586_v31 = vld [vmem:[%s16144_s5 + $0x884] sm:$0xf] }
 0x251   :  { %3074 = vmatpush.bf16.msra.mxu1 %v7946_v17  ;;  %3087 = vmatpush.bf16.msrb.mxu3 %v8074_v37  ;;  %v8046_v17 = vor.u32 %v10543_v58, %v8043_v22  ;;  %v2046_v37 = vpop.f32.mrf.mxu3  ;;  %v10628_v58 = vld [vmem:[%s16144_s5 + $0x9cc] sm:$0xf0]  ;;  %v10594_v22 = vld [vmem:[%s16144_s5 + $0x8c4] sm:$0xf] }
 0x252   :  { %3100 = vmatpush.bf16.msra.mxu0 %v7950_v36  ;;  %3113 = vmatpush.bf16.msra.mxu2 %v8078_v7  ;;  %v10539_v36 = vld [vmem:[%s16144_s5 + $0x70c] sm:$0xf]  ;;  %v2072_v7 = vpop.f32.mrf.mxu2  ;;  %v8434_v46 = vor.u32 %v10628_v58, %v8433_v55 }
 0x253   :  { %v8030_v29 = vor.u32 %v10539_v36, %v8027_v14  ;;  %v10590_v36 = vld [vmem:[%s16144_s5 + $0x8a4] sm:$0xf]  ;;  %v8291_v7 = vld [vmem:[%s16144_s5 + $0x8b0] sm:$0xf0] }
 0x254   :  { %v10622_v14 = vld [vmem:[%s16144_s5 + $0x9a4] sm:$0xf] }
 0x255   :  { %3075 = vmatpush.bf16.msra.mxu1 %v7930_v51  ;;  %3088 = vmatpush.bf16.msrb.mxu3 %v8058_v53  ;;  %v8451_v51 = vld [vmem:[%s16144_s5 + $0x9f0] sm:$0xf0]  ;;  %v7902_v53 = vor.u32 %v10507_v5, %v7899_v20  ;;  %v8417_v5 = vld [vmem:[%s16144_s5 + $0x9a0] sm:$0xf]  ;;  %v10624_v20 = vld [vmem:[%s16144_s5 + $0x9ac] sm:$0xf0] }
 0x256   :  { %3101 = vmatpush.bf16.msra.mxu0 %v7934_v24  ;;  %3114 = vmatpush.bf16.msra.mxu2 %v8062_v18  ;;  %v8450_v24 = vor.u32 %v10632_v11, %v8449_v43  ;;  %v8305_v18 = vld [vmem:[%s16144_s5 + $0x8c0] sm:$0xf]  ;;  %v8454_v40 = vor.u32 %v10630_v49, %v8451_v51  ;;  %v8418_v43 = vor.u32 %v10624_v20, %v8417_v5  ;;  %v8275_v49 = vld [vmem:[%s16144_s5 + $0x890] sm:$0xf0]  ;;  %v10618_v51 = vld [vmem:[%s16144_s5 + $0x984] sm:$0xf] }
 0x257   :  { %v8306_v13 = vor.u32 %v10596_v60, %v8305_v18  ;;  %v8273_v11 = vld [vmem:[%s16144_s5 + $0x880] sm:$0xf]  ;;  %v8278_v58 = vor.u32 %v10586_v31, %v8275_v49 }
 0x258   :  { %v8274_v18 = vor.u32 %v10588_v12, %v8273_v11  ;;  %v10610_v11 = vld [vmem:[%s16144_s5 + $0x944] sm:$0xf]  ;;  %v8371_v12 = vld [vmem:[%s16144_s5 + $0x950] sm:$0xf0]  ;;  %v8225_v49 = vld [vmem:[%s16144_s5 + $0x820] sm:$0xf] }
 0x259   :  { %3076 = vmatpush.bf16.msra.mxu1 %v7914_v61  ;;  %3089 = vmatpush.bf16.msrb.mxu3 %v8042_v2  ;;  %v10626_v61 = vld [vmem:[%s16144_s5 + $0x9c4] sm:$0xf]  ;;  %v8435_v2 = vld [vmem:[%s16144_s5 + $0x9d0] sm:$0xf0] }
 0x25a   :  { %3102 = vmatpush.bf16.msra.mxu0 %v7918_v28  ;;  %3115 = vmatpush.bf16.msra.mxu2 %v8046_v17  ;;  %v10592_v28 = vld [vmem:[%s16144_s5 + $0x8ac] sm:$0xf0]  ;;  %v8310_v17 = vor.u32 %v10594_v22, %v8307_v16  ;;  %v8438_v37 = vor.u32 %v10626_v61, %v8435_v2  ;;  %v10582_v61 = vld [vmem:[%s16144_s5 + $0x864] sm:$0xf]  ;;  %v8259_v2 = vld [vmem:[%s16144_s5 + $0x870] sm:$0xf0] }
 0x25b   :  { %v8290_v44 = vor.u32 %v10592_v28, %v8289_v1  ;;  %v10616_v16 = vld [vmem:[%s16144_s5 + $0x96c] sm:$0xf0]  ;;  %v8241_v28 = vld [vmem:[%s16144_s5 + $0x840] sm:$0xf] }
 0x25d   :  { %3077 = vmatpush.bf16.msra.mxu1 %v7898_v10  ;;  %3090 = vmatpush.bf16.msrb.mxu3 %v8026_v23  ;;  %v8294_v10 = vor.u32 %v10590_v36, %v8291_v7  ;;  %v8422_v23 = vor.u32 %v10622_v14, %v8419_v39  ;;  %v8369_v36 = vld [vmem:[%s16144_s5 + $0x940] sm:$0xf]  ;;  %v10612_v7 = vld [vmem:[%s16144_s5 + $0x94c] sm:$0xf0]  ;;  %v10578_v14 = vld [vmem:[%s16144_s5 + $0x844] sm:$0xf] }
 0x25e   :  { %3103 = vmatpush.bf16.msra.mxu0 %v7902_v53  ;;  %3116 = vmatpush.bf16.msra.mxu2 %v8030_v29  ;;  %v8403_v53 = vld [vmem:[%s16144_s5 + $0x990] sm:$0xf0]  ;;  %v2083_v29 = vpop.f32.mrf.mxu1  ;;  %v8370_v31 = vor.u32 %v10612_v7, %v8369_v36  ;;  %v8457_v36 = vld [vmem:[%s16144_s5 + $0x9e8] sm:$0xf]  ;;  %v10633_v7 = vld [vmem:[%s16144_s5 + $0x9f4] sm:$0xf0] }
 0x25f   :  { %v8406_v22 = vor.u32 %v10618_v51, %v8403_v53  ;;  %v10576_v51 = vld [vmem:[%s16144_s5 + $0x82c] sm:$0xf0] }
 0x260   :  { %3078 = vmatmul.bf16.vlgmr.msra.gmra.mxu1 %v13339_v3  ;;  %3091 = vmatmul.bf16.vlgmr.msrb.gmra.mxu3 %v13341_v27 }
 0x261   :  { %3518 = vmatpush.bf16.msrb.mxu1 %v8322_v57  ;;  %3531 = vmatpush.bf16.msra.mxu3 %v8450_v24  ;;  %v2084_v57 = vadd.f32 %v2083_v29, %v13311_v52  ;;  %v2109_v24 = vpop.f32.mrf.mxu0  ;;  %v8385_v52 = vld [vmem:[%s16144_s5 + $0x960] sm:$0xf]  ;;  %v8374_v29 = vor.u32 %v10610_v11, %v8371_v12  ;;  %v8331_v11 = vld [vmem:[%s16144_s5 + $0x8f8] sm:$0xf0]  ;;  %v10631_v12 = vld [vmem:[%s16144_s5 + $0x9ec] sm:$0xf] }
 0x262   :  { %3544 = vmatpush.bf16.msrb.mxu0 %v8326_v9  ;;  %3557 = vmatpush.bf16.msrb.mxu2 %v8454_v40  ;;  %v8257_v9 = vld [vmem:[%s16144_s5 + $0x860] sm:$0xf]  ;;  %v10584_v40 = vld [vmem:[%s16144_s5 + $0x86c] sm:$0xf0]  ;;  %v2110_v55 = vadd.f32 %v2109_v24, %v13319_v59  ;;  %v10614_v59 = vld [vmem:[%s16144_s5 + $0x964] sm:$0xf]  ;;  %v8386_v1 = vor.u32 %v10616_v16, %v8385_v52 }
 0x263   :  { %3104 = vmatmul.bf16.vlgmr.msra.gmra.mxu0 %v13339_v3  ;;  %3117 = vmatmul.bf16.vlgmr.msra.gmra.mxu2 %v13341_v27  ;;  %v8401_v3 = vld [vmem:[%s16144_s5 + $0x980] sm:$0xf]  ;;  %v10620_v27 = vld [vmem:[%s16144_s5 + $0x98c] sm:$0xf0]  ;;  %v2096_v20 = vpop.f32.mrf.mxu3 }
 0x264   :  { %v8402_v60 = vor.u32 %v10620_v27, %v8401_v3  ;;  %v13638_v39 = vadd.f32 %v2096_v20, %v2084_v57  ;;  %v8353_v57 = vld [vmem:[%s16144_s5 + $0x920] sm:$0xf]  ;;  %v10608_v24 = vld [vmem:[%s16144_s5 + $0x92c] sm:$0xf0]  ;;  %v10601_v20 = vld [vmem:[%s16144_s5 + $0x8f4] sm:$0xf0] }
 0x265   :  { %3519 = vmatpush.bf16.msrb.mxu1 %v8306_v13  ;;  %3532 = vmatpush.bf16.msra.mxu3 %v8434_v46  ;;  %v8387_v13 = vld [vmem:[%s16144_s5 + $0x970] sm:$0xf0]  ;;  %v8258_v46 = vor.u32 %v10584_v40, %v8257_v9  ;;  %v10606_v9 = vld [vmem:[%s16144_s5 + $0x924] sm:$0xf]  ;;  %v10572_v52 = vld [vmem:[%s16144_s5 + $0x80c] sm:$0xf0] }
 0x266   :  { %3545 = vmatpush.bf16.msrb.mxu0 %v8310_v17  ;;  %3558 = vmatpush.bf16.msrb.mxu2 %v8438_v37  ;;  %v10580_v17 = vld [vmem:[%s16144_s5 + $0x84c] sm:$0xf0]  ;;  %v8262_v37 = vor.u32 %v10582_v61, %v8259_v2  ;;  %v8390_v5 = vor.u32 %v10614_v59, %v8387_v13  ;;  %v8355_v40 = vld [vmem:[%s16144_s5 + $0x930] sm:$0xf0]  ;;  %v8337_v16 = vld [vmem:[%s16144_s5 + $0x900] sm:$0xf] }
 0x267   :  { %v8242_v27 = vor.u32 %v10580_v17, %v8241_v28  ;;  %v10604_v61 = vld [vmem:[%s16144_s5 + $0x90c] sm:$0xf0]  ;;  %v8358_v59 = vor.u32 %v10606_v9, %v8355_v40  ;;  %v10602_v28 = vld [vmem:[%s16144_s5 + $0x904] sm:$0xf]  ;;  %v10595_v9 = vld [vmem:[%s16144_s5 + $0x8cc] sm:$0xf] }
 0x268   :  { %v8315_v40 = vld [vmem:[%s16144_s5 + $0x8d8] sm:$0xf0] }
 0x269   :  { %3520 = vmatpush.bf16.msrb.mxu1 %v8290_v44  ;;  %3533 = vmatpush.bf16.msra.mxu3 %v8418_v43  ;;  %v2122_v44 = vpop.f32.mrf.mxu2  ;;  %v8243_v43 = vld [vmem:[%s16144_s5 + $0x850] sm:$0xf0]  ;;  %v2111_v3 = vpop.f32.mrf.mxu0 }
 0x26a   :  { %3546 = vmatpush.bf16.msrb.mxu0 %v8294_v10  ;;  %3559 = vmatpush.bf16.msrb.mxu2 %v8422_v23  ;;  %v13649_v10 = vadd.f32 %v2122_v44, %v2110_v55  ;;  %v2085_v23 = vpop.f32.mrf.mxu1  ;;  %v8246_v53 = vor.u32 %v10578_v14, %v8243_v43  ;;  %v8209_v55 = vld [vmem:[%s16144_s5 + $0x800] sm:$0xf]  ;;  %v10599_v14 = vld [vmem:[%s16144_s5 + $0x8ec] sm:$0xf]  ;;  %v8338_v43 = vor.u32 %v10604_v61, %v8337_v16  ;;  %v3192_v3 = vunpack.c.l.b16 %v12400_v4 }
 0x26b   :  { %v2098_v13 = vpop.f32.mrf.mxu3  ;;  %v8210_v44 = vor.u32 %v10572_v52, %v8209_v55  ;;  %v8459_v23 = vld [vmem:[%s16144_s5 + $0x9f8] sm:$0xf0]  ;;  %v10627_v55 = vld [vmem:[%s16144_s5 + $0x9cc] sm:$0xf] }
 0x26c   :  { %v8318_v13 = vor.u32 %v10595_v9, %v8315_v40  ;;  %v8393_v9 = vld [vmem:[%s16144_s5 + $0x968] sm:$0xf]  ;;  %v10617_v40 = vld [vmem:[%s16144_s5 + $0x974] sm:$0xf0] }
 0x26d   :  { %3521 = vmatpush.bf16.msrb.mxu1 %v8274_v18  ;;  %3534 = vmatpush.bf16.msra.mxu3 %v8402_v60  ;;  %v10574_v18 = vld [vmem:[%s16144_s5 + $0x824] sm:$0xf]  ;;  %v8227_v60 = vld [vmem:[%s16144_s5 + $0x830] sm:$0xf0] }
 0x26e   :  { %3547 = vmatpush.bf16.msrb.mxu0 %v8278_v58  ;;  %3560 = vmatpush.bf16.msrb.mxu2 %v8406_v22  ;;  %v8226_v58 = vor.u32 %v10576_v51, %v8225_v49  ;;  %v8354_v22 = vor.u32 %v10608_v24, %v8353_v57  ;;  %v8230_v2 = vor.u32 %v10574_v18, %v8227_v60  ;;  %v3193_v49 = vunpack.c.h.b16 %v12400_v4  ;;  %v10597_v57 = vld [vmem:[%s16144_s5 + $0x8d4] sm:$0xf0]  ;;  %v8441_v60 = vld [vmem:[%s16144_s5 + $0x9c8] sm:$0xf] }
 0x26f   :  { %v8334_v24 = vor.u32 %v10599_v14, %v8331_v11  ;;  %v8462_v18 = vor.u32 %v10631_v12, %v8459_v23  ;;  %v10629_v4 = vld [vmem:[%s16144_s5 + $0x9d4] sm:$0xf0]  ;;  %v8281_v14 = vld [vmem:[%s16144_s5 + $0x888] sm:$0xf] }
 0x270   :  { %v13751_v52 = vpack.c.b16 %v3193_v49, %v3193_v49  ;;  %v8442_v61 = vor.u32 %v10629_v4, %v8441_v60  ;;  %v8409_v12 = vld [vmem:[%s16144_s5 + $0x988] sm:$0xf]  ;;  %v10621_v23 = vld [vmem:[%s16144_s5 + $0x994] sm:$0xf0]  ;;  %v8411_v49 = vld [vmem:[%s16144_s5 + $0x998] sm:$0xf0] }
 0x271   :  { %3522 = vmatpush.bf16.msrb.mxu1 %v8258_v46  ;;  %3535 = vmatpush.bf16.msra.mxu3 %v8386_v1  ;;  %v10570_v46 = vld [vmem:[%s16144_s5 + $0x804] sm:$0xf]  ;;  %v8211_v1 = vld [vmem:[%s16144_s5 + $0x810] sm:$0xf0]  ;;  %v2124_v17 = vpop.f32.mrf.mxu2 }
 0x272   :  { %3548 = vmatpush.bf16.msrb.mxu0 %v8262_v37  ;;  %3561 = vmatpush.bf16.msrb.mxu2 %v8390_v5  ;;  %v8339_v37 = vld [vmem:[%s16144_s5 + $0x910] sm:$0xf0]  ;;  %v8329_v5 = vld [vmem:[%s16144_s5 + $0x8e8] sm:$0xf]  ;;  %v10591_v17 = vld [vmem:[%s16144_s5 + $0x8ac] sm:$0xf] }
 0x273   :  { %v8330_v51 = vor.u32 %v10601_v20, %v8329_v5  ;;  %v10623_v5 = vld [vmem:[%s16144_s5 + $0x9ac] sm:$0xf]  ;;  %v8427_v20 = vld [vmem:[%s16144_s5 + $0x9b8] sm:$0xf0] }
 0x274   :  { %v8430_v11 = vor.u32 %v10623_v5, %v8427_v20  ;;  %v10613_v5 = vld [vmem:[%s16144_s5 + $0x954] sm:$0xf0]  ;;  %v10579_v20 = vld [vmem:[%s16144_s5 + $0x84c] sm:$0xf] }
 0x275   :  { %3523 = vmatpush.bf16.msrb.mxu1 %v8242_v27  ;;  %3536 = vmatpush.bf16.msra.mxu3 %v8370_v31  ;;  %v8214_v27 = vor.u32 %v10570_v46, %v8211_v1  ;;  %v8342_v31 = vor.u32 %v10602_v28, %v8339_v37  ;;  %v8425_v1 = vld [vmem:[%s16144_s5 + $0x9a8] sm:$0xf]  ;;  %v10625_v28 = vld [vmem:[%s16144_s5 + $0x9b4] sm:$0xf0]  ;;  %v8299_v37 = vld [vmem:[%s16144_s5 + $0x8b8] sm:$0xf0] }
 0x276   :  { %3549 = vmatpush.bf16.msrb.mxu0 %v8246_v53  ;;  %3562 = vmatpush.bf16.msrb.mxu2 %v8374_v29  ;;  %v8458_v53 = vor.u32 %v10633_v7, %v8457_v36  ;;  %v8313_v29 = vld [vmem:[%s16144_s5 + $0x8c8] sm:$0xf]  ;;  %v8426_v7 = vor.u32 %v10625_v28, %v8425_v1 }
 0x277   :  { %v8314_v16 = vor.u32 %v10597_v57, %v8313_v29  ;;  %v8410_v57 = vor.u32 %v10621_v23, %v8409_v12 }
 0x279   :  { %3524 = vmatpush.bf16.msrb.mxu1 %v8226_v58  ;;  %3537 = vmatpush.bf16.msra.mxu3 %v8354_v22  ;;  %v8443_v58 = vld [vmem:[%s16144_s5 + $0x9d8] sm:$0xf0]  ;;  %v13749_v22 = vpack.c.b16 %v3192_v3, %v3192_v3  ;;  %v10587_v3 = vld [vmem:[%s16144_s5 + $0x88c] sm:$0xf] }
 0x27a   :  { %3550 = vmatpush.bf16.msrb.mxu0 %v8230_v2  ;;  %3563 = vmatpush.bf16.msrb.mxu2 %v8358_v59  ;;  %v8297_v2 = vld [vmem:[%s16144_s5 + $0x8a8] sm:$0xf]  ;;  %v10593_v59 = vld [vmem:[%s16144_s5 + $0x8b4] sm:$0xf0]  ;;  %v8446_v46 = vor.u32 %v10627_v55, %v8443_v58  ;;  %v10583_v55 = vld [vmem:[%s16144_s5 + $0x86c] sm:$0xf] }
 0x27b   :  { %v8298_v36 = vor.u32 %v10593_v59, %v8297_v2  ;;  %v8267_v58 = vld [vmem:[%s16144_s5 + $0x878] sm:$0xf0]  ;;  %v8394_v59 = vor.u32 %v10617_v40, %v8393_v9  ;;  %v8217_v9 = vld [vmem:[%s16144_s5 + $0x808] sm:$0xf] }
 0x27c   :  { %v8270_v1 = vor.u32 %v10583_v55, %v8267_v58  ;;  %v10573_v58 = vld [vmem:[%s16144_s5 + $0x814] sm:$0xf0] }
 0x27d   :  { %3525 = vmatpush.bf16.msrb.mxu1 %v8210_v44  ;;  %3538 = vmatpush.bf16.msra.mxu3 %v8338_v43  ;;  %v10589_v44 = vld [vmem:[%s16144_s5 + $0x894] sm:$0xf0]  ;;  %v8302_v43 = vor.u32 %v10591_v17, %v8299_v37  ;;  %v8377_v37 = vld [vmem:[%s16144_s5 + $0x948] sm:$0xf] }
 0x27e   :  { %3551 = vmatpush.bf16.msrb.mxu0 %v8214_v27  ;;  %3564 = vmatpush.bf16.msrb.mxu2 %v8342_v31  ;;  %v8283_v27 = vld [vmem:[%s16144_s5 + $0x898] sm:$0xf0]  ;;  %v10619_v31 = vld [vmem:[%s16144_s5 + $0x98c] sm:$0xf]  ;;  %v8282_v29 = vor.u32 %v10589_v44, %v8281_v14 }
 0x27f   :  { %v8286_v60 = vor.u32 %v10587_v3, %v8283_v27  ;;  %v8414_v4 = vor.u32 %v10619_v31, %v8411_v49  ;;  %v8251_v14 = vld [vmem:[%s16144_s5 + $0x858] sm:$0xf0]  ;;  %v10611_v44 = vld [vmem:[%s16144_s5 + $0x94c] sm:$0xf]  ;;  %v8378_v31 = vor.u32 %v10613_v5, %v8377_v37  ;;  %v8233_v49 = vld [vmem:[%s16144_s5 + $0x828] sm:$0xf] }
 0x280   :  { %3526 = vmatmul.bf16.vlgmr.msrb.gmra.mxu1 %v13749_v22  ;;  %3539 = vmatmul.bf16.vlgmr.msra.gmra.mxu3 %v13751_v52  ;;  %v8347_v37 = vld [vmem:[%s16144_s5 + $0x918] sm:$0xf0]  ;;  %v8641_v5 = vld [vmem:[%s16144_s5 + $0xae0] sm:$0xf] }
 0x281   :  { %3570 = vmatpush.bf16.msra.mxu1 %v8330_v51  ;;  %3583 = vmatpush.bf16.msrb.mxu3 %v8458_v53  ;;  %v2527_v51 = vpop.f32.mrf.mxu1  ;;  %v2553_v53 = vpop.f32.mrf.mxu0 }
 0x282   :  { %3596 = vmatpush.bf16.msra.mxu0 %v8334_v24  ;;  %3609 = vmatpush.bf16.msra.mxu2 %v8462_v18  ;;  %v8265_v24 = vld [vmem:[%s16144_s5 + $0x868] sm:$0xf]  ;;  %v10585_v18 = vld [vmem:[%s16144_s5 + $0x874] sm:$0xf0] }
 0x283   :  { %3552 = vmatmul.bf16.vlgmr.msrb.gmra.mxu0 %v13749_v22  ;;  %3565 = vmatmul.bf16.vlgmr.msrb.gmra.mxu2 %v13751_v52  ;;  %v8266_v2 = vor.u32 %v10585_v18, %v8265_v24  ;;  %v2540_v17 = vpop.f32.mrf.mxu3  ;;  %v10609_v24 = vld [vmem:[%s16144_s5 + $0x934] sm:$0xf0]  ;;  %v10575_v18 = vld [vmem:[%s16144_s5 + $0x82c] sm:$0xf] }
 0x285   :  { %3571 = vmatpush.bf16.msra.mxu1 %v8314_v16  ;;  %3584 = vmatpush.bf16.msrb.mxu3 %v8442_v61  ;;  %v10615_v16 = vld [vmem:[%s16144_s5 + $0x96c] sm:$0xf]  ;;  %v8395_v61 = vld [vmem:[%s16144_s5 + $0x978] sm:$0xf0] }
 0x286   :  { %3597 = vmatpush.bf16.msra.mxu0 %v8318_v13  ;;  %3610 = vmatpush.bf16.msra.mxu2 %v8446_v46  ;;  %v8249_v13 = vld [vmem:[%s16144_s5 + $0x848] sm:$0xf]  ;;  %v10581_v46 = vld [vmem:[%s16144_s5 + $0x854] sm:$0xf0]  ;;  %v8398_v28 = vor.u32 %v10615_v16, %v8395_v61 }
 0x287   :  { %v8250_v27 = vor.u32 %v10581_v46, %v8249_v13  ;;  %v8345_v16 = vld [vmem:[%s16144_s5 + $0x908] sm:$0xf]  ;;  %v10605_v61 = vld [vmem:[%s16144_s5 + $0x914] sm:$0xf0]  ;;  %v10571_v46 = vld [vmem:[%s16144_s5 + $0x80c] sm:$0xf] }
 0x289   :  { %3572 = vmatpush.bf16.msra.mxu1 %v8298_v36  ;;  %3585 = vmatpush.bf16.msrb.mxu3 %v8426_v7  ;;  %v2541_v36 = vadd.f32 %v2540_v17, %v2527_v51  ;;  %v2566_v7 = vpop.f32.mrf.mxu2  ;;  %v2529_v12 = vpop.f32.mrf.mxu1  ;;  %v10577_v51 = vld [vmem:[%s16144_s5 + $0x834] sm:$0xf0] }
 0x28a   :  { %3598 = vmatpush.bf16.msra.mxu0 %v8302_v43  ;;  %3611 = vmatpush.bf16.msra.mxu2 %v8430_v11  ;;  %v8379_v43 = vld [vmem:[%s16144_s5 + $0x958] sm:$0xf0]  ;;  %v2567_v11 = vadd.f32 %v2566_v7, %v2553_v53  ;;  %v2555_v3 = vpop.f32.mrf.mxu0  ;;  %v8234_v40 = vor.u32 %v10577_v51, %v8233_v49  ;;  %v10696_v7 = vld [vmem:[%s16144_s5 + $0xbec] sm:$0xf0]  ;;  %v10694_v12 = vld [vmem:[%s16144_s5 + $0xbe4] sm:$0xf] }
 0x28b   :  { %v13854_v23 = vadd.f32 %v2541_v36, %v13436_v35  ;;  %v8361_v35 = vld [vmem:[%s16144_s5 + $0x928] sm:$0xf]  ;;  %v2542_v13 = vpop.f32.mrf.mxu3  ;;  %v8769_v36 = vld [vmem:[%s16144_s5 + $0xbe0] sm:$0xf]  ;;  %v8771_v3 = vld [vmem:[%s16144_s5 + $0xbf0] sm:$0xf0] }
 0x28c   :  { %v13863_v53 = vadd.f32 %v2567_v11, %v13447_v62  ;;  %v10607_v62 = vld [vmem:[%s16144_s5 + $0x92c] sm:$0xf]  ;;  %v8362_v55 = vor.u32 %v10609_v24, %v8361_v35  ;;  %v8643_v11 = vld [vmem:[%s16144_s5 + $0xaf0] sm:$0xf0]  ;;  %v8770_v51 = vor.u32 %v10696_v7, %v8769_v36  ;;  %v8774_v24 = vor.u32 %v10694_v12, %v8771_v3  ;;  %v8737_v13 = vld [vmem:[%s16144_s5 + $0xba0] sm:$0xf] }
 0x28d   :  { %3573 = vmatpush.bf16.msra.mxu1 %v8282_v29  ;;  %3586 = vmatpush.bf16.msrb.mxu3 %v8410_v57  ;;  %v8254_v29 = vor.u32 %v10579_v20, %v8251_v14  ;;  %v8382_v57 = vor.u32 %v10611_v44, %v8379_v43  ;;  %v10664_v20 = vld [vmem:[%s16144_s5 + $0xaec] sm:$0xf0]  ;;  %v10662_v14 = vld [vmem:[%s16144_s5 + $0xae4] sm:$0xf]  ;;  %v8218_v44 = vor.u32 %v10573_v58, %v8217_v9  ;;  %v8593_v36 = vld [vmem:[%s16144_s5 + $0xa80] sm:$0xf] }
 0x28e   :  { %3599 = vmatpush.bf16.msra.mxu0 %v8286_v60  ;;  %3612 = vmatpush.bf16.msra.mxu2 %v8414_v4  ;;  %v8235_v60 = vld [vmem:[%s16144_s5 + $0x838] sm:$0xf0]  ;;  %v8346_v43 = vor.u32 %v10605_v61, %v8345_v16  ;;  %v8642_v49 = vor.u32 %v10664_v20, %v8641_v5  ;;  %v8646_v35 = vor.u32 %v10662_v14, %v8643_v11  ;;  %v10690_v9 = vld [vmem:[%s16144_s5 + $0xbc4] sm:$0xf]  ;;  %v8609_v16 = vld [vmem:[%s16144_s5 + $0xaa0] sm:$0xf] }
 0x28f   :  { %v8363_v4 = vld [vmem:[%s16144_s5 + $0x938] sm:$0xf0]  ;;  %v10656_v61 = vld [vmem:[%s16144_s5 + $0xaac] sm:$0xf0]  ;;  %v8595_v11 = vld [vmem:[%s16144_s5 + $0xa90] sm:$0xf0] }
 0x290   :  { %v8610_v5 = vor.u32 %v10656_v61, %v8609_v16  ;;  %v10652_v7 = vld [vmem:[%s16144_s5 + $0xa8c] sm:$0xf0]  ;;  %v10682_v12 = vld [vmem:[%s16144_s5 + $0xb84] sm:$0xf]  ;;  %v8723_v3 = vld [vmem:[%s16144_s5 + $0xb90] sm:$0xf0] }
 0x291   :  { %3574 = vmatpush.bf16.msra.mxu1 %v8266_v2  ;;  %3587 = vmatpush.bf16.msrb.mxu3 %v8394_v59  ;;  %v8238_v2 = vor.u32 %v10575_v18, %v8235_v60  ;;  %v8366_v59 = vor.u32 %v10607_v62, %v8363_v4  ;;  %v2568_v17 = vpop.f32.mrf.mxu2  ;;  %v8753_v18 = vld [vmem:[%s16144_s5 + $0xbc0] sm:$0xf]  ;;  %v10692_v60 = vld [vmem:[%s16144_s5 + $0xbcc] sm:$0xf0]  ;;  %v10658_v62 = vld [vmem:[%s16144_s5 + $0xac4] sm:$0xf] }
 0x292   :  { %3600 = vmatpush.bf16.msra.mxu0 %v8270_v1  ;;  %3613 = vmatpush.bf16.msra.mxu2 %v8398_v28  ;;  %v8219_v1 = vld [vmem:[%s16144_s5 + $0x818] sm:$0xf0]  ;;  %v10603_v28 = vld [vmem:[%s16144_s5 + $0x90c] sm:$0xf]  ;;  %v8627_v4 = vld [vmem:[%s16144_s5 + $0xad0] sm:$0xf0]  ;;  %v8754_v58 = vor.u32 %v10692_v60, %v8753_v18  ;;  %v8726_v18 = vor.u32 %v10682_v12, %v8723_v3 }
 0x293   :  { %v10686_v17 = vld [vmem:[%s16144_s5 + $0xba4] sm:$0xf]  ;;  %v10680_v60 = vld [vmem:[%s16144_s5 + $0xb6c] sm:$0xf0]  ;;  %v8545_v3 = vld [vmem:[%s16144_s5 + $0xa20] sm:$0xf] }
 0x295   :  { %3575 = vmatpush.bf16.msra.mxu1 %v8250_v27  ;;  %3588 = vmatpush.bf16.msrb.mxu3 %v8378_v31  ;;  %v8222_v27 = vor.u32 %v10571_v46, %v8219_v1  ;;  %v8350_v31 = vor.u32 %v10603_v28, %v8347_v37  ;;  %v10688_v46 = vld [vmem:[%s16144_s5 + $0xbac] sm:$0xf0]  ;;  %v10654_v1 = vld [vmem:[%s16144_s5 + $0xaa4] sm:$0xf]  ;;  %v8611_v28 = vld [vmem:[%s16144_s5 + $0xab0] sm:$0xf0] }
 0x296   :  { %3601 = vmatpush.bf16.msra.mxu0 %v8254_v29  ;;  %3614 = vmatpush.bf16.msra.mxu2 %v8382_v57  ;;  %v8625_v29 = vld [vmem:[%s16144_s5 + $0xac0] sm:$0xf]  ;;  %v10660_v57 = vld [vmem:[%s16144_s5 + $0xacc] sm:$0xf0]  ;;  %v8739_v37 = vld [vmem:[%s16144_s5 + $0xbb0] sm:$0xf0]  ;;  %v8738_v20 = vor.u32 %v10688_v46, %v8737_v13  ;;  %v8614_v14 = vor.u32 %v10654_v1, %v8611_v28 }
 0x297   :  { %v10676_v28 = vld [vmem:[%s16144_s5 + $0xb4c] sm:$0xf0] }
 0x299   :  { %3576 = vmatpush.bf16.msra.mxu1 %v8234_v40  ;;  %3589 = vmatpush.bf16.msrb.mxu3 %v8362_v55  ;;  %v8755_v40 = vld [vmem:[%s16144_s5 + $0xbd0] sm:$0xf0]  ;;  %v8626_v55 = vor.u32 %v10660_v57, %v8625_v29  ;;  %v8577_v57 = vld [vmem:[%s16144_s5 + $0xa60] sm:$0xf] }
 0x29a   :  { %3602 = vmatpush.bf16.msra.mxu0 %v8238_v2  ;;  %3615 = vmatpush.bf16.msra.mxu2 %v8366_v59  ;;  %v8630_v2 = vor.u32 %v10658_v62, %v8627_v4  ;;  %v8758_v59 = vor.u32 %v10690_v9, %v8755_v40  ;;  %v10646_v62 = vld [vmem:[%s16144_s5 + $0xa64] sm:$0xf]  ;;  %v8579_v9 = vld [vmem:[%s16144_s5 + $0xa70] sm:$0xf0] }
 0x29b   :  { %v10678_v40 = vld [vmem:[%s16144_s5 + $0xb64] sm:$0xf]  ;;  %v8582_v46 = vor.u32 %v10646_v62, %v8579_v9  ;;  %v10636_v62 = vld [vmem:[%s16144_s5 + $0xa0c] sm:$0xf0] }
 0x29c   :  { %v10668_v9 = vld [vmem:[%s16144_s5 + $0xb0c] sm:$0xf0] }
 0x29d   :  { %3577 = vmatpush.bf16.msra.mxu1 %v8218_v44  ;;  %3590 = vmatpush.bf16.msrb.mxu3 %v8346_v43  ;;  %v8742_v44 = vor.u32 %v10686_v17, %v8739_v37  ;;  %v10650_v43 = vld [vmem:[%s16144_s5 + $0xa84] sm:$0xf] }
 0x29e   :  { %3603 = vmatpush.bf16.msra.mxu0 %v8222_v27  ;;  %3616 = vmatpush.bf16.msra.mxu2 %v8350_v31  ;;  %v2579_v27 = vpop.f32.mrf.mxu1  ;;  %v1025_v31 = vadd.f32 %v12231_v0, %v12207_v45  ;;  %v8705_v0 = vld [vmem:[%s16144_s5 + $0xb60] sm:$0xf]  ;;  %v10642_v17 = vld [vmem:[%s16144_s5 + $0xa44] sm:$0xf] }
 0x29f   :  { %v8706_v61 = vor.u32 %v10680_v60, %v8705_v0 }
 0x2a0   :  { %3578 = vmatmul.bf16.vlgmr.msra.gmra.mxu1 %v13749_v22  ;;  %3591 = vmatmul.bf16.vlgmr.msrb.gmra.mxu3 %v13751_v52  ;;  %v1059_v4 = vadd.f32 %v12313_v6, %v1025_v31 }
 0x2a1   :  { %4018 = vmatpush.bf16.msrb.mxu1 %v8642_v49  ;;  %4031 = vmatpush.bf16.msra.mxu3 %v8770_v51  ;;  %v2605_v49 = vpop.f32.mrf.mxu0  ;;  %v8594_v51 = vor.u32 %v10652_v7, %v8593_v36  ;;  %v8691_v36 = vld [vmem:[%s16144_s5 + $0xb50] sm:$0xf0] }
 0x2a2   :  { %4044 = vmatpush.bf16.msrb.mxu0 %v8646_v35  ;;  %4057 = vmatpush.bf16.msrb.mxu2 %v8774_v24  ;;  %v10648_v35 = vld [vmem:[%s16144_s5 + $0xa6c] sm:$0xf0]  ;;  %v8598_v24 = vor.u32 %v10650_v43, %v8595_v11  ;;  %v1093_v16 = vadd.f32 %v12426_v33, %v1059_v4  ;;  %v8689_v33 = vld [vmem:[%s16144_s5 + $0xb40] sm:$0xf] }
 0x2a3   :  { %3604 = vmatmul.bf16.vlgmr.msra.gmra.mxu0 %v13749_v22  ;;  %3617 = vmatmul.bf16.vlgmr.msra.gmra.mxu2 %v13751_v52  ;;  %v8721_v22 = vld [vmem:[%s16144_s5 + $0xb80] sm:$0xf]  ;;  %v10684_v52 = vld [vmem:[%s16144_s5 + $0xb8c] sm:$0xf0]  ;;  %v8578_v6 = vor.u32 %v10648_v35, %v8577_v57  ;;  %v2592_v1 = vpop.f32.mrf.mxu3  ;;  %v8690_v12 = vor.u32 %v10676_v28, %v8689_v33  ;;  %v8547_v57 = vld [vmem:[%s16144_s5 + $0xa30] sm:$0xf0] }
 0x2a4   :  { %v8722_v29 = vor.u32 %v10684_v52, %v8721_v22  ;;  %v2593_v37 = vadd.f32 %v2592_v1, %v2579_v27  ;;  %v1116_v22 = vmax.f32 %v1093_v16, 0.0  ;;  %v10640_v27 = vld [vmem:[%s16144_s5 + $0xa2c] sm:$0xf0]  ;;  %v8675_v35 = vld [vmem:[%s16144_s5 + $0xb30] sm:$0xf0] }
 0x2a5   :  { %4019 = vmatpush.bf16.msrb.mxu1 %v8626_v55  ;;  %4032 = vmatpush.bf16.msra.mxu3 %v8754_v58  ;;  %v8707_v55 = vld [vmem:[%s16144_s5 + $0xb70] sm:$0xf0]  ;;  %v923_v58 = vadd.f32 %v11900_v42, %v11763_v19  ;;  %v8546_v0 = vor.u32 %v10640_v27, %v8545_v3  ;;  %v8657_v4 = vld [vmem:[%s16144_s5 + $0xb00] sm:$0xf]  ;;  %v8777_v1 = vld [vmem:[%s16144_s5 + $0xbe8] sm:$0xf] }
 0x2a6   :  { %4045 = vmatpush.bf16.msrb.mxu0 %v8630_v2  ;;  %4058 = vmatpush.bf16.msrb.mxu2 %v8758_v59  ;;  %v8561_v2 = vld [vmem:[%s16144_s5 + $0xa40] sm:$0xf]  ;;  %v10644_v59 = vld [vmem:[%s16144_s5 + $0xa4c] sm:$0xf0]  ;;  %v8710_v42 = vor.u32 %v10678_v40, %v8707_v55  ;;  %v14064_v52 = vadd.f32 %v2593_v37, %v13638_v39  ;;  %v10697_v33 = vld [vmem:[%s16144_s5 + $0xbf4] sm:$0xf0]  ;;  %v8658_v37 = vor.u32 %v10668_v9, %v8657_v4 }
 0x2a7   :  { %v957_v13 = vadd.f32 %v12009_v41, %v923_v58  ;;  %v8563_v41 = vld [vmem:[%s16144_s5 + $0xa50] sm:$0xf0]  ;;  %v8562_v11 = vor.u32 %v10644_v59, %v8561_v2  ;;  %v8673_v39 = vld [vmem:[%s16144_s5 + $0xb20] sm:$0xf]  ;;  %v10666_v2 = vld [vmem:[%s16144_s5 + $0xb04] sm:$0xf] }
 0x2a8   :  { %v8566_v31 = vor.u32 %v10642_v17, %v8563_v41  ;;  %v10663_v28 = vld [vmem:[%s16144_s5 + $0xaec] sm:$0xf]  ;;  %v8745_v9 = vld [vmem:[%s16144_s5 + $0xba8] sm:$0xf] }
 0x2a9   :  { %4020 = vmatpush.bf16.msrb.mxu1 %v8610_v5  ;;  %4033 = vmatpush.bf16.msra.mxu3 %v8738_v20  ;;  %v2618_v5 = vpop.f32.mrf.mxu2  ;;  %v10674_v20 = vld [vmem:[%s16144_s5 + $0xb44] sm:$0xf]  ;;  %v991_v7 = vadd.f32 %v12373_v38, %v957_v13  ;;  %v2607_v43 = vpop.f32.mrf.mxu0  ;;  %v8659_v13 = vld [vmem:[%s16144_s5 + $0xb10] sm:$0xf0]  ;;  %v10695_v41 = vld [vmem:[%s16144_s5 + $0xbec] sm:$0xf] }
 0x2aa   :  { %4046 = vmatpush.bf16.msrb.mxu0 %v8614_v14  ;;  %4059 = vmatpush.bf16.msrb.mxu2 %v8742_v44  ;;  %v2619_v14 = vadd.f32 %v2618_v5, %v2605_v49  ;;  %v2581_v44 = vpop.f32.mrf.mxu1  ;;  %v8694_v49 = vor.u32 %v10674_v20, %v8691_v36  ;;  %v8651_v5 = vld [vmem:[%s16144_s5 + $0xaf8] sm:$0xf0]  ;;  %v8778_v43 = vor.u32 %v10697_v33, %v8777_v1  ;;  %v8729_v1 = vld [vmem:[%s16144_s5 + $0xb88] sm:$0xf]  ;;  %v10685_v33 = vld [vmem:[%s16144_s5 + $0xb94] sm:$0xf0] }
 0x2ab   :  { %v2594_v16 = vpop.f32.mrf.mxu3  ;;  %v8779_v20 = vld [vmem:[%s16144_s5 + $0xbf8] sm:$0xf0]  ;;  %v8654_v3 = vor.u32 %v10663_v28, %v8651_v5  ;;  %v10651_v28 = vld [vmem:[%s16144_s5 + $0xa8c] sm:$0xf] }
 0x2ac   :  { %v14073_v38 = vadd.f32 %v2619_v14, %v13649_v10  ;;  %v10670_v10 = vld [vmem:[%s16144_s5 + $0xb24] sm:$0xf]  ;;  %v8662_v14 = vor.u32 %v10666_v2, %v8659_v13  ;;  %v8782_v27 = vor.u32 %v10695_v41, %v8779_v20  ;;  %v10687_v16 = vld [vmem:[%s16144_s5 + $0xbac] sm:$0xf]  ;;  %v10653_v13 = vld [vmem:[%s16144_s5 + $0xa94] sm:$0xf0] }
 0x2ad   :  { %4021 = vmatpush.bf16.msrb.mxu1 %v8594_v51  ;;  %4034 = vmatpush.bf16.msra.mxu3 %v8722_v29  ;;  %v10672_v51 = vld [vmem:[%s16144_s5 + $0xb2c] sm:$0xf0]  ;;  %v10638_v29 = vld [vmem:[%s16144_s5 + $0xa24] sm:$0xf]  ;;  %v8678_v58 = vor.u32 %v10670_v10, %v8675_v35  ;;  %v8731_v5 = vld [vmem:[%s16144_s5 + $0xb98] sm:$0xf0] }
 0x2ae   :  { %4047 = vmatpush.bf16.msrb.mxu0 %v8598_v24  ;;  %4060 = vmatpush.bf16.msrb.mxu2 %v8726_v18  ;;  %v1115_v24 = vmax.f32 %v991_v7, 0.0  ;;  %v8529_v18 = vld [vmem:[%s16144_s5 + $0xa00] sm:$0xf]  ;;  %v8674_v60 = vor.u32 %v10672_v51, %v8673_v39  ;;  %v8550_v55 = vor.u32 %v10638_v29, %v8547_v57  ;;  %v10659_v39 = vld [vmem:[%s16144_s5 + $0xacc] sm:$0xf] }
 0x2af   :  { %v8530_v17 = vor.u32 %v10636_v62, %v8529_v18  ;;  %v8635_v51 = vld [vmem:[%s16144_s5 + $0xad8] sm:$0xf0]  ;;  %v10691_v29 = vld [vmem:[%s16144_s5 + $0xbcc] sm:$0xf] }
 0x2b0   :  { %v1130_v40 = vpack.c.bf16 %v1116_v22, %v1115_v24  ;;  %v8763_v57 = vld [vmem:[%s16144_s5 + $0xbd8] sm:$0xf0]  ;;  %v8638_v62 = vor.u32 %v10659_v39, %v8635_v51 }
 0x2b1   :  { %4022 = vmatpush.bf16.msrb.mxu1 %v8578_v6  ;;  %4035 = vmatpush.bf16.msra.mxu3 %v8706_v61  ;;  %v10634_v6 = vld [vmem:[%s16144_s5 + $0xa04] sm:$0xf]  ;;  %v8531_v61 = vld [vmem:[%s16144_s5 + $0xa10] sm:$0xf0]  ;;  %v2620_v59 = vpop.f32.mrf.mxu2  ;;  %v8766_v4 = vor.u32 %v10691_v29, %v8763_v57  ;;  %v8569_v29 = vld [vmem:[%s16144_s5 + $0xa48] sm:$0xf] }
 0x2b2   :  { %4048 = vmatpush.bf16.msrb.mxu0 %v8582_v46  ;;  %4061 = vmatpush.bf16.msrb.mxu2 %v8710_v42  ;;  %v8649_v46 = vld [vmem:[%s16144_s5 + $0xae8] sm:$0xf]  ;;  %v10665_v42 = vld [vmem:[%s16144_s5 + $0xaf4] sm:$0xf0]  ;;  %v3692_v36 = vunpack.c.l.b16 %v1130_v40  ;;  %v8534_v7 = vor.u32 %v10634_v6, %v8531_v61  ;;  %v3693_v44 = vunpack.c.h.b16 %v1130_v40  ;;  %v8747_v6 = vld [vmem:[%s16144_s5 + $0xbb8] sm:$0xf0] }
 0x2b3   :  { %v8650_v22 = vor.u32 %v10665_v42, %v8649_v46  ;;  %v10689_v40 = vld [vmem:[%s16144_s5 + $0xbb4] sm:$0xf0]  ;;  %v8601_v59 = vld [vmem:[%s16144_s5 + $0xa88] sm:$0xf]  ;;  %v8750_v42 = vor.u32 %v10687_v16, %v8747_v6  ;;  %v8699_v16 = vld [vmem:[%s16144_s5 + $0xb58] sm:$0xf0] }
 0x2b4   :  { %v14165_v10 = vpack.c.b16 %v3692_v36, %v3692_v36  ;;  %v14167_v35 = vpack.c.b16 %v3693_v44, %v3693_v44  ;;  %v8746_v2 = vor.u32 %v10689_v40, %v8745_v9  ;;  %v8602_v36 = vor.u32 %v10653_v13, %v8601_v59  ;;  %v10649_v44 = vld [vmem:[%s16144_s5 + $0xa74] sm:$0xf0] }
 0x2b5   :  { %4023 = vmatpush.bf16.msrb.mxu1 %v8562_v11  ;;  %4036 = vmatpush.bf16.msra.mxu3 %v8690_v12  ;;  %v8633_v11 = vld [vmem:[%s16144_s5 + $0xac8] sm:$0xf]  ;;  %v10661_v12 = vld [vmem:[%s16144_s5 + $0xad4] sm:$0xf0] }
 0x2b6   :  { %4049 = vmatpush.bf16.msrb.mxu0 %v8566_v31  ;;  %4062 = vmatpush.bf16.msrb.mxu2 %v8694_v49  ;;  %v8761_v31 = vld [vmem:[%s16144_s5 + $0xbc8] sm:$0xf]  ;;  %v10693_v49 = vld [vmem:[%s16144_s5 + $0xbd4] sm:$0xf0]  ;;  %v8634_v24 = vor.u32 %v10661_v12, %v8633_v11 }
 0x2b7   :  { %v8762_v18 = vor.u32 %v10693_v49, %v8761_v31  ;;  %v8713_v11 = vld [vmem:[%s16144_s5 + $0xb68] sm:$0xf]  ;;  %v10681_v12 = vld [vmem:[%s16144_s5 + $0xb74] sm:$0xf0]  ;;  %v10679_v31 = vld [vmem:[%s16144_s5 + $0xb6c] sm:$0xf] }
 0x2b8   :  { %v8715_v49 = vld [vmem:[%s16144_s5 + $0xb78] sm:$0xf0]  ;;  %v8714_v51 = vor.u32 %v10681_v12, %v8713_v11  ;;  %v10645_v57 = vld [vmem:[%s16144_s5 + $0xa54] sm:$0xf0] }
 0x2b9   :  { %4024 = vmatpush.bf16.msrb.mxu1 %v8546_v0  ;;  %4037 = vmatpush.bf16.msra.mxu3 %v8674_v60  ;;  %v8617_v0 = vld [vmem:[%s16144_s5 + $0xaa8] sm:$0xf]  ;;  %v10657_v60 = vld [vmem:[%s16144_s5 + $0xab4] sm:$0xf0]  ;;  %v8570_v13 = vor.u32 %v10645_v57, %v8569_v29  ;;  %v8961_v29 = vld [vmem:[%s16144_s5 + $0xce0] sm:$0xf] }
 0x2ba   :  { %4050 = vmatpush.bf16.msrb.mxu0 %v8550_v55  ;;  %4063 = vmatpush.bf16.msrb.mxu2 %v8678_v58  ;;  %v10655_v55 = vld [vmem:[%s16144_s5 + $0xaac] sm:$0xf]  ;;  %v8619_v58 = vld [vmem:[%s16144_s5 + $0xab8] sm:$0xf0]  ;;  %v8618_v61 = vor.u32 %v10657_v60, %v8617_v0  ;;  %v8697_v60 = vld [vmem:[%s16144_s5 + $0xb48] sm:$0xf] }
 0x2bb   :  { %v8622_v46 = vor.u32 %v10655_v55, %v8619_v58  ;;  %v8571_v55 = vld [vmem:[%s16144_s5 + $0xa58] sm:$0xf0]  ;;  %v10675_v58 = vld [vmem:[%s16144_s5 + $0xb4c] sm:$0xf]  ;;  %v10728_v57 = vld [vmem:[%s16144_s5 + $0xcec] sm:$0xf0] }
 0x2bd   :  { %4025 = vmatpush.bf16.msrb.mxu1 %v8530_v17  ;;  %4038 = vmatpush.bf16.msra.mxu3 %v8658_v37  ;;  %v8603_v17 = vld [vmem:[%s16144_s5 + $0xa98] sm:$0xf0]  ;;  %v10683_v37 = vld [vmem:[%s16144_s5 + $0xb8c] sm:$0xf]  ;;  %v3027_v41 = vpop.f32.mrf.mxu1 }
 0x2be   :  { %4051 = vmatpush.bf16.msrb.mxu0 %v8534_v7  ;;  %4064 = vmatpush.bf16.msrb.mxu2 %v8662_v14  ;;  %v8730_v7 = vor.u32 %v10685_v33, %v8729_v1  ;;  %v8585_v14 = vld [vmem:[%s16144_s5 + $0xa68] sm:$0xf]  ;;  %v10641_v1 = vld [vmem:[%s16144_s5 + $0xa34] sm:$0xf0] }
 0x2bf   :  { %v8586_v39 = vor.u32 %v10649_v44, %v8585_v14  ;;  %v10637_v44 = vld [vmem:[%s16144_s5 + $0xa14] sm:$0xf0] }
 0x2c0   :  { %4026 = vmatmul.bf16.vlgmr.msrb.gmra.mxu1 %v14165_v10  ;;  %4039 = vmatmul.bf16.vlgmr.msra.gmra.mxu3 %v14167_v35  ;;  %v3053_v20 = vpop.f32.mrf.mxu0 }
 0x2c1   :  { %4070 = vmatpush.bf16.msra.mxu1 %v8650_v22  ;;  %4083 = vmatpush.bf16.msrb.mxu3 %v8778_v43  ;;  %v8606_v22 = vor.u32 %v10651_v28, %v8603_v17  ;;  %v8734_v43 = vor.u32 %v10683_v37, %v8731_v5  ;;  %v8702_v17 = vor.u32 %v10675_v58, %v8699_v16  ;;  %v10673_v37 = vld [vmem:[%s16144_s5 + $0xb34] sm:$0xf0]  ;;  %v10639_v5 = vld [vmem:[%s16144_s5 + $0xa2c] sm:$0xf] }
 0x2c2   :  { %4096 = vmatpush.bf16.msra.mxu0 %v8654_v3  ;;  %4109 = vmatpush.bf16.msra.mxu2 %v8782_v27  ;;  %v10647_v3 = vld [vmem:[%s16144_s5 + $0xa6c] sm:$0xf]  ;;  %v8587_v27 = vld [vmem:[%s16144_s5 + $0xa78] sm:$0xf0]  ;;  %v8962_v16 = vor.u32 %v10728_v57, %v8961_v29  ;;  %v10714_v29 = vld [vmem:[%s16144_s5 + $0xc84] sm:$0xf] }
 0x2c3   :  { %4052 = vmatmul.bf16.vlgmr.msrb.gmra.mxu0 %v14165_v10  ;;  %4065 = vmatmul.bf16.vlgmr.msrb.gmra.mxu2 %v14167_v35  ;;  %v3040_v0 = vpop.f32.mrf.mxu3  ;;  %v8915_v57 = vld [vmem:[%s16144_s5 + $0xc90] sm:$0xf0] }
 0x2c4   :  { %v3041_v9 = vadd.f32 %v3040_v0, %v3027_v41  ;;  %v8555_v41 = vld [vmem:[%s16144_s5 + $0xa38] sm:$0xf0]  ;;  %v10726_v0 = vld [vmem:[%s16144_s5 + $0xce4] sm:$0xf] }
 0x2c5   :  { %4071 = vmatpush.bf16.msra.mxu1 %v8634_v24  ;;  %4084 = vmatpush.bf16.msrb.mxu3 %v8762_v18  ;;  %v8590_v24 = vor.u32 %v10647_v3, %v8587_v27  ;;  %v8718_v18 = vor.u32 %v10679_v31, %v8715_v49  ;;  %v8558_v11 = vor.u32 %v10639_v5, %v8555_v41  ;;  %v10635_v27 = vld [vmem:[%s16144_s5 + $0xa0c] sm:$0xf]  ;;  %v8539_v31 = vld [vmem:[%s16144_s5 + $0xa18] sm:$0xf0] }
 0x2c6   :  { %4097 = vmatpush.bf16.msra.mxu0 %v8638_v62  ;;  %4110 = vmatpush.bf16.msra.mxu2 %v8766_v4  ;;  %v10677_v62 = vld [vmem:[%s16144_s5 + $0xb54] sm:$0xf0]  ;;  %v10643_v4 = vld [vmem:[%s16144_s5 + $0xa4c] sm:$0xf]  ;;  %v3066_v40 = vpop.f32.mrf.mxu2 }
 0x2c7   :  { %v3067_v6 = vadd.f32 %v3066_v40, %v3053_v20  ;;  %v8574_v28 = vor.u32 %v10643_v4, %v8571_v55  ;;  %v8683_v20 = vld [vmem:[%s16144_s5 + $0xb38] sm:$0xf0]  ;;  %v10667_v49 = vld [vmem:[%s16144_s5 + $0xb0c] sm:$0xf]  ;;  %v8963_v4 = vld [vmem:[%s16144_s5 + $0xcf0] sm:$0xf0]  ;;  %v8542_v55 = vor.u32 %v10635_v27, %v8539_v31 }
 0x2c8   :  { %v3055_v59 = vpop.f32.mrf.mxu0  ;;  %v9091_v40 = vld [vmem:[%s16144_s5 + $0xdf0] sm:$0xf0]  ;;  %v8913_v31 = vld [vmem:[%s16144_s5 + $0xc80] sm:$0xf] }
 0x2c9   :  { %4072 = vmatpush.bf16.msra.mxu1 %v8618_v61  ;;  %4085 = vmatpush.bf16.msrb.mxu3 %v8746_v2  ;;  %v3029_v61 = vpop.f32.mrf.mxu1  ;;  %v14270_v2 = vadd.f32 %v3041_v9, %v13854_v23  ;;  %v14279_v33 = vadd.f32 %v3067_v6, %v13863_v53  ;;  %v8681_v23 = vld [vmem:[%s16144_s5 + $0xb28] sm:$0xf]  ;;  %v10671_v53 = vld [vmem:[%s16144_s5 + $0xb2c] sm:$0xf]  ;;  %v10758_v9 = vld [vmem:[%s16144_s5 + $0xde4] sm:$0xf] }
 0x2ca   :  { %4098 = vmatpush.bf16.msra.mxu0 %v8622_v46  ;;  %4111 = vmatpush.bf16.msra.mxu2 %v8750_v42  ;;  %v8698_v46 = vor.u32 %v10677_v62, %v8697_v60  ;;  %v8553_v42 = vld [vmem:[%s16144_s5 + $0xa28] sm:$0xf]  ;;  %v8682_v14 = vor.u32 %v10673_v37, %v8681_v23  ;;  %v8686_v12 = vor.u32 %v10671_v53, %v8683_v20  ;;  %v8945_v61 = vld [vmem:[%s16144_s5 + $0xcc0] sm:$0xf]  ;;  %v10724_v59 = vld [vmem:[%s16144_s5 + $0xccc] sm:$0xf0] }
 0x2cb   :  { %v3042_v3 = vpop.f32.mrf.mxu3  ;;  %v10754_v23 = vld [vmem:[%s16144_s5 + $0xdc4] sm:$0xf]  ;;  %v9075_v37 = vld [vmem:[%s16144_s5 + $0xdd0] sm:$0xf0]  ;;  %v8946_v5 = vor.u32 %v10724_v59, %v8945_v61  ;;  %v8929_v53 = vld [vmem:[%s16144_s5 + $0xca0] sm:$0xf] }
 0x2cc   :  { %v10720_v20 = vld [vmem:[%s16144_s5 + $0xcac] sm:$0xf0]  ;;  %v10710_v61 = vld [vmem:[%s16144_s5 + $0xc64] sm:$0xf]  ;;  %v8899_v59 = vld [vmem:[%s16144_s5 + $0xc70] sm:$0xf0] }
 0x2cd   :  { %4073 = vmatpush.bf16.msra.mxu1 %v8602_v36  ;;  %4086 = vmatpush.bf16.msrb.mxu3 %v8730_v7  ;;  %v8537_v36 = vld [vmem:[%s16144_s5 + $0xa08] sm:$0xf]  ;;  %v8554_v7 = vor.u32 %v10641_v1, %v8553_v42  ;;  %v9073_v42 = vld [vmem:[%s16144_s5 + $0xdc0] sm:$0xf]  ;;  %v10756_v1 = vld [vmem:[%s16144_s5 + $0xdcc] sm:$0xf0]  ;;  %v8930_v3 = vor.u32 %v10720_v20, %v8929_v53 }
 0x2ce   :  { %4099 = vmatpush.bf16.msra.mxu0 %v8606_v22  ;;  %4112 = vmatpush.bf16.msra.mxu2 %v8734_v43  ;;  %v8665_v22 = vld [vmem:[%s16144_s5 + $0xb08] sm:$0xf]  ;;  %v10669_v43 = vld [vmem:[%s16144_s5 + $0xb14] sm:$0xf0]  ;;  %v8538_v60 = vor.u32 %v10637_v44, %v8537_v36  ;;  %v9074_v41 = vor.u32 %v10756_v1, %v9073_v42  ;;  %v10752_v44 = vld [vmem:[%s16144_s5 + $0xdac] sm:$0xf0] }
 0x2cf   :  { %v8666_v62 = vor.u32 %v10669_v43, %v8665_v22  ;;  %v10718_v22 = vld [vmem:[%s16144_s5 + $0xca4] sm:$0xf]  ;;  %v8931_v43 = vld [vmem:[%s16144_s5 + $0xcb0] sm:$0xf0]  ;;  %v10740_v53 = vld [vmem:[%s16144_s5 + $0xd4c] sm:$0xf0] }
 0x2d0   :  { %v10706_v20 = vld [vmem:[%s16144_s5 + $0xc44] sm:$0xf] }
 0x2d1   :  { %4074 = vmatpush.bf16.msra.mxu1 %v8586_v39  ;;  %4087 = vmatpush.bf16.msrb.mxu3 %v8714_v51  ;;  %v3068_v39 = vpop.f32.mrf.mxu2  ;;  %v8667_v51 = vld [vmem:[%s16144_s5 + $0xb18] sm:$0xf0] }
 0x2d2   :  { %4100 = vmatpush.bf16.msra.mxu0 %v8590_v24  ;;  %4113 = vmatpush.bf16.msra.mxu2 %v8718_v18  ;;  %v9089_v24 = vld [vmem:[%s16144_s5 + $0xde0] sm:$0xf]  ;;  %v10760_v18 = vld [vmem:[%s16144_s5 + $0xdec] sm:$0xf0]  ;;  %v8670_v58 = vor.u32 %v10667_v49, %v8667_v51  ;;  %v8934_v39 = vor.u32 %v10718_v22, %v8931_v43  ;;  %v9011_v22 = vld [vmem:[%s16144_s5 + $0xd50] sm:$0xf0] }
 0x2d3   :  { %v9090_v6 = vor.u32 %v10760_v18, %v9089_v24  ;;  %v10716_v49 = vld [vmem:[%s16144_s5 + $0xc8c] sm:$0xf0]  ;;  %v10746_v24 = vld [vmem:[%s16144_s5 + $0xd84] sm:$0xf]  ;;  %v9043_v18 = vld [vmem:[%s16144_s5 + $0xd90] sm:$0xf0] }
 0x2d5   :  { %4075 = vmatpush.bf16.msra.mxu1 %v8570_v13  ;;  %4088 = vmatpush.bf16.msrb.mxu3 %v8698_v46  ;;  %v8966_v13 = vor.u32 %v10726_v0, %v8963_v4  ;;  %v9094_v46 = vor.u32 %v10758_v9, %v9091_v40  ;;  %v8897_v9 = vld [vmem:[%s16144_s5 + $0xc60] sm:$0xf]  ;;  %v10712_v40 = vld [vmem:[%s16144_s5 + $0xc6c] sm:$0xf0] }
 0x2d6   :  { %4101 = vmatpush.bf16.msra.mxu0 %v8574_v28  ;;  %4114 = vmatpush.bf16.msra.mxu2 %v8702_v17  ;;  %v10722_v28 = vld [vmem:[%s16144_s5 + $0xcc4] sm:$0xf]  ;;  %v8947_v17 = vld [vmem:[%s16144_s5 + $0xcd0] sm:$0xf0]  ;;  %v8898_v42 = vor.u32 %v10712_v40, %v8897_v9  ;;  %v8977_v9 = vld [vmem:[%s16144_s5 + $0xd00] sm:$0xf] }
 0x2d7   :  { %v8950_v36 = vor.u32 %v10722_v28, %v8947_v17  ;;  %v8881_v28 = vld [vmem:[%s16144_s5 + $0xc40] sm:$0xf]  ;;  %v10708_v17 = vld [vmem:[%s16144_s5 + $0xc4c] sm:$0xf0] }
 0x2d8   :  { %v10732_v40 = vld [vmem:[%s16144_s5 + $0xd0c] sm:$0xf0] }
 0x2d9   :  { %4076 = vmatpush.bf16.msra.mxu1 %v8554_v7  ;;  %4089 = vmatpush.bf16.msrb.mxu3 %v8682_v14  ;;  %v9078_v7 = vor.u32 %v10754_v23, %v9075_v37  ;;  %v9057_v14 = vld [vmem:[%s16144_s5 + $0xda0] sm:$0xf]  ;;  %v8902_v23 = vor.u32 %v10710_v61, %v8899_v59  ;;  %v8851_v61 = vld [vmem:[%s16144_s5 + $0xc10] sm:$0xf0]  ;;  %v10730_v59 = vld [vmem:[%s16144_s5 + $0xd04] sm:$0xf] }
 0x2da   :  { %4102 = vmatpush.bf16.msra.mxu0 %v8558_v11  ;;  %4115 = vmatpush.bf16.msra.mxu2 %v8686_v12  ;;  %v10750_v11 = vld [vmem:[%s16144_s5 + $0xda4] sm:$0xf]  ;;  %v9059_v12 = vld [vmem:[%s16144_s5 + $0xdb0] sm:$0xf0]  ;;  %v9058_v27 = vor.u32 %v10752_v44, %v9057_v14 }
 0x2db   :  { %v9062_v51 = vor.u32 %v10750_v11, %v9059_v12  ;;  %v8883_v14 = vld [vmem:[%s16144_s5 + $0xc50] sm:$0xf0]  ;;  %v10738_v44 = vld [vmem:[%s16144_s5 + $0xd44] sm:$0xf] }
 0x2dd   :  { %4077 = vmatpush.bf16.msra.mxu1 %v8538_v60  ;;  %4090 = vmatpush.bf16.msrb.mxu3 %v8666_v62  ;;  %v3079_v0 = vpop.f32.mrf.mxu1  ;;  %v8914_v62 = vor.u32 %v10716_v49, %v8913_v31  ;;  %v8865_v49 = vld [vmem:[%s16144_s5 + $0xc20] sm:$0xf] }
 0x2de   :  { %4103 = vmatpush.bf16.msra.mxu0 %v8542_v55  ;;  %4116 = vmatpush.bf16.msra.mxu2 %v8670_v58  ;;  %v8918_v55 = vor.u32 %v10714_v29, %v8915_v57  ;;  %v9046_v58 = vor.u32 %v10746_v24, %v9043_v18  ;;  %v10736_v29 = vld [vmem:[%s16144_s5 + $0xd2c] sm:$0xf0]  ;;  %v10702_v57 = vld [vmem:[%s16144_s5 + $0xc24] sm:$0xf]  ;;  %v8867_v24 = vld [vmem:[%s16144_s5 + $0xc30] sm:$0xf0] }
 0x2df   :  { %v8995_v18 = vld [vmem:[%s16144_s5 + $0xd30] sm:$0xf0] }
 0x2e0   :  { %4078 = vmatmul.bf16.vlgmr.msra.gmra.mxu1 %v14165_v10  ;;  %4091 = vmatmul.bf16.vlgmr.msrb.gmra.mxu3 %v14167_v35  ;;  %v3105_v60 = vpop.f32.mrf.mxu0 }
 0x2e1   :  { %4518 = vmatpush.bf16.msrb.mxu1 %v8962_v16  ;;  %4531 = vmatpush.bf16.msra.mxu3 %v9090_v6  ;;  %v9025_v16 = vld [vmem:[%s16144_s5 + $0xd60] sm:$0xf]  ;;  %v10744_v6 = vld [vmem:[%s16144_s5 + $0xd6c] sm:$0xf0] }
 0x2e2   :  { %4544 = vmatpush.bf16.msrb.mxu0 %v8966_v13  ;;  %4557 = vmatpush.bf16.msrb.mxu2 %v9094_v46  ;;  %v10742_v13 = vld [vmem:[%s16144_s5 + $0xd64] sm:$0xf]  ;;  %v9027_v46 = vld [vmem:[%s16144_s5 + $0xd70] sm:$0xf0]  ;;  %v9026_v1 = vor.u32 %v10744_v6, %v9025_v16 }
 0x2e3   :  { %4104 = vmatmul.bf16.vlgmr.msra.gmra.mxu0 %v14165_v10  ;;  %4117 = vmatmul.bf16.vlgmr.msra.gmra.mxu2 %v14167_v35  ;;  %v9041_v10 = vld [vmem:[%s16144_s5 + $0xd80] sm:$0xf]  ;;  %v10748_v35 = vld [vmem:[%s16144_s5 + $0xd8c] sm:$0xf0]  ;;  %v9030_v37 = vor.u32 %v10742_v13, %v9027_v46  ;;  %v10698_v6 = vld [vmem:[%s16144_s5 + $0xc04] sm:$0xf] }
 0x2e4   :  { %v9042_v4 = vor.u32 %v10748_v35, %v9041_v10  ;;  %v8886_v10 = vor.u32 %v10706_v20, %v8883_v14  ;;  %v9014_v35 = vor.u32 %v10738_v44, %v9011_v22  ;;  %v8979_v46 = vld [vmem:[%s16144_s5 + $0xd10] sm:$0xf0]  ;;  %v9099_v20 = vld [vmem:[%s16144_s5 + $0xdf8] sm:$0xf0]  ;;  %v4193_v44 = vunpack.c.h.b16 %v12528_v54 }
 0x2e5   :  { %4519 = vmatpush.bf16.msrb.mxu1 %v8946_v5  ;;  %4532 = vmatpush.bf16.msra.mxu3 %v9074_v41  ;;  %v3092_v5 = vpop.f32.mrf.mxu3  ;;  %v9009_v41 = vld [vmem:[%s16144_s5 + $0xd40] sm:$0xf]  ;;  %v3081_v11 = vpop.f32.mrf.mxu1  ;;  %v8982_v14 = vor.u32 %v10730_v59, %v8979_v46  ;;  %v8921_v59 = vld [vmem:[%s16144_s5 + $0xc88] sm:$0xf] }
 0x2e6   :  { %4545 = vmatpush.bf16.msrb.mxu0 %v8950_v36  ;;  %4558 = vmatpush.bf16.msrb.mxu2 %v9078_v7  ;;  %v3093_v36 = vadd.f32 %v3092_v5, %v3079_v0  ;;  %v3118_v7 = vpop.f32.mrf.mxu2  ;;  %v9010_v31 = vor.u32 %v10740_v53, %v9009_v41  ;;  %v8849_v0 = vld [vmem:[%s16144_s5 + $0xc00] sm:$0xf]  ;;  %v8978_v5 = vor.u32 %v10732_v40, %v8977_v9  ;;  %v8971_v41 = vld [vmem:[%s16144_s5 + $0xcf8] sm:$0xf0]  ;;  %v10759_v53 = vld [vmem:[%s16144_s5 + $0xdec] sm:$0xf] }
 0x2e7   :  { %v3119_v43 = vadd.f32 %v3118_v7, %v3105_v60  ;;  %v8854_v7 = vor.u32 %v10698_v6, %v8851_v61  ;;  %v8953_v11 = vld [vmem:[%s16144_s5 + $0xcc8] sm:$0xf]  ;;  %v10753_v9 = vld [vmem:[%s16144_s5 + $0xdb4] sm:$0xf0]  ;;  %v10719_v40 = vld [vmem:[%s16144_s5 + $0xcac] sm:$0xf] }
 0x2e8   :  { %v14472_v12 = vadd.f32 %v3093_v36, %v14064_v52  ;;  %v8993_v52 = vld [vmem:[%s16144_s5 + $0xd20] sm:$0xf]  ;;  %v4192_v36 = vunpack.c.l.b16 %v12528_v54  ;;  %v10757_v54 = vld [vmem:[%s16144_s5 + $0xdd4] sm:$0xf0] }
 0x2e9   :  { %4520 = vmatpush.bf16.msrb.mxu1 %v8930_v3  ;;  %4533 = vmatpush.bf16.msra.mxu3 %v9058_v27  ;;  %v3107_v3 = vpop.f32.mrf.mxu0  ;;  %v8882_v27 = vor.u32 %v10708_v17, %v8881_v28  ;;  %v9097_v28 = vld [vmem:[%s16144_s5 + $0xde8] sm:$0xf]  ;;  %v10761_v17 = vld [vmem:[%s16144_s5 + $0xdf4] sm:$0xf0] }
 0x2ea   :  { %4546 = vmatpush.bf16.msrb.mxu0 %v8934_v39  ;;  %4559 = vmatpush.bf16.msrb.mxu2 %v9062_v51  ;;  %v10704_v39 = vld [vmem:[%s16144_s5 + $0xc2c] sm:$0xf0]  ;;  %v14481_v51 = vadd.f32 %v3119_v43, %v14073_v38  ;;  %v10734_v38 = vld [vmem:[%s16144_s5 + $0xd24] sm:$0xf]  ;;  %v9098_v43 = vor.u32 %v10761_v17, %v9097_v28  ;;  %v10725_v3 = vld [vmem:[%s16144_s5 + $0xcd4] sm:$0xf0] }
 0x2eb   :  { %v8866_v60 = vor.u32 %v10704_v39, %v8865_v49  ;;  %v9081_v49 = vld [vmem:[%s16144_s5 + $0xdc8] sm:$0xf]  ;;  %v10723_v39 = vld [vmem:[%s16144_s5 + $0xccc] sm:$0xf]  ;;  %v10749_v28 = vld [vmem:[%s16144_s5 + $0xd94] sm:$0xf0] }
 0x2ec   :  { %v10715_v17 = vld [vmem:[%s16144_s5 + $0xc8c] sm:$0xf] }
 0x2ed   :  { %4521 = vmatpush.bf16.msrb.mxu1 %v8914_v62  ;;  %4534 = vmatpush.bf16.msra.mxu3 %v9042_v4  ;;  %v8994_v62 = vor.u32 %v10736_v29, %v8993_v52  ;;  %v10700_v4 = vld [vmem:[%s16144_s5 + $0xc0c] sm:$0xf0]  ;;  %v3094_v16 = vpop.f32.mrf.mxu3  ;;  %v9083_v52 = vld [vmem:[%s16144_s5 + $0xdd8] sm:$0xf0]  ;;  %v14575_v29 = vpack.c.b16 %v4192_v36, %v4192_v36 }
 0x2ee   :  { %4547 = vmatpush.bf16.msrb.mxu0 %v8918_v55  ;;  %4560 = vmatpush.bf16.msrb.mxu2 %v9046_v58  ;;  %v8870_v55 = vor.u32 %v10702_v57, %v8867_v24  ;;  %v8998_v58 = vor.u32 %v10734_v38, %v8995_v18  ;;  %v3120_v13 = vpop.f32.mrf.mxu2  ;;  %v14577_v57 = vpack.c.b16 %v4193_v44, %v4193_v44  ;;  %v8937_v18 = vld [vmem:[%s16144_s5 + $0xca8] sm:$0xf]  ;;  %v9067_v16 = vld [vmem:[%s16144_s5 + $0xdb8] sm:$0xf0] }
 0x2ef   :  { %v8954_v24 = vor.u32 %v10725_v3, %v8953_v11  ;;  %v9082_v38 = vor.u32 %v10757_v54, %v9081_v49  ;;  %v10717_v13 = vld [vmem:[%s16144_s5 + $0xc94] sm:$0xf0]  ;;  %v10711_v3 = vld [vmem:[%s16144_s5 + $0xc6c] sm:$0xf]  ;;  %v9035_v49 = vld [vmem:[%s16144_s5 + $0xd78] sm:$0xf0] }
 0x2f0   :  { %v10745_v11 = vld [vmem:[%s16144_s5 + $0xd74] sm:$0xf0] }
 0x2f1   :  { %4522 = vmatpush.bf16.msrb.mxu1 %v8898_v42  ;;  %4535 = vmatpush.bf16.msra.mxu3 %v9026_v1  ;;  %v8969_v42 = vld [vmem:[%s16144_s5 + $0xce8] sm:$0xf]  ;;  %v10729_v1 = vld [vmem:[%s16144_s5 + $0xcf4] sm:$0xf0] }
 0x2f2   :  { %4548 = vmatpush.bf16.msrb.mxu0 %v8902_v23  ;;  %4561 = vmatpush.bf16.msrb.mxu2 %v9030_v37  ;;  %v10727_v23 = vld [vmem:[%s16144_s5 + $0xcec] sm:$0xf]  ;;  %v8850_v37 = vor.u32 %v10700_v4, %v8849_v0  ;;  %v8970_v22 = vor.u32 %v10729_v1, %v8969_v42  ;;  %v10721_v0 = vld [vmem:[%s16144_s5 + $0xcb4] sm:$0xf0]  ;;  %v9065_v4 = vld [vmem:[%s16144_s5 + $0xda8] sm:$0xf] }
 0x2f3   :  { %v8938_v6 = vor.u32 %v10721_v0, %v8937_v18  ;;  %v9066_v61 = vor.u32 %v10753_v9, %v9065_v4  ;;  %v9049_v1 = vld [vmem:[%s16144_s5 + $0xd88] sm:$0xf]  ;;  %v10741_v0 = vld [vmem:[%s16144_s5 + $0xd54] sm:$0xf0]  ;;  %v8891_v9 = vld [vmem:[%s16144_s5 + $0xc58] sm:$0xf0] }
 0x2f4   :  { %v9050_v36 = vor.u32 %v10749_v28, %v9049_v1  ;;  %v9017_v18 = vld [vmem:[%s16144_s5 + $0xd48] sm:$0xf] }
 0x2f5   :  { %4523 = vmatpush.bf16.msrb.mxu1 %v8882_v27  ;;  %4536 = vmatpush.bf16.msra.mxu3 %v9010_v31  ;;  %v8974_v27 = vor.u32 %v10727_v23, %v8971_v41  ;;  %v9102_v31 = vor.u32 %v10759_v53, %v9099_v20  ;;  %v8923_v23 = vld [vmem:[%s16144_s5 + $0xc98] sm:$0xf0]  ;;  %v8922_v20 = vor.u32 %v10717_v13, %v8921_v59 }
 0x2f6   :  { %4549 = vmatpush.bf16.msrb.mxu0 %v8886_v10  ;;  %4562 = vmatpush.bf16.msrb.mxu2 %v9014_v35  ;;  %v8955_v10 = vld [vmem:[%s16144_s5 + $0xcd8] sm:$0xf0]  ;;  %v10755_v35 = vld [vmem:[%s16144_s5 + $0xdcc] sm:$0xf]  ;;  %v8926_v44 = vor.u32 %v10715_v17, %v8923_v23  ;;  %v9018_v13 = vor.u32 %v10741_v0, %v9017_v18  ;;  %v10737_v23 = vld [vmem:[%s16144_s5 + $0xd34] sm:$0xf0] }
 0x2f7   :  { %v9283_v0 = vld [vmem:[%s16144_s5 + $0xef0] sm:$0xf0] }
 0x2f9   :  { %4524 = vmatpush.bf16.msrb.mxu1 %v8866_v60  ;;  %4537 = vmatpush.bf16.msra.mxu3 %v8994_v62  ;;  %v8958_v60 = vor.u32 %v10723_v39, %v8955_v10  ;;  %v9086_v62 = vor.u32 %v10755_v35, %v9083_v52  ;;  %v8889_v10 = vld [vmem:[%s16144_s5 + $0xc48] sm:$0xf]  ;;  %v10709_v35 = vld [vmem:[%s16144_s5 + $0xc54] sm:$0xf0] }
 0x2fa   :  { %4550 = vmatpush.bf16.msrb.mxu0 %v8870_v55  ;;  %4563 = vmatpush.bf16.msrb.mxu2 %v8998_v58  ;;  %v8939_v55 = vld [vmem:[%s16144_s5 + $0xcb8] sm:$0xf0]  ;;  %v10751_v58 = vld [vmem:[%s16144_s5 + $0xdac] sm:$0xf]  ;;  %v8890_v59 = vor.u32 %v10709_v35, %v8889_v10  ;;  %v10792_v10 = vld [vmem:[%s16144_s5 + $0xeec] sm:$0xf0] }
 0x2fb   :  { %v8942_v46 = vor.u32 %v10719_v40, %v8939_v55  ;;  %v9070_v42 = vor.u32 %v10751_v58, %v9067_v16  ;;  %v10739_v40 = vld [vmem:[%s16144_s5 + $0xd4c] sm:$0xf]  ;;  %v9019_v55 = vld [vmem:[%s16144_s5 + $0xd58] sm:$0xf0]  ;;  %v9409_v35 = vld [vmem:[%s16144_s5 + $0xfe0] sm:$0xf] }
 0x2fc   :  { %v9022_v17 = vor.u32 %v10739_v40, %v9019_v55 }
 0x2fd   :  { %4525 = vmatpush.bf16.msrb.mxu1 %v8850_v37  ;;  %4538 = vmatpush.bf16.msra.mxu3 %v8978_v5  ;;  %v10747_v37 = vld [vmem:[%s16144_s5 + $0xd8c] sm:$0xf]  ;;  %v9051_v5 = vld [vmem:[%s16144_s5 + $0xd98] sm:$0xf0]  ;;  %v3527_v41 = vpop.f32.mrf.mxu1 }
 0x2fe   :  { %4551 = vmatpush.bf16.msrb.mxu0 %v8854_v7  ;;  %4564 = vmatpush.bf16.msrb.mxu2 %v8982_v14  ;;  %v8905_v7 = vld [vmem:[%s16144_s5 + $0xc68] sm:$0xf]  ;;  %v10713_v14 = vld [vmem:[%s16144_s5 + $0xc74] sm:$0xf0] }
 0x2ff   :  { %v8906_v54 = vor.u32 %v10713_v14, %v8905_v7  ;;  %v10701_v7 = vld [vmem:[%s16144_s5 + $0xc14] sm:$0xf0]  ;;  %v8985_v14 = vld [vmem:[%s16144_s5 + $0xd08] sm:$0xf] }
 0x300   :  { %4526 = vmatmul.bf16.vlgmr.msrb.gmra.mxu1 %v14575_v29  ;;  %4539 = vmatmul.bf16.vlgmr.msra.gmra.mxu3 %v14577_v57  ;;  %v3553_v53 = vpop.f32.mrf.mxu0 }
 0x301   :  { %4570 = vmatpush.bf16.msra.mxu1 %v8970_v22  ;;  %4583 = vmatpush.bf16.msrb.mxu3 %v9098_v43  ;;  %v9054_v22 = vor.u32 %v10747_v37, %v9051_v5  ;;  %v9033_v43 = vld [vmem:[%s16144_s5 + $0xd68] sm:$0xf]  ;;  %v10703_v37 = vld [vmem:[%s16144_s5 + $0xc2c] sm:$0xf]  ;;  %v8875_v5 = vld [vmem:[%s16144_s5 + $0xc38] sm:$0xf0] }
 0x302   :  { %4596 = vmatpush.bf16.msra.mxu0 %v8974_v27  ;;  %4609 = vmatpush.bf16.msra.mxu2 %v9102_v31  ;;  %v8907_v27 = vld [vmem:[%s16144_s5 + $0xc78] sm:$0xf0]  ;;  %v10743_v31 = vld [vmem:[%s16144_s5 + $0xd6c] sm:$0xf]  ;;  %v9034_v39 = vor.u32 %v10745_v11, %v9033_v43 }
 0x303   :  { %4552 = vmatmul.bf16.vlgmr.msrb.gmra.mxu0 %v14575_v29  ;;  %4565 = vmatmul.bf16.vlgmr.msrb.gmra.mxu2 %v14577_v57  ;;  %v8910_v52 = vor.u32 %v10711_v3, %v8907_v27  ;;  %v10699_v3 = vld [vmem:[%s16144_s5 + $0xc0c] sm:$0xf]  ;;  %v8859_v27 = vld [vmem:[%s16144_s5 + $0xc18] sm:$0xf0] }
 0x305   :  { %4571 = vmatpush.bf16.msra.mxu1 %v8954_v24  ;;  %4584 = vmatpush.bf16.msrb.mxu3 %v9082_v38  ;;  %v9038_v24 = vor.u32 %v10743_v31, %v9035_v49  ;;  %v3540_v38 = vpop.f32.mrf.mxu3  ;;  %v3529_v16 = vpop.f32.mrf.mxu1  ;;  %v10731_v31 = vld [vmem:[%s16144_s5 + $0xd0c] sm:$0xf] }
 0x306   :  { %4597 = vmatpush.bf16.msra.mxu0 %v8958_v60  ;;  %4610 = vmatpush.bf16.msra.mxu2 %v9086_v62  ;;  %v10707_v60 = vld [vmem:[%s16144_s5 + $0xc4c] sm:$0xf]  ;;  %v3541_v62 = vadd.f32 %v3540_v38, %v3527_v41  ;;  %v3566_v4 = vpop.f32.mrf.mxu2  ;;  %v9003_v41 = vld [vmem:[%s16144_s5 + $0xd38] sm:$0xf0]  ;;  %v10788_v16 = vld [vmem:[%s16144_s5 + $0xecc] sm:$0xf0] }
 0x307   :  { %v3567_v58 = vadd.f32 %v3566_v4, %v3553_v53  ;;  %v8894_v28 = vor.u32 %v10707_v60, %v8891_v9  ;;  %v8857_v53 = vld [vmem:[%s16144_s5 + $0xc08] sm:$0xf]  ;;  %v10822_v60 = vld [vmem:[%s16144_s5 + $0xfe4] sm:$0xf]  ;;  %v8862_v4 = vor.u32 %v10699_v3, %v8859_v27  ;;  %v9233_v3 = vld [vmem:[%s16144_s5 + $0xe80] sm:$0xf] }
 0x308   :  { %v8858_v38 = vor.u32 %v10701_v7, %v8857_v53  ;;  %v10782_v7 = vld [vmem:[%s16144_s5 + $0xea4] sm:$0xf]  ;;  %v10780_v27 = vld [vmem:[%s16144_s5 + $0xe8c] sm:$0xf0] }
 0x309   :  { %4572 = vmatpush.bf16.msra.mxu1 %v8938_v6  ;;  %4585 = vmatpush.bf16.msrb.mxu3 %v9066_v61  ;;  %v14680_v6 = vadd.f32 %v3541_v62, %v14270_v2  ;;  %v3555_v61 = vpop.f32.mrf.mxu0  ;;  %v14689_v1 = vadd.f32 %v3567_v58, %v14279_v33  ;;  %v9001_v2 = vld [vmem:[%s16144_s5 + $0xd28] sm:$0xf]  ;;  %v10735_v33 = vld [vmem:[%s16144_s5 + $0xd2c] sm:$0xf]  ;;  %v9411_v62 = vld [vmem:[%s16144_s5 + $0xff0] sm:$0xf0] }
 0x30a   :  { %4598 = vmatpush.bf16.msra.mxu0 %v8942_v46  ;;  %4611 = vmatpush.bf16.msra.mxu2 %v9070_v42  ;;  %v8873_v46 = vld [vmem:[%s16144_s5 + $0xc28] sm:$0xf]  ;;  %v10705_v42 = vld [vmem:[%s16144_s5 + $0xc34] sm:$0xf0]  ;;  %v9006_v43 = vor.u32 %v10735_v33, %v9003_v41  ;;  %v9265_v58 = vld [vmem:[%s16144_s5 + $0xec0] sm:$0xf] }
 0x30b   :  { %v10784_v33 = vld [vmem:[%s16144_s5 + $0xeac] sm:$0xf0] }
 0x30d   :  { %4573 = vmatpush.bf16.msra.mxu1 %v8922_v20  ;;  %4586 = vmatpush.bf16.msrb.mxu3 %v9050_v36  ;;  %v8874_v20 = vor.u32 %v10705_v42, %v8873_v46  ;;  %v9002_v36 = vor.u32 %v10737_v23, %v9001_v2  ;;  %v3542_v11 = vpop.f32.mrf.mxu3  ;;  %v10820_v46 = vld [vmem:[%s16144_s5 + $0xfcc] sm:$0xf0]  ;;  %v10786_v42 = vld [vmem:[%s16144_s5 + $0xec4] sm:$0xf]  ;;  %v9395_v2 = vld [vmem:[%s16144_s5 + $0xfd0] sm:$0xf0]  ;;  %v9266_v23 = vor.u32 %v10788_v16, %v9265_v58 }
 0x30e   :  { %4599 = vmatpush.bf16.msra.mxu0 %v8926_v44  ;;  %4612 = vmatpush.bf16.msra.mxu2 %v9054_v22  ;;  %v10733_v44 = vld [vmem:[%s16144_s5 + $0xd14] sm:$0xf0]  ;;  %v8878_v22 = vor.u32 %v10703_v37, %v8875_v5  ;;  %v3568_v49 = vpop.f32.mrf.mxu2  ;;  %v9249_v5 = vld [vmem:[%s16144_s5 + $0xea0] sm:$0xf]  ;;  %v9219_v16 = vld [vmem:[%s16144_s5 + $0xe70] sm:$0xf0] }
 0x30f   :  { %v8986_v18 = vor.u32 %v10733_v44, %v8985_v14  ;;  %v9251_v14 = vld [vmem:[%s16144_s5 + $0xeb0] sm:$0xf0]  ;;  %v10814_v44 = vld [vmem:[%s16144_s5 + $0xfa4] sm:$0xf] }
 0x311   :  { %4574 = vmatpush.bf16.msra.mxu1 %v8906_v54  ;;  %4587 = vmatpush.bf16.msrb.mxu3 %v9034_v39  ;;  %v8987_v54 = vld [vmem:[%s16144_s5 + $0xd18] sm:$0xf0]  ;;  %v9281_v39 = vld [vmem:[%s16144_s5 + $0xee0] sm:$0xf] }
 0x312   :  { %4600 = vmatpush.bf16.msra.mxu0 %v8910_v52  ;;  %4613 = vmatpush.bf16.msra.mxu2 %v9038_v24  ;;  %v10824_v52 = vld [vmem:[%s16144_s5 + $0xfec] sm:$0xf0]  ;;  %v10790_v24 = vld [vmem:[%s16144_s5 + $0xee4] sm:$0xf]  ;;  %v8990_v9 = vor.u32 %v10731_v31, %v8987_v54  ;;  %v9282_v40 = vor.u32 %v10792_v10, %v9281_v39  ;;  %v9254_v31 = vor.u32 %v10782_v7, %v9251_v14  ;;  %v9235_v39 = vld [vmem:[%s16144_s5 + $0xe90] sm:$0xf0] }
 0x313   :  { %v9410_v55 = vor.u32 %v10824_v52, %v9409_v35  ;;  %v9286_v61 = vor.u32 %v10790_v24, %v9283_v0  ;;  %v10778_v54 = vld [vmem:[%s16144_s5 + $0xe84] sm:$0xf]  ;;  %v9363_v35 = vld [vmem:[%s16144_s5 + $0xf90] sm:$0xf0]  ;;  %v1030_v24 = vadd.f32 %v12394_v32, %v12207_v45  ;;  %v9345_v32 = vld [vmem:[%s16144_s5 + $0xf60] sm:$0xf] }
 0x314   :  { %v10810_v10 = vld [vmem:[%s16144_s5 + $0xf84] sm:$0xf] }
 0x315   :  { %4575 = vmatpush.bf16.msra.mxu1 %v8890_v59  ;;  %4588 = vmatpush.bf16.msrb.mxu3 %v9018_v13  ;;  %v9414_v59 = vor.u32 %v10822_v60, %v9411_v62  ;;  %v9393_v13 = vld [vmem:[%s16144_s5 + $0xfc0] sm:$0xf]  ;;  %v10776_v62 = vld [vmem:[%s16144_s5 + $0xe6c] sm:$0xf0]  ;;  %v1064_v58 = vadd.f32 %v12440_v63, %v1030_v24 }
 0x316   :  { %4601 = vmatpush.bf16.msra.mxu0 %v8894_v28  ;;  %4614 = vmatpush.bf16.msra.mxu2 %v9022_v17  ;;  %v9267_v28 = vld [vmem:[%s16144_s5 + $0xed0] sm:$0xf0]  ;;  %v10818_v17 = vld [vmem:[%s16144_s5 + $0xfc4] sm:$0xf]  ;;  %v9394_v37 = vor.u32 %v10820_v46, %v9393_v13  ;;  %v9217_v60 = vld [vmem:[%s16144_s5 + $0xe60] sm:$0xf]  ;;  %v928_v13 = vadd.f32 %v12029_v50, %v11763_v19 }
 0x317   :  { %v9270_v41 = vor.u32 %v10786_v42, %v9267_v28  ;;  %v9398_v53 = vor.u32 %v10818_v17, %v9395_v2  ;;  %v1098_v46 = vadd.f32 %v12549_v48, %v1064_v58  ;;  %v9218_v63 = vor.u32 %v10776_v62, %v9217_v60  ;;  %v9201_v28 = vld [vmem:[%s16144_s5 + $0xe40] sm:$0xf]  ;;  %v10772_v17 = vld [vmem:[%s16144_s5 + $0xe4c] sm:$0xf0]  ;;  %v9171_v58 = vld [vmem:[%s16144_s5 + $0xe10] sm:$0xf0] }
 0x318   :  { %v962_v2 = vadd.f32 %v12120_v47, %v928_v13  ;;  %v9329_v48 = vld [vmem:[%s16144_s5 + $0xf40] sm:$0xf]  ;;  %v9203_v47 = vld [vmem:[%s16144_s5 + $0xe50] sm:$0xf0]  ;;  %v10796_v62 = vld [vmem:[%s16144_s5 + $0xf0c] sm:$0xf0] }
 0x319   :  { %4576 = vmatpush.bf16.msra.mxu1 %v8874_v20  ;;  %4589 = vmatpush.bf16.msrb.mxu3 %v9002_v36  ;;  %v9377_v20 = vld [vmem:[%s16144_s5 + $0xfa0] sm:$0xf]  ;;  %v10816_v36 = vld [vmem:[%s16144_s5 + $0xfac] sm:$0xf0]  ;;  %v9289_v13 = vld [vmem:[%s16144_s5 + $0xee8] sm:$0xf] }
 0x31a   :  { %4602 = vmatpush.bf16.msra.mxu0 %v8878_v22  ;;  %4615 = vmatpush.bf16.msra.mxu2 %v9006_v43  ;;  %v9379_v22 = vld [vmem:[%s16144_s5 + $0xfb0] sm:$0xf0]  ;;  %v9250_v43 = vor.u32 %v10784_v33, %v9249_v5  ;;  %v9378_v11 = vor.u32 %v10816_v36, %v9377_v20  ;;  %v10804_v5 = vld [vmem:[%s16144_s5 + $0xf4c] sm:$0xf0]  ;;  %v10770_v33 = vld [vmem:[%s16144_s5 + $0xe44] sm:$0xf]  ;;  %v996_v7 = vadd.f32 %v12509_v34, %v962_v2 }
 0x31b   :  { %v9382_v49 = vor.u32 %v10814_v44, %v9379_v22  ;;  %v10802_v20 = vld [vmem:[%s16144_s5 + $0xf44] sm:$0xf]  ;;  %v9331_v36 = vld [vmem:[%s16144_s5 + $0xf50] sm:$0xf0]  ;;  %v1120_v22 = vmax.f32 %v1098_v46, 0.0 }
 0x31c   :  { %v9169_v24 = vld [vmem:[%s16144_s5 + $0xe00] sm:$0xf]  ;;  %v10793_v46 = vld [vmem:[%s16144_s5 + $0xef4] sm:$0xf0] }
 0x31d   :  { %4577 = vmatpush.bf16.msra.mxu1 %v8858_v38  ;;  %4590 = vmatpush.bf16.msrb.mxu3 %v8986_v18  ;;  %v3579_v52 = vpop.f32.mrf.mxu1  ;;  %v9234_v18 = vor.u32 %v10780_v27, %v9233_v3  ;;  %v9202_v3 = vor.u32 %v10772_v17, %v9201_v28  ;;  %v9330_v27 = vor.u32 %v10804_v5, %v9329_v48  ;;  %v9297_v60 = vld [vmem:[%s16144_s5 + $0xf00] sm:$0xf]  ;;  %v10791_v28 = vld [vmem:[%s16144_s5 + $0xeec] sm:$0xf] }
 0x31e   :  { %4603 = vmatpush.bf16.msra.mxu0 %v8862_v4  ;;  %4616 = vmatpush.bf16.msra.mxu2 %v8990_v9  ;;  %v9238_v4 = vor.u32 %v10778_v54, %v9235_v39  ;;  %v9366_v9 = vor.u32 %v10810_v10, %v9363_v35  ;;  %v10800_v54 = vld [vmem:[%s16144_s5 + $0xf2c] sm:$0xf0]  ;;  %v10766_v39 = vld [vmem:[%s16144_s5 + $0xe24] sm:$0xf]  ;;  %v9187_v10 = vld [vmem:[%s16144_s5 + $0xe30] sm:$0xf0]  ;;  %v9298_v2 = vor.u32 %v10796_v62, %v9297_v60 }
 0x31f   :  { %v9315_v35 = vld [vmem:[%s16144_s5 + $0xf30] sm:$0xf0] }
 0x320   :  { %4578 = vmatmul.bf16.vlgmr.msra.gmra.mxu1 %v14575_v29  ;;  %4591 = vmatmul.bf16.vlgmr.msrb.gmra.mxu3 %v14577_v57  ;;  %v3605_v38 = vpop.f32.mrf.mxu0 }
 0x321   :  { %5018 = vmatpush.bf16.msrb.mxu1 %v9282_v40  ;;  %5031 = vmatpush.bf16.msra.mxu3 %v9410_v55  ;;  %v10808_v40 = vld [vmem:[%s16144_s5 + $0xf6c] sm:$0xf0]  ;;  %v10774_v55 = vld [vmem:[%s16144_s5 + $0xe64] sm:$0xf] }
 0x322   :  { %5044 = vmatpush.bf16.msrb.mxu0 %v9286_v61  ;;  %5057 = vmatpush.bf16.msrb.mxu2 %v9414_v59  ;;  %v10806_v61 = vld [vmem:[%s16144_s5 + $0xf64] sm:$0xf]  ;;  %v9347_v59 = vld [vmem:[%s16144_s5 + $0xf70] sm:$0xf0]  ;;  %v9346_v42 = vor.u32 %v10808_v40, %v9345_v32 }
 0x323   :  { %4604 = vmatmul.bf16.vlgmr.msra.gmra.mxu0 %v14575_v29  ;;  %4617 = vmatmul.bf16.vlgmr.msra.gmra.mxu2 %v14577_v57  ;;  %v9361_v29 = vld [vmem:[%s16144_s5 + $0xf80] sm:$0xf]  ;;  %v10812_v57 = vld [vmem:[%s16144_s5 + $0xf8c] sm:$0xf0]  ;;  %v9350_v50 = vor.u32 %v10806_v61, %v9347_v59  ;;  %v9299_v59 = vld [vmem:[%s16144_s5 + $0xf10] sm:$0xf0] }
 0x324   :  { %v9362_v0 = vor.u32 %v10812_v57, %v9361_v29  ;;  %v9206_v29 = vor.u32 %v10770_v33, %v9203_v47  ;;  %v9334_v57 = vor.u32 %v10802_v20, %v9331_v36  ;;  %v9273_v20 = vld [vmem:[%s16144_s5 + $0xec8] sm:$0xf]  ;;  %v10789_v36 = vld [vmem:[%s16144_s5 + $0xed4] sm:$0xf0] }
 0x325   :  { %5019 = vmatpush.bf16.msrb.mxu1 %v9266_v23  ;;  %5032 = vmatpush.bf16.msra.mxu3 %v9394_v37  ;;  %v9222_v23 = vor.u32 %v10774_v55, %v9219_v16  ;;  %v3592_v37 = vpop.f32.mrf.mxu3  ;;  %v3581_v44 = vpop.f32.mrf.mxu1  ;;  %v10762_v55 = vld [vmem:[%s16144_s5 + $0xe04] sm:$0xf] }
 0x326   :  { %5045 = vmatpush.bf16.msrb.mxu0 %v9270_v41  ;;  %5058 = vmatpush.bf16.msrb.mxu2 %v9398_v53  ;;  %v3593_v41 = vadd.f32 %v3592_v37, %v3579_v52  ;;  %v3618_v53 = vpop.f32.mrf.mxu2  ;;  %v1119_v52 = vmax.f32 %v996_v7, 0.0  ;;  %v10794_v16 = vld [vmem:[%s16144_s5 + $0xf04] sm:$0xf]  ;;  %v9419_v37 = vld [vmem:[%s16144_s5 + $0xff8] sm:$0xf0]  ;;  %v9174_v5 = vor.u32 %v10762_v55, %v9171_v58 }
 0x327   :  { %v3619_v14 = vadd.f32 %v3618_v53, %v3605_v38  ;;  %v9302_v33 = vor.u32 %v10794_v16, %v9299_v59  ;;  %v9290_v53 = vor.u32 %v10793_v46, %v9289_v13  ;;  %v9401_v44 = vld [vmem:[%s16144_s5 + $0xfc8] sm:$0xf]  ;;  %v10813_v58 = vld [vmem:[%s16144_s5 + $0xf94] sm:$0xf0]  ;;  %v10779_v16 = vld [vmem:[%s16144_s5 + $0xe8c] sm:$0xf] }
 0x328   :  { %v9369_v55 = vld [vmem:[%s16144_s5 + $0xf88] sm:$0xf]  ;;  %v10811_v59 = vld [vmem:[%s16144_s5 + $0xf8c] sm:$0xf]  ;;  %v9371_v13 = vld [vmem:[%s16144_s5 + $0xf98] sm:$0xf0] }
 0x329   :  { %5020 = vmatpush.bf16.msrb.mxu1 %v9250_v43  ;;  %5033 = vmatpush.bf16.msra.mxu3 %v9378_v11  ;;  %v14890_v43 = vadd.f32 %v3593_v41, %v14472_v12  ;;  %v3607_v11 = vpop.f32.mrf.mxu0  ;;  %v14899_v34 = vadd.f32 %v3619_v14, %v14481_v51  ;;  %v9313_v12 = vld [vmem:[%s16144_s5 + $0xf20] sm:$0xf]  ;;  %v10798_v51 = vld [vmem:[%s16144_s5 + $0xf24] sm:$0xf] }
 0x32a   :  { %5046 = vmatpush.bf16.msrb.mxu0 %v9254_v31  ;;  %5059 = vmatpush.bf16.msrb.mxu2 %v9382_v49  ;;  %v9185_v31 = vld [vmem:[%s16144_s5 + $0xe20] sm:$0xf]  ;;  %v10768_v49 = vld [vmem:[%s16144_s5 + $0xe2c] sm:$0xf0]  ;;  %v9318_v32 = vor.u32 %v10798_v51, %v9315_v35  ;;  %v10787_v11 = vld [vmem:[%s16144_s5 + $0xecc] sm:$0xf] }
 0x32b   :  { %v9186_v38 = vor.u32 %v10768_v49, %v9185_v31  ;;  %v9403_v31 = vld [vmem:[%s16144_s5 + $0xfd8] sm:$0xf0]  ;;  %v9385_v35 = vld [vmem:[%s16144_s5 + $0xfa8] sm:$0xf] }
 0x32d   :  { %5021 = vmatpush.bf16.msrb.mxu1 %v9234_v18  ;;  %5034 = vmatpush.bf16.msra.mxu3 %v9362_v0  ;;  %v9314_v18 = vor.u32 %v10800_v54, %v9313_v12  ;;  %v10764_v0 = vld [vmem:[%s16144_s5 + $0xe0c] sm:$0xf0]  ;;  %v3594_v40 = vpop.f32.mrf.mxu3  ;;  %v9257_v54 = vld [vmem:[%s16144_s5 + $0xea8] sm:$0xf] }
 0x32e   :  { %5047 = vmatpush.bf16.msrb.mxu0 %v9238_v4  ;;  %5060 = vmatpush.bf16.msrb.mxu2 %v9366_v9  ;;  %v1132_v4 = vpack.c.bf16 %v1120_v22, %v1119_v52  ;;  %v9190_v9 = vor.u32 %v10766_v39, %v9187_v10  ;;  %v3620_v61 = vpop.f32.mrf.mxu2  ;;  %v9170_v17 = vor.u32 %v10764_v0, %v9169_v24  ;;  %v10821_v22 = vld [vmem:[%s16144_s5 + $0xfd4] sm:$0xf0]  ;;  %v10783_v24 = vld [vmem:[%s16144_s5 + $0xeac] sm:$0xf]  ;;  %v9387_v0 = vld [vmem:[%s16144_s5 + $0xfb8] sm:$0xf0] }
 0x32f   :  { %v9402_v12 = vor.u32 %v10821_v22, %v9401_v44  ;;  %v10785_v39 = vld [vmem:[%s16144_s5 + $0xeb4] sm:$0xf0]  ;;  %v9243_v61 = vld [vmem:[%s16144_s5 + $0xe98] sm:$0xf0] }
 0x330   :  { %v4692_v48 = vunpack.c.l.b16 %v1132_v4  ;;  %v4693_v41 = vunpack.c.h.b16 %v1132_v4  ;;  %v10817_v52 = vld [vmem:[%s16144_s5 + $0xfb4] sm:$0xf0]  ;;  %v9258_v60 = vor.u32 %v10785_v39, %v9257_v54  ;;  %v9241_v4 = vld [vmem:[%s16144_s5 + $0xe88] sm:$0xf]  ;;  %v10803_v54 = vld [vmem:[%s16144_s5 + $0xf4c] sm:$0xf] }
 0x331   :  { %5022 = vmatpush.bf16.msrb.mxu1 %v9218_v63  ;;  %5035 = vmatpush.bf16.msra.mxu3 %v9346_v42  ;;  %v9417_v63 = vld [vmem:[%s16144_s5 + $0xfe8] sm:$0xf]  ;;  %v10825_v42 = vld [vmem:[%s16144_s5 + $0xff4] sm:$0xf0]  ;;  %v9386_v62 = vor.u32 %v10817_v52, %v9385_v35  ;;  %v9339_v39 = vld [vmem:[%s16144_s5 + $0xf58] sm:$0xf0] }
 0x332   :  { %5048 = vmatpush.bf16.msrb.mxu0 %v9222_v23  ;;  %5061 = vmatpush.bf16.msrb.mxu2 %v9350_v50  ;;  %v9291_v23 = vld [vmem:[%s16144_s5 + $0xef8] sm:$0xf0]  ;;  %v10823_v50 = vld [vmem:[%s16144_s5 + $0xfec] sm:$0xf]  ;;  %v9418_v47 = vor.u32 %v10825_v42, %v9417_v63  ;;  %v14991_v49 = vpack.c.b16 %v4692_v48, %v4692_v48  ;;  %v10809_v48 = vld [vmem:[%s16144_s5 + $0xf74] sm:$0xf0] }
 0x333   :  { %v9294_v7 = vor.u32 %v10791_v28, %v9291_v23  ;;  %v9422_v14 = vor.u32 %v10823_v50, %v9419_v37  ;;  %v9370_v28 = vor.u32 %v10813_v58, %v9369_v55  ;;  %v9246_v23 = vor.u32 %v10779_v16, %v9243_v61  ;;  %v9353_v37 = vld [vmem:[%s16144_s5 + $0xf68] sm:$0xf]  ;;  %v9323_v55 = vld [vmem:[%s16144_s5 + $0xf38] sm:$0xf0] }
 0x334   :  { %v9374_v50 = vor.u32 %v10811_v59, %v9371_v13  ;;  %v9177_v58 = vld [vmem:[%s16144_s5 + $0xe08] sm:$0xf]  ;;  %v10765_v59 = vld [vmem:[%s16144_s5 + $0xe14] sm:$0xf0] }
 0x335   :  { %5023 = vmatpush.bf16.msrb.mxu1 %v9202_v3  ;;  %5036 = vmatpush.bf16.msra.mxu3 %v9330_v27  ;;  %v9275_v3 = vld [vmem:[%s16144_s5 + $0xed8] sm:$0xf0]  ;;  %v10819_v27 = vld [vmem:[%s16144_s5 + $0xfcc] sm:$0xf]  ;;  %v9305_v13 = vld [vmem:[%s16144_s5 + $0xf08] sm:$0xf] }
 0x336   :  { %5049 = vmatpush.bf16.msrb.mxu0 %v9206_v29  ;;  %5062 = vmatpush.bf16.msrb.mxu2 %v9334_v57  ;;  %v14993_v29 = vpack.c.b16 %v4693_v41, %v4693_v41  ;;  %v9274_v57 = vor.u32 %v10789_v36, %v9273_v20  ;;  %v9278_v10 = vor.u32 %v10787_v11, %v9275_v3  ;;  %v10807_v41 = vld [vmem:[%s16144_s5 + $0xf6c] sm:$0xf]  ;;  %v9209_v36 = vld [vmem:[%s16144_s5 + $0xe48] sm:$0xf]  ;;  %v10805_v3 = vld [vmem:[%s16144_s5 + $0xf54] sm:$0xf0] }
 0x337   :  { %v9406_v51 = vor.u32 %v10819_v27, %v9403_v31  ;;  %v9354_v20 = vor.u32 %v10809_v48, %v9353_v37  ;;  %v9337_v11 = vld [vmem:[%s16144_s5 + $0xf48] sm:$0xf]  ;;  %v10771_v27 = vld [vmem:[%s16144_s5 + $0xe4c] sm:$0xf]  ;;  %v9307_v37 = vld [vmem:[%s16144_s5 + $0xf18] sm:$0xf0] }
 0x338   :  { %v9601_v48 = vld [vmem:[%s16144_s5 + $0x10e0] sm:$0xf] }
 0x339   :  { %5024 = vmatpush.bf16.msrb.mxu1 %v9186_v38  ;;  %5037 = vmatpush.bf16.msra.mxu3 %v9314_v18  ;;  %v9259_v38 = vld [vmem:[%s16144_s5 + $0xeb8] sm:$0xf0]  ;;  %v10815_v18 = vld [vmem:[%s16144_s5 + $0xfac] sm:$0xf] }
 0x33a   :  { %5050 = vmatpush.bf16.msrb.mxu0 %v9190_v9  ;;  %5063 = vmatpush.bf16.msrb.mxu2 %v9318_v32  ;;  %v10781_v9 = vld [vmem:[%s16144_s5 + $0xe94] sm:$0xf0]  ;;  %v9262_v32 = vor.u32 %v10783_v24, %v9259_v38  ;;  %v9390_v40 = vor.u32 %v10815_v18, %v9387_v0  ;;  %v9338_v38 = vor.u32 %v10805_v3, %v9337_v11  ;;  %v9193_v18 = vld [vmem:[%s16144_s5 + $0xe28] sm:$0xf] }
 0x33b   :  { %v9242_v42 = vor.u32 %v10781_v9, %v9241_v4  ;;  %v10769_v0 = vld [vmem:[%s16144_s5 + $0xe34] sm:$0xf0]  ;;  %v9342_v4 = vor.u32 %v10803_v54, %v9339_v39  ;;  %v9713_v54 = vld [vmem:[%s16144_s5 + $0x11c0] sm:$0xf]  ;;  %v10884_v39 = vld [vmem:[%s16144_s5 + $0x11cc] sm:$0xf0] }
 0x33c   :  { %v10801_v9 = vld [vmem:[%s16144_s5 + $0xf34] sm:$0xf0]  ;;  %v9194_v16 = vor.u32 %v10769_v0, %v9193_v18  ;;  %v9714_v18 = vor.u32 %v10884_v39, %v9713_v54  ;;  %v9569_v0 = vld [vmem:[%s16144_s5 + $0x10a0] sm:$0xf]  ;;  %v10868_v39 = vld [vmem:[%s16144_s5 + $0x114c] sm:$0xf0] }
 0x33d   :  { %5025 = vmatpush.bf16.msrb.mxu1 %v9170_v17  ;;  %5038 = vmatpush.bf16.msra.mxu3 %v9298_v2  ;;  %v4027_v46 = vpop.f32.mrf.mxu1  ;;  %v9225_v17 = vld [vmem:[%s16144_s5 + $0xe68] sm:$0xf]  ;;  %v10777_v2 = vld [vmem:[%s16144_s5 + $0xe74] sm:$0xf0]  ;;  %v9649_v54 = vld [vmem:[%s16144_s5 + $0x1140] sm:$0xf] }
 0x33e   :  { %5051 = vmatpush.bf16.msrb.mxu0 %v9174_v5  ;;  %5064 = vmatpush.bf16.msrb.mxu2 %v9302_v33  ;;  %v10775_v5 = vld [vmem:[%s16144_s5 + $0xe6c] sm:$0xf]  ;;  %v9227_v33 = vld [vmem:[%s16144_s5 + $0xe78] sm:$0xf0] }
 0x340   :  { %5026 = vmatmul.bf16.vlgmr.msrb.gmra.mxu1 %v14991_v49  ;;  %5039 = vmatmul.bf16.vlgmr.msra.gmra.mxu3 %v14993_v29  ;;  %v4053_v63 = vpop.f32.mrf.mxu0 }
 0x341   :  { %5070 = vmatpush.bf16.msra.mxu1 %v9290_v53  ;;  %5083 = vmatpush.bf16.msrb.mxu3 %v9418_v47  ;;  %v9355_v53 = vld [vmem:[%s16144_s5 + $0xf78] sm:$0xf0]  ;;  %v9226_v47 = vor.u32 %v10777_v2, %v9225_v17  ;;  %v10763_v17 = vld [vmem:[%s16144_s5 + $0xe0c] sm:$0xf] }
 0x342   :  { %5096 = vmatpush.bf16.msra.mxu0 %v9294_v7  ;;  %5109 = vmatpush.bf16.msra.mxu2 %v9422_v14  ;;  %v10773_v7 = vld [vmem:[%s16144_s5 + $0xe54] sm:$0xf0]  ;;  %v9230_v14 = vor.u32 %v10775_v5, %v9227_v33  ;;  %v9358_v44 = vor.u32 %v10807_v41, %v9355_v53  ;;  %v9179_v2 = vld [vmem:[%s16144_s5 + $0xe18] sm:$0xf0]  ;;  %v10856_v5 = vld [vmem:[%s16144_s5 + $0x10ec] sm:$0xf0] }
 0x343   :  { %5052 = vmatmul.bf16.vlgmr.msrb.gmra.mxu0 %v14991_v49  ;;  %5065 = vmatmul.bf16.vlgmr.msrb.gmra.mxu2 %v14993_v29  ;;  %v4040_v22 = vpop.f32.mrf.mxu3  ;;  %v9210_v24 = vor.u32 %v10773_v7, %v9209_v36  ;;  %v9729_v33 = vld [vmem:[%s16144_s5 + $0x11e0] sm:$0xf]  ;;  %v10888_v41 = vld [vmem:[%s16144_s5 + $0x11ec] sm:$0xf0]  ;;  %v10854_v53 = vld [vmem:[%s16144_s5 + $0x10e4] sm:$0xf]  ;;  %v9602_v11 = vor.u32 %v10856_v5, %v9601_v48 }
 0x344   :  { %v4041_v31 = vadd.f32 %v4040_v22, %v4027_v46  ;;  %v10797_v46 = vld [vmem:[%s16144_s5 + $0xf14] sm:$0xf0]  ;;  %v9603_v36 = vld [vmem:[%s16144_s5 + $0x10f0] sm:$0xf0]  ;;  %v10886_v7 = vld [vmem:[%s16144_s5 + $0x11e4] sm:$0xf]  ;;  %v9730_v3 = vor.u32 %v10888_v41, %v9729_v33 }
 0x345   :  { %5071 = vmatpush.bf16.msra.mxu1 %v9274_v57  ;;  %5084 = vmatpush.bf16.msrb.mxu3 %v9402_v12  ;;  %v9211_v12 = vld [vmem:[%s16144_s5 + $0xe58] sm:$0xf0]  ;;  %v9537_v5 = vld [vmem:[%s16144_s5 + $0x1060] sm:$0xf]  ;;  %v10840_v33 = vld [vmem:[%s16144_s5 + $0x106c] sm:$0xf0] }
 0x346   :  { %5097 = vmatpush.bf16.msra.mxu0 %v9278_v10  ;;  %5110 = vmatpush.bf16.msra.mxu2 %v9406_v51  ;;  %v4066_v57 = vpop.f32.mrf.mxu2  ;;  %v4029_v51 = vpop.f32.mrf.mxu1  ;;  %v15096_v35 = vadd.f32 %v4041_v31, %v14680_v6  ;;  %v9321_v6 = vld [vmem:[%s16144_s5 + $0xf28] sm:$0xf]  ;;  %v10852_v31 = vld [vmem:[%s16144_s5 + $0x10cc] sm:$0xf0] }
 0x347   :  { %v4067_v10 = vadd.f32 %v4066_v57, %v4053_v63  ;;  %v9322_v61 = vor.u32 %v10801_v9, %v9321_v6  ;;  %v9606_v57 = vor.u32 %v10854_v53, %v9603_v36  ;;  %v9587_v51 = vld [vmem:[%s16144_s5 + $0x10d0] sm:$0xf0]  ;;  %v9697_v9 = vld [vmem:[%s16144_s5 + $0x11a0] sm:$0xf]  ;;  %v10838_v36 = vld [vmem:[%s16144_s5 + $0x1064] sm:$0xf] }
 0x348   :  { %v4055_v52 = vpop.f32.mrf.mxu0 }
 0x349   :  { %5072 = vmatpush.bf16.msra.mxu1 %v9258_v60  ;;  %5085 = vmatpush.bf16.msrb.mxu3 %v9386_v62  ;;  %v15105_v60 = vadd.f32 %v4067_v10, %v14689_v1  ;;  %v9214_v62 = vor.u32 %v10771_v27, %v9211_v12  ;;  %v10799_v1 = vld [vmem:[%s16144_s5 + $0xf2c] sm:$0xf]  ;;  %v9585_v27 = vld [vmem:[%s16144_s5 + $0x10c0] sm:$0xf]  ;;  %v10850_v10 = vld [vmem:[%s16144_s5 + $0x10c4] sm:$0xf] }
 0x34a   :  { %5098 = vmatpush.bf16.msra.mxu0 %v9262_v32  ;;  %5111 = vmatpush.bf16.msra.mxu2 %v9390_v40  ;;  %v10767_v32 = vld [vmem:[%s16144_s5 + $0xe2c] sm:$0xf]  ;;  %v9195_v40 = vld [vmem:[%s16144_s5 + $0xe38] sm:$0xf0]  ;;  %v10882_v52 = vld [vmem:[%s16144_s5 + $0x11c4] sm:$0xf] }
 0x34b   :  { %v9198_v63 = vor.u32 %v10767_v32, %v9195_v40  ;;  %v10880_v32 = vld [vmem:[%s16144_s5 + $0x11ac] sm:$0xf0]  ;;  %v10846_v40 = vld [vmem:[%s16144_s5 + $0x10a4] sm:$0xf] }
 0x34d   :  { %5073 = vmatpush.bf16.msra.mxu1 %v9242_v42  ;;  %5086 = vmatpush.bf16.msrb.mxu3 %v9370_v28  ;;  %v9326_v42 = vor.u32 %v10799_v1, %v9323_v55  ;;  %v4042_v28 = vpop.f32.mrf.mxu3  ;;  %v9571_v1 = vld [vmem:[%s16144_s5 + $0x10b0] sm:$0xf0]  ;;  %v10878_v55 = vld [vmem:[%s16144_s5 + $0x11a4] sm:$0xf] }
 0x34e   :  { %5099 = vmatpush.bf16.msra.mxu0 %v9246_v23  ;;  %5112 = vmatpush.bf16.msra.mxu2 %v9374_v50  ;;  %v10795_v23 = vld [vmem:[%s16144_s5 + $0xf0c] sm:$0xf]  ;;  %v4068_v50 = vpop.f32.mrf.mxu2  ;;  %v9555_v28 = vld [vmem:[%s16144_s5 + $0x1090] sm:$0xf0] }
 0x34f   :  { %v9310_v22 = vor.u32 %v10795_v23, %v9307_v37 }
 0x351   :  { %5074 = vmatpush.bf16.msra.mxu1 %v9226_v47  ;;  %5087 = vmatpush.bf16.msrb.mxu3 %v9354_v20  ;;  %v9178_v47 = vor.u32 %v10765_v59, %v9177_v58  ;;  %v9306_v20 = vor.u32 %v10797_v46, %v9305_v13  ;;  %v9699_v58 = vld [vmem:[%s16144_s5 + $0x11b0] sm:$0xf0]  ;;  %v9553_v59 = vld [vmem:[%s16144_s5 + $0x1080] sm:$0xf]  ;;  %v10844_v13 = vld [vmem:[%s16144_s5 + $0x108c] sm:$0xf0]  ;;  %v9574_v46 = vor.u32 %v10846_v40, %v9571_v1 }
 0x352   :  { %5100 = vmatpush.bf16.msra.mxu0 %v9230_v14  ;;  %5113 = vmatpush.bf16.msra.mxu2 %v9358_v44  ;;  %v9731_v14 = vld [vmem:[%s16144_s5 + $0x11f0] sm:$0xf0]  ;;  %v9182_v44 = vor.u32 %v10763_v17, %v9179_v2  ;;  %v10874_v17 = vld [vmem:[%s16144_s5 + $0x1184] sm:$0xf]  ;;  %v9554_v37 = vor.u32 %v10844_v13, %v9553_v59  ;;  %v9505_v40 = vld [vmem:[%s16144_s5 + $0x1020] sm:$0xf] }
 0x353   :  { %v9734_v12 = vor.u32 %v10886_v7, %v9731_v14  ;;  %v9683_v2 = vld [vmem:[%s16144_s5 + $0x1190] sm:$0xf0]  ;;  %v10870_v14 = vld [vmem:[%s16144_s5 + $0x1164] sm:$0xf]  ;;  %v10832_v1 = vld [vmem:[%s16144_s5 + $0x102c] sm:$0xf0] }
 0x354   :  { %v9686_v53 = vor.u32 %v10874_v17, %v9683_v2  ;;  %v9539_v7 = vld [vmem:[%s16144_s5 + $0x1070] sm:$0xf0]  ;;  %v10830_v59 = vld [vmem:[%s16144_s5 + $0x1024] sm:$0xf]  ;;  %v10860_v17 = vld [vmem:[%s16144_s5 + $0x110c] sm:$0xf0] }
 0x355   :  { %5075 = vmatpush.bf16.msra.mxu1 %v9210_v24  ;;  %5088 = vmatpush.bf16.msrb.mxu3 %v9338_v38  ;;  %v9715_v24 = vld [vmem:[%s16144_s5 + $0x11d0] sm:$0xf0]  ;;  %v9586_v38 = vor.u32 %v10852_v31, %v9585_v27  ;;  %v10836_v27 = vld [vmem:[%s16144_s5 + $0x104c] sm:$0xf0]  ;;  %v9542_v31 = vor.u32 %v10838_v36, %v9539_v7  ;;  %v10889_v36 = vld [vmem:[%s16144_s5 + $0x11f4] sm:$0xf0] }
 0x356   :  { %5101 = vmatpush.bf16.msra.mxu0 %v9214_v62  ;;  %5114 = vmatpush.bf16.msra.mxu2 %v9342_v4  ;;  %v10848_v62 = vld [vmem:[%s16144_s5 + $0x10ac] sm:$0xf0]  ;;  %v9590_v4 = vor.u32 %v10850_v10, %v9587_v51  ;;  %v9718_v6 = vor.u32 %v10882_v52, %v9715_v24  ;;  %v10834_v10 = vld [vmem:[%s16144_s5 + $0x1044] sm:$0xf]  ;;  %v9523_v24 = vld [vmem:[%s16144_s5 + $0x1050] sm:$0xf0] }
 0x357   :  { %v9507_v13 = vld [vmem:[%s16144_s5 + $0x1030] sm:$0xf0]  ;;  %v10855_v7 = vld [vmem:[%s16144_s5 + $0x10ec] sm:$0xf] }
 0x358   :  { %v9510_v2 = vor.u32 %v10830_v59, %v9507_v13  ;;  %v9705_v59 = vld [vmem:[%s16144_s5 + $0x11a8] sm:$0xf]  ;;  %v10881_v13 = vld [vmem:[%s16144_s5 + $0x11b4] sm:$0xf0] }
 0x359   :  { %5076 = vmatpush.bf16.msra.mxu1 %v9194_v16  ;;  %5089 = vmatpush.bf16.msrb.mxu3 %v9322_v61  ;;  %v9570_v16 = vor.u32 %v10848_v62, %v9569_v0  ;;  %v9698_v61 = vor.u32 %v10880_v32, %v9697_v9  ;;  %v9650_v32 = vor.u32 %v10868_v39, %v9649_v54 }
 0x35a   :  { %5102 = vmatpush.bf16.msra.mxu0 %v9198_v63  ;;  %5115 = vmatpush.bf16.msra.mxu2 %v9326_v42  ;;  %v9702_v63 = vor.u32 %v10878_v55, %v9699_v58  ;;  %v10842_v42 = vld [vmem:[%s16144_s5 + $0x1084] sm:$0xf]  ;;  %v9526_v58 = vor.u32 %v10834_v10, %v9523_v24  ;;  %v9593_v10 = vld [vmem:[%s16144_s5 + $0x10c8] sm:$0xf] }
 0x35b   :  { %v9558_v41 = vor.u32 %v10842_v42, %v9555_v28  ;;  %v10828_v42 = vld [vmem:[%s16144_s5 + $0x100c] sm:$0xf0]  ;;  %v9617_v28 = vld [vmem:[%s16144_s5 + $0x1100] sm:$0xf] }
 0x35d   :  { %5077 = vmatpush.bf16.msra.mxu1 %v9178_v47  ;;  %5090 = vmatpush.bf16.msrb.mxu3 %v9306_v20  ;;  %v4079_v23 = vpop.f32.mrf.mxu1  ;;  %v9665_v47 = vld [vmem:[%s16144_s5 + $0x1160] sm:$0xf]  ;;  %v10872_v20 = vld [vmem:[%s16144_s5 + $0x116c] sm:$0xf0] }
 0x35e   :  { %5103 = vmatpush.bf16.msra.mxu0 %v9182_v44  ;;  %5116 = vmatpush.bf16.msra.mxu2 %v9310_v22  ;;  %v9667_v44 = vld [vmem:[%s16144_s5 + $0x1170] sm:$0xf0]  ;;  %v9538_v22 = vor.u32 %v10840_v33, %v9537_v5  ;;  %v10858_v5 = vld [vmem:[%s16144_s5 + $0x1104] sm:$0xf] }
 0x360   :  { %5078 = vmatmul.bf16.vlgmr.msra.gmra.mxu1 %v14991_v49  ;;  %5091 = vmatmul.bf16.vlgmr.msrb.gmra.mxu3 %v14993_v29  ;;  %v4105_v50 = vpop.f32.mrf.mxu0 }
 0x361   :  { %5518 = vmatpush.bf16.msrb.mxu1 %v9602_v11  ;;  %5531 = vmatpush.bf16.msra.mxu3 %v9730_v3  ;;  %v9666_v11 = vor.u32 %v10872_v20, %v9665_v47  ;;  %v9521_v3 = vld [vmem:[%s16144_s5 + $0x1040] sm:$0xf]  ;;  %v10857_v47 = vld [vmem:[%s16144_s5 + $0x10f4] sm:$0xf0]  ;;  %v9737_v20 = vld [vmem:[%s16144_s5 + $0x11e8] sm:$0xf] }
 0x362   :  { %5544 = vmatpush.bf16.msrb.mxu0 %v9606_v57  ;;  %5557 = vmatpush.bf16.msrb.mxu2 %v9734_v12  ;;  %v9670_v57 = vor.u32 %v10870_v14, %v9667_v44  ;;  %v9522_v9 = vor.u32 %v10836_v27, %v9521_v3  ;;  %v9618_v44 = vor.u32 %v10860_v17, %v9617_v28  ;;  %v9739_v3 = vld [vmem:[%s16144_s5 + $0x11f8] sm:$0xf0]  ;;  %v5192_v27 = vunpack.c.l.b16 %v12634_v8  ;;  %v9561_v28 = vld [vmem:[%s16144_s5 + $0x1088] sm:$0xf]  ;;  %v10845_v17 = vld [vmem:[%s16144_s5 + $0x1094] sm:$0xf0] }
 0x363   :  { %5104 = vmatmul.bf16.vlgmr.msra.gmra.mxu0 %v14991_v49  ;;  %5117 = vmatmul.bf16.vlgmr.msra.gmra.mxu2 %v14993_v29  ;;  %v9681_v49 = vld [vmem:[%s16144_s5 + $0x1180] sm:$0xf]  ;;  %v10876_v29 = vld [vmem:[%s16144_s5 + $0x118c] sm:$0xf0]  ;;  %v4092_v12 = vpop.f32.mrf.mxu3  ;;  %v9738_v39 = vor.u32 %v10889_v36, %v9737_v20  ;;  %v9562_v20 = vor.u32 %v10845_v17, %v9561_v28  ;;  %v10865_v28 = vld [vmem:[%s16144_s5 + $0x1134] sm:$0xf0] }
 0x364   :  { %v9682_v48 = vor.u32 %v10876_v29, %v9681_v49  ;;  %v4093_v51 = vadd.f32 %v4092_v12, %v4079_v23  ;;  %v9506_v49 = vor.u32 %v10832_v1, %v9505_v40  ;;  %v5193_v12 = vunpack.c.h.b16 %v12634_v8  ;;  %v10885_v8 = vld [vmem:[%s16144_s5 + $0x11d4] sm:$0xf0]  ;;  %v10831_v17 = vld [vmem:[%s16144_s5 + $0x102c] sm:$0xf] }
 0x365   :  { %5519 = vmatpush.bf16.msrb.mxu1 %v9586_v38  ;;  %5532 = vmatpush.bf16.msra.mxu3 %v9714_v18  ;;  %v10866_v38 = vld [vmem:[%s16144_s5 + $0x1144] sm:$0xf]  ;;  %v9651_v18 = vld [vmem:[%s16144_s5 + $0x1150] sm:$0xf0]  ;;  %v4081_v62 = vpop.f32.mrf.mxu1 }
 0x366   :  { %5545 = vmatpush.bf16.msrb.mxu0 %v9590_v4  ;;  %5558 = vmatpush.bf16.msrb.mxu2 %v9718_v6  ;;  %v4118_v52 = vpop.f32.mrf.mxu2  ;;  %v15298_v4 = vadd.f32 %v4093_v51, %v14890_v43  ;;  %v9633_v43 = vld [vmem:[%s16144_s5 + $0x1120] sm:$0xf]  ;;  %v10853_v51 = vld [vmem:[%s16144_s5 + $0x10d4] sm:$0xf0]  ;;  %v10883_v62 = vld [vmem:[%s16144_s5 + $0x11cc] sm:$0xf] }
 0x367   :  { %v4119_v0 = vadd.f32 %v4118_v52, %v4105_v50  ;;  %v9594_v40 = vor.u32 %v10853_v51, %v9593_v10  ;;  %v9529_v10 = vld [vmem:[%s16144_s5 + $0x1048] sm:$0xf]  ;;  %v10837_v51 = vld [vmem:[%s16144_s5 + $0x1054] sm:$0xf0] }
 0x368   :  { %v4107_v6 = vpop.f32.mrf.mxu0 }
 0x369   :  { %5520 = vmatpush.bf16.msrb.mxu1 %v9570_v16  ;;  %5533 = vmatpush.bf16.msra.mxu3 %v9698_v61  ;;  %v15307_v55 = vadd.f32 %v4119_v0, %v14899_v34  ;;  %v9654_v16 = vor.u32 %v10866_v38, %v9651_v18  ;;  %v10864_v61 = vld [vmem:[%s16144_s5 + $0x112c] sm:$0xf0]  ;;  %v10862_v34 = vld [vmem:[%s16144_s5 + $0x1124] sm:$0xf]  ;;  %v9721_v38 = vld [vmem:[%s16144_s5 + $0x11c8] sm:$0xf] }
 0x36a   :  { %5546 = vmatpush.bf16.msrb.mxu0 %v9574_v46  ;;  %5559 = vmatpush.bf16.msrb.mxu2 %v9702_v63  ;;  %v9635_v46 = vld [vmem:[%s16144_s5 + $0x1130] sm:$0xf0]  ;;  %v9489_v63 = vld [vmem:[%s16144_s5 + $0x1000] sm:$0xf]  ;;  %v9634_v29 = vor.u32 %v10864_v61, %v9633_v43  ;;  %v10851_v18 = vld [vmem:[%s16144_s5 + $0x10cc] sm:$0xf]  ;;  %v9722_v1 = vor.u32 %v10885_v8, %v9721_v38 }
 0x36b   :  { %v9638_v23 = vor.u32 %v10862_v34, %v9635_v46  ;;  %v4094_v50 = vpop.f32.mrf.mxu3  ;;  %v9490_v14 = vor.u32 %v10828_v42, %v9489_v63  ;;  %v9595_v0 = vld [vmem:[%s16144_s5 + $0x10d8] sm:$0xf0]  ;;  %v10847_v34 = vld [vmem:[%s16144_s5 + $0x10ac] sm:$0xf]  ;;  %v9706_v42 = vor.u32 %v10881_v13, %v9705_v59  ;;  %v9657_v8 = vld [vmem:[%s16144_s5 + $0x1148] sm:$0xf]  ;;  %v9530_v13 = vor.u32 %v10837_v51, %v9529_v10 }
 0x36c   :  { %v9723_v6 = vld [vmem:[%s16144_s5 + $0x11d8] sm:$0xf0]  ;;  %v9598_v43 = vor.u32 %v10851_v18, %v9595_v0  ;;  %v10879_v63 = vld [vmem:[%s16144_s5 + $0x11ac] sm:$0xf]  ;;  %v9689_v50 = vld [vmem:[%s16144_s5 + $0x1188] sm:$0xf] }
 0x36d   :  { %5521 = vmatpush.bf16.msrb.mxu1 %v9554_v37  ;;  %5534 = vmatpush.bf16.msra.mxu3 %v9682_v48  ;;  %v10826_v37 = vld [vmem:[%s16144_s5 + $0x1004] sm:$0xf]  ;;  %v9491_v48 = vld [vmem:[%s16144_s5 + $0x1010] sm:$0xf0]  ;;  %v9726_v61 = vor.u32 %v10883_v62, %v9723_v6  ;;  %v9579_v46 = vld [vmem:[%s16144_s5 + $0x10b8] sm:$0xf0] }
 0x36e   :  { %5547 = vmatpush.bf16.msrb.mxu0 %v9558_v41  ;;  %5560 = vmatpush.bf16.msrb.mxu2 %v9686_v53  ;;  %v4120_v33 = vpop.f32.mrf.mxu2  ;;  %v9619_v41 = vld [vmem:[%s16144_s5 + $0x1110] sm:$0xf0]  ;;  %v9609_v53 = vld [vmem:[%s16144_s5 + $0x10e8] sm:$0xf]  ;;  %v10869_v18 = vld [vmem:[%s16144_s5 + $0x1154] sm:$0xf0] }
 0x36f   :  { %v9610_v54 = vor.u32 %v10857_v47, %v9609_v53  ;;  %v10875_v33 = vld [vmem:[%s16144_s5 + $0x118c] sm:$0xf]  ;;  %v10950_v10 = vld [vmem:[%s16144_s5 + $0x13e4] sm:$0xf]  ;;  %v10051_v51 = vld [vmem:[%s16144_s5 + $0x13f0] sm:$0xf0] }
 0x370   :  { %v10835_v0 = vld [vmem:[%s16144_s5 + $0x104c] sm:$0xf] }
 0x371   :  { %5522 = vmatpush.bf16.msrb.mxu1 %v9538_v22  ;;  %5535 = vmatpush.bf16.msra.mxu3 %v9666_v11  ;;  %v9611_v22 = vld [vmem:[%s16144_s5 + $0x10f8] sm:$0xf0]  ;;  %v10887_v11 = vld [vmem:[%s16144_s5 + $0x11ec] sm:$0xf] }
 0x372   :  { %5548 = vmatpush.bf16.msrb.mxu0 %v9542_v31  ;;  %5561 = vmatpush.bf16.msrb.mxu2 %v9670_v57  ;;  %v9494_v31 = vor.u32 %v10826_v37, %v9491_v48  ;;  %v9622_v57 = vor.u32 %v10858_v5, %v9619_v41  ;;  %v9614_v52 = vor.u32 %v10855_v7, %v9611_v22  ;;  %v10877_v37 = vld [vmem:[%s16144_s5 + $0x1194] sm:$0xf0]  ;;  %v10843_v48 = vld [vmem:[%s16144_s5 + $0x108c] sm:$0xf]  ;;  %v9563_v5 = vld [vmem:[%s16144_s5 + $0x1098] sm:$0xf0] }
 0x373   :  { %v9742_v24 = vor.u32 %v10887_v11, %v9739_v3  ;;  %v9691_v41 = vld [vmem:[%s16144_s5 + $0x1198] sm:$0xf0]  ;;  %v9690_v36 = vor.u32 %v10877_v37, %v9689_v50  ;;  %v9545_v7 = vld [vmem:[%s16144_s5 + $0x1068] sm:$0xf]  ;;  %v10873_v3 = vld [vmem:[%s16144_s5 + $0x1174] sm:$0xf0] }
 0x374   :  { %v9694_v22 = vor.u32 %v10875_v33, %v9691_v41  ;;  %v9673_v11 = vld [vmem:[%s16144_s5 + $0x1168] sm:$0xf]  ;;  %v10861_v41 = vld [vmem:[%s16144_s5 + $0x1114] sm:$0xf0] }
 0x375   :  { %5523 = vmatpush.bf16.msrb.mxu1 %v9522_v9  ;;  %5536 = vmatpush.bf16.msra.mxu3 %v9650_v32  ;;  %v15401_v9 = vpack.c.b16 %v5192_v27, %v5192_v27  ;;  %v15403_v32 = vpack.c.b16 %v5193_v12, %v5193_v12  ;;  %v10839_v27 = vld [vmem:[%s16144_s5 + $0x106c] sm:$0xf]  ;;  %v9675_v12 = vld [vmem:[%s16144_s5 + $0x1178] sm:$0xf0]  ;;  %v9497_v50 = vld [vmem:[%s16144_s5 + $0x1008] sm:$0xf] }
 0x376   :  { %5549 = vmatpush.bf16.msrb.mxu0 %v9526_v58  ;;  %5562 = vmatpush.bf16.msrb.mxu2 %v9654_v16  ;;  %v9577_v58 = vld [vmem:[%s16144_s5 + $0x10a8] sm:$0xf]  ;;  %v10849_v16 = vld [vmem:[%s16144_s5 + $0x10b4] sm:$0xf0] }
 0x377   :  { %v9625_v33 = vld [vmem:[%s16144_s5 + $0x1108] sm:$0xf] }
 0x379   :  { %5524 = vmatpush.bf16.msrb.mxu1 %v9506_v49  ;;  %5537 = vmatpush.bf16.msra.mxu3 %v9634_v29  ;;  %v9707_v49 = vld [vmem:[%s16144_s5 + $0x11b8] sm:$0xf0]  ;;  %v9578_v29 = vor.u32 %v10849_v16, %v9577_v58 }
 0x37a   :  { %5550 = vmatpush.bf16.msrb.mxu0 %v9510_v2  ;;  %5563 = vmatpush.bf16.msrb.mxu2 %v9638_v23  ;;  %v9582_v2 = vor.u32 %v10847_v34, %v9579_v46  ;;  %v9710_v23 = vor.u32 %v10879_v63, %v9707_v49  ;;  %v9659_v58 = vld [vmem:[%s16144_s5 + $0x1158] sm:$0xf0]  ;;  %v9658_v34 = vor.u32 %v10869_v18, %v9657_v8  ;;  %v9513_v46 = vld [vmem:[%s16144_s5 + $0x1028] sm:$0xf]  ;;  %v10833_v63 = vld [vmem:[%s16144_s5 + $0x1034] sm:$0xf0] }
 0x37b   :  { %v9514_v37 = vor.u32 %v10833_v63, %v9513_v46  ;;  %v9905_v18 = vld [vmem:[%s16144_s5 + $0x12c0] sm:$0xf]  ;;  %v10912_v63 = vld [vmem:[%s16144_s5 + $0x12ac] sm:$0xf0] }
 0x37c   :  { %v9889_v46 = vld [vmem:[%s16144_s5 + $0x12a0] sm:$0xf] }
 0x37d   :  { %5525 = vmatpush.bf16.msrb.mxu1 %v9490_v14  ;;  %5538 = vmatpush.bf16.msra.mxu3 %v9618_v44  ;;  %v4527_v53 = vpop.f32.mrf.mxu1  ;;  %v10841_v14 = vld [vmem:[%s16144_s5 + $0x1074] sm:$0xf0]  ;;  %v9566_v44 = vor.u32 %v10843_v48, %v9563_v5 }
 0x37e   :  { %5551 = vmatpush.bf16.msrb.mxu0 %v9494_v31  ;;  %5564 = vmatpush.bf16.msrb.mxu2 %v9622_v57  ;;  %v9547_v31 = vld [vmem:[%s16144_s5 + $0x1078] sm:$0xf0]  ;;  %v10871_v57 = vld [vmem:[%s16144_s5 + $0x116c] sm:$0xf]  ;;  %v10829_v5 = vld [vmem:[%s16144_s5 + $0x1014] sm:$0xf0] }
 0x380   :  { %5526 = vmatmul.bf16.vlgmr.msrb.gmra.mxu1 %v15401_v9  ;;  %5539 = vmatmul.bf16.vlgmr.msra.gmra.mxu3 %v15403_v32  ;;  %v4553_v47 = vpop.f32.mrf.mxu0 }
 0x381   :  { %5570 = vmatpush.bf16.msra.mxu1 %v9610_v54  ;;  %5583 = vmatpush.bf16.msrb.mxu3 %v9738_v39  ;;  %v9546_v54 = vor.u32 %v10841_v14, %v9545_v7  ;;  %v9674_v39 = vor.u32 %v10873_v3, %v9673_v11  ;;  %v9499_v7 = vld [vmem:[%s16144_s5 + $0x1018] sm:$0xf0]  ;;  %v10859_v14 = vld [vmem:[%s16144_s5 + $0x110c] sm:$0xf]  ;;  %v9921_v11 = vld [vmem:[%s16144_s5 + $0x12e0] sm:$0xf] }
 0x382   :  { %5596 = vmatpush.bf16.msra.mxu0 %v9614_v52  ;;  %5609 = vmatpush.bf16.msra.mxu2 %v9742_v24  ;;  %v9550_v52 = vor.u32 %v10839_v27, %v9547_v31  ;;  %v9678_v24 = vor.u32 %v10871_v57, %v9675_v12  ;;  %v10920_v3 = vld [vmem:[%s16144_s5 + $0x12ec] sm:$0xf0]  ;;  %v10049_v27 = vld [vmem:[%s16144_s5 + $0x13e0] sm:$0xf]  ;;  %v10918_v57 = vld [vmem:[%s16144_s5 + $0x12e4] sm:$0xf]  ;;  %v9498_v12 = vor.u32 %v10829_v5, %v9497_v50 }
 0x383   :  { %5552 = vmatmul.bf16.vlgmr.msrb.gmra.mxu0 %v15401_v9  ;;  %5565 = vmatmul.bf16.vlgmr.msrb.gmra.mxu2 %v15403_v32  ;;  %v4540_v38 = vpop.f32.mrf.mxu3  ;;  %v10952_v31 = vld [vmem:[%s16144_s5 + $0x13ec] sm:$0xf0]  ;;  %v9890_v50 = vor.u32 %v10912_v63, %v9889_v46 }
 0x384   :  { %v4541_v62 = vadd.f32 %v4540_v38, %v4527_v53  ;;  %v9922_v38 = vor.u32 %v10920_v3, %v9921_v11  ;;  %v10050_v8 = vor.u32 %v10952_v31, %v10049_v27  ;;  %v10908_v5 = vld [vmem:[%s16144_s5 + $0x128c] sm:$0xf0]  ;;  %v9857_v3 = vld [vmem:[%s16144_s5 + $0x1260] sm:$0xf] }
 0x385   :  { %5571 = vmatpush.bf16.msra.mxu1 %v9594_v40  ;;  %5584 = vmatpush.bf16.msrb.mxu3 %v9722_v1  ;;  %v9531_v40 = vld [vmem:[%s16144_s5 + $0x1058] sm:$0xf0]  ;;  %v10867_v1 = vld [vmem:[%s16144_s5 + $0x114c] sm:$0xf]  ;;  %v10904_v27 = vld [vmem:[%s16144_s5 + $0x126c] sm:$0xf0] }
 0x386   :  { %5597 = vmatpush.bf16.msra.mxu0 %v9598_v43  ;;  %5610 = vmatpush.bf16.msra.mxu2 %v9726_v61  ;;  %v4566_v6 = vpop.f32.mrf.mxu2  ;;  %v4529_v43 = vpop.f32.mrf.mxu1  ;;  %v15506_v61 = vadd.f32 %v4541_v62, %v15096_v35  ;;  %v9641_v35 = vld [vmem:[%s16144_s5 + $0x1128] sm:$0xf] }
 0x387   :  { %v4567_v16 = vadd.f32 %v4566_v6, %v4553_v47  ;;  %v9642_v48 = vor.u32 %v10865_v28, %v9641_v35  ;;  %v10054_v6 = vor.u32 %v10950_v10, %v10051_v51  ;;  %v10946_v43 = vld [vmem:[%s16144_s5 + $0x13c4] sm:$0xf]  ;;  %v10017_v35 = vld [vmem:[%s16144_s5 + $0x13a0] sm:$0xf]  ;;  %v10944_v28 = vld [vmem:[%s16144_s5 + $0x13ac] sm:$0xf0] }
 0x388   :  { %v4555_v59 = vpop.f32.mrf.mxu0  ;;  %v10934_v10 = vld [vmem:[%s16144_s5 + $0x1364] sm:$0xf]  ;;  %v9987_v51 = vld [vmem:[%s16144_s5 + $0x1370] sm:$0xf0] }
 0x389   :  { %5572 = vmatpush.bf16.msra.mxu1 %v9578_v29  ;;  %5585 = vmatpush.bf16.msrb.mxu3 %v9706_v42  ;;  %v15515_v49 = vadd.f32 %v4567_v16, %v15105_v60  ;;  %v9534_v29 = vor.u32 %v10835_v0, %v9531_v40  ;;  %v9662_v42 = vor.u32 %v10867_v1, %v9659_v58  ;;  %v10863_v60 = vld [vmem:[%s16144_s5 + $0x112c] sm:$0xf]  ;;  %v10916_v0 = vld [vmem:[%s16144_s5 + $0x12cc] sm:$0xf0]  ;;  %v10033_v40 = vld [vmem:[%s16144_s5 + $0x13c0] sm:$0xf] }
 0x38a   :  { %5598 = vmatpush.bf16.msra.mxu0 %v9582_v2  ;;  %5611 = vmatpush.bf16.msra.mxu2 %v9710_v23  ;;  %v9515_v2 = vld [vmem:[%s16144_s5 + $0x1038] sm:$0xf0]  ;;  %v10948_v1 = vld [vmem:[%s16144_s5 + $0x13cc] sm:$0xf0]  ;;  %v10914_v58 = vld [vmem:[%s16144_s5 + $0x12c4] sm:$0xf] }
 0x38b   :  { %v9643_v23 = vld [vmem:[%s16144_s5 + $0x1138] sm:$0xf0]  ;;  %v9518_v53 = vor.u32 %v10831_v17, %v9515_v2  ;;  %v9907_v16 = vld [vmem:[%s16144_s5 + $0x12d0] sm:$0xf0]  ;;  %v10910_v17 = vld [vmem:[%s16144_s5 + $0x12a4] sm:$0xf] }
 0x38c   :  { %v9646_v47 = vor.u32 %v10863_v60, %v9643_v23  ;;  %v10035_v59 = vld [vmem:[%s16144_s5 + $0x13d0] sm:$0xf0]  ;;  %v10942_v60 = vld [vmem:[%s16144_s5 + $0x13a4] sm:$0xf] }
 0x38d   :  { %5573 = vmatpush.bf16.msra.mxu1 %v9562_v20  ;;  %5586 = vmatpush.bf16.msrb.mxu3 %v9690_v36  ;;  %v4542_v20 = vpop.f32.mrf.mxu3  ;;  %v10827_v36 = vld [vmem:[%s16144_s5 + $0x100c] sm:$0xf]  ;;  %v9891_v2 = vld [vmem:[%s16144_s5 + $0x12b0] sm:$0xf0] }
 0x38e   :  { %5599 = vmatpush.bf16.msra.mxu0 %v9566_v44  ;;  %5612 = vmatpush.bf16.msra.mxu2 %v9694_v22  ;;  %v4568_v44 = vpop.f32.mrf.mxu2  ;;  %v9627_v22 = vld [vmem:[%s16144_s5 + $0x1118] sm:$0xf0]  ;;  %v10019_v23 = vld [vmem:[%s16144_s5 + $0x13b0] sm:$0xf0]  ;;  %v10938_v20 = vld [vmem:[%s16144_s5 + $0x1384] sm:$0xf] }
 0x391   :  { %5574 = vmatpush.bf16.msra.mxu1 %v9546_v54  ;;  %5587 = vmatpush.bf16.msrb.mxu3 %v9674_v39  ;;  %v9626_v54 = vor.u32 %v10861_v41, %v9625_v33  ;;  %v9923_v39 = vld [vmem:[%s16144_s5 + $0x12f0] sm:$0xf0]  ;;  %v9894_v33 = vor.u32 %v10910_v17, %v9891_v2  ;;  %v10022_v41 = vor.u32 %v10942_v60, %v10019_v23  ;;  %v10896_v17 = vld [vmem:[%s16144_s5 + $0x122c] sm:$0xf0] }
 0x392   :  { %5600 = vmatpush.bf16.msra.mxu0 %v9550_v52  ;;  %5613 = vmatpush.bf16.msra.mxu2 %v9678_v24  ;;  %v9502_v52 = vor.u32 %v10827_v36, %v9499_v7  ;;  %v9630_v24 = vor.u32 %v10859_v14, %v9627_v22  ;;  %v9926_v62 = vor.u32 %v10918_v57, %v9923_v39  ;;  %v10003_v36 = vld [vmem:[%s16144_s5 + $0x1390] sm:$0xf0]  ;;  %v10928_v23 = vld [vmem:[%s16144_s5 + $0x132c] sm:$0xf0] }
 0x393   :  { %v1035_v14 = vadd.f32 %v13129_v25, %v12207_v45  ;;  %v10006_v57 = vor.u32 %v10938_v20, %v10003_v36  ;;  %v9985_v45 = vld [vmem:[%s16144_s5 + $0x1360] sm:$0xf]  ;;  %v10936_v25 = vld [vmem:[%s16144_s5 + $0x136c] sm:$0xf0]  ;;  %v9859_v39 = vld [vmem:[%s16144_s5 + $0x1270] sm:$0xf0] }
 0x395   :  { %5575 = vmatpush.bf16.msra.mxu1 %v9530_v13  ;;  %5588 = vmatpush.bf16.msrb.mxu3 %v9658_v34  ;;  %v9906_v13 = vor.u32 %v10916_v0, %v9905_v18  ;;  %v10034_v34 = vor.u32 %v10948_v1, %v10033_v40  ;;  %v10900_v18 = vld [vmem:[%s16144_s5 + $0x124c] sm:$0xf0]  ;;  %v10898_v40 = vld [vmem:[%s16144_s5 + $0x1244] sm:$0xf] }
 0x396   :  { %5601 = vmatpush.bf16.msra.mxu0 %v9534_v29  ;;  %5614 = vmatpush.bf16.msra.mxu2 %v9662_v42  ;;  %v9910_v29 = vor.u32 %v10914_v58, %v9907_v16  ;;  %v10038_v42 = vor.u32 %v10946_v43, %v10035_v59  ;;  %v10930_v16 = vld [vmem:[%s16144_s5 + $0x1344] sm:$0xf]  ;;  %v9971_v43 = vld [vmem:[%s16144_s5 + $0x1350] sm:$0xf0] }
 0x397   :  { %v9974_v60 = vor.u32 %v10930_v16, %v9971_v43  ;;  %v10043_v16 = vld [vmem:[%s16144_s5 + $0x13d8] sm:$0xf0] }
 0x399   :  { %5576 = vmatpush.bf16.msra.mxu1 %v9514_v37  ;;  %5589 = vmatpush.bf16.msrb.mxu3 %v9642_v48  ;;  %v10018_v37 = vor.u32 %v10944_v28, %v10017_v35  ;;  %v9873_v48 = vld [vmem:[%s16144_s5 + $0x1280] sm:$0xf] }
 0x39a   :  { %5602 = vmatpush.bf16.msra.mxu0 %v9518_v53  ;;  %5615 = vmatpush.bf16.msra.mxu2 %v9646_v47  ;;  %v10906_v53 = vld [vmem:[%s16144_s5 + $0x1284] sm:$0xf]  ;;  %v9875_v47 = vld [vmem:[%s16144_s5 + $0x1290] sm:$0xf0]  ;;  %v9874_v22 = vor.u32 %v10908_v5, %v9873_v48  ;;  %v9825_v28 = vld [vmem:[%s16144_s5 + $0x1220] sm:$0xf] }
 0x39b   :  { %v9878_v31 = vor.u32 %v10906_v53, %v9875_v47  ;;  %v9955_v48 = vld [vmem:[%s16144_s5 + $0x1330] sm:$0xf0]  ;;  %v9937_v53 = vld [vmem:[%s16144_s5 + $0x1300] sm:$0xf]  ;;  %v10924_v47 = vld [vmem:[%s16144_s5 + $0x130c] sm:$0xf0] }
 0x39d   :  { %5577 = vmatpush.bf16.msra.mxu1 %v9498_v12  ;;  %5590 = vmatpush.bf16.msrb.mxu3 %v9626_v54  ;;  %v4579_v7 = vpop.f32.mrf.mxu1  ;;  %v10902_v12 = vld [vmem:[%s16144_s5 + $0x1264] sm:$0xf]  ;;  %v1069_v54 = vadd.f32 %v13097_v30, %v1035_v14  ;;  %v9858_v30 = vor.u32 %v10904_v27, %v9857_v3  ;;  %v9939_v27 = vld [vmem:[%s16144_s5 + $0x1310] sm:$0xf0] }
 0x39e   :  { %5603 = vmatpush.bf16.msra.mxu0 %v9502_v52  ;;  %5616 = vmatpush.bf16.msra.mxu2 %v9630_v24  ;;  %v933_v52 = vadd.f32 %v12137_v56, %v11763_v19  ;;  %v9990_v19 = vor.u32 %v10934_v10, %v9987_v51  ;;  %v9931_v10 = vld [vmem:[%s16144_s5 + $0x12f8] sm:$0xf0]  ;;  %v10951_v51 = vld [vmem:[%s16144_s5 + $0x13ec] sm:$0xf] }
 0x39f   :  { %v1103_v24 = vadd.f32 %v13140_v15, %v1069_v54  ;;  %v9969_v15 = vld [vmem:[%s16144_s5 + $0x1340] sm:$0xf] }
 0x3a0   :  { %5578 = vmatmul.bf16.vlgmr.msra.gmra.mxu1 %v15401_v9  ;;  %5591 = vmatmul.bf16.vlgmr.msrb.gmra.mxu3 %v15403_v32  ;;  %v4605_v44 = vpop.f32.mrf.mxu0  ;;  %v967_v0 = vadd.f32 %v12194_v21, %v933_v52  ;;  %v9843_v21 = vld [vmem:[%s16144_s5 + $0x1250] sm:$0xf0]  ;;  %v10059_v52 = vld [vmem:[%s16144_s5 + $0x13f8] sm:$0xf0] }
 0x3a1   :  { %6018 = vmatpush.bf16.msrb.mxu1 %v9922_v38  ;;  %6031 = vmatpush.bf16.msra.mxu3 %v10050_v8  ;;  %v9986_v38 = vor.u32 %v10936_v25, %v9985_v45  ;;  %v9841_v8 = vld [vmem:[%s16144_s5 + $0x1240] sm:$0xf]  ;;  %v1124_v46 = vmax.f32 %v1103_v24, 0.0  ;;  %v9846_v2 = vor.u32 %v10898_v40, %v9843_v21  ;;  %v10057_v45 = vld [vmem:[%s16144_s5 + $0x13e8] sm:$0xf] }
 0x3a2   :  { %6044 = vmatpush.bf16.msrb.mxu0 %v9926_v62  ;;  %6057 = vmatpush.bf16.msrb.mxu2 %v10054_v6  ;;  %v9862_v62 = vor.u32 %v10902_v12, %v9859_v39  ;;  %v10932_v6 = vld [vmem:[%s16144_s5 + $0x134c] sm:$0xf0]  ;;  %v1001_v59 = vadd.f32 %v13095_v26, %v967_v0  ;;  %v10953_v25 = vld [vmem:[%s16144_s5 + $0x13f4] sm:$0xf0]  ;;  %v10919_v12 = vld [vmem:[%s16144_s5 + $0x12ec] sm:$0xf]  ;;  %v9938_v39 = vor.u32 %v10924_v47, %v9937_v53 }
 0x3a3   :  { %5604 = vmatmul.bf16.vlgmr.msra.gmra.mxu0 %v15401_v9  ;;  %5617 = vmatmul.bf16.vlgmr.msra.gmra.mxu2 %v15403_v32  ;;  %v10001_v9 = vld [vmem:[%s16144_s5 + $0x1380] sm:$0xf]  ;;  %v10940_v32 = vld [vmem:[%s16144_s5 + $0x138c] sm:$0xf0]  ;;  %v4592_v56 = vpop.f32.mrf.mxu3  ;;  %v9970_v35 = vor.u32 %v10932_v6, %v9969_v15  ;;  %v10058_v0 = vor.u32 %v10953_v25, %v10057_v45  ;;  %v10062_v15 = vor.u32 %v10951_v51, %v10059_v52  ;;  %v10041_v6 = vld [vmem:[%s16144_s5 + $0x13c8] sm:$0xf] }
 0x3a4   :  { %v10002_v11 = vor.u32 %v10940_v32, %v10001_v9  ;;  %v4593_v1 = vadd.f32 %v4592_v56, %v4579_v7  ;;  %v1123_v5 = vmax.f32 %v1001_v59, 0.0  ;;  %v10892_v32 = vld [vmem:[%s16144_s5 + $0x120c] sm:$0xf0]  ;;  %v9934_v56 = vor.u32 %v10919_v12, %v9931_v10  ;;  %v10949_v40 = vld [vmem:[%s16144_s5 + $0x13d4] sm:$0xf0] }
 0x3a5   :  { %6019 = vmatpush.bf16.msrb.mxu1 %v9906_v13  ;;  %6032 = vmatpush.bf16.msra.mxu3 %v10034_v34  ;;  %v4581_v34 = vpop.f32.mrf.mxu1  ;;  %v10947_v21 = vld [vmem:[%s16144_s5 + $0x13cc] sm:$0xf]  ;;  %v9883_v53 = vld [vmem:[%s16144_s5 + $0x1298] sm:$0xf0]  ;;  %v9849_v51 = vld [vmem:[%s16144_s5 + $0x1248] sm:$0xf] }
 0x3a6   :  { %6045 = vmatpush.bf16.msrb.mxu0 %v9910_v29  ;;  %6058 = vmatpush.bf16.msrb.mxu2 %v10038_v42  ;;  %v4618_v58 = vpop.f32.mrf.mxu2  ;;  %v15716_v63 = vadd.f32 %v4593_v1, %v15298_v4  ;;  %v9842_v42 = vor.u32 %v10900_v18, %v9841_v8  ;;  %v9953_v4 = vld [vmem:[%s16144_s5 + $0x1320] sm:$0xf]  ;;  %v1134_v20 = vpack.c.bf16 %v1124_v46, %v1123_v5  ;;  %v10915_v1 = vld [vmem:[%s16144_s5 + $0x12cc] sm:$0xf]  ;;  %v9897_v46 = vld [vmem:[%s16144_s5 + $0x12a8] sm:$0xf] }
 0x3a7   :  { %v4619_v13 = vadd.f32 %v4618_v58, %v4605_v44  ;;  %v9954_v9 = vor.u32 %v10928_v23, %v9953_v4  ;;  %v10890_v44 = vld [vmem:[%s16144_s5 + $0x1204] sm:$0xf]  ;;  %v9915_v58 = vld [vmem:[%s16144_s5 + $0x12d8] sm:$0xf0]  ;;  %v10042_v34 = vor.u32 %v10949_v40, %v10041_v6  ;;  %v10943_v4 = vld [vmem:[%s16144_s5 + $0x13ac] sm:$0xf] }
 0x3a8   :  { %v4607_v29 = vpop.f32.mrf.mxu0  ;;  %v5692_v24 = vunpack.c.l.b16 %v1134_v20  ;;  %v5693_v8 = vunpack.c.h.b16 %v1134_v20  ;;  %v10027_v23 = vld [vmem:[%s16144_s5 + $0x13b8] sm:$0xf0]  ;;  %v10939_v47 = vld [vmem:[%s16144_s5 + $0x138c] sm:$0xf]  ;;  %v10901_v52 = vld [vmem:[%s16144_s5 + $0x1254] sm:$0xf0] }
 0x3a9   :  { %6020 = vmatpush.bf16.msrb.mxu1 %v9890_v50  ;;  %6033 = vmatpush.bf16.msra.mxu3 %v10018_v37  ;;  %v15725_v26 = vadd.f32 %v4619_v13, %v15307_v55  ;;  %v10894_v50 = vld [vmem:[%s16144_s5 + $0x1224] sm:$0xf]  ;;  %v9827_v37 = vld [vmem:[%s16144_s5 + $0x1230] sm:$0xf0]  ;;  %v10913_v29 = vld [vmem:[%s16144_s5 + $0x12b4] sm:$0xf0] }
 0x3aa   :  { %6046 = vmatpush.bf16.msrb.mxu0 %v9894_v33  ;;  %6059 = vmatpush.bf16.msrb.mxu2 %v10022_v41  ;;  %v10926_v55 = vld [vmem:[%s16144_s5 + $0x1324] sm:$0xf]  ;;  %v9809_v33 = vld [vmem:[%s16144_s5 + $0x1200] sm:$0xf]  ;;  %v9826_v41 = vor.u32 %v10896_v17, %v9825_v28  ;;  %v9830_v36 = vor.u32 %v10894_v50, %v9827_v37  ;;  %v15817_v43 = vpack.c.b16 %v5692_v24, %v5692_v24  ;;  %v10025_v28 = vld [vmem:[%s16144_s5 + $0x13a8] sm:$0xf] }
 0x3ab   :  { %v9958_v7 = vor.u32 %v10926_v55, %v9955_v48  ;;  %v4594_v14 = vpop.f32.mrf.mxu3  ;;  %v9810_v54 = vor.u32 %v10892_v32, %v9809_v33  ;;  %v15819_v59 = vpack.c.b16 %v5693_v8, %v5693_v8  ;;  %v10945_v17 = vld [vmem:[%s16144_s5 + $0x13b4] sm:$0xf0]  ;;  %v9898_v50 = vor.u32 %v10913_v29, %v9897_v46  ;;  %v9881_v55 = vld [vmem:[%s16144_s5 + $0x1288] sm:$0xf]  ;;  %v10907_v32 = vld [vmem:[%s16144_s5 + $0x128c] sm:$0xf] }
 0x3ac   :  { %v10026_v37 = vor.u32 %v10945_v17, %v10025_v28  ;;  %v10909_v48 = vld [vmem:[%s16144_s5 + $0x1294] sm:$0xf0]  ;;  %v10030_v33 = vor.u32 %v10943_v4, %v10027_v23  ;;  %v10011_v20 = vld [vmem:[%s16144_s5 + $0x1398] sm:$0xf0]  ;;  %v10903_v45 = vld [vmem:[%s16144_s5 + $0x126c] sm:$0xf] }
 0x3ad   :  { %6021 = vmatpush.bf16.msrb.mxu1 %v9874_v22  ;;  %6034 = vmatpush.bf16.msra.mxu3 %v10002_v11  ;;  %v9811_v22 = vld [vmem:[%s16144_s5 + $0x1210] sm:$0xf0]  ;;  %v10922_v11 = vld [vmem:[%s16144_s5 + $0x1304] sm:$0xf]  ;;  %v9882_v14 = vor.u32 %v10909_v48, %v9881_v55  ;;  %v9867_v25 = vld [vmem:[%s16144_s5 + $0x1278] sm:$0xf0] }
 0x3ae   :  { %6047 = vmatpush.bf16.msrb.mxu0 %v9878_v31  ;;  %6060 = vmatpush.bf16.msrb.mxu2 %v10006_v57  ;;  %v4620_v3 = vpop.f32.mrf.mxu2  ;;  %v9929_v31 = vld [vmem:[%s16144_s5 + $0x12e8] sm:$0xf]  ;;  %v10921_v57 = vld [vmem:[%s16144_s5 + $0x12f4] sm:$0xf0]  ;;  %v10935_v12 = vld [vmem:[%s16144_s5 + $0x136c] sm:$0xf]  ;;  %v9870_v24 = vor.u32 %v10903_v45, %v9867_v25 }
 0x3af   :  { %v9930_v18 = vor.u32 %v10921_v57, %v9929_v31  ;;  %v9886_v3 = vor.u32 %v10907_v32, %v9883_v53  ;;  %v9993_v31 = vld [vmem:[%s16144_s5 + $0x1368] sm:$0xf]  ;;  %v10937_v57 = vld [vmem:[%s16144_s5 + $0x1374] sm:$0xf0]  ;;  %v9979_v6 = vld [vmem:[%s16144_s5 + $0x1358] sm:$0xf0] }
 0x3b0   :  { %v9994_v10 = vor.u32 %v10937_v57, %v9993_v31  ;;  %v9977_v8 = vld [vmem:[%s16144_s5 + $0x1348] sm:$0xf]  ;;  %v10897_v46 = vld [vmem:[%s16144_s5 + $0x1234] sm:$0xf0]  ;;  %v10895_v17 = vld [vmem:[%s16144_s5 + $0x122c] sm:$0xf] }
 0x3b1   :  { %6022 = vmatpush.bf16.msrb.mxu1 %v9858_v30  ;;  %6035 = vmatpush.bf16.msra.mxu3 %v9986_v38  ;;  %v9814_v30 = vor.u32 %v10890_v44, %v9811_v22  ;;  %v9942_v38 = vor.u32 %v10922_v11, %v9939_v27  ;;  %v9865_v22 = vld [vmem:[%s16144_s5 + $0x1268] sm:$0xf]  ;;  %v10905_v11 = vld [vmem:[%s16144_s5 + $0x1274] sm:$0xf0]  ;;  %v10014_v27 = vor.u32 %v10939_v47, %v10011_v20  ;;  %v9819_v53 = vld [vmem:[%s16144_s5 + $0x1218] sm:$0xf0] }
 0x3b2   :  { %6048 = vmatpush.bf16.msrb.mxu0 %v9862_v62  ;;  %6061 = vmatpush.bf16.msrb.mxu2 %v9990_v19  ;;  %v9913_v62 = vld [vmem:[%s16144_s5 + $0x12c8] sm:$0xf]  ;;  %v10917_v19 = vld [vmem:[%s16144_s5 + $0x12d4] sm:$0xf0]  ;;  %v10923_v47 = vld [vmem:[%s16144_s5 + $0x130c] sm:$0xf] }
 0x3b3   :  { %v9914_v13 = vor.u32 %v10917_v19, %v9913_v62  ;;  %v10929_v28 = vld [vmem:[%s16144_s5 + $0x1334] sm:$0xf0]  ;;  %v9947_v20 = vld [vmem:[%s16144_s5 + $0x1318] sm:$0xf0] }
 0x3b5   :  { %6023 = vmatpush.bf16.msrb.mxu1 %v9842_v42  ;;  %6036 = vmatpush.bf16.msra.mxu3 %v9970_v35  ;;  %v9918_v42 = vor.u32 %v10915_v1, %v9915_v58  ;;  %v10046_v35 = vor.u32 %v10947_v21, %v10043_v16  ;;  %v9850_v16 = vor.u32 %v10901_v52, %v9849_v51 }
 0x3b6   :  { %6049 = vmatpush.bf16.msrb.mxu0 %v9846_v2  ;;  %6062 = vmatpush.bf16.msrb.mxu2 %v9974_v60  ;;  %v10911_v2 = vld [vmem:[%s16144_s5 + $0x12ac] sm:$0xf]  ;;  %v9899_v60 = vld [vmem:[%s16144_s5 + $0x12b8] sm:$0xf0] }
 0x3b7   :  { %v9902_v5 = vor.u32 %v10911_v2, %v9899_v60  ;;  %v9835_v2 = vld [vmem:[%s16144_s5 + $0x1238] sm:$0xf0] }
 0x3b8   :  { %v9963_v60 = vld [vmem:[%s16144_s5 + $0x1338] sm:$0xf0]  ;;  %v9838_v55 = vor.u32 %v10895_v17, %v9835_v2 }
 0x3b9   :  { %6024 = vmatpush.bf16.msrb.mxu1 %v9826_v41  ;;  %6037 = vmatpush.bf16.msra.mxu3 %v9954_v9  ;;  %v10009_v41 = vld [vmem:[%s16144_s5 + $0x1388] sm:$0xf]  ;;  %v10941_v9 = vld [vmem:[%s16144_s5 + $0x1394] sm:$0xf0] }
 0x3ba   :  { %6050 = vmatpush.bf16.msrb.mxu0 %v9830_v36  ;;  %6063 = vmatpush.bf16.msrb.mxu2 %v9958_v7  ;;  %v10010_v44 = vor.u32 %v10941_v9, %v10009_v41  ;;  %v10925_v41 = vld [vmem:[%s16144_s5 + $0x1314] sm:$0xf0]  ;;  %v10891_v9 = vld [vmem:[%s16144_s5 + $0x120c] sm:$0xf] }
 0x3bd   :  { %6025 = vmatpush.bf16.msrb.mxu1 %v9810_v54  ;;  %6038 = vmatpush.bf16.msra.mxu3 %v9938_v39  ;;  %v5027_v36 = vpop.f32.mrf.mxu1  ;;  %v9995_v54 = vld [vmem:[%s16144_s5 + $0x1378] sm:$0xf0]  ;;  %v9866_v39 = vor.u32 %v10905_v11, %v9865_v22 }
 0x3be   :  { %6051 = vmatpush.bf16.msrb.mxu0 %v9814_v30  ;;  %6064 = vmatpush.bf16.msrb.mxu2 %v9942_v38  ;;  %v9998_v30 = vor.u32 %v10935_v12, %v9995_v54 }
 0x3c0   :  { %6026 = vmatmul.bf16.vlgmr.msrb.gmra.mxu1 %v15817_v43  ;;  %6039 = vmatmul.bf16.vlgmr.msra.gmra.mxu3 %v15819_v59  ;;  %v5053_v7 = vpop.f32.mrf.mxu0 }
 0x3c1   :  { %6070 = vmatpush.bf16.msra.mxu1 %v9930_v18  ;;  %6083 = vmatpush.bf16.msrb.mxu3 %v10058_v0  ;;  %v10933_v18 = vld [vmem:[%s16144_s5 + $0x1354] sm:$0xf0]  ;;  %v10899_v0 = vld [vmem:[%s16144_s5 + $0x124c] sm:$0xf] }
 0x3c2   :  { %6096 = vmatpush.bf16.msra.mxu0 %v9934_v56  ;;  %6109 = vmatpush.bf16.msra.mxu2 %v10062_v15  ;;  %v9851_v56 = vld [vmem:[%s16144_s5 + $0x1258] sm:$0xf0]  ;;  %v10931_v15 = vld [vmem:[%s16144_s5 + $0x134c] sm:$0xf] }
 0x3c3   :  { %6052 = vmatmul.bf16.vlgmr.msrb.gmra.mxu0 %v15817_v43  ;;  %6065 = vmatmul.bf16.vlgmr.msrb.gmra.mxu2 %v15819_v59  ;;  %v5040_v38 = vpop.f32.mrf.mxu3 }
 0x3c4   :  { %v5041_v62 = vadd.f32 %v5040_v38, %v5027_v36 }
 0x3c5   :  { %6071 = vmatpush.bf16.msra.mxu1 %v9914_v13  ;;  %6084 = vmatpush.bf16.msrb.mxu3 %v10042_v34  ;;  %v5029_v1 = vpop.f32.mrf.mxu1  ;;  %v9978_v13 = vor.u32 %v10933_v18, %v9977_v8  ;;  %v9833_v34 = vld [vmem:[%s16144_s5 + $0x1228] sm:$0xf] }
 0x3c6   :  { %6097 = vmatpush.bf16.msra.mxu0 %v9918_v42  ;;  %6110 = vmatpush.bf16.msra.mxu2 %v10046_v35  ;;  %v5066_v19 = vpop.f32.mrf.mxu2  ;;  %v15922_v58 = vadd.f32 %v5041_v62, %v15506_v61  ;;  %v9854_v42 = vor.u32 %v10899_v0, %v9851_v56  ;;  %v9982_v35 = vor.u32 %v10931_v15, %v9979_v6  ;;  %v9961_v61 = vld [vmem:[%s16144_s5 + $0x1328] sm:$0xf]  ;;  %v10969_v0 = vld [vmem:[%s16146_s7 + $0x78] sm:$0xff]  ;;  %v10960_v56 = vld [vmem:[%s16146_s7 + $0x30] sm:$0xff] }
 0x3c7   :  { %v5067_v40 = vadd.f32 %v5066_v19, %v5053_v7  ;;  %v9834_v4 = vor.u32 %v10897_v46, %v9833_v34  ;;  %v9962_v23 = vor.u32 %v10929_v28, %v9961_v61  ;;  %v10968_v15 = vld [vmem:[%s16146_s7 + $0x70] sm:$0xff]  ;;  %v10959_v6 = vld [vmem:[%s16146_s7 + $0x28] sm:$0xff]  ;;  %v10958_v1 = vld [vmem:[%s16146_s7 + $0x20] sm:$0xff] }
 0x3c8   :  { %v5055_v21 = vpop.f32.mrf.mxu0  ;;  %v10956_v46 = vld [vmem:[%s16146_s7 + $0x10] sm:$0xff]  ;;  %v10955_v61 = vld [vmem:[%s16146_s7 + $0x8] sm:$0xff] }
 0x3c9   :  { %6072 = vmatpush.bf16.msra.mxu1 %v9898_v50  ;;  %6085 = vmatpush.bf16.msrb.mxu3 %v10026_v37  ;;  %v15931_v29 = vadd.f32 %v5067_v40, %v15515_v49  ;;  %v10927_v49 = vld [vmem:[%s16144_s5 + $0x132c] sm:$0xf]  ;;  %v9817_v50 = vld [vmem:[%s16144_s5 + $0x1208] sm:$0xf]  ;;  %v10893_v37 = vld [vmem:[%s16144_s5 + $0x1214] sm:$0xf0] }
 0x3ca   :  { %6098 = vmatpush.bf16.msra.mxu0 %v9902_v5  ;;  %6111 = vmatpush.bf16.msra.mxu2 %v10030_v33  ;;  %v9966_v48 = vor.u32 %v10927_v49, %v9963_v60  ;;  %v9945_v33 = vld [vmem:[%s16144_s5 + $0x1308] sm:$0xf]  ;;  %v9818_v36 = vor.u32 %v10893_v37, %v9817_v50  ;;  %v10957_v21 = vld [vmem:[%s16146_s7 + $0x18] sm:$0xff]  ;;  %v10954_v49 = vld [vmem:[%s16146_s7] sm:$0xff] }
 0x3cb   :  { %v5042_v5 = vpop.f32.mrf.mxu3  ;;  %v9946_v7 = vor.u32 %v10925_v41, %v9945_v33  ;;  %v10967_v40 = vld [vmem:[%s16146_s7 + $0x68] sm:$0xff]  ;;  %v10962_v60 = vld [vmem:[%s16146_s7 + $0x40] sm:$0xff] }
 0x3cc   :  { %v10963_v28 = vld [vmem:[%s16146_s7 + $0x48] sm:$0xff]  ;;  %v10974_v41 = vld [vmem:[%s16146_s7 + $0xa0] sm:$0xff] }
 0x3cd   :  { %6073 = vmatpush.bf16.msra.mxu1 %v9882_v14  ;;  %6086 = vmatpush.bf16.msrb.mxu3 %v10010_v44  ;;  %v9822_v14 = vor.u32 %v10891_v9, %v9819_v53  ;;  %v9950_v44 = vor.u32 %v10923_v47, %v9947_v20  ;;  %v10975_v5 = vld [vmem:[%s16146_s7 + $0xa8] sm:$0xff]  ;;  %v10982_v9 = vld [vmem:[%s16146_s7 + $0xe0] sm:$0xff]  ;;  %v10981_v53 = vld [vmem:[%s16146_s7 + $0xd8] sm:$0xff] }
 0x3ce   :  { %6099 = vmatpush.bf16.msra.mxu0 %v9886_v3  ;;  %6112 = vmatpush.bf16.msra.mxu2 %v10014_v27  ;;  %v5068_v32 = vpop.f32.mrf.mxu2  ;;  %v10983_v33 = vld [vmem:[%s16146_s7 + $0xe8] sm:$0xff] }
 0x3cf   :  { %v10973_v32 = vld [vmem:[%s16146_s7 + $0x98] sm:$0xff] }
 0x3d1   :  { %6074 = vmatpush.bf16.msra.mxu1 %v9866_v39  ;;  %6087 = vmatpush.bf16.msrb.mxu3 %v9994_v10 }
 0x3d2   :  { %6100 = vmatpush.bf16.msra.mxu0 %v9870_v24  ;;  %6113 = vmatpush.bf16.msra.mxu2 %v9998_v30 }
 0x3d5   :  { %6075 = vmatpush.bf16.msra.mxu1 %v9850_v16  ;;  %6088 = vmatpush.bf16.msrb.mxu3 %v9978_v13  ;;  %v10965_v16 = vld [vmem:[%s16146_s7 + $0x58] sm:$0xff] }
 0x3d6   :  { %6101 = vmatpush.bf16.msra.mxu0 %v9854_v42  ;;  %6114 = vmatpush.bf16.msra.mxu2 %v9982_v35 }
 0x3d9   :  { %6076 = vmatpush.bf16.msra.mxu1 %v9834_v4  ;;  %6089 = vmatpush.bf16.msrb.mxu3 %v9962_v23  ;;  %v10977_v4 = vld [vmem:[%s16146_s7 + $0xb8] sm:$0xff] }
 0x3da   :  { %6102 = vmatpush.bf16.msra.mxu0 %v9838_v55  ;;  %6115 = vmatpush.bf16.msra.mxu2 %v9966_v48  ;;  %v10985_v23 = vld [vmem:[%s16146_s7 + $0xf8] sm:$0xff]  ;;  %v10976_v55 = vld [vmem:[%s16146_s7 + $0xb0] sm:$0xff] }
 0x3db   :  { %v10984_v48 = vld [vmem:[%s16146_s7 + $0xf0] sm:$0xff] }
 0x3dd   :  { %6077 = vmatpush.bf16.msra.mxu1 %v9818_v36  ;;  %6090 = vmatpush.bf16.msrb.mxu3 %v9946_v7  ;;  %v5079_v22 = vpop.f32.mrf.mxu1  ;;  %v10972_v36 = vld [vmem:[%s16146_s7 + $0x90] sm:$0xff] }
 0x3de   :  { %6103 = vmatpush.bf16.msra.mxu0 %v9822_v14  ;;  %6116 = vmatpush.bf16.msra.mxu2 %v9950_v44  ;;  %v10980_v7 = vld [vmem:[%s16146_s7 + $0xd0] sm:$0xff]  ;;  %v6126_v14 = vld [vmem:[%s16147_s6] sm:$0xf] }
 0x3e0   :  { %6078 = vmatmul.bf16.vlgmr.msra.gmra.mxu1 %v15817_v43  ;;  %6091 = vmatmul.bf16.vlgmr.msrb.gmra.mxu3 %v15819_v59  ;;  %v5105_v11 = vpop.f32.mrf.mxu0 }
 0x3e1   :  { %6104 = vmatmul.bf16.vlgmr.msra.gmra.mxu0 %v15817_v43  ;;  %6117 = vmatmul.bf16.vlgmr.msra.gmra.mxu2 %v15819_v59 }
 0x3e2   :  { %6421 = vmatpush.bf16.msra.mxu3 %v10969_v0  ;;  %6434 = vmatpush.bf16.msrb.mxu0 %v10977_v4 }
 0x3e3   :  { %v5092_v3 = vpop.f32.mrf.mxu3  ;;  %6447 = vmatpush.bf16.msrb.mxu2 %v10985_v23  ;;  %v10991_v23 = vld [vmem:[%s16149_s9 + $0x28] sm:$0xff] }
 0x3e4   :  { %v5093_v27 = vadd.f32 %v5092_v3, %v5079_v22  ;;  %v10971_v22 = vld [vmem:[%s16146_s7 + $0x88] sm:$0xff] }
 0x3e5   :  { %v5081_v45 = vpop.f32.mrf.mxu1 }
 0x3e6   :  { %v5118_v31 = vpop.f32.mrf.mxu2  ;;  %v15980_v25 = vadd.f32 %v5093_v27, %v15716_v63  ;;  %6422 = vmatpush.bf16.msra.mxu3 %v10968_v15  ;;  %6435 = vmatpush.bf16.msrb.mxu0 %v10976_v55  ;;  %v6128_v27 = vperm.slane %v6126_v14, 0  ;;  %v6129_v45 = vperm.slane %v6126_v14, 1  ;;  %v10988_v55 = vld [vmem:[%s16149_s9 + $0x10] sm:$0xff] }
 0x3e7   :  { %v5119_v57 = vadd.f32 %v5118_v31, %v5105_v11  ;;  %6448 = vmatpush.bf16.msrb.mxu2 %v10984_v48  ;;  %v10979_v11 = vld [vmem:[%s16146_s7 + $0xc8] sm:$0xff] }
 0x3e8   :  { %v5107_v12 = vpop.f32.mrf.mxu0 }
 0x3e9   :  { %v15983_v54 = vadd.f32 %v5119_v57, %v15725_v26  ;;  %v10961_v26 = vld [vmem:[%s16146_s7 + $0x38] sm:$0xff] }
 0x3ea   :  { %6408 = vmatpush.bf16.msrb.mxu1 %v10961_v26  ;;  %6423 = vmatpush.bf16.msra.mxu3 %v10967_v40 }
 0x3eb   :  { %v5094_v39 = vpop.f32.mrf.mxu3  ;;  %6436 = vmatpush.bf16.msrb.mxu0 %v10975_v5  ;;  %6449 = vmatpush.bf16.msrb.mxu2 %v10983_v33  ;;  %v10987_v5 = vld [vmem:[%s16149_s9 + $0x8] sm:$0xff]  ;;  %v10986_v33 = vld [vmem:[%s16149_s9] sm:$0xff] }
 0x3ee   :  { %v5120_v10 = vpop.f32.mrf.mxu2  ;;  %6409 = vmatpush.bf16.msrb.mxu1 %v10960_v56 }
 0x3ef   :  { %6437 = vmatpush.bf16.msrb.mxu0 %v10974_v41  ;;  %6450 = vmatpush.bf16.msrb.mxu2 %v10982_v9 }
 0x3f2   :  { %6410 = vmatpush.bf16.msrb.mxu1 %v10959_v6 }
 0x3f3   :  { %6438 = vmatpush.bf16.msrb.mxu0 %v10973_v32  ;;  %6451 = vmatpush.bf16.msrb.mxu2 %v10981_v53  ;;  %v10998_v53 = vld [vmem:[%s16145_s8] ss:$0 sm:$0xff] }
 0x3f6   :  { %6411 = vmatpush.bf16.msrb.mxu1 %v10958_v1  ;;  %v6130_v1 = vperm.slane %v6126_v14, 2 }
 0x3f7   :  { %6439 = vmatpush.bf16.msrb.mxu0 %v10972_v36  ;;  %6452 = vmatpush.bf16.msrb.mxu2 %v10980_v7 }
 0x3fa   :  { %6412 = vmatpush.bf16.msrb.mxu1 %v10957_v21 }
 0x3fb   :  { %6440 = vmatpush.bf16.msrb.mxu0 %v10971_v22  ;;  %6453 = vmatpush.bf16.msrb.mxu2 %v10979_v11 }
 0x3fd   :  { %v5527_v51 = vpop.f32.mrf.mxu1 }
 0x3fe   :  { %6413 = vmatpush.bf16.msrb.mxu1 %v10956_v46  ;;  %v6131_v46 = vperm.slane %v6126_v14, 3 }
 0x400   :  { %v5553_v43 = vpop.f32.mrf.mxu0 }
 0x402   :  { %6414 = vmatpush.bf16.msrb.mxu1 %v10955_v61 }
 0x403   :  { %v5540_v52 = vpop.f32.mrf.mxu3 }
 0x404   :  { %v5541_v59 = vadd.f32 %v5540_v52, %v5527_v51  ;;  %v10978_v52 = vld [vmem:[%s16146_s7 + $0xc0] sm:$0xff] }
 0x405   :  { %v5529_v38 = vpop.f32.mrf.mxu1  ;;  %6454 = vmatpush.bf16.msrb.mxu2 %v10978_v52 }
 0x406   :  { %v5566_v24 = vpop.f32.mrf.mxu2  ;;  %v15986_v8 = vadd.f32 %v5541_v59, %v15922_v58  ;;  %v10966_v58 = vld [vmem:[%s16146_s7 + $0x60] sm:$0xff]  ;;  %6415 = vmatpush.bf16.msrb.mxu1 %v10954_v49 }
 0x407   :  { %v5567_v30 = vadd.f32 %v5566_v24, %v5553_v43  ;;  %6424 = vmatpush.bf16.msra.mxu3 %v10966_v58  ;;  %v10970_v43 = vld [vmem:[%s16146_s7 + $0x80] sm:$0xff] }
 0x408   :  { %v5555_v18 = vpop.f32.mrf.mxu0  ;;  %6441 = vmatpush.bf16.msrb.mxu0 %v10970_v43 }
 0x409   :  { %v15989_v63 = vadd.f32 %v5567_v30, %v15931_v29  ;;  %v10964_v29 = vld [vmem:[%s16146_s7 + $0x50] sm:$0xff] }
 0x40b   :  { %v5542_v62 = vpop.f32.mrf.mxu3  ;;  %6425 = vmatpush.bf16.msra.mxu3 %v10965_v16 }
 0x40e   :  { %v5568_v19 = vpop.f32.mrf.mxu2 }
 0x40f   :  { %6426 = vmatpush.bf16.msra.mxu3 %v10964_v29 }
 0x413   :  { %6427 = vmatpush.bf16.msra.mxu3 %v10963_v28 }
 0x417   :  { %6428 = vmatpush.bf16.msra.mxu3 %v10962_v60 }
 0x41d   :  { %v16021_v13 = vpop.f32.mrf.mxu1 }
 0x420   :  { %v16023_v34 = vpop.f32.mrf.mxu0 }
 0x423   :  { %v16031_v42 = vpop.f32.mrf.mxu3 }
 0x424   :  { %v5593_v19 = vadd.f32 %v16031_v42, %v16021_v13 }
 0x425   :  { %v5581_v17 = vpop.f32.mrf.mxu1 }
 0x426   :  { %v16033_v35 = vpop.f32.mrf.mxu2  ;;  %v5624_v6 = vadd.f32 %v5593_v19, %v15980_v25  ;;  %v10993_v25 = vld [vmem:[%s16149_s9 + $0x38] sm:$0xff] }
 0x427   :  { %v5619_v56 = vadd.f32 %v16033_v35, %v16023_v34  ;;  %6530 = vmatpush.bf16.msra.mxu1 %v10993_v25 }
 0x428   :  { %v5607_v2 = vpop.f32.mrf.mxu0 }
 0x429   :  { %v5625_v21 = vadd.f32 %v5619_v56, %v15983_v54  ;;  %v10992_v54 = vld [vmem:[%s16149_s9 + $0x30] sm:$0xff] }
 0x42b   :  { %v5594_v50 = vpop.f32.mrf.mxu3  ;;  %6531 = vmatpush.bf16.msra.mxu1 %v10992_v54 }
 0x42c   :  { %v10990_v50 = vld [vmem:[%s16149_s9 + $0x20] sm:$0xff] }
 0x42e   :  { %v5620_v37 = vpop.f32.mrf.mxu2 }
 0x42f   :  { %6532 = vmatpush.bf16.msra.mxu1 %v10991_v23  ;;  %v10989_v37 = vld [vmem:[%s16149_s9 + $0x18] sm:$0xff] }
 0x433   :  { %6533 = vmatpush.bf16.msra.mxu1 %v10990_v50 }
 0x437   :  { %6534 = vmatpush.bf16.msra.mxu1 %v10989_v37 }
 0x43b   :  { %6535 = vmatpush.bf16.msra.mxu1 %v10988_v55 }
 0x43d   :  { %v6027_v47 = vpop.f32.mrf.mxu1 }
 0x43f   :  { %6536 = vmatpush.bf16.msra.mxu1 %v10987_v5 }
 0x440   :  { %v6053_v20 = vpop.f32.mrf.mxu0 }
 0x443   :  { %v6040_v44 = vpop.f32.mrf.mxu3  ;;  %6537 = vmatpush.bf16.msra.mxu1 %v10986_v33 }
 0x444   :  { %v6041_v3 = vadd.f32 %v6040_v44, %v6027_v47 }
 0x445   :  { %v6029_v12 = vpop.f32.mrf.mxu1 }
 0x446   :  { %v6066_v31 = vpop.f32.mrf.mxu2  ;;  %v6122_v39 = vadd.f32 %v6041_v3, %v15986_v8 }
 0x447   :  { %v6067_v57 = vadd.f32 %v6066_v31, %v6053_v20  ;;  %v10999_v31 = vld [vmem:[%s16148_s10] ss:$0 sm:$0xff] }
 0x448   :  { %v6055_v10 = vpop.f32.mrf.mxu0  ;;  %v6136_v59 = vadd.f32 %v6128_v27, %v6122_v39 }
 0x449   :  { %v6123_v51 = vadd.f32 %v6067_v57, %v15989_v63 }
 0x44a   :  { %v6140_v30 = vmax.f32 %v6136_v59, 0.0 }
 0x44b   :  { %v6137_v24 = vadd.f32 %v6129_v45, %v6123_v51  ;;  %v6042_v18 = vpop.f32.mrf.mxu3 }
 0x44c   :  { %v6144_v26 = vpack.c.bf16 %v6140_v30, %v6140_v30 }
 0x44d   :  { %v6141_v38 = vmax.f32 %v6137_v24, 0.0 }
 0x44e   :  { %v6068_v8 = vpop.f32.mrf.mxu2  ;;  %6416 = vmatmul.bf16.vlgmr.msrb.gmra.mxu1 %v6144_v26 }
 0x44f   :  { %v6145_v0 = vpack.c.bf16 %v6141_v38, %v6141_v38 }
 0x451   :  { %6429 = vmatmul.bf16.vlgmr.msra.gmra.mxu3 %v6145_v0 }
 0x45d   :  { %v6079_v63 = vpop.f32.mrf.mxu1 }
 0x45e   :  { %v6105_v62 = vpop.f32.mrf.mxu0 }
 0x463   :  { %v6092_v15 = vpop.f32.mrf.mxu3 }
 0x464   :  { %v6093_v40 = vadd.f32 %v6092_v15, %v6079_v63  ;;  %v6118_v58 = vpop.f32.mrf.mxu2 }
 0x465   :  { %v6119_v16 = vadd.f32 %v6118_v58, %v6105_v62  ;;  %v6081_v29 = vpop.f32.mrf.mxu1 }
 0x466   :  { %v6124_v61 = vadd.f32 %v6093_v40, %v5624_v6  ;;  %v6107_v28 = vpop.f32.mrf.mxu0 }
 0x467   :  { %v6125_v17 = vadd.f32 %v6119_v16, %v5625_v21 }
 0x468   :  { %v6138_v2 = vadd.f32 %v6130_v1, %v6124_v61 }
 0x469   :  { %v6139_v49 = vadd.f32 %v6131_v46, %v6125_v17 }
 0x46a   :  { %v6142_v13 = vmax.f32 %v6138_v2, 0.0 }
 0x46b   :  { %v6143_v42 = vmax.f32 %v6139_v49, 0.0  ;;  %v6094_v60 = vpop.f32.mrf.mxu3 }
 0x46c   :  { %v6146_v34 = vpack.c.bf16 %v6142_v13, %v6142_v13  ;;  %v6120_v35 = vpop.f32.mrf.mxu2 }
 0x46d   :  { %v6147_v4 = vpack.c.bf16 %v6143_v42, %v6143_v42 }
 0x46e   :  { %6442 = vmatmul.bf16.vlgmr.msrb.gmra.mxu0 %v6146_v34 }
 0x46f   :  { %6455 = vmatmul.bf16.vlgmr.msrb.gmra.mxu2 %v6147_v4 }
 0x4cb   :  { %v6417_v48 = vpop.f32.mrf.mxu1 }
 0x4cc   :  { %v6418_v20 = vadd.f32 %v10998_v53, %v6417_v48 }
 0x4d3   :  { %v6419_v9 = vpop.f32.mrf.mxu1 }
 0x4d4   :  { %v6430_v41 = vpop.f32.mrf.mxu3 }
 0x4d5   :  { %v6431_v36 = vadd.f32 %v6430_v41, %v6418_v20 }
 0x4dc   :  { %v6432_v32 = vpop.f32.mrf.mxu3 }
 0x4eb   :  { %v6443_v47 = vpop.f32.mrf.mxu0 }
 0x4ec   :  { %v6444_v7 = vadd.f32 %v6443_v47, %v6431_v36 }
 0x4f2   :  { %v6456_v14 = vpop.f32.mrf.mxu2 }
 0x4f3   :  { %v6457_v44 = vadd.f32 %v6456_v14, %v6444_v7  ;;  %v6445_v22 = vpop.f32.mrf.mxu0 }
 0x4f5   :  { %v6460_v11 = vmax.f32 %v6457_v44, 0.0 }
 0x4f7   :  { %v6461_v3 = vpack.c.bf16 %v6460_v11, %v6460_v11 }
 0x4f9   :  { %6538 = vmatmul.bf16.vlgmr.msra.gmra.mxu1 %v6461_v3 }
 0x4fa   :  { %v6458_v27 = vpop.f32.mrf.mxu2 }
 0x576   :  { %v6539_v57 = vpop.f32.mrf.mxu1 }
 0x577   :  { %v6540_v45 = vadd.f32 %v10999_v31, %v6539_v57 }
 0x579   :  { %6543 = vst [vmem:[%s16150_s11] sm:$0xff] %v6540_v45 }
 0x57e   :  { %v6541_v12 = vpop.f32.mrf.mxu1 }

</bundles_post_ra>
